<compile_context>
chip_gen: v7x
topology: tpu7x:2x2x1
jax: 0.10.0
libtpu: 0.0.40
codegen_flags: <defaults>
</compile_context>

<pallas_src>
import jax
import jax.numpy as jnp
from jax.experimental import pallas as pl
from jax.experimental.pallas import tpu as pltpu


# ---------------------------------------------------------------------------
# Hardware-derived budgets (generation-aware: v5e/v6e 128 MiB VMEM, v7x 64 MiB)
# ---------------------------------------------------------------------------
try:
    _VMEM_CAP = int(pltpu.get_tpu_info().vmem_capacity_bytes)
except Exception:                      # conservative fallback (v7x per-core VMEM)
    _VMEM_CAP = 64 * 1024 * 1024
_VMEM_LIMIT = min((_VMEM_CAP * 3) // 4, 112 * 1024 * 1024)   # 48 MiB v7x, 96 MiB v5e/v6e
_TILE_BUDGET = _VMEM_CAP // 2


# ---------------------------------------------------------------------------
# Pallas kernels
# ---------------------------------------------------------------------------

def _conv_raw_kernel(p_ref, w_ref, b_ref, y_ref):
    """conv1: packed bf16 matmul + bias.  Output is RAW (activation deferred)."""
    y = jnp.dot(p_ref[...], w_ref[...], preferred_element_type=jnp.float32)
    y_ref[...] = y + b_ref[...]


def _preact_conv_stats_kernel(p_ref, sc_ref, sh_ref, w_ref, b_ref, y_ref, st_ref):
    """Fused: previous layer's BN-affine + LReLU on the patch tile (f32),
    bf16 packed matmul + bias, raw y tile + per-tile [sum, sum_sq] stats."""
    z = p_ref[...] * sc_ref[...] + sh_ref[...]          # prev-layer affine (f32)
    a = jnp.where(z > 0, z, 0.2 * z)                    # LeakyReLU(0.2)
    y = jnp.dot(a.astype(jnp.bfloat16), w_ref[...],
                preferred_element_type=jnp.float32)
    y = y + b_ref[...]
    y_ref[...] = y
    # direct sub-block slice stores (no in-kernel concatenate)
    st_ref[:, 0:1, :] = jnp.sum(y, axis=0, keepdims=True)[None]
    st_ref[:, 1:2, :] = jnp.sum(y * y, axis=0, keepdims=True)[None]


def _head_kernel(y_ref, sc_ref, sh_ref, emb_ref, we_ref, be_ref, wf_ref, bf_ref, o_ref):
    """Fused BN5-apply + LReLU + projection head.
    logits = sum(act * (emb @ We + be + wf), axis=1) + bf
           = final_linear(act) + sum(act * embed_proj(emb), axis=1)."""
    z = y_ref[...] * sc_ref[...] + sh_ref[...]
    flat = jnp.where(z > 0, z, 0.2 * z)                               # [B, D]
    wcomb = jnp.dot(emb_ref[...], we_ref[...],
                    preferred_element_type=jnp.float32)
    wcomb = wcomb + be_ref[...] + wf_ref[...]                         # [B, D]
    o_ref[...] = jnp.sum(flat * wcomb, axis=1, keepdims=True) + bf_ref[...]


# ---------------------------------------------------------------------------
# Tiling helper
# ---------------------------------------------------------------------------

def _pick_tm(m, kp, np_, in_itemsize):
    """Largest row tile that (a) fits the VMEM budget with double-buffering,
    (b) gives >= 2 grid steps when possible (v7x has 2 TensorCores),
    (c) divides m and is a multiple of 8."""
    per_row = (kp * in_itemsize + np_ * 4) * 2                   # in + out tiles, x2 buffers
    fixed = kp * np_ * 2 * 2 + (2 * kp + 3 * np_) * 4 * 2        # resident weight/scale/shift/bias/stats
    cap = max(8, (_TILE_BUDGET - fixed) // max(per_row, 1))
    if m >= 16:
        cap = min(cap, m // 2)
    cap = min(cap, m)
    if m <= 8 or m % 8 != 0:
        return m                                                 # tiny/irregular: full block
    tm = max(8, (cap // 8) * 8)
    while tm > 8 and m % tm != 0:
        tm -= 8
    return tm                                                    # 8 always divides m here


# ---------------------------------------------------------------------------
# Pallas-call wrappers
# ---------------------------------------------------------------------------

def _conv_raw(patches, wbd, bpk):
    mp, kp = patches.shape
    np_ = wbd.shape[1]
    tm = _pick_tm(mp, kp, np_, patches.dtype.itemsize)
    return pl.pallas_call(
        _conv_raw_kernel,
        out_shape=jax.ShapeDtypeStruct((mp, np_), jnp.float32),
        grid_spec=pltpu.PrefetchScalarGridSpec(
            num_scalar_prefetch=0,
            grid=(mp // tm,),
            in_specs=[
                pl.BlockSpec((tm, kp), lambda i: (i, 0)),
                pl.BlockSpec((kp, np_), lambda i: (0, 0)),    # resident (const index)
                pl.BlockSpec((1, np_), lambda i: (0, 0)),
            ],
            out_specs=pl.BlockSpec((tm, np_), lambda i: (i, 0)),
        ),
        compiler_params=pltpu.CompilerParams(
            dimension_semantics=("parallel",),
            vmem_limit_bytes=_VMEM_LIMIT),
    )(patches, wbd, bpk)


def _preact_conv_stats(patches, kscale, kshift, wbd, bpk):
    mp, kp = patches.shape
    np_ = wbd.shape[1]
    tm = _pick_tm(mp, kp, np_, patches.dtype.itemsize)
    nt = mp // tm
    return pl.pallas_call(
        _preact_conv_stats_kernel,
        out_shape=(jax.ShapeDtypeStruct((mp, np_), jnp.float32),
                   jax.ShapeDtypeStruct((nt, 2, np_), jnp.float32)),
        grid_spec=pltpu.PrefetchScalarGridSpec(
            num_scalar_prefetch=0,
            grid=(nt,),
            in_specs=[
                pl.BlockSpec((tm, kp), lambda i: (i, 0)),
                pl.BlockSpec((1, kp), lambda i: (0, 0)),      # resident
                pl.BlockSpec((1, kp), lambda i: (0, 0)),      # resident
                pl.BlockSpec((kp, np_), lambda i: (0, 0)),    # resident
                pl.BlockSpec((1, np_), lambda i: (0, 0)),     # resident
            ],
            out_specs=(pl.BlockSpec((tm, np_), lambda i: (i, 0)),
                       pl.BlockSpec((1, 2, np_), lambda i: (i, 0, 0))),
        ),
        compiler_params=pltpu.CompilerParams(
            dimension_semantics=("parallel",),
            vmem_limit_bytes=_VMEM_LIMIT),
    )(patches, kscale, kshift, wbd, bpk)


def _head(y5_flat, scale_flat, shift_flat, emb, we, be, wf, bf):
    B, D = y5_flat.shape
    E = emb.shape[1]
    return pl.pallas_call(
        _head_kernel,
        out_shape=jax.ShapeDtypeStruct((B, 1), jnp.float32),
        grid_spec=pltpu.PrefetchScalarGridSpec(
            num_scalar_prefetch=0,
            grid=(1,),
            in_specs=[
                pl.BlockSpec((B, D), lambda i: (0, 0)),
                pl.BlockSpec((1, D), lambda i: (0, 0)),
                pl.BlockSpec((1, D), lambda i: (0, 0)),
                pl.BlockSpec((B, E), lambda i: (0, 0)),
                pl.BlockSpec((E, D), lambda i: (0, 0)),
                pl.BlockSpec((1, D), lambda i: (0, 0)),
                pl.BlockSpec((1, D), lambda i: (0, 0)),
                pl.BlockSpec((1, 1), lambda i: (0, 0)),
            ],
            out_specs=pl.BlockSpec((B, 1), lambda i: (0, 0)),
        ),
        compiler_params=pltpu.CompilerParams(vmem_limit_bytes=_VMEM_LIMIT),
    )(y5_flat, scale_flat, shift_flat, emb, we, be, wf, bf)


# ---------------------------------------------------------------------------
# XLA glue: per-channel halo padding + packed im2col (k=4, s=2, p=1)
# ---------------------------------------------------------------------------

def _pad_nhwc(x, pad_val_c):
    """Pad H and W by 1 with a per-channel constant (NHWC)."""
    B, H, W, C = x.shape
    base = jnp.broadcast_to(pad_val_c.astype(x.dtype).reshape(1, 1, 1, C),
                            (B, H + 2, W + 2, C))
    return jax.lax.dynamic_update_slice(base, x, (0, 1, 1, 0))


def _im2col_pack(xp, Ho, Wo, r, k=4, s=2):
    """Padded NHWC -> row-packed im2col rows [B*Ho*Wo/r, r*k*k*C]."""
    B, _, _, C = xp.shape
    cols = []
    for i in range(k):
        for j in range(k):
            cols.append(xp[:, i:i + s * Ho:s, j:j + s * Wo:s, :])   # [B, Ho, Wo, C]
    patches = jnp.stack(cols, axis=3).reshape(B * Ho * Wo, k * k * C)
    m = B * Ho * Wo
    assert m % r == 0, f"packing factor {r} must divide rows {m}"
    return patches.reshape(m // r, r * k * k * C)


# ---------------------------------------------------------------------------
# Parameter construction (PyTorch-shaped init, permuted / lane-packed once)
# ---------------------------------------------------------------------------

def init_params(key, channels, base_ch_cfg, embedding_dim):
    base_ch = base_ch_cfg // 2
    chans = [channels, base_ch, base_ch * 2, base_ch * 4, base_ch * 8, base_ch * 16]
    ks = jax.random.split(key, 7)
    std = 0.02
    params = {}
    for li in range(5):
        cout, cin = chans[li + 1], chans[li]
        # PyTorch Conv2d weight [Cout, Cin, kh, kw] -> im2col order [(kh, kw, Cin), Cout]
        w_pt = std * jax.random.normal(ks[li], (cout, cin, 4, 4), jnp.float32)
        w2d = w_pt.transpose(2, 3, 1, 0).reshape(16 * cin, cout)
        b_pt = jnp.zeros((cout,), jnp.float32)
        r = max(1, 128 // cout)                       # lane-packing factor
        # block-diagonal packed weight -> lane-dense (r*cout-wide) conv output
        params[f"conv{li+1}_w"] = jnp.kron(
            jnp.eye(r, dtype=jnp.float32), w2d).astype(jnp.bfloat16)
        params[f"conv{li+1}_b"] = jnp.tile(b_pt, r)[None, :]
        if li >= 1:                                   # bn2..bn5, PyTorch default affine
            params[f"bn{li+1}_g"] = jnp.ones((cout,), jnp.float32)
            params[f"bn{li+1}_b"] = jnp.zeros((cout,), jnp.float32)

    c5 = chans[5]
    feat = c5 * 16
    # PyTorch flattens NCHW as (c, h, w); our NHWC flatten is (h, w, c) -> permute once.
    wf_pt = std * jax.random.normal(ks[5], (1, feat), jnp.float32)
    we_pt = std * jax.random.normal(ks[6], (feat, embedding_dim), jnp.float32)
    params["final_w"] = wf_pt.reshape(1, c5, 4, 4).transpose(0, 2, 3, 1).reshape(1, feat)
    params["final_b"] = jnp.zeros((1, 1), jnp.float32)
    params["embed_w"] = (we_pt.T.reshape(embedding_dim, c5, 4, 4)
                         .transpose(0, 2, 3, 1).reshape(embedding_dim, feat))
    params["embed_b"] = jnp.zeros((1, feat), jnp.float32)
    return params


# ---------------------------------------------------------------------------
# Forward pass
# ---------------------------------------------------------------------------

@jax.jit
def conditional_discriminator_forward(params, x_nchw, emb):
    """x_nchw: [B, C, 128, 128], emb: [B, embedding_dim] -> logits [B, 1]."""
    B, C, H, W = x_nchw.shape
    x = jnp.transpose(x_nchw, (0, 2, 3, 1))            # one-time NCHW -> NHWC

    # ---- conv1: raw conv (bias only); its LeakyReLU is fused into conv2 ----
    wbd, bpk = params["conv1_w"], params["conv1_b"]
    cin = C
    r = wbd.shape[0] // (16 * cin)
    cout = wbd.shape[1] // r
    Ho, Wo = H // 2, W // 2
    xp = _pad_nhwc(x, jnp.zeros((cin,), jnp.float32)).astype(jnp.bfloat16)
    patches = _im2col_pack(xp, Ho, Wo, r)
    y_pk = _conv_raw(patches, wbd, bpk)                # raw y1, lane-packed
    feat_raw = y_pk.reshape(B, Ho, Wo, cout)           # free row-major reshape

    # pending (not yet applied) activation of the previous layer
    in_scale = jnp.ones((cout,), jnp.float32)          # conv1 has no BatchNorm
    in_shift = jnp.zeros((cout,), jnp.float32)
    pad_val = jnp.zeros((cout,), jnp.float32)          # lrelu(0*1+0) == 0 == zero-padded act

    # ---- conv2..conv5: fused [prev BN-affine + LReLU] -> conv -> own BN stats ----
    for li in range(2, 6):
        wbd, bpk = params[f"conv{li}_w"], params[f"conv{li}_b"]
        cin = cout
        r = wbd.shape[0] // (16 * cin)
        cout = wbd.shape[1] // r
        Ho, Wo = Ho // 2, Wo // 2
        xp = _pad_nhwc(feat_raw, pad_val)              # halo -> exactly 0 after affine+LReLU
        patches = _im2col_pack(xp, Ho, Wo, r)          # f32 raw (pre-BN) values
        kscale = jnp.tile(in_scale, 16 * r)[None, :]
        kshift = jnp.tile(in_shift, 16 * r)[None, :]
        y_pk, stats = _preact_conv_stats(patches, kscale, kshift, wbd, bpk)
        feat_raw = y_pk.reshape(B, Ho, Wo, cout)

        # this layer's training-mode batch statistics -> fused BN scale/shift
        m_rows = B * Ho * Wo
        s = stats.reshape(stats.shape[0], 2, r, cout).sum(axis=(0, 2))   # [2, cout]
        mean = s[0] / m_rows
        var = s[1] / m_rows - mean * mean              # biased variance (PyTorch train mode)
        gamma, beta = params[f"bn{li}_g"], params[f"bn{li}_b"]
        in_scale = gamma * jax.lax.rsqrt(var + 1e-5)
        in_shift = beta - mean * in_scale
        pad_val = -in_shift / in_scale                 # TODO(synk): undefined if gamma == 0

    # ---- head: fused BN5-apply + LReLU + projection logits ----
    D = 16 * cout
    y5_flat = feat_raw.reshape(B, D)                   # (h, w, c) flatten; head weights permuted at init
    scale_flat = jnp.tile(in_scale, 16)[None, :]
    shift_flat = jnp.tile(in_shift, 16)[None, :]
    return _head(y5_flat, scale_flat, shift_flat, emb,
                 params["embed_w"], params["embed_b"],
                 params["final_w"], params["final_b"])


# ---------------------------------------------------------------------------
# Demo
# ---------------------------------------------------------------------------

if __name__ == "__main__":
    # Spatial must be 128 so the five stride-2 convs end at 4x4 (final_linear dim).
    B, C, H, W = 2, 3, 128, 128
    EMB = 16
    BASE_CH_CFG = 16   # -> internal base_ch = 8

    key = jax.random.PRNGKey(0)
    kp, kx, ke = jax.random.split(key, 3)
    params = init_params(kp, C, BASE_CH_CFG, EMB)
    x = jax.random.normal(kx, (B, C, H, W), jnp.float32)
    emb = jax.random.normal(ke, (B, EMB), jnp.float32)

    logits = conditional_discriminator_forward(params, x, emb)
    jax.block_until_ready(logits)
    assert logits.shape == (B, 1), logits.shape
    print("KERNEL_OK")
</pallas_src>

<mosaic_0001>
module attributes {stable_mosaic.version = 11 : i64} {
  func.func @_conv_raw_kernel(%arg0: i32, %arg1: memref<256x768xbf16, #tpu.memory_space<vmem>>, %arg2: memref<768x128xbf16, #tpu.memory_space<vmem>>, %arg3: memref<1x128xf32, #tpu.memory_space<vmem>>, %arg4: memref<256x128xf32, #tpu.memory_space<vmem>>) attributes {dimension_semantics = [#tpu.dimension_semantics<parallel>], iteration_bounds = array<i64: 2>, scalar_prefetch = 0 : i64, scratch_operands = 0 : i64, tpu.core_type = #tpu.core_type<tc>, window_params = [{transform_indices = @transform_0, window_bounds = array<i64: 256, 768>}, {pipeline_mode = #tpu.pipeline_mode<synchronous>, transform_indices = @transform_1, window_bounds = array<i64: 768, 128>}, {pipeline_mode = #tpu.pipeline_mode<synchronous>, transform_indices = @transform_2, window_bounds = array<i64: 1, 128>}, {transform_indices = @transform_3, window_bounds = array<i64: 256, 128>}]} {
    %c0 = arith.constant 0 : index
    %c0_0 = arith.constant 0 : index
    %0 = vector.load %arg1[%c0, %c0_0] : memref<256x768xbf16, #tpu.memory_space<vmem>>, vector<256x768xbf16>
    %c0_1 = arith.constant 0 : index
    %c0_2 = arith.constant 0 : index
    %1 = vector.load %arg2[%c0_1, %c0_2] : memref<768x128xbf16, #tpu.memory_space<vmem>>, vector<768x128xbf16>
    %cst = arith.constant dense<0.000000e+00> : vector<256x128xf32>
    %2 = tpu.matmul %0, %1, %cst {dimension_numbers = #tpu.dot_dimension_numbers<[1], [0], [0], [1], [0, 0, 1, 1], [], []>} : vector<256x768xbf16>, vector<768x128xbf16>, vector<256x128xf32> -> vector<256x128xf32>
    %c0_3 = arith.constant 0 : index
    %c0_4 = arith.constant 0 : index
    %3 = vector.load %arg3[%c0_3, %c0_4] : memref<1x128xf32, #tpu.memory_space<vmem>>, vector<1x128xf32>
    %4 = vector.broadcast %3 : vector<1x128xf32> to vector<256x128xf32>
    %5 = arith.addf %2, %4 : vector<256x128xf32>
    %c0_5 = arith.constant 0 : index
    %c0_6 = arith.constant 0 : index
    %6 = vector.load %arg4[%c0_5, %c0_6] : memref<256x128xf32, #tpu.memory_space<vmem>>, vector<256x128xf32>
    tpu.vector_store %arg4[%c0_5, %c0_6], %5 {strides = array<i32>} : memref<256x128xf32, #tpu.memory_space<vmem>>, vector<256x128xf32>,
    return
  }
  func.func @transform_0(%arg0: i32) -> (i32, i32) {
    %c0_i32 = arith.constant 0 : i32
    %c0_i32_0 = arith.constant 0 : i32
    return %arg0, %c0_i32 : i32, i32
  }
  func.func @transform_1(%arg0: i32) -> (i32, i32) {
    %c0_i32 = arith.constant 0 : i32
    %c0_i32_0 = arith.constant 0 : i32
    %c0_i32_1 = arith.constant 0 : i32
    return %c0_i32, %c0_i32_0 : i32, i32
  }
  func.func @transform_2(%arg0: i32) -> (i32, i32) {
    %c0_i32 = arith.constant 0 : i32
    %c0_i32_0 = arith.constant 0 : i32
    %c0_i32_1 = arith.constant 0 : i32
    return %c0_i32, %c0_i32_0 : i32, i32
  }
  func.func @transform_3(%arg0: i32) -> (i32, i32) {
    %c0_i32 = arith.constant 0 : i32
    %c0_i32_0 = arith.constant 0 : i32
    return %arg0, %c0_i32 : i32, i32
  }
}

module attributes {stable_mosaic.version = 11 : i64} {
  func.func @_preact_conv_stats_kernel(%arg0: i32, %arg1: memref<128x1024xf32, #tpu.memory_space<vmem>>, %arg2: memref<1x1024xf32, #tpu.memory_space<vmem>>, %arg3: memref<1x1024xf32, #tpu.memory_space<vmem>>, %arg4: memref<1024x128xbf16, #tpu.memory_space<vmem>>, %arg5: memref<1x128xf32, #tpu.memory_space<vmem>>, %arg6: memref<128x128xf32, #tpu.memory_space<vmem>>, %arg7: memref<1x2x128xf32, #tpu.memory_space<vmem>>) attributes {dimension_semantics = [#tpu.dimension_semantics<parallel>], iteration_bounds = array<i64: 2>, scalar_prefetch = 0 : i64, scratch_operands = 0 : i64, tpu.core_type = #tpu.core_type<tc>, window_params = [{transform_indices = @transform_0, window_bounds = array<i64: 128, 1024>}, {pipeline_mode = #tpu.pipeline_mode<synchronous>, transform_indices = @transform_1, window_bounds = array<i64: 1, 1024>}, {pipeline_mode = #tpu.pipeline_mode<synchronous>, transform_indices = @transform_2, window_bounds = array<i64: 1, 1024>}, {pipeline_mode = #tpu.pipeline_mode<synchronous>, transform_indices = @transform_3, window_bounds = array<i64: 1024, 128>}, {pipeline_mode = #tpu.pipeline_mode<synchronous>, transform_indices = @transform_4, window_bounds = array<i64: 1, 128>}, {transform_indices = @transform_5, window_bounds = array<i64: 128, 128>}, {transform_indices = @transform_6, window_bounds = array<i64: 1, 2, 128>}]} {
    %c0 = arith.constant 0 : index
    %c0_0 = arith.constant 0 : index
    %0 = vector.load %arg1[%c0, %c0_0] : memref<128x1024xf32, #tpu.memory_space<vmem>>, vector<128x1024xf32>
    %c0_1 = arith.constant 0 : index
    %c0_2 = arith.constant 0 : index
    %1 = vector.load %arg2[%c0_1, %c0_2] : memref<1x1024xf32, #tpu.memory_space<vmem>>, vector<1x1024xf32>
    %2 = vector.broadcast %1 : vector<1x1024xf32> to vector<128x1024xf32>
    %3 = arith.mulf %0, %2 : vector<128x1024xf32>
    %c0_3 = arith.constant 0 : index
    %c0_4 = arith.constant 0 : index
    %4 = vector.load %arg3[%c0_3, %c0_4] : memref<1x1024xf32, #tpu.memory_space<vmem>>, vector<1x1024xf32>
    %5 = vector.broadcast %4 : vector<1x1024xf32> to vector<128x1024xf32>
    %6 = arith.addf %3, %5 : vector<128x1024xf32>
    %cst = arith.constant 0.000000e+00 : f32
    %7 = vector.broadcast %cst : f32 to vector<128x1024xf32>
    %8 = arith.cmpf ogt, %6, %7 : vector<128x1024xf32>
    %cst_5 = arith.constant 2.000000e-01 : f32
    %9 = vector.broadcast %cst_5 : f32 to vector<128x1024xf32>
    %10 = arith.mulf %9, %6 : vector<128x1024xf32>
    %11 = arith.select %8, %6, %10 : vector<128x1024xi1>, vector<128x1024xf32>
    %12 = arith.truncf %11 : vector<128x1024xf32> to vector<128x1024xbf16>
    %c0_6 = arith.constant 0 : index
    %c0_7 = arith.constant 0 : index
    %13 = vector.load %arg4[%c0_6, %c0_7] : memref<1024x128xbf16, #tpu.memory_space<vmem>>, vector<1024x128xbf16>
    %cst_8 = arith.constant dense<0.000000e+00> : vector<128x128xf32>
    %14 = tpu.matmul %12, %13, %cst_8 {dimension_numbers = #tpu.dot_dimension_numbers<[1], [0], [0], [1], [0, 0, 1, 1], [], []>} : vector<128x1024xbf16>, vector<1024x128xbf16>, vector<128x128xf32> -> vector<128x128xf32>
    %c0_9 = arith.constant 0 : index
    %c0_10 = arith.constant 0 : index
    %15 = vector.load %arg5[%c0_9, %c0_10] : memref<1x128xf32, #tpu.memory_space<vmem>>, vector<1x128xf32>
    %16 = vector.broadcast %15 : vector<1x128xf32> to vector<128x128xf32>
    %17 = arith.addf %14, %16 : vector<128x128xf32>
    %c0_11 = arith.constant 0 : index
    %c0_12 = arith.constant 0 : index
    %18 = vector.load %arg6[%c0_11, %c0_12] : memref<128x128xf32, #tpu.memory_space<vmem>>, vector<128x128xf32>
    tpu.vector_store %arg6[%c0_11, %c0_12], %17 {strides = array<i32>} : memref<128x128xf32, #tpu.memory_space<vmem>>, vector<128x128xf32>,
    %cst_13 = arith.constant dense<0.000000e+00> : vector<128xf32>
    %19 = vector.multi_reduction <add>, %17, %cst_13 [0] : vector<128x128xf32> to vector<128xf32>
    %20 = vector.shape_cast %19 : vector<128xf32> to vector<1x128xf32>
    %21 = vector.shape_cast %20 : vector<1x128xf32> to vector<1x1x128xf32>
    %c0_14 = arith.constant 0 : index
    %c0_15 = arith.constant 0 : index
    %c0_16 = arith.constant 0 : index
    %22 = vector.load %arg7[%c0_14, %c0_15, %c0_16] : memref<1x2x128xf32, #tpu.memory_space<vmem>>, vector<1x1x128xf32>
    tpu.vector_store %arg7[%c0_14, %c0_15, %c0_16], %21 {strides = array<i32>} : memref<1x2x128xf32, #tpu.memory_space<vmem>>, vector<1x1x128xf32>,
    %23 = arith.mulf %17, %17 : vector<128x128xf32>
    %cst_17 = arith.constant dense<0.000000e+00> : vector<128xf32>
    %24 = vector.multi_reduction <add>, %23, %cst_17 [0] : vector<128x128xf32> to vector<128xf32>
    %25 = vector.shape_cast %24 : vector<128xf32> to vector<1x128xf32>
    %26 = vector.shape_cast %25 : vector<1x128xf32> to vector<1x1x128xf32>
    %c0_18 = arith.constant 0 : index
    %c1 = arith.constant 1 : index
    %c0_19 = arith.constant 0 : index
    %27 = vector.load %arg7[%c0_18, %c1, %c0_19] : memref<1x2x128xf32, #tpu.memory_space<vmem>>, vector<1x1x128xf32>
    tpu.vector_store %arg7[%c0_18, %c1, %c0_19], %26 {strides = array<i32>} : memref<1x2x128xf32, #tpu.memory_space<vmem>>, vector<1x1x128xf32>,
    return
  }
  func.func @transform_0(%arg0: i32) -> (i32, i32) {
    %c0_i32 = arith.constant 0 : i32
    %c0_i32_0 = arith.constant 0 : i32
    return %arg0, %c0_i32 : i32, i32
  }
  func.func @transform_1(%arg0: i32) -> (i32, i32) {
    %c0_i32 = arith.constant 0 : i32
    %c0_i32_0 = arith.constant 0 : i32
    %c0_i32_1 = arith.constant 0 : i32
    return %c0_i32, %c0_i32_0 : i32, i32
  }
  func.func @transform_2(%arg0: i32) -> (i32, i32) {
    %c0_i32 = arith.constant 0 : i32
    %c0_i32_0 = arith.constant 0 : i32
    %c0_i32_1 = arith.constant 0 : i32
    return %c0_i32, %c0_i32_0 : i32, i32
  }
  func.func @transform_3(%arg0: i32) -> (i32, i32) {
    %c0_i32 = arith.constant 0 : i32
    %c0_i32_0 = arith.constant 0 : i32
    %c0_i32_1 = arith.constant 0 : i32
    return %c0_i32, %c0_i32_0 : i32, i32
  }
  func.func @transform_4(%arg0: i32) -> (i32, i32) {
    %c0_i32 = arith.constant 0 : i32
    %c0_i32_0 = arith.constant 0 : i32
    %c0_i32_1 = arith.constant 0 : i32
    return %c0_i32, %c0_i32_0 : i32, i32
  }
  func.func @transform_5(%arg0: i32) -> (i32, i32) {
    %c0_i32 = arith.constant 0 : i32
    %c0_i32_0 = arith.constant 0 : i32
    return %arg0, %c0_i32 : i32, i32
  }
  func.func @transform_6(%arg0: i32) -> (i32, i32, i32) {
    %c0_i32 = arith.constant 0 : i32
    %c0_i32_0 = arith.constant 0 : i32
    %c0_i32_1 = arith.constant 0 : i32
    return %arg0, %c0_i32, %c0_i32_0 : i32, i32, i32
  }
}

module attributes {stable_mosaic.version = 11 : i64} {
  func.func @_preact_conv_stats_kernel(%arg0: i32, %arg1: memref<64x1024xf32, #tpu.memory_space<vmem>>, %arg2: memref<1x1024xf32, #tpu.memory_space<vmem>>, %arg3: memref<1x1024xf32, #tpu.memory_space<vmem>>, %arg4: memref<1024x128xbf16, #tpu.memory_space<vmem>>, %arg5: memref<1x128xf32, #tpu.memory_space<vmem>>, %arg6: memref<64x128xf32, #tpu.memory_space<vmem>>, %arg7: memref<1x2x128xf32, #tpu.memory_space<vmem>>) attributes {dimension_semantics = [#tpu.dimension_semantics<parallel>], iteration_bounds = array<i64: 2>, scalar_prefetch = 0 : i64, scratch_operands = 0 : i64, tpu.core_type = #tpu.core_type<tc>, window_params = [{transform_indices = @transform_0, window_bounds = array<i64: 64, 1024>}, {pipeline_mode = #tpu.pipeline_mode<synchronous>, transform_indices = @transform_1, window_bounds = array<i64: 1, 1024>}, {pipeline_mode = #tpu.pipeline_mode<synchronous>, transform_indices = @transform_2, window_bounds = array<i64: 1, 1024>}, {pipeline_mode = #tpu.pipeline_mode<synchronous>, transform_indices = @transform_3, window_bounds = array<i64: 1024, 128>}, {pipeline_mode = #tpu.pipeline_mode<synchronous>, transform_indices = @transform_4, window_bounds = array<i64: 1, 128>}, {transform_indices = @transform_5, window_bounds = array<i64: 64, 128>}, {transform_indices = @transform_6, window_bounds = array<i64: 1, 2, 128>}]} {
    %c0 = arith.constant 0 : index
    %c0_0 = arith.constant 0 : index
    %0 = vector.load %arg1[%c0, %c0_0] : memref<64x1024xf32, #tpu.memory_space<vmem>>, vector<64x1024xf32>
    %c0_1 = arith.constant 0 : index
    %c0_2 = arith.constant 0 : index
    %1 = vector.load %arg2[%c0_1, %c0_2] : memref<1x1024xf32, #tpu.memory_space<vmem>>, vector<1x1024xf32>
    %2 = vector.broadcast %1 : vector<1x1024xf32> to vector<64x1024xf32>
    %3 = arith.mulf %0, %2 : vector<64x1024xf32>
    %c0_3 = arith.constant 0 : index
    %c0_4 = arith.constant 0 : index
    %4 = vector.load %arg3[%c0_3, %c0_4] : memref<1x1024xf32, #tpu.memory_space<vmem>>, vector<1x1024xf32>
    %5 = vector.broadcast %4 : vector<1x1024xf32> to vector<64x1024xf32>
    %6 = arith.addf %3, %5 : vector<64x1024xf32>
    %cst = arith.constant 0.000000e+00 : f32
    %7 = vector.broadcast %cst : f32 to vector<64x1024xf32>
    %8 = arith.cmpf ogt, %6, %7 : vector<64x1024xf32>
    %cst_5 = arith.constant 2.000000e-01 : f32
    %9 = vector.broadcast %cst_5 : f32 to vector<64x1024xf32>
    %10 = arith.mulf %9, %6 : vector<64x1024xf32>
    %11 = arith.select %8, %6, %10 : vector<64x1024xi1>, vector<64x1024xf32>
    %12 = arith.truncf %11 : vector<64x1024xf32> to vector<64x1024xbf16>
    %c0_6 = arith.constant 0 : index
    %c0_7 = arith.constant 0 : index
    %13 = vector.load %arg4[%c0_6, %c0_7] : memref<1024x128xbf16, #tpu.memory_space<vmem>>, vector<1024x128xbf16>
    %cst_8 = arith.constant dense<0.000000e+00> : vector<64x128xf32>
    %14 = tpu.matmul %12, %13, %cst_8 {dimension_numbers = #tpu.dot_dimension_numbers<[1], [0], [0], [1], [0, 0, 1, 1], [], []>} : vector<64x1024xbf16>, vector<1024x128xbf16>, vector<64x128xf32> -> vector<64x128xf32>
    %c0_9 = arith.constant 0 : index
    %c0_10 = arith.constant 0 : index
    %15 = vector.load %arg5[%c0_9, %c0_10] : memref<1x128xf32, #tpu.memory_space<vmem>>, vector<1x128xf32>
    %16 = vector.broadcast %15 : vector<1x128xf32> to vector<64x128xf32>
    %17 = arith.addf %14, %16 : vector<64x128xf32>
    %c0_11 = arith.constant 0 : index
    %c0_12 = arith.constant 0 : index
    %18 = vector.load %arg6[%c0_11, %c0_12] : memref<64x128xf32, #tpu.memory_space<vmem>>, vector<64x128xf32>
    tpu.vector_store %arg6[%c0_11, %c0_12], %17 {strides = array<i32>} : memref<64x128xf32, #tpu.memory_space<vmem>>, vector<64x128xf32>,
    %cst_13 = arith.constant dense<0.000000e+00> : vector<128xf32>
    %19 = vector.multi_reduction <add>, %17, %cst_13 [0] : vector<64x128xf32> to vector<128xf32>
    %20 = vector.shape_cast %19 : vector<128xf32> to vector<1x128xf32>
    %21 = vector.shape_cast %20 : vector<1x128xf32> to vector<1x1x128xf32>
    %c0_14 = arith.constant 0 : index
    %c0_15 = arith.constant 0 : index
    %c0_16 = arith.constant 0 : index
    %22 = vector.load %arg7[%c0_14, %c0_15, %c0_16] : memref<1x2x128xf32, #tpu.memory_space<vmem>>, vector<1x1x128xf32>
    tpu.vector_store %arg7[%c0_14, %c0_15, %c0_16], %21 {strides = array<i32>} : memref<1x2x128xf32, #tpu.memory_space<vmem>>, vector<1x1x128xf32>,
    %23 = arith.mulf %17, %17 : vector<64x128xf32>
    %cst_17 = arith.constant dense<0.000000e+00> : vector<128xf32>
    %24 = vector.multi_reduction <add>, %23, %cst_17 [0] : vector<64x128xf32> to vector<128xf32>
    %25 = vector.shape_cast %24 : vector<128xf32> to vector<1x128xf32>
    %26 = vector.shape_cast %25 : vector<1x128xf32> to vector<1x1x128xf32>
    %c0_18 = arith.constant 0 : index
    %c1 = arith.constant 1 : index
    %c0_19 = arith.constant 0 : index
    %27 = vector.load %arg7[%c0_18, %c1, %c0_19] : memref<1x2x128xf32, #tpu.memory_space<vmem>>, vector<1x1x128xf32>
    tpu.vector_store %arg7[%c0_18, %c1, %c0_19], %26 {strides = array<i32>} : memref<1x2x128xf32, #tpu.memory_space<vmem>>, vector<1x1x128xf32>,
    return
  }
  func.func @transform_0(%arg0: i32) -> (i32, i32) {
    %c0_i32 = arith.constant 0 : i32
    %c0_i32_0 = arith.constant 0 : i32
    return %arg0, %c0_i32 : i32, i32
  }
  func.func @transform_1(%arg0: i32) -> (i32, i32) {
    %c0_i32 = arith.constant 0 : i32
    %c0_i32_0 = arith.constant 0 : i32
    %c0_i32_1 = arith.constant 0 : i32
    return %c0_i32, %c0_i32_0 : i32, i32
  }
  func.func @transform_2(%arg0: i32) -> (i32, i32) {
    %c0_i32 = arith.constant 0 : i32
    %c0_i32_0 = arith.constant 0 : i32
    %c0_i32_1 = arith.constant 0 : i32
    return %c0_i32, %c0_i32_0 : i32, i32
  }
  func.func @transform_3(%arg0: i32) -> (i32, i32) {
    %c0_i32 = arith.constant 0 : i32
    %c0_i32_0 = arith.constant 0 : i32
    %c0_i32_1 = arith.constant 0 : i32
    return %c0_i32, %c0_i32_0 : i32, i32
  }
  func.func @transform_4(%arg0: i32) -> (i32, i32) {
    %c0_i32 = arith.constant 0 : i32
    %c0_i32_0 = arith.constant 0 : i32
    %c0_i32_1 = arith.constant 0 : i32
    return %c0_i32, %c0_i32_0 : i32, i32
  }
  func.func @transform_5(%arg0: i32) -> (i32, i32) {
    %c0_i32 = arith.constant 0 : i32
    %c0_i32_0 = arith.constant 0 : i32
    return %arg0, %c0_i32 : i32, i32
  }
  func.func @transform_6(%arg0: i32) -> (i32, i32, i32) {
    %c0_i32 = arith.constant 0 : i32
    %c0_i32_0 = arith.constant 0 : i32
    %c0_i32_1 = arith.constant 0 : i32
    return %arg0, %c0_i32, %c0_i32_0 : i32, i32, i32
  }
}

module attributes {stable_mosaic.version = 11 : i64} {
  func.func @_preact_conv_stats_kernel(%arg0: i32, %arg1: memref<32x1024xf32, #tpu.memory_space<vmem>>, %arg2: memref<1x1024xf32, #tpu.memory_space<vmem>>, %arg3: memref<1x1024xf32, #tpu.memory_space<vmem>>, %arg4: memref<1024x128xbf16, #tpu.memory_space<vmem>>, %arg5: memref<1x128xf32, #tpu.memory_space<vmem>>, %arg6: memref<32x128xf32, #tpu.memory_space<vmem>>, %arg7: memref<1x2x128xf32, #tpu.memory_space<vmem>>) attributes {dimension_semantics = [#tpu.dimension_semantics<parallel>], iteration_bounds = array<i64: 2>, scalar_prefetch = 0 : i64, scratch_operands = 0 : i64, tpu.core_type = #tpu.core_type<tc>, window_params = [{transform_indices = @transform_0, window_bounds = array<i64: 32, 1024>}, {pipeline_mode = #tpu.pipeline_mode<synchronous>, transform_indices = @transform_1, window_bounds = array<i64: 1, 1024>}, {pipeline_mode = #tpu.pipeline_mode<synchronous>, transform_indices = @transform_2, window_bounds = array<i64: 1, 1024>}, {pipeline_mode = #tpu.pipeline_mode<synchronous>, transform_indices = @transform_3, window_bounds = array<i64: 1024, 128>}, {pipeline_mode = #tpu.pipeline_mode<synchronous>, transform_indices = @transform_4, window_bounds = array<i64: 1, 128>}, {transform_indices = @transform_5, window_bounds = array<i64: 32, 128>}, {transform_indices = @transform_6, window_bounds = array<i64: 1, 2, 128>}]} {
    %c0 = arith.constant 0 : index
    %c0_0 = arith.constant 0 : index
    %0 = vector.load %arg1[%c0, %c0_0] : memref<32x1024xf32, #tpu.memory_space<vmem>>, vector<32x1024xf32>
    %c0_1 = arith.constant 0 : index
    %c0_2 = arith.constant 0 : index
    %1 = vector.load %arg2[%c0_1, %c0_2] : memref<1x1024xf32, #tpu.memory_space<vmem>>, vector<1x1024xf32>
    %2 = vector.broadcast %1 : vector<1x1024xf32> to vector<32x1024xf32>
    %3 = arith.mulf %0, %2 : vector<32x1024xf32>
    %c0_3 = arith.constant 0 : index
    %c0_4 = arith.constant 0 : index
    %4 = vector.load %arg3[%c0_3, %c0_4] : memref<1x1024xf32, #tpu.memory_space<vmem>>, vector<1x1024xf32>
    %5 = vector.broadcast %4 : vector<1x1024xf32> to vector<32x1024xf32>
    %6 = arith.addf %3, %5 : vector<32x1024xf32>
    %cst = arith.constant 0.000000e+00 : f32
    %7 = vector.broadcast %cst : f32 to vector<32x1024xf32>
    %8 = arith.cmpf ogt, %6, %7 : vector<32x1024xf32>
    %cst_5 = arith.constant 2.000000e-01 : f32
    %9 = vector.broadcast %cst_5 : f32 to vector<32x1024xf32>
    %10 = arith.mulf %9, %6 : vector<32x1024xf32>
    %11 = arith.select %8, %6, %10 : vector<32x1024xi1>, vector<32x1024xf32>
    %12 = arith.truncf %11 : vector<32x1024xf32> to vector<32x1024xbf16>
    %c0_6 = arith.constant 0 : index
    %c0_7 = arith.constant 0 : index
    %13 = vector.load %arg4[%c0_6, %c0_7] : memref<1024x128xbf16, #tpu.memory_space<vmem>>, vector<1024x128xbf16>
    %cst_8 = arith.constant dense<0.000000e+00> : vector<32x128xf32>
    %14 = tpu.matmul %12, %13, %cst_8 {dimension_numbers = #tpu.dot_dimension_numbers<[1], [0], [0], [1], [0, 0, 1, 1], [], []>} : vector<32x1024xbf16>, vector<1024x128xbf16>, vector<32x128xf32> -> vector<32x128xf32>
    %c0_9 = arith.constant 0 : index
    %c0_10 = arith.constant 0 : index
    %15 = vector.load %arg5[%c0_9, %c0_10] : memref<1x128xf32, #tpu.memory_space<vmem>>, vector<1x128xf32>
    %16 = vector.broadcast %15 : vector<1x128xf32> to vector<32x128xf32>
    %17 = arith.addf %14, %16 : vector<32x128xf32>
    %c0_11 = arith.constant 0 : index
    %c0_12 = arith.constant 0 : index
    %18 = vector.load %arg6[%c0_11, %c0_12] : memref<32x128xf32, #tpu.memory_space<vmem>>, vector<32x128xf32>
    tpu.vector_store %arg6[%c0_11, %c0_12], %17 {strides = array<i32>} : memref<32x128xf32, #tpu.memory_space<vmem>>, vector<32x128xf32>,
    %cst_13 = arith.constant dense<0.000000e+00> : vector<128xf32>
    %19 = vector.multi_reduction <add>, %17, %cst_13 [0] : vector<32x128xf32> to vector<128xf32>
    %20 = vector.shape_cast %19 : vector<128xf32> to vector<1x128xf32>
    %21 = vector.shape_cast %20 : vector<1x128xf32> to vector<1x1x128xf32>
    %c0_14 = arith.constant 0 : index
    %c0_15 = arith.constant 0 : index
    %c0_16 = arith.constant 0 : index
    %22 = vector.load %arg7[%c0_14, %c0_15, %c0_16] : memref<1x2x128xf32, #tpu.memory_space<vmem>>, vector<1x1x128xf32>
    tpu.vector_store %arg7[%c0_14, %c0_15, %c0_16], %21 {strides = array<i32>} : memref<1x2x128xf32, #tpu.memory_space<vmem>>, vector<1x1x128xf32>,
    %23 = arith.mulf %17, %17 : vector<32x128xf32>
    %cst_17 = arith.constant dense<0.000000e+00> : vector<128xf32>
    %24 = vector.multi_reduction <add>, %23, %cst_17 [0] : vector<32x128xf32> to vector<128xf32>
    %25 = vector.shape_cast %24 : vector<128xf32> to vector<1x128xf32>
    %26 = vector.shape_cast %25 : vector<1x128xf32> to vector<1x1x128xf32>
    %c0_18 = arith.constant 0 : index
    %c1 = arith.constant 1 : index
    %c0_19 = arith.constant 0 : index
    %27 = vector.load %arg7[%c0_18, %c1, %c0_19] : memref<1x2x128xf32, #tpu.memory_space<vmem>>, vector<1x1x128xf32>
    tpu.vector_store %arg7[%c0_18, %c1, %c0_19], %26 {strides = array<i32>} : memref<1x2x128xf32, #tpu.memory_space<vmem>>, vector<1x1x128xf32>,
    return
  }
  func.func @transform_0(%arg0: i32) -> (i32, i32) {
    %c0_i32 = arith.constant 0 : i32
    %c0_i32_0 = arith.constant 0 : i32
    return %arg0, %c0_i32 : i32, i32
  }
  func.func @transform_1(%arg0: i32) -> (i32, i32) {
    %c0_i32 = arith.constant 0 : i32
    %c0_i32_0 = arith.constant 0 : i32
    %c0_i32_1 = arith.constant 0 : i32
    return %c0_i32, %c0_i32_0 : i32, i32
  }
  func.func @transform_2(%arg0: i32) -> (i32, i32) {
    %c0_i32 = arith.constant 0 : i32
    %c0_i32_0 = arith.constant 0 : i32
    %c0_i32_1 = arith.constant 0 : i32
    return %c0_i32, %c0_i32_0 : i32, i32
  }
  func.func @transform_3(%arg0: i32) -> (i32, i32) {
    %c0_i32 = arith.constant 0 : i32
    %c0_i32_0 = arith.constant 0 : i32
    %c0_i32_1 = arith.constant 0 : i32
    return %c0_i32, %c0_i32_0 : i32, i32
  }
  func.func @transform_4(%arg0: i32) -> (i32, i32) {
    %c0_i32 = arith.constant 0 : i32
    %c0_i32_0 = arith.constant 0 : i32
    %c0_i32_1 = arith.constant 0 : i32
    return %c0_i32, %c0_i32_0 : i32, i32
  }
  func.func @transform_5(%arg0: i32) -> (i32, i32) {
    %c0_i32 = arith.constant 0 : i32
    %c0_i32_0 = arith.constant 0 : i32
    return %arg0, %c0_i32 : i32, i32
  }
  func.func @transform_6(%arg0: i32) -> (i32, i32, i32) {
    %c0_i32 = arith.constant 0 : i32
    %c0_i32_0 = arith.constant 0 : i32
    %c0_i32_1 = arith.constant 0 : i32
    return %arg0, %c0_i32, %c0_i32_0 : i32, i32, i32
  }
}

module attributes {stable_mosaic.version = 11 : i64} {
  func.func @_preact_conv_stats_kernel(%arg0: i32, %arg1: memref<16x1024xf32, #tpu.memory_space<vmem>>, %arg2: memref<1x1024xf32, #tpu.memory_space<vmem>>, %arg3: memref<1x1024xf32, #tpu.memory_space<vmem>>, %arg4: memref<1024x128xbf16, #tpu.memory_space<vmem>>, %arg5: memref<1x128xf32, #tpu.memory_space<vmem>>, %arg6: memref<16x128xf32, #tpu.memory_space<vmem>>, %arg7: memref<1x2x128xf32, #tpu.memory_space<vmem>>) attributes {dimension_semantics = [#tpu.dimension_semantics<parallel>], iteration_bounds = array<i64: 2>, scalar_prefetch = 0 : i64, scratch_operands = 0 : i64, tpu.core_type = #tpu.core_type<tc>, window_params = [{transform_indices = @transform_0, window_bounds = array<i64: 16, 1024>}, {pipeline_mode = #tpu.pipeline_mode<synchronous>, transform_indices = @transform_1, window_bounds = array<i64: 1, 1024>}, {pipeline_mode = #tpu.pipeline_mode<synchronous>, transform_indices = @transform_2, window_bounds = array<i64: 1, 1024>}, {pipeline_mode = #tpu.pipeline_mode<synchronous>, transform_indices = @transform_3, window_bounds = array<i64: 1024, 128>}, {pipeline_mode = #tpu.pipeline_mode<synchronous>, transform_indices = @transform_4, window_bounds = array<i64: 1, 128>}, {transform_indices = @transform_5, window_bounds = array<i64: 16, 128>}, {transform_indices = @transform_6, window_bounds = array<i64: 1, 2, 128>}]} {
    %c0 = arith.constant 0 : index
    %c0_0 = arith.constant 0 : index
    %0 = vector.load %arg1[%c0, %c0_0] : memref<16x1024xf32, #tpu.memory_space<vmem>>, vector<16x1024xf32>
    %c0_1 = arith.constant 0 : index
    %c0_2 = arith.constant 0 : index
    %1 = vector.load %arg2[%c0_1, %c0_2] : memref<1x1024xf32, #tpu.memory_space<vmem>>, vector<1x1024xf32>
    %2 = vector.broadcast %1 : vector<1x1024xf32> to vector<16x1024xf32>
    %3 = arith.mulf %0, %2 : vector<16x1024xf32>
    %c0_3 = arith.constant 0 : index
    %c0_4 = arith.constant 0 : index
    %4 = vector.load %arg3[%c0_3, %c0_4] : memref<1x1024xf32, #tpu.memory_space<vmem>>, vector<1x1024xf32>
    %5 = vector.broadcast %4 : vector<1x1024xf32> to vector<16x1024xf32>
    %6 = arith.addf %3, %5 : vector<16x1024xf32>
    %cst = arith.constant 0.000000e+00 : f32
    %7 = vector.broadcast %cst : f32 to vector<16x1024xf32>
    %8 = arith.cmpf ogt, %6, %7 : vector<16x1024xf32>
    %cst_5 = arith.constant 2.000000e-01 : f32
    %9 = vector.broadcast %cst_5 : f32 to vector<16x1024xf32>
    %10 = arith.mulf %9, %6 : vector<16x1024xf32>
    %11 = arith.select %8, %6, %10 : vector<16x1024xi1>, vector<16x1024xf32>
    %12 = arith.truncf %11 : vector<16x1024xf32> to vector<16x1024xbf16>
    %c0_6 = arith.constant 0 : index
    %c0_7 = arith.constant 0 : index
    %13 = vector.load %arg4[%c0_6, %c0_7] : memref<1024x128xbf16, #tpu.memory_space<vmem>>, vector<1024x128xbf16>
    %cst_8 = arith.constant dense<0.000000e+00> : vector<16x128xf32>
    %14 = tpu.matmul %12, %13, %cst_8 {dimension_numbers = #tpu.dot_dimension_numbers<[1], [0], [0], [1], [0, 0, 1, 1], [], []>} : vector<16x1024xbf16>, vector<1024x128xbf16>, vector<16x128xf32> -> vector<16x128xf32>
    %c0_9 = arith.constant 0 : index
    %c0_10 = arith.constant 0 : index
    %15 = vector.load %arg5[%c0_9, %c0_10] : memref<1x128xf32, #tpu.memory_space<vmem>>, vector<1x128xf32>
    %16 = vector.broadcast %15 : vector<1x128xf32> to vector<16x128xf32>
    %17 = arith.addf %14, %16 : vector<16x128xf32>
    %c0_11 = arith.constant 0 : index
    %c0_12 = arith.constant 0 : index
    %18 = vector.load %arg6[%c0_11, %c0_12] : memref<16x128xf32, #tpu.memory_space<vmem>>, vector<16x128xf32>
    tpu.vector_store %arg6[%c0_11, %c0_12], %17 {strides = array<i32>} : memref<16x128xf32, #tpu.memory_space<vmem>>, vector<16x128xf32>,
    %cst_13 = arith.constant dense<0.000000e+00> : vector<128xf32>
    %19 = vector.multi_reduction <add>, %17, %cst_13 [0] : vector<16x128xf32> to vector<128xf32>
    %20 = vector.shape_cast %19 : vector<128xf32> to vector<1x128xf32>
    %21 = vector.shape_cast %20 : vector<1x128xf32> to vector<1x1x128xf32>
    %c0_14 = arith.constant 0 : index
    %c0_15 = arith.constant 0 : index
    %c0_16 = arith.constant 0 : index
    %22 = vector.load %arg7[%c0_14, %c0_15, %c0_16] : memref<1x2x128xf32, #tpu.memory_space<vmem>>, vector<1x1x128xf32>
    tpu.vector_store %arg7[%c0_14, %c0_15, %c0_16], %21 {strides = array<i32>} : memref<1x2x128xf32, #tpu.memory_space<vmem>>, vector<1x1x128xf32>,
    %23 = arith.mulf %17, %17 : vector<16x128xf32>
    %cst_17 = arith.constant dense<0.000000e+00> : vector<128xf32>
    %24 = vector.multi_reduction <add>, %23, %cst_17 [0] : vector<16x128xf32> to vector<128xf32>
    %25 = vector.shape_cast %24 : vector<128xf32> to vector<1x128xf32>
    %26 = vector.shape_cast %25 : vector<1x128xf32> to vector<1x1x128xf32>
    %c0_18 = arith.constant 0 : index
    %c1 = arith.constant 1 : index
    %c0_19 = arith.constant 0 : index
    %27 = vector.load %arg7[%c0_18, %c1, %c0_19] : memref<1x2x128xf32, #tpu.memory_space<vmem>>, vector<1x1x128xf32>
    tpu.vector_store %arg7[%c0_18, %c1, %c0_19], %26 {strides = array<i32>} : memref<1x2x128xf32, #tpu.memory_space<vmem>>, vector<1x1x128xf32>,
    return
  }
  func.func @transform_0(%arg0: i32) -> (i32, i32) {
    %c0_i32 = arith.constant 0 : i32
    %c0_i32_0 = arith.constant 0 : i32
    return %arg0, %c0_i32 : i32, i32
  }
  func.func @transform_1(%arg0: i32) -> (i32, i32) {
    %c0_i32 = arith.constant 0 : i32
    %c0_i32_0 = arith.constant 0 : i32
    %c0_i32_1 = arith.constant 0 : i32
    return %c0_i32, %c0_i32_0 : i32, i32
  }
  func.func @transform_2(%arg0: i32) -> (i32, i32) {
    %c0_i32 = arith.constant 0 : i32
    %c0_i32_0 = arith.constant 0 : i32
    %c0_i32_1 = arith.constant 0 : i32
    return %c0_i32, %c0_i32_0 : i32, i32
  }
  func.func @transform_3(%arg0: i32) -> (i32, i32) {
    %c0_i32 = arith.constant 0 : i32
    %c0_i32_0 = arith.constant 0 : i32
    %c0_i32_1 = arith.constant 0 : i32
    return %c0_i32, %c0_i32_0 : i32, i32
  }
  func.func @transform_4(%arg0: i32) -> (i32, i32) {
    %c0_i32 = arith.constant 0 : i32
    %c0_i32_0 = arith.constant 0 : i32
    %c0_i32_1 = arith.constant 0 : i32
    return %c0_i32, %c0_i32_0 : i32, i32
  }
  func.func @transform_5(%arg0: i32) -> (i32, i32) {
    %c0_i32 = arith.constant 0 : i32
    %c0_i32_0 = arith.constant 0 : i32
    return %arg0, %c0_i32 : i32, i32
  }
  func.func @transform_6(%arg0: i32) -> (i32, i32, i32) {
    %c0_i32 = arith.constant 0 : i32
    %c0_i32_0 = arith.constant 0 : i32
    %c0_i32_1 = arith.constant 0 : i32
    return %arg0, %c0_i32, %c0_i32_0 : i32, i32, i32
  }
}

module attributes {stable_mosaic.version = 11 : i64} {
  func.func @_head_kernel(%arg0: i32, %arg1: memref<2x2048xf32, #tpu.memory_space<vmem>>, %arg2: memref<1x2048xf32, #tpu.memory_space<vmem>>, %arg3: memref<1x2048xf32, #tpu.memory_space<vmem>>, %arg4: memref<2x16xf32, #tpu.memory_space<vmem>>, %arg5: memref<16x2048xf32, #tpu.memory_space<vmem>>, %arg6: memref<1x2048xf32, #tpu.memory_space<vmem>>, %arg7: memref<1x2048xf32, #tpu.memory_space<vmem>>, %arg8: memref<1x1xf32, #tpu.memory_space<vmem>>, %arg9: memref<2x1xf32, #tpu.memory_space<vmem>>) attributes {dimension_semantics = [#tpu.dimension_semantics<arbitrary>], iteration_bounds = array<i64: 1>, scalar_prefetch = 0 : i64, scratch_operands = 0 : i64, tpu.core_type = #tpu.core_type<tc>, window_params = [{pipeline_mode = #tpu.pipeline_mode<synchronous>, transform_indices = @transform_0, window_bounds = array<i64: 2, 2048>}, {pipeline_mode = #tpu.pipeline_mode<synchronous>, transform_indices = @transform_1, window_bounds = array<i64: 1, 2048>}, {pipeline_mode = #tpu.pipeline_mode<synchronous>, transform_indices = @transform_2, window_bounds = array<i64: 1, 2048>}, {pipeline_mode = #tpu.pipeline_mode<synchronous>, transform_indices = @transform_3, window_bounds = array<i64: 2, 16>}, {pipeline_mode = #tpu.pipeline_mode<synchronous>, transform_indices = @transform_4, window_bounds = array<i64: 16, 2048>}, {pipeline_mode = #tpu.pipeline_mode<synchronous>, transform_indices = @transform_5, window_bounds = array<i64: 1, 2048>}, {pipeline_mode = #tpu.pipeline_mode<synchronous>, transform_indices = @transform_6, window_bounds = array<i64: 1, 2048>}, {pipeline_mode = #tpu.pipeline_mode<synchronous>, transform_indices = @transform_7, window_bounds = array<i64: 1, 1>}, {pipeline_mode = #tpu.pipeline_mode<synchronous>, transform_indices = @transform_8, window_bounds = array<i64: 2, 1>}]} {
    %c0 = arith.constant 0 : index
    %c0_0 = arith.constant 0 : index
    %0 = vector.load %arg1[%c0, %c0_0] : memref<2x2048xf32, #tpu.memory_space<vmem>>, vector<2x2048xf32>
    %c0_1 = arith.constant 0 : index
    %c0_2 = arith.constant 0 : index
    %1 = vector.load %arg2[%c0_1, %c0_2] : memref<1x2048xf32, #tpu.memory_space<vmem>>, vector<1x2048xf32>
    %2 = vector.broadcast %1 : vector<1x2048xf32> to vector<2x2048xf32>
    %3 = arith.mulf %0, %2 : vector<2x2048xf32>
    %c0_3 = arith.constant 0 : index
    %c0_4 = arith.constant 0 : index
    %4 = vector.load %arg3[%c0_3, %c0_4] : memref<1x2048xf32, #tpu.memory_space<vmem>>, vector<1x2048xf32>
    %5 = vector.broadcast %4 : vector<1x2048xf32> to vector<2x2048xf32>
    %6 = arith.addf %3, %5 : vector<2x2048xf32>
    %cst = arith.constant 0.000000e+00 : f32
    %7 = vector.broadcast %cst : f32 to vector<2x2048xf32>
    %8 = arith.cmpf ogt, %6, %7 : vector<2x2048xf32>
    %cst_5 = arith.constant 2.000000e-01 : f32
    %9 = vector.broadcast %cst_5 : f32 to vector<2x2048xf32>
    %10 = arith.mulf %9, %6 : vector<2x2048xf32>
    %11 = arith.select %8, %6, %10 : vector<2x2048xi1>, vector<2x2048xf32>
    %c0_6 = arith.constant 0 : index
    %c0_7 = arith.constant 0 : index
    %12 = vector.load %arg4[%c0_6, %c0_7] : memref<2x16xf32, #tpu.memory_space<vmem>>, vector<2x16xf32>
    %c0_8 = arith.constant 0 : index
    %c0_9 = arith.constant 0 : index
    %13 = vector.load %arg5[%c0_8, %c0_9] : memref<16x2048xf32, #tpu.memory_space<vmem>>, vector<16x2048xf32>
    %cst_10 = arith.constant dense<0.000000e+00> : vector<2x2048xf32>
    %14 = tpu.matmul %12, %13, %cst_10 {dimension_numbers = #tpu.dot_dimension_numbers<[1], [0], [0], [1], [0, 0, 1, 1], [], []>} : vector<2x16xf32>, vector<16x2048xf32>, vector<2x2048xf32> -> vector<2x2048xf32>
    %c0_11 = arith.constant 0 : index
    %c0_12 = arith.constant 0 : index
    %15 = vector.load %arg6[%c0_11, %c0_12] : memref<1x2048xf32, #tpu.memory_space<vmem>>, vector<1x2048xf32>
    %16 = vector.broadcast %15 : vector<1x2048xf32> to vector<2x2048xf32>
    %17 = arith.addf %14, %16 : vector<2x2048xf32>
    %c0_13 = arith.constant 0 : index
    %c0_14 = arith.constant 0 : index
    %18 = vector.load %arg7[%c0_13, %c0_14] : memref<1x2048xf32, #tpu.memory_space<vmem>>, vector<1x2048xf32>
    %19 = vector.broadcast %18 : vector<1x2048xf32> to vector<2x2048xf32>
    %20 = arith.addf %17, %19 : vector<2x2048xf32>
    %21 = arith.mulf %11, %20 : vector<2x2048xf32>
    %cst_15 = arith.constant dense<0.000000e+00> : vector<2xf32>
    %22 = vector.multi_reduction <add>, %21, %cst_15 [1] : vector<2x2048xf32> to vector<2xf32>
    %23 = vector.shape_cast %22 : vector<2xf32> to vector<2x1xf32>
    %c0_16 = arith.constant 0 : index
    %c0_17 = arith.constant 0 : index
    %24 = vector.load %arg8[%c0_16, %c0_17] : memref<1x1xf32, #tpu.memory_space<vmem>>, vector<1x1xf32>
    %25 = vector.broadcast %24 : vector<1x1xf32> to vector<2x1xf32>
    %26 = arith.addf %23, %25 : vector<2x1xf32>
    %c0_18 = arith.constant 0 : index
    %c0_19 = arith.constant 0 : index
    %27 = vector.load %arg9[%c0_18, %c0_19] : memref<2x1xf32, #tpu.memory_space<vmem>>, vector<2x1xf32>
    tpu.vector_store %arg9[%c0_18, %c0_19], %26 {strides = array<i32>} : memref<2x1xf32, #tpu.memory_space<vmem>>, vector<2x1xf32>,
    return
  }
  func.func @transform_0(%arg0: i32) -> (i32, i32) {
    %c0_i32 = arith.constant 0 : i32
    %c0_i32_0 = arith.constant 0 : i32
    %c0_i32_1 = arith.constant 0 : i32
    return %c0_i32, %c0_i32_0 : i32, i32
  }
  func.func @transform_1(%arg0: i32) -> (i32, i32) {
    %c0_i32 = arith.constant 0 : i32
    %c0_i32_0 = arith.constant 0 : i32
    %c0_i32_1 = arith.constant 0 : i32
    return %c0_i32, %c0_i32_0 : i32, i32
  }
  func.func @transform_2(%arg0: i32) -> (i32, i32) {
    %c0_i32 = arith.constant 0 : i32
    %c0_i32_0 = arith.constant 0 : i32
    %c0_i32_1 = arith.constant 0 : i32
    return %c0_i32, %c0_i32_0 : i32, i32
  }
  func.func @transform_3(%arg0: i32) -> (i32, i32) {
    %c0_i32 = arith.constant 0 : i32
    %c0_i32_0 = arith.constant 0 : i32
    %c0_i32_1 = arith.constant 0 : i32
    return %c0_i32, %c0_i32_0 : i32, i32
  }
  func.func @transform_4(%arg0: i32) -> (i32, i32) {
    %c0_i32 = arith.constant 0 : i32
    %c0_i32_0 = arith.constant 0 : i32
    %c0_i32_1 = arith.constant 0 : i32
    return %c0_i32, %c0_i32_0 : i32, i32
  }
  func.func @transform_5(%arg0: i32) -> (i32, i32) {
    %c0_i32 = arith.constant 0 : i32
    %c0_i32_0 = arith.constant 0 : i32
    %c0_i32_1 = arith.constant 0 : i32
    return %c0_i32, %c0_i32_0 : i32, i32
  }
  func.func @transform_6(%arg0: i32) -> (i32, i32) {
    %c0_i32 = arith.constant 0 : i32
    %c0_i32_0 = arith.constant 0 : i32
    %c0_i32_1 = arith.constant 0 : i32
    return %c0_i32, %c0_i32_0 : i32, i32
  }
  func.func @transform_7(%arg0: i32) -> (i32, i32) {
    %c0_i32 = arith.constant 0 : i32
    %c0_i32_0 = arith.constant 0 : i32
    %c0_i32_1 = arith.constant 0 : i32
    return %c0_i32, %c0_i32_0 : i32, i32
  }
  func.func @transform_8(%arg0: i32) -> (i32, i32) {
    %c0_i32 = arith.constant 0 : i32
    %c0_i32_0 = arith.constant 0 : i32
    %c0_i32_1 = arith.constant 0 : i32
    return %c0_i32, %c0_i32_0 : i32, i32
  }
}

</mosaic_0001>

<bundles_post_ra>
// kernel: conditional_discriminator_forward.6
= control target key start
LH: loop header
LB: loop body
LE: loop exit
PB: predicated region body
PF: predicated region fallthrough
CT: control target
= control target key end

     0   :  { %8 = vsyncpa [#allocation3], 0  ;;  %s3156_s0 = inlined_call_operand.hbm [shape: bf16[512,768], index: 0, kind: input, shape index: {}]   ;;  %s3157_s1 = inlined_call_operand.hbm [shape: bf16[768,128], index: 1, kind: input, shape index: {}]   ;;  %s3158_s2 = inlined_call_operand.hbm [shape: f32[1,128], index: 2, kind: input, shape index: {}]   ;;  %s3159_s3 = inlined_call_operand.vmem [shape: f32[512,128], index: 3, kind: output, shape index: {}]  }
   0x1   :  { %10 = vsyncpa [#allocation3 + $0x1], 0 }
   0x2   :  { %11 = vsyncpa [#allocation5], 0  ;;  %s2715_s12 = smov 0   ;;  %s2717_s13 = smov 0  }
   0x3   :  { %s2719_s14 = smov 0   ;;  %s2721_s15 = smov 0  }
   0x4 LB: > { %s1790_s16 = sadd.s32 4294967295, %s2686_s15   ;;  %p37_p0 = scmp.ne.s32.totalorder %s2678_s13, %s2674_s12  ;;  %s2686_s15 = sphi %s2721_s15, %s3175_s15   ;;  %s2682_s14 = sphi %s2719_s14, %s3174_s14   ;;  %s2678_s13 = sphi %s2717_s13, %s3173_s13   ;;  %s2674_s12 = sphi %s2715_s12, %s3172_s12  }
   0x5   : > { %p2737_p1 = scmp.eq.s32.totalorder %s1790_s16, 0  ;;  %p1792_p2 = scmp.ge.s32.totalorder %s2686_s15, 1 }
   0x6   : > { %p116_p3 = scmp.lt.s32.totalorder %s2686_s15, 3  ;;  %s2688_s20 = smov [#allocation4]  }
   0x7   : > { %s3164_s17 = scalar_select %p2737_p1, 1, 0 }
   0x8   : > { %p2745_p4 = por %p2737_p1, %p37_p0  ;;  %p2749_p5 = pnand %p1792_p2, %p116_p3 }
   0x9   : > { %s128_s21 = sshll.u32 %s2688_s20, 4  ;;  %s2689_s23 = smov [#allocation6]   ;;  %s129_s21 = int_to_ptr.vmem [resolvable:$true] %s128_s21 }
   0xa   : > { %s3165_s18 = scalar_select %p2745_p4, 1, 0 }
   0xb   : > { %s3166_s19 = scalar_select %p2749_p5, 1, 0 }
   0xc   : > { %p2316_p6 = pneg %p2749_p5  ;;  %s142_s24 = sshll.u32 %s2689_s23, 4  ;;  %s2761_s24 = int_to_ptr.vmem [resolvable:$true] %s142_s24 }
   0xd   : > { %s2562_s27 = scalar_lea.hbm %s3157_s1, 6144 }
   0xe   : > { %p2757_p7 = pnand %p2316_p6, %p2737_p1  ;;  %p2563_p8 = scmp.ne.s32.totalorder %s3157_s1, %s2562_s27 }
   0xf   : > { %p2569_p12 = scmp.lt.u32.totalorder %s2562_s27, %s3157_s1 }
  0x10   : > { %p2564_p9 = pneg %p2757_p7 }
  0x12   : > { %p2565_p10 = pnand %p2564_p9, %p2563_p8 }
  0x14   : > { %p2566_p11 = pneg %p2565_p10 }
  0x16   : > { %p2571_p13 = pnand %p2569_p12, %p2566_p11 }
  0x18   : > { %2574 = shalt.err (!%p2571_p13)
}
  0x19   : > { %s2575_s5 = scalar_lea.vmem %s129_s21, 6144  ;;  %p2583_p6 = scmp.lt.s32.totalorder %s129_s21, %s129_s21 }
  0x1a   : > { %p2576_p0 = scmp.ne.s32.totalorder %s129_s21, %s2575_s5  ;;  %p2584_p1 = scmp.lt.s32.totalorder %s2575_s5, %s2575_s5 }
  0x1c   : > { %p2578_p2 = pnand %p2576_p0, %p2564_p9  ;;  %p2585_p4 = por %p2584_p1, %p2583_p6 }
  0x1e   : > { %p2579_p3 = pneg %p2578_p2 }
  0x20   : > { %p2586_p5 = pnand %p2585_p4, %p2579_p3 }
  0x22   : > { %2589 = shalt.err (!%p2586_p5)
}
  0x23   : > { %s2690_s6 = smov 64   ;;  %s2691_s7 = smov 4  }
  0x24   : > { %2319 = dma.hbm_to_vmem [thread:$0]  (!%p2757_p7), %s3157_s1, 6144, %s129_s21, [#allocation5], %s2690_s6, %s2690_s6, %s2691_s7  }
  0x25   : > { %s2590_s12 = scalar_lea.hbm %s3158_s2, 16 }
  0x26   : > { %p2591_p8 = scmp.ne.s32.totalorder %s3158_s2, %s2590_s12  ;;  %p2597_p5 = scmp.lt.u32.totalorder %s2590_s12, %s3158_s2 }
  0x28   : > { %p2593_p1 = pnand %p2591_p8, %p2564_p9 }
  0x2a   : > { %p2594_p4 = pneg %p2593_p1 }
  0x2c   : > { %p2599_p10 = pnand %p2597_p5, %p2594_p4 }
  0x2e   : > { %2602 = shalt.err (!%p2599_p10)
}
  0x2f   : > { %s2603_s21 = scalar_lea.vmem %s2761_s24, 16  ;;  %s2610_s27 = scalar_lea.vmem %s2761_s24, 32 }
  0x30   : > { %p2604_p11 = scmp.ne.s32.totalorder %s2761_s24, %s2603_s21  ;;  %p2611_p0 = scmp.lt.s32.totalorder %s2761_s24, %s2761_s24 }
  0x31   : > { %p2612_p2 = scmp.lt.s32.totalorder %s2610_s27, %s2603_s21 }
  0x32   : > { %p2606_p12 = pnand %p2604_p11, %p2564_p9 }
  0x33   : > { %p2613_p3 = por %p2612_p2, %p2611_p0 }
  0x34   : > { %p2607_p13 = pneg %p2606_p12 }
  0x36   : > { %p2614_p6 = pnand %p2613_p3, %p2607_p13 }
  0x38   : > { %2617 = shalt.err (!%p2614_p6)
}
  0x39   : > { %2322 = dma.hbm_to_vmem [thread:$0]  (!%p2757_p7), %s3158_s2, 16, %s2761_s24, [#allocation5]  }
  0x3a   : > { %s2812_s30 = sadd.s32 1, %s2686_s15   ;;  %s24_s4 = sadd.s32 1, %s2682_s14 }
  0x3b   : > { %s21_s22 = ssub.s32 %s2686_s15, %s2812_s30  ;;  %p31_p9 = scmp.ne.s32.totalorder %s2682_s14, %s2678_s13 }
  0x3c   : > { %p22_p8 = scmp.eq.s32.totalorder %s21_s22, 0  ;;  %p32_p1 = scmp.eq.s32.totalorder %s2686_s15, 0 }
  0x3d   : > { %p2329_p4 = scmp.lt.s32.totalorder %s2686_s15, 2  ;;  %s153_s5 = sand.u32 1, %s2682_s14  }
  0x3e   : > { %s2823_s6 = scalar_select %p22_p8, %s2682_s14, %s24_s4  }
  0x3f   : > { %p33_p5 = por %p32_p1, %p31_p9  ;;  %s2303_s7 = smul.u32 768, %s153_s5 }
  0x40   : > { %s2304_s8 = smul.u32 12288, %s2686_s15  ;;  %s2837_s23 = scalar_lea.sflag [#allocation3], %s153_s5 }
  0x41   : > { %p2826_p10 = pnand %p2329_p4, %p33_p5  ;;  %s157_s12 = scalar_lea.vmem [#allocation2], %s2303_s7 }
  0x42   : > { %s2833_s11 = scalar_lea.hbm %s3156_s0, %s2304_s8  ;;  %s165_s20 = sshll.u32 %s157_s12, 4  ;;  %s2835_s20 = int_to_ptr.vmem [resolvable:$true] %s165_s20 }
  0x43   : > { %s2618_s25 = scalar_lea.hbm %s2833_s11, 12288  ;;  %p2620_p11 = pneg %p2826_p10 }
  0x44   : > { %p2619_p7 = scmp.ne.s32.totalorder %s2833_s11, %s2618_s25  ;;  %s2623_s27 = scalar_lea.hbm %s3156_s0, 24576 }
  0x45   : > { %p2624_p0 = scmp.lt.u32.totalorder %s2833_s11, %s3156_s0  ;;  %p2625_p2 = scmp.lt.u32.totalorder %s2623_s27, %s2618_s25 }
  0x46   : > { %p2621_p12 = pnand %p2620_p11, %p2619_p7  ;;  %p2627_p6 = scmp.lt.u32.totalorder %s2618_s25, %s2833_s11 }
  0x47   : > { %p2626_p3 = por %p2625_p2, %p2624_p0 }
  0x48   : > { %p2622_p13 = pneg %p2621_p12 }
  0x49   : > { %p2628_p9 = por %p2627_p6, %p2626_p3 }
  0x4b   : > { %p2629_p8 = pnand %p2628_p9, %p2622_p13 }
  0x4d   : > { %2632 = shalt.err (!%p2629_p8)
}
  0x4e   : > { %s2633_s4 = scalar_lea.vmem %s2835_s20, 12288  ;;  %s2692_s22 = smov [#allocation2]  }
  0x4f   : > { %p2634_p1 = scmp.ne.s32.totalorder %s2835_s20, %s2633_s4  ;;  %s2638_s5 = sshll.u32 %s2692_s22, 4  ;;  %s2639_s5 = int_to_ptr.vmem [resolvable:$false] %s2638_s5 }
  0x50   : > { %s2640_s7 = scalar_lea.vmem %s2639_s5, 24576  ;;  %p2641_p7 = scmp.lt.s32.totalorder %s2835_s20, %s2639_s5 }
  0x51   : > { %p2636_p4 = pnand %p2634_p1, %p2620_p11  ;;  %p2642_p12 = scmp.lt.s32.totalorder %s2640_s7, %s2633_s4 }
  0x53   : > { %p2637_p5 = pneg %p2636_p4  ;;  %p2643_p0 = por %p2642_p12, %p2641_p7 }
  0x55   : > { %p2644_p2 = pnand %p2643_p0, %p2637_p5 }
  0x57   : > { %2647 = shalt.err (!%p2644_p2)
}
  0x58   : > { %s2693_s8 = smov 384   ;;  %s2694_s24 = smov 24  }
  0x59   : > { %2326 = dma.hbm_to_vmem [thread:$0]  (!%p2826_p10), %s2833_s11, 12288, %s2835_s20, %s2837_s23, %s2693_s8, %s2693_s8, %s2694_s24  }
  0x5a   : > { %p3169_p11 = scmp.ne.s32.totalorder %s3166_s19, 0 }
  0x5b   : > { %s179_s10 = sand.u32 (!%p3169_p11), 1, %s2678_s13   ;;  %p3170_p13 = scmp.ne.s32.totalorder (!%p3169_p11), %s3165_s18, 0 }
  0x5c   : > { %177 = sbr.rel (%p3169_p11) target bundleno = 542 (0x21e), region = 32  ;;  %s180_s25 = scalar_lea.sflag (!%p3169_p11), [#allocation3], %s179_s10 }
  0x5d   : > { %s2305_s12 = smul.u32 (!%p3169_p11), 768, %s179_s10 }
  0x5f   : > { %s2868_s26 = scalar_lea.vmem (!%p3169_p11), [#allocation2], %s2305_s12 }
  0x63   : > { %2665 = dma.done.wait (%p3170_p13), %s180_s25, 12288  }
  0x64   : > { %2667 = vsyncadd (%p3170_p13), %s180_s25, 4294955008  ;;  %p3171_p3 = scmp.ne.s32.totalorder %s3164_s17, 0 }
  0x66   : > { %2669 = dma.done.wait (%p3171_p3), [#allocation5], 6160  }
  0x67   : > { %2671 = vsyncadd (%p3171_p3), [#allocation5], 4294961136  ;;  %v2370_v0 = vld [vmem:[#allocation4 + $0x40] sm:$0xff]   ;;  %v2372_v2 = vld [vmem:[#allocation4 + $0x48] sm:$0xff]   ;;  %s1802_s17 = sshll.u32 %s1790_s16, 5 }
  0x68   : > { %v2371_v1 = vld [vmem:[#allocation4] sm:$0xff]   ;;  %1951 = vmatprep.subr.bf16.mxu0 %v2370_v0  ;;  %2287 = vmatprep.subr.bf16.mxu1 %v2370_v0  ;;  %v2373_v3 = vld [vmem:[#allocation4 + $0x8] sm:$0xff]   ;;  %v2374_v4 = vld [vmem:[#allocation4 + $0x50] sm:$0xff]   ;;  %p216_p10 = scmp.lt.s32.totalorder %s1802_s17, 63 }
  0x69   : > { %1952 = vmatpush3.bf16.msra.mxu0 %v2371_v1  ;;  %2295 = vmatpush3.bf16.msra.mxu1 %v2371_v1  ;;  %v2375_v5 = vld [vmem:[#allocation4 + $0x10] sm:$0xff]   ;;  %v2376_v6 = vld [vmem:[#allocation4 + $0x58] sm:$0xff]   ;;  %v2378_v8 = vld [vmem:[#allocation4 + $0x60] sm:$0xff]  }
  0x6a   : > { %1953 = vmatprep.subr.bf16.mxu0 %v2372_v2  ;;  %2288 = vmatprep.subr.bf16.mxu1 %v2372_v2  ;;  %v2377_v7 = vld [vmem:[#allocation4 + $0x18] sm:$0xff]   ;;  %v2379_v9 = vld [vmem:[#allocation4 + $0x20] sm:$0xff]   ;;  %v2380_v10 = vld [vmem:[#allocation4 + $0x68] sm:$0xff]   ;;  %s3177_s17 = smov (!%p216_p10, %s1802_s17), 63 }
  0x6b   : > { %v2388_v11 = vld [vmem:[%s2868_s26 + $0x4] ss:$24 sps:$4 sm:$0xff]   ;;  %v2381_v13 = vld [vmem:[#allocation4 + $0x28] sm:$0xff]   ;;  %v2382_v14 = vld [vmem:[#allocation4 + $0x70] sm:$0xff]   ;;  %s1803_s15 = sshll.u32 %s3177_s17, 3 }
  0x6c   : > { %v2391_v12 = vld [vmem:[%s2868_s26 + $0x184] ss:$24 sps:$4 sm:$0xff]   ;;  %1221 = vmatprep.mubr.bf16.mxu0 %v2388_v11  ;;  %v2383_v15 = vld [vmem:[#allocation4 + $0x30] sm:$0xff]   ;;  %v2386_v19 = vld [vmem:[%s2868_s26] ss:$24 sps:$4 sm:$0xff]   ;;  %s3065_s19 = scalar_lea.vmem %s3159_s3, %s1803_s15 }
  0x6d   : > { %1954 = vmatpush3.bf16.msra.mxu0 %v2373_v3  ;;  %2296 = vmatpush3.bf16.msra.mxu1 %v2373_v3  ;;  %v2384_v16 = vld [vmem:[#allocation4 + $0x78] sm:$0xff]   ;;  %v2392_v18 = vld [vmem:[#allocation4 + $0xc0] sm:$0xff]   ;;  %v2396_v24 = vld [vmem:[%s2868_s26 + $0x34] ss:$24 sps:$4 sm:$0xff]  }
  0x6e   : > { %1955 = vmatprep.subr.bf16.mxu0 %v2374_v4  ;;  %2289 = vmatprep.subr.bf16.mxu1 %v2374_v4  ;;  %v2385_v17 = vld [vmem:[#allocation4 + $0x38] sm:$0xff]   ;;  %v2394_v20 = vld [vmem:[#allocation4 + $0x140] sm:$0xff]   ;;  %v2398_v25 = vld [vmem:[%s2868_s26 + $0x1b4] ss:$24 sps:$4 sm:$0xff]  }
  0x6f   : > { %1285 = vmatprep.mubr.bf16.mxu1 %v2391_v12  ;;  %v2389_v21 = vld [vmem:[%s2868_s26 + $0x180] ss:$24 sps:$4 sm:$0xff]   ;;  %v2402_v26 = vld [vmem:[#allocation4 + $0xc8] sm:$0xff]   ;;  %v2412_v30 = vld [vmem:[#allocation4 + $0xd0] sm:$0xff]  }
  0x70   : > { %v2393_v22 = vld [vmem:[#allocation4 + $0x80] sm:$0xff]   ;;  %v2403_v27 = vld [vmem:[#allocation4 + $0x88] sm:$0xff]   ;;  %v2414_v33 = vld [vmem:[#allocation4 + $0x150] sm:$0xff]  }
  0x71   : > { %1956 = vmatpush3.bf16.msra.mxu0 %v2375_v5  ;;  %2297 = vmatpush3.bf16.msra.mxu1 %v2375_v5  ;;  %v2395_v23 = vld [vmem:[#allocation4 + $0x100] sm:$0xff]   ;;  %v2404_v28 = vld [vmem:[#allocation4 + $0x148] sm:$0xff]   ;;  %v2413_v36 = vld [vmem:[#allocation4 + $0x90] sm:$0xff]  }
  0x72   : > { %1957 = vmatprep.subr.bf16.mxu0 %v2376_v6  ;;  %2290 = vmatprep.subr.bf16.mxu1 %v2376_v6  ;;  %v2405_v29 = vld [vmem:[#allocation4 + $0x108] sm:$0xff]   ;;  %v2406_v34 = vld [vmem:[%s2868_s26 + $0x64] ss:$24 sps:$4 sm:$0xff]   ;;  %v2415_v37 = vld [vmem:[#allocation4 + $0x110] sm:$0xff]  }
  0x73   : > { %v2400_v31 = vld [vmem:[%s2868_s26 + $0x30] ss:$24 sps:$4 sm:$0xff]   ;;  %v2408_v35 = vld [vmem:[%s2868_s26 + $0x1e4] ss:$24 sps:$4 sm:$0xff]   ;;  %v2410_v40 = vld [vmem:[%s2868_s26 + $0x60] ss:$24 sps:$4 sm:$0xff]  }
  0x74   : > { %v2401_v32 = vld [vmem:[%s2868_s26 + $0x1b0] ss:$24 sps:$4 sm:$0xff]   ;;  %v2422_v38 = vld [vmem:[#allocation4 + $0xd8] sm:$0xff]   ;;  %v2416_v44 = vld [vmem:[%s2868_s26 + $0x94] ss:$24 sps:$4 sm:$0xff]  }
  0x75   : > { %1958 = vmatpush3.bf16.msra.mxu0 %v2377_v7  ;;  %2298 = vmatpush3.bf16.msra.mxu1 %v2377_v7  ;;  %v2424_v39 = vld [vmem:[#allocation4 + $0x158] sm:$0xff]   ;;  %v2418_v45 = vld [vmem:[%s2868_s26 + $0x214] ss:$24 sps:$4 sm:$0xff]   ;;  %v2432_v46 = vld [vmem:[#allocation4 + $0xe0] sm:$0xff]  }
  0x76   : > { %1959 = vmatprep.subr.bf16.mxu0 %v2378_v8  ;;  %2291 = vmatprep.subr.bf16.mxu1 %v2378_v8  ;;  %v2411_v41 = vld [vmem:[%s2868_s26 + $0x1e0] ss:$24 sps:$4 sm:$0xff]   ;;  %v2420_v50 = vld [vmem:[%s2868_s26 + $0x90] ss:$24 sps:$4 sm:$0xff]   ;;  %v2426_v53 = vld [vmem:[%s2868_s26 + $0xc4] ss:$24 sps:$4 sm:$0xff]  }
  0x77   : > { %v2423_v42 = vld [vmem:[#allocation4 + $0x98] sm:$0xff]   ;;  %v2433_v47 = vld [vmem:[#allocation4 + $0xa0] sm:$0xff]   ;;  %v2421_v51 = vld [vmem:[%s2868_s26 + $0x210] ss:$24 sps:$4 sm:$0xff]  }
  0x78   : > { %v2425_v43 = vld [vmem:[#allocation4 + $0x118] sm:$0xff]   ;;  %v2434_v48 = vld [vmem:[#allocation4 + $0x160] sm:$0xff]   ;;  %v2442_v52 = vld [vmem:[#allocation4 + $0xe8] sm:$0xff]  }
  0x79   : > { %1960 = vmatpush3.bf16.msra.mxu0 %v2379_v9  ;;  %2299 = vmatpush3.bf16.msra.mxu1 %v2379_v9  ;;  %v2435_v49 = vld [vmem:[#allocation4 + $0x120] sm:$0xff]   ;;  %v2443_v55 = vld [vmem:[#allocation4 + $0xa8] sm:$0xff]   ;;  %v2452_v58 = vld [vmem:[#allocation4 + $0xf0] sm:$0xff]  }
  0x7a   : > { %1961 = vmatprep.subr.bf16.mxu0 %v2380_v10  ;;  %2292 = vmatprep.subr.bf16.mxu1 %v2380_v10  ;;  %v2428_v54 = vld [vmem:[%s2868_s26 + $0x244] ss:$24 sps:$4 sm:$0xff]   ;;  %v2444_v56 = vld [vmem:[#allocation4 + $0x168] sm:$0xff]   ;;  %v2430_v59 = vld [vmem:[%s2868_s26 + $0xc0] ss:$24 sps:$4 sm:$0xff]  }
  0x7b   : > { %v2445_v57 = vld [vmem:[#allocation4 + $0x128] sm:$0xff]   ;;  %v2431_v60 = vld [vmem:[%s2868_s26 + $0x240] ss:$24 sps:$4 sm:$0xff]   ;;  %v2453_v61 = vld [vmem:[#allocation4 + $0xb0] sm:$0xff]  }
  0x7c   : > { %v2436_v62 = vld [vmem:[%s2868_s26 + $0xf4] ss:$24 sps:$4 sm:$0xff]   ;;  %v2462_v2 = vld [vmem:[#allocation4 + $0xf8] sm:$0xff]   ;;  %v2440_v6 = vld [vmem:[%s2868_s26 + $0xf0] ss:$24 sps:$4 sm:$0xff]  }
  0x7d   : > { %1962 = vmatpush3.bf16.msra.mxu0 %v2381_v13  ;;  %2300 = vmatpush3.bf16.msra.mxu1 %v2381_v13  ;;  %v2454_v63 = vld [vmem:[#allocation4 + $0x170] sm:$0xff]   ;;  %v2463_v3 = vld [vmem:[#allocation4 + $0xb8] sm:$0xff]  }
  0x7e   : > { %1963 = vmatprep.subr.bf16.mxu0 %v2382_v14  ;;  %2293 = vmatprep.subr.bf16.mxu1 %v2382_v14  ;;  %v2455_v0 = vld [vmem:[#allocation4 + $0x130] sm:$0xff]   ;;  %v2464_v4 = vld [vmem:[#allocation4 + $0x178] sm:$0xff]  }
  0x7f   : > { %v2438_v1 = vld [vmem:[%s2868_s26 + $0x274] ss:$24 sps:$4 sm:$0xff]   ;;  %v2465_v5 = vld [vmem:[#allocation4 + $0x138] sm:$0xff]   ;;  %v2441_v7 = vld [vmem:[%s2868_s26 + $0x270] ss:$24 sps:$4 sm:$0xff]  }
  0x80   : > { %v2446_v8 = vld [vmem:[%s2868_s26 + $0x124] ss:$24 sps:$4 sm:$0xff]   ;;  %v2450_v10 = vld [vmem:[%s2868_s26 + $0x120] ss:$24 sps:$4 sm:$0xff]   ;;  %v2456_v12 = vld [vmem:[%s2868_s26 + $0x154] ss:$24 sps:$4 sm:$0xff]  }
  0x81   : > { %1964 = vmatpush3.bf16.msra.mxu0 %v2383_v15  ;;  %2301 = vmatpush3.bf16.msra.mxu1 %v2383_v15  ;;  %v2448_v9 = vld [vmem:[%s2868_s26 + $0x2a4] ss:$24 sps:$4 sm:$0xff]   ;;  %v2451_v11 = vld [vmem:[%s2868_s26 + $0x2a0] ss:$24 sps:$4 sm:$0xff]   ;;  %v2458_v13 = vld [vmem:[%s2868_s26 + $0x2d4] ss:$24 sps:$4 sm:$0xff]  }
  0x82   : > { %1965 = vmatprep.subr.bf16.mxu0 %v2384_v16  ;;  %2294 = vmatprep.subr.bf16.mxu1 %v2384_v16  ;;  %v2460_v14 = vld [vmem:[%s2868_s26 + $0x150] ss:$24 sps:$4 sm:$0xff]   ;;  %v2468_v16 = vld [vmem:[%s2868_s26 + $0xc] ss:$24 sps:$4 sm:$0xff]  }
  0x83   : > { %v2461_v15 = vld [vmem:[%s2868_s26 + $0x2d0] ss:$24 sps:$4 sm:$0xff]  }
  0x85   : > { %1966 = vmatpush3.bf16.msra.mxu0 %v2385_v17  ;;  %2302 = vmatpush3.bf16.msra.mxu1 %v2385_v17  ;;  %v2471_v17 = vld [vmem:[%s2868_s26 + $0x14] ss:$24 sps:$4 sm:$0xff]  }
  0x86   : > { %2063 = vmatprep.subr.bf16.mxu1 %v2392_v18  ;;  %2175 = vmatprep.subr.bf16.mxu0 %v2394_v20  ;;  %v2466_v18 = vld [vmem:[%s2868_s26 + $0x8] ss:$24 sps:$4 sm:$0xff]   ;;  %v2472_v20 = vld [vmem:[%s2868_s26 + $0x3c] ss:$24 sps:$4 sm:$0xff]  }
  0x88   : > { %1222 = vmatmul.mubr.bf16.vlgmr.msra.gmra.mrb[0].mxu0 %v2386_v19  ;;  %1286 = vmatmul.mubr.bf16.vlgmr.msra.gmra.mrb[0].mxu1 %v2389_v21  ;;  %v2469_v19 = vld [vmem:[%s2868_s26 + $0x10] ss:$24 sps:$4 sm:$0xff]   ;;  %v2474_v21 = vld [vmem:[%s2868_s26 + $0x44] ss:$24 sps:$4 sm:$0xff]  }
  0x89   : > { %2064 = vmatpush3.bf16.msra.mxu1 %v2393_v22  ;;  %2176 = vmatpush3.bf16.msra.mxu0 %v2395_v23  ;;  %v2476_v22 = vld [vmem:[%s2868_s26 + $0x38] ss:$24 sps:$4 sm:$0xff]  }
  0x8a   : > { %1229 = vmatprep.mubr.bf16.mxu0 %v2396_v24  ;;  %1293 = vmatprep.mubr.bf16.mxu1 %v2398_v25  ;;  %v2477_v23 = vld [vmem:[%s2868_s26 + $0x40] ss:$24 sps:$4 sm:$0xff]   ;;  %v2478_v24 = vld [vmem:[%s2868_s26 + $0x6c] ss:$24 sps:$4 sm:$0xff]  }
  0x8b   : > { %2065 = vmatprep.subr.bf16.mxu1 %v2402_v26  ;;  %2177 = vmatprep.subr.bf16.mxu0 %v2404_v28  ;;  %v2480_v25 = vld [vmem:[%s2868_s26 + $0x74] ss:$24 sps:$4 sm:$0xff]   ;;  %v2482_v26 = vld [vmem:[%s2868_s26 + $0x68] ss:$24 sps:$4 sm:$0xff]  }
  0x8c   : > { %v2484_v28 = vld [vmem:[%s2868_s26 + $0x9c] ss:$24 sps:$4 sm:$0xff]  }
  0x8d   : > { %2066 = vmatpush3.bf16.msra.mxu1 %v2403_v27  ;;  %2178 = vmatpush3.bf16.msra.mxu0 %v2405_v29  ;;  %v2483_v27 = vld [vmem:[%s2868_s26 + $0x70] ss:$24 sps:$4 sm:$0xff]   ;;  %v2486_v29 = vld [vmem:[%s2868_s26 + $0xa4] ss:$24 sps:$4 sm:$0xff]  }
  0x8e   : > { %2067 = vmatprep.subr.bf16.mxu1 %v2412_v30  ;;  %2179 = vmatprep.subr.bf16.mxu0 %v2414_v33  ;;  %v2488_v30 = vld [vmem:[%s2868_s26 + $0x98] ss:$24 sps:$4 sm:$0xff]   ;;  %v2492_v33 = vld [vmem:[%s2868_s26 + $0xd4] ss:$24 sps:$4 sm:$0xff]  }
  0x90   : > { %1230 = vmatmul.mubr.bf16.gmra.mrb[4].mxu0 %v2400_v31  ;;  %1294 = vmatmul.mubr.bf16.gmra.mrb[4].mxu1 %v2401_v32  ;;  %v2489_v31 = vld [vmem:[%s2868_s26 + $0xa0] ss:$24 sps:$4 sm:$0xff]   ;;  %v2490_v32 = vld [vmem:[%s2868_s26 + $0xcc] ss:$24 sps:$4 sm:$0xff]  }
  0x91   : > { %1237 = vmatprep.mubr.bf16.mxu0 %v2406_v34  ;;  %1301 = vmatprep.mubr.bf16.mxu1 %v2408_v35  ;;  %v2494_v34 = vld [vmem:[%s2868_s26 + $0xc8] ss:$24 sps:$4 sm:$0xff]  }
  0x92   : > { %2068 = vmatpush3.bf16.msra.mxu1 %v2413_v36  ;;  %2180 = vmatpush3.bf16.msra.mxu0 %v2415_v37  ;;  %v2495_v35 = vld [vmem:[%s2868_s26 + $0xd0] ss:$24 sps:$4 sm:$0xff]   ;;  %v2496_v36 = vld [vmem:[%s2868_s26 + $0xfc] ss:$24 sps:$4 sm:$0xff]  }
  0x93   : > { %2069 = vmatprep.subr.bf16.mxu1 %v2422_v38  ;;  %2181 = vmatprep.subr.bf16.mxu0 %v2424_v39  ;;  %v2498_v37 = vld [vmem:[%s2868_s26 + $0x104] ss:$24 sps:$4 sm:$0xff]   ;;  %v2500_v38 = vld [vmem:[%s2868_s26 + $0xf8] ss:$24 sps:$4 sm:$0xff]  }
  0x94   : > { %v2501_v39 = vld [vmem:[%s2868_s26 + $0x100] ss:$24 sps:$4 sm:$0xff]  }
  0x96   : > { %2070 = vmatpush3.bf16.msra.mxu1 %v2423_v42  ;;  %2182 = vmatpush3.bf16.msra.mxu0 %v2425_v43  ;;  %v2506_v42 = vld [vmem:[%s2868_s26 + $0x128] ss:$24 sps:$4 sm:$0xff]  }
  0x97   : > { %2071 = vmatprep.subr.bf16.mxu1 %v2432_v46  ;;  %2183 = vmatprep.subr.bf16.mxu0 %v2434_v48  ;;  %v2507_v43 = vld [vmem:[%s2868_s26 + $0x130] ss:$24 sps:$4 sm:$0xff]   ;;  %v2514_v48 = vld [vmem:[%s2868_s26 + $0x18c] ss:$24 sps:$4 sm:$0xff]  }
  0x98   : > { %1238 = vmatmul.mubr.bf16.gmra.mrb[8].mxu0 %v2410_v40  ;;  %1302 = vmatmul.mubr.bf16.gmra.mrb[8].mxu1 %v2411_v41  ;;  %v2502_v40 = vld [vmem:[%s2868_s26 + $0x12c] ss:$24 sps:$4 sm:$0xff]   ;;  %v2512_v46 = vld [vmem:[%s2868_s26 + $0x158] ss:$24 sps:$4 sm:$0xff]  }
  0x99   : > { %1245 = vmatprep.mubr.bf16.mxu0 %v2416_v44  ;;  %1309 = vmatprep.mubr.bf16.mxu1 %v2418_v45  ;;  %v2504_v41 = vld [vmem:[%s2868_s26 + $0x134] ss:$24 sps:$4 sm:$0xff]   ;;  %v2510_v45 = vld [vmem:[%s2868_s26 + $0x164] ss:$24 sps:$4 sm:$0xff]  }
  0x9a   : > { %2072 = vmatpush3.bf16.msra.mxu1 %v2433_v47  ;;  %2184 = vmatpush3.bf16.msra.mxu0 %v2435_v49  ;;  %v2508_v44 = vld [vmem:[%s2868_s26 + $0x15c] ss:$24 sps:$4 sm:$0xff]   ;;  %v2513_v47 = vld [vmem:[%s2868_s26 + $0x160] ss:$24 sps:$4 sm:$0xff]  }
  0x9b   : > { %2073 = vmatprep.subr.bf16.mxu1 %v2442_v52  ;;  %2185 = vmatprep.subr.bf16.mxu0 %v2444_v56  ;;  %v2516_v49 = vld [vmem:[%s2868_s26 + $0x194] ss:$24 sps:$4 sm:$0xff]  }
  0x9c   : > { %v2520_v52 = vld [vmem:[%s2868_s26 + $0x1bc] ss:$24 sps:$4 sm:$0xff]   ;;  %v2526_v56 = vld [vmem:[%s2868_s26 + $0x1ec] ss:$24 sps:$4 sm:$0xff]  }
  0x9e   : > { %2074 = vmatpush3.bf16.msra.mxu1 %v2443_v55  ;;  %2186 = vmatpush3.bf16.msra.mxu0 %v2445_v57  ;;  %v2525_v55 = vld [vmem:[%s2868_s26 + $0x1c0] ss:$24 sps:$4 sm:$0xff]   ;;  %v2528_v57 = vld [vmem:[%s2868_s26 + $0x1f4] ss:$24 sps:$4 sm:$0xff]  }
  0x9f   : > { %2075 = vmatprep.subr.bf16.mxu1 %v2452_v58  ;;  %2187 = vmatprep.subr.bf16.mxu0 %v2454_v63  ;;  %v2530_v58 = vld [vmem:[%s2868_s26 + $0x1e8] ss:$24 sps:$4 sm:$0xff]  }
  0xa0   : > { %1246 = vmatmul.mubr.bf16.gmra.mrb[12].mxu0 %v2420_v50  ;;  %1310 = vmatmul.mubr.bf16.gmra.mrb[12].mxu1 %v2421_v51  ;;  %v2518_v50 = vld [vmem:[%s2868_s26 + $0x188] ss:$24 sps:$4 sm:$0xff]  }
  0xa1   : > { %1253 = vmatprep.mubr.bf16.mxu0 %v2426_v53  ;;  %1317 = vmatprep.mubr.bf16.mxu1 %v2428_v54  ;;  %v2519_v51 = vld [vmem:[%s2868_s26 + $0x190] ss:$24 sps:$4 sm:$0xff]   ;;  %v2522_v53 = vld [vmem:[%s2868_s26 + $0x1c4] ss:$24 sps:$4 sm:$0xff]   ;;  %v2537_v63 = vld [vmem:[%s2868_s26 + $0x220] ss:$24 sps:$4 sm:$0xff]  }
  0xa2   : > { %2076 = vmatpush3.bf16.msra.mxu1 %v2453_v61  ;;  %2188 = vmatpush3.bf16.msra.mxu0 %v2455_v0  ;;  %v2524_v54 = vld [vmem:[%s2868_s26 + $0x1b8] ss:$24 sps:$4 sm:$0xff]   ;;  %v2534_v61 = vld [vmem:[%s2868_s26 + $0x224] ss:$24 sps:$4 sm:$0xff]  }
  0xa3   : > { %2077 = vmatprep.subr.bf16.mxu1 %v2462_v2  ;;  %2189 = vmatprep.subr.bf16.mxu0 %v2464_v4  ;;  %v2538_v0 = vld [vmem:[%s2868_s26 + $0x24c] ss:$24 sps:$4 sm:$0xff]   ;;  %v2542_v2 = vld [vmem:[%s2868_s26 + $0x248] ss:$24 sps:$4 sm:$0xff]   ;;  %v2544_v4 = vld [vmem:[%s2868_s26 + $0x27c] ss:$24 sps:$4 sm:$0xff]  }
  0xa6   : > { %2078 = vmatpush3.bf16.msra.mxu1 %v2463_v3  ;;  %2190 = vmatpush3.bf16.msra.mxu0 %v2465_v5  ;;  %v2543_v3 = vld [vmem:[%s2868_s26 + $0x250] ss:$24 sps:$4 sm:$0xff]   ;;  %v2546_v5 = vld [vmem:[%s2868_s26 + $0x284] ss:$24 sps:$4 sm:$0xff]  }
  0xa8   : > { %1254 = vmatmul.mubr.bf16.gmra.mrb[16].mxu0 %v2430_v59  ;;  %1318 = vmatmul.mubr.bf16.gmra.mrb[16].mxu1 %v2431_v60  ;;  %v2531_v59 = vld [vmem:[%s2868_s26 + $0x1f0] ss:$24 sps:$4 sm:$0xff]   ;;  %v2532_v60 = vld [vmem:[%s2868_s26 + $0x21c] ss:$24 sps:$4 sm:$0xff]  }
  0xa9   : > { %1261 = vmatprep.mubr.bf16.mxu0 %v2436_v62  ;;  %1325 = vmatprep.mubr.bf16.mxu1 %v2438_v1  ;;  %v2536_v62 = vld [vmem:[%s2868_s26 + $0x218] ss:$24 sps:$4 sm:$0xff]   ;;  %v2540_v1 = vld [vmem:[%s2868_s26 + $0x254] ss:$24 sps:$4 sm:$0xff]  }
  0xb0   : > { %1262 = vmatmul.mubr.bf16.gmra.mrb[20].mxu0 %v2440_v6  ;;  %1326 = vmatmul.mubr.bf16.gmra.mrb[20].mxu1 %v2441_v7  ;;  %v2548_v6 = vld [vmem:[%s2868_s26 + $0x278] ss:$24 sps:$4 sm:$0xff]  }
  0xb1   : > { %1269 = vmatprep.mubr.bf16.mxu0 %v2446_v8  ;;  %1333 = vmatprep.mubr.bf16.mxu1 %v2448_v9  ;;  %v2549_v7 = vld [vmem:[%s2868_s26 + $0x280] ss:$24 sps:$4 sm:$0xff]   ;;  %v2550_v8 = vld [vmem:[%s2868_s26 + $0x2ac] ss:$24 sps:$4 sm:$0xff]  }
  0xb2   : > { %v2552_v9 = vld [vmem:[%s2868_s26 + $0x2b4] ss:$24 sps:$4 sm:$0xff]  }
  0xb8   : > { %1270 = vmatmul.mubr.bf16.gmra.mrb[24].mxu0 %v2450_v10  ;;  %1334 = vmatmul.mubr.bf16.gmra.mrb[24].mxu1 %v2451_v11  ;;  %v2554_v10 = vld [vmem:[%s2868_s26 + $0x2a8] ss:$24 sps:$4 sm:$0xff]  }
  0xb9   : > { %1277 = vmatprep.mubr.bf16.mxu0 %v2456_v12  ;;  %1341 = vmatprep.mubr.bf16.mxu1 %v2458_v13  ;;  %v2555_v11 = vld [vmem:[%s2868_s26 + $0x2b0] ss:$24 sps:$4 sm:$0xff]   ;;  %v2556_v12 = vld [vmem:[%s2868_s26 + $0x2dc] ss:$24 sps:$4 sm:$0xff]  }
  0xba   : > { %v2558_v13 = vld [vmem:[%s2868_s26 + $0x2e4] ss:$24 sps:$4 sm:$0xff]  }
  0xc0   : > { %1278 = vmatmul.mubr.bf16.gmra.mrb[28].mxu0 %v2460_v14  ;;  %1342 = vmatmul.mubr.bf16.gmra.mrb[28].mxu1 %v2461_v15  ;;  %v2560_v14 = vld [vmem:[%s2868_s26 + $0x2d8] ss:$24 sps:$4 sm:$0xff]  }
  0xc1   : > { %1382 = vmatprep.mubr.bf16.mxu1 %v2468_v16  ;;  %1543 = vmatprep.mubr.bf16.mxu0 %v2471_v17  ;;  %v2561_v15 = vld [vmem:[%s2868_s26 + $0x2e0] ss:$24 sps:$4 sm:$0xff]  }
  0xc8   : > { %1383 = vmatmul.mubr.bf16.vlgmr.msra.gmra.mrb[32].mxu1 %v2466_v18  ;;  %1544 = vmatmul.mubr.bf16.vlgmr.msra.gmra.mrb[32].mxu0 %v2469_v19  ;;  %v2974_v18 = vld [vmem:[#allocation6] ss:$0 sm:$0xff] }
  0xc9   : > { %1390 = vmatprep.mubr.bf16.mxu1 %v2472_v20  ;;  %1551 = vmatprep.mubr.bf16.mxu0 %v2474_v21 }
  0xd0   : > { %1391 = vmatmul.mubr.bf16.gmra.mrb[36].mxu1 %v2476_v22  ;;  %1552 = vmatmul.mubr.bf16.gmra.mrb[36].mxu0 %v2477_v23 }
  0xd1   : > { %1398 = vmatprep.mubr.bf16.mxu1 %v2478_v24  ;;  %1559 = vmatprep.mubr.bf16.mxu0 %v2480_v25 }
  0xd8   : > { %1399 = vmatmul.mubr.bf16.gmra.mrb[40].mxu1 %v2482_v26  ;;  %1560 = vmatmul.mubr.bf16.gmra.mrb[40].mxu0 %v2483_v27 }
  0xd9   : > { %1406 = vmatprep.mubr.bf16.mxu1 %v2484_v28  ;;  %1567 = vmatprep.mubr.bf16.mxu0 %v2486_v29 }
  0xe0   : > { %1407 = vmatmul.mubr.bf16.gmra.mrb[44].mxu1 %v2488_v30  ;;  %1568 = vmatmul.mubr.bf16.gmra.mrb[44].mxu0 %v2489_v31 }
  0xe1   : > { %1414 = vmatprep.mubr.bf16.mxu1 %v2490_v32  ;;  %1575 = vmatprep.mubr.bf16.mxu0 %v2492_v33 }
  0xe8   : > { %1415 = vmatmul.mubr.bf16.gmra.mrb[48].mxu1 %v2494_v34  ;;  %1576 = vmatmul.mubr.bf16.gmra.mrb[48].mxu0 %v2495_v35 }
  0xe9   : > { %1422 = vmatprep.mubr.bf16.mxu1 %v2496_v36  ;;  %1583 = vmatprep.mubr.bf16.mxu0 %v2498_v37 }
  0xf0   : > { %1423 = vmatmul.mubr.bf16.gmra.mrb[52].mxu1 %v2500_v38  ;;  %1584 = vmatmul.mubr.bf16.gmra.mrb[52].mxu0 %v2501_v39 }
  0xf1   : > { %1430 = vmatprep.mubr.bf16.mxu1 %v2502_v40  ;;  %1591 = vmatprep.mubr.bf16.mxu0 %v2504_v41 }
  0xf8   : > { %1431 = vmatmul.mubr.bf16.gmra.mrb[56].mxu1 %v2506_v42  ;;  %1592 = vmatmul.mubr.bf16.gmra.mrb[56].mxu0 %v2507_v43 }
  0xf9   : > { %1438 = vmatprep.mubr.bf16.mxu1 %v2508_v44  ;;  %1599 = vmatprep.mubr.bf16.mxu0 %v2510_v45 }
 0x100   : > { %1439 = vmatmul.mubr.bf16.gmra.mrb[60].mxu1 %v2512_v46  ;;  %1600 = vmatmul.mubr.bf16.gmra.mrb[60].mxu0 %v2513_v47 }
 0x101   : > { %1446 = vmatprep.mubr.bf16.mxu1 %v2514_v48  ;;  %1607 = vmatprep.mubr.bf16.mxu0 %v2516_v49 }
 0x108   : > { %1447 = vmatmul.mubr.bf16.gmra.mrb[64].mxu1 %v2518_v50  ;;  %1608 = vmatmul.mubr.bf16.gmra.mrb[64].mxu0 %v2519_v51 }
 0x109   : > { %1454 = vmatprep.mubr.bf16.mxu1 %v2520_v52  ;;  %1615 = vmatprep.mubr.bf16.mxu0 %v2522_v53 }
 0x110   : > { %1455 = vmatmul.mubr.bf16.gmra.mrb[68].mxu1 %v2524_v54  ;;  %1616 = vmatmul.mubr.bf16.gmra.mrb[68].mxu0 %v2525_v55 }
 0x111   : > { %1462 = vmatprep.mubr.bf16.mxu1 %v2526_v56  ;;  %1623 = vmatprep.mubr.bf16.mxu0 %v2528_v57 }
 0x118   : > { %1463 = vmatmul.mubr.bf16.gmra.mrb[72].mxu1 %v2530_v58  ;;  %1624 = vmatmul.mubr.bf16.gmra.mrb[72].mxu0 %v2531_v59 }
 0x119   : > { %1470 = vmatprep.mubr.bf16.mxu1 %v2532_v60  ;;  %1631 = vmatprep.mubr.bf16.mxu0 %v2534_v61 }
 0x120   : > { %1471 = vmatmul.mubr.bf16.gmra.mrb[76].mxu1 %v2536_v62  ;;  %1632 = vmatmul.mubr.bf16.gmra.mrb[76].mxu0 %v2537_v63 }
 0x121   : > { %1478 = vmatprep.mubr.bf16.mxu1 %v2538_v0  ;;  %1639 = vmatprep.mubr.bf16.mxu0 %v2540_v1 }
 0x128   : > { %1479 = vmatmul.mubr.bf16.gmra.mrb[80].mxu1 %v2542_v2  ;;  %1640 = vmatmul.mubr.bf16.gmra.mrb[80].mxu0 %v2543_v3 }
 0x129   : > { %1486 = vmatprep.mubr.bf16.mxu1 %v2544_v4  ;;  %1647 = vmatprep.mubr.bf16.mxu0 %v2546_v5 }
 0x130   : > { %1487 = vmatmul.mubr.bf16.gmra.mrb[84].mxu1 %v2548_v6  ;;  %1648 = vmatmul.mubr.bf16.gmra.mrb[84].mxu0 %v2549_v7 }
 0x131   : > { %1494 = vmatprep.mubr.bf16.mxu1 %v2550_v8  ;;  %1655 = vmatprep.mubr.bf16.mxu0 %v2552_v9 }
 0x138   : > { %1495 = vmatmul.mubr.bf16.gmra.mrb[88].mxu1 %v2554_v10  ;;  %1656 = vmatmul.mubr.bf16.gmra.mrb[88].mxu0 %v2555_v11 }
 0x139   : > { %1502 = vmatprep.mubr.bf16.mxu1 %v2556_v12  ;;  %1663 = vmatprep.mubr.bf16.mxu0 %v2558_v13 }
 0x140   : > { %1503 = vmatmul.mubr.bf16.gmra.mrb[92].mxu1 %v2560_v14  ;;  %1664 = vmatmul.mubr.bf16.gmra.mrb[92].mxu0 %v2561_v15 }
 0x15b   : > { %v1967_v16 = vpop.f32.mrb[0].mxu0  ;;  %v2015_v17 = vpop.f32.mrb[0].mxu1 }
 0x15c   : > { %v1968_v19 = vpop.f32.mrb[1].mxu0  ;;  %v2016_v20 = vpop.f32.mrb[1].mxu1 }
 0x15d   : > { %v2976_v21 = vadd.f32 %v1968_v19, %v1967_v16  ;;  %v2017_v22 = vadd.f32 %v2016_v20, %v2015_v17  ;;  %v1970_v23 = vpop.f32.mrb[2].mxu0  ;;  %v2018_v24 = vpop.f32.mrb[2].mxu1 }
 0x15e   : > { %v1971_v25 = vpop.f32.mrb[3].mxu0  ;;  %v2019_v26 = vpop.f32.mrb[3].mxu1 }
 0x15f   : > { %v2979_v27 = vadd.f32 %v2017_v22, %v2974_v18  ;;  %v2981_v28 = vadd.f32 %v1971_v25, %v1970_v23  ;;  %v2020_v29 = vadd.f32 %v2019_v26, %v2018_v24 }
 0x161   : > { %v2984_v30 = vadd.f32 %v2020_v29, %v2974_v18 }
 0x163   : > { %v1973_v31 = vpop.f32.mrb[4].mxu0  ;;  %v2021_v32 = vpop.f32.mrb[4].mxu1 }
 0x164   : > { %v1974_v33 = vpop.f32.mrb[5].mxu0  ;;  %v2022_v34 = vpop.f32.mrb[5].mxu1 }
 0x165   : > { %v2986_v35 = vadd.f32 %v1974_v33, %v1973_v31  ;;  %v2023_v36 = vadd.f32 %v2022_v34, %v2021_v32  ;;  %v1976_v37 = vpop.f32.mrb[6].mxu0  ;;  %v2024_v38 = vpop.f32.mrb[6].mxu1 }
 0x166   : > { %v1977_v39 = vpop.f32.mrb[7].mxu0  ;;  %v2025_v40 = vpop.f32.mrb[7].mxu1 }
 0x167   : > { %v2989_v41 = vadd.f32 %v2023_v36, %v2974_v18  ;;  %v2991_v42 = vadd.f32 %v1977_v39, %v1976_v37  ;;  %v2026_v43 = vadd.f32 %v2025_v40, %v2024_v38 }
 0x169   : > { %v2994_v44 = vadd.f32 %v2026_v43, %v2974_v18 }
 0x16b   : > { %v1979_v45 = vpop.f32.mrb[8].mxu0  ;;  %v2027_v46 = vpop.f32.mrb[8].mxu1 }
 0x16c   : > { %v1980_v47 = vpop.f32.mrb[9].mxu0  ;;  %v2028_v48 = vpop.f32.mrb[9].mxu1 }
 0x16d   : > { %v2996_v49 = vadd.f32 %v1980_v47, %v1979_v45  ;;  %v2029_v50 = vadd.f32 %v2028_v48, %v2027_v46  ;;  %v1982_v51 = vpop.f32.mrb[10].mxu0  ;;  %v2030_v52 = vpop.f32.mrb[10].mxu1 }
 0x16e   : > { %v1983_v53 = vpop.f32.mrb[11].mxu0  ;;  %v2031_v54 = vpop.f32.mrb[11].mxu1 }
 0x16f   : > { %v2999_v55 = vadd.f32 %v2029_v50, %v2974_v18  ;;  %v3001_v56 = vadd.f32 %v1983_v53, %v1982_v51  ;;  %v2032_v57 = vadd.f32 %v2031_v54, %v2030_v52 }
 0x171   : > { %v3004_v58 = vadd.f32 %v2032_v57, %v2974_v18 }
 0x173   : > { %v1985_v59 = vpop.f32.mrb[12].mxu0  ;;  %v2033_v60 = vpop.f32.mrb[12].mxu1 }
 0x174   : > { %v1986_v61 = vpop.f32.mrb[13].mxu0  ;;  %v2034_v62 = vpop.f32.mrb[13].mxu1 }
 0x175   : > { %v3006_v63 = vadd.f32 %v1986_v61, %v1985_v59  ;;  %v2035_v0 = vadd.f32 %v2034_v62, %v2033_v60  ;;  %v1988_v1 = vpop.f32.mrb[14].mxu0  ;;  %v2036_v2 = vpop.f32.mrb[14].mxu1 }
 0x176   : > { %v1989_v3 = vpop.f32.mrb[15].mxu0  ;;  %v2037_v4 = vpop.f32.mrb[15].mxu1 }
 0x177   : > { %v3009_v5 = vadd.f32 %v2035_v0, %v2974_v18  ;;  %v3011_v6 = vadd.f32 %v1989_v3, %v1988_v1  ;;  %v2038_v7 = vadd.f32 %v2037_v4, %v2036_v2 }
 0x179   : > { %v3014_v8 = vadd.f32 %v2038_v7, %v2974_v18 }
 0x17b   : > { %v1991_v9 = vpop.f32.mrb[16].mxu0  ;;  %v2039_v10 = vpop.f32.mrb[16].mxu1 }
 0x17c   : > { %v1992_v11 = vpop.f32.mrb[17].mxu0  ;;  %v2040_v12 = vpop.f32.mrb[17].mxu1 }
 0x17d   : > { %v3016_v13 = vadd.f32 %v1992_v11, %v1991_v9  ;;  %v2041_v14 = vadd.f32 %v2040_v12, %v2039_v10  ;;  %v1994_v15 = vpop.f32.mrb[18].mxu0  ;;  %v2042_v16 = vpop.f32.mrb[18].mxu1 }
 0x17e   : > { %v1995_v17 = vpop.f32.mrb[19].mxu0  ;;  %v2043_v19 = vpop.f32.mrb[19].mxu1 }
 0x17f   : > { %v3019_v20 = vadd.f32 %v2041_v14, %v2974_v18  ;;  %v3021_v22 = vadd.f32 %v1995_v17, %v1994_v15  ;;  %v2044_v23 = vadd.f32 %v2043_v19, %v2042_v16 }
 0x181   : > { %v3024_v24 = vadd.f32 %v2044_v23, %v2974_v18 }
 0x183   : > { %v1997_v25 = vpop.f32.mrb[20].mxu0  ;;  %v2045_v26 = vpop.f32.mrb[20].mxu1 }
 0x184   : > { %v1998_v29 = vpop.f32.mrb[21].mxu0  ;;  %v2046_v31 = vpop.f32.mrb[21].mxu1 }
 0x185   : > { %v3026_v32 = vadd.f32 %v1998_v29, %v1997_v25  ;;  %v2047_v33 = vadd.f32 %v2046_v31, %v2045_v26  ;;  %v2000_v34 = vpop.f32.mrb[22].mxu0  ;;  %v2048_v36 = vpop.f32.mrb[22].mxu1  ;;  %v1224_v31 = vadd.f32 %v2976_v21, %v2974_v18 }
 0x186   : > { %v2001_v37 = vpop.f32.mrb[23].mxu0  ;;  %v2049_v38 = vpop.f32.mrb[23].mxu1 }
 0x187   : > { %v3029_v39 = vadd.f32 %v2047_v33, %v2974_v18  ;;  %v3031_v40 = vadd.f32 %v2001_v37, %v2000_v34  ;;  %v2050_v43 = vadd.f32 %v2049_v38, %v2048_v36 }
 0x189   : > { %v3034_v45 = vadd.f32 %v2050_v43, %v2974_v18 }
 0x18b   : > { %v2003_v46 = vpop.f32.mrb[24].mxu0  ;;  %v2051_v47 = vpop.f32.mrb[24].mxu1 }
 0x18c   : > { %v2004_v48 = vpop.f32.mrb[25].mxu0  ;;  %v2052_v50 = vpop.f32.mrb[25].mxu1 }
 0x18d   : > { %v3036_v51 = vadd.f32 %v2004_v48, %v2003_v46  ;;  %v2053_v52 = vadd.f32 %v2052_v50, %v2051_v47  ;;  %v2006_v53 = vpop.f32.mrb[26].mxu0  ;;  %v2054_v54 = vpop.f32.mrb[26].mxu1  ;;  %v1227_v46 = vadd.f32 %v2981_v28, %v2974_v18  ;;  %v1232_v28 = vadd.f32 %v2986_v35, %v2974_v18 }
 0x18e   : > { %v2007_v57 = vpop.f32.mrb[27].mxu0  ;;  %v2055_v59 = vpop.f32.mrb[27].mxu1 }
 0x18f   : > { %v3039_v60 = vadd.f32 %v2053_v52, %v2974_v18  ;;  %v3041_v61 = vadd.f32 %v2007_v57, %v2006_v53  ;;  %v2056_v62 = vadd.f32 %v2055_v59, %v2054_v54 }
 0x191   : > { %v3044_v0 = vadd.f32 %v2056_v62, %v2974_v18 }
 0x193   : > { %v2009_v1 = vpop.f32.mrb[28].mxu0  ;;  %v2057_v2 = vpop.f32.mrb[28].mxu1 }
 0x194   : > { %v2010_v3 = vpop.f32.mrb[29].mxu0  ;;  %v2058_v4 = vpop.f32.mrb[29].mxu1 }
 0x195   : > { %v3048_v7 = vadd.f32 %v2010_v3, %v2009_v1  ;;  %v2059_v9 = vadd.f32 %v2058_v4, %v2057_v2  ;;  %v2012_v10 = vpop.f32.mrb[30].mxu0  ;;  %v2060_v11 = vpop.f32.mrb[30].mxu1 }
 0x196   : > { %v2013_v12 = vpop.f32.mrb[31].mxu0  ;;  %v2061_v14 = vpop.f32.mrb[31].mxu1 }
 0x197   : > { %v3051_v15 = vadd.f32 %v2059_v9, %v2974_v18  ;;  %v3053_v16 = vadd.f32 %v2013_v12, %v2012_v10  ;;  %v2062_v17 = vadd.f32 %v2061_v14, %v2060_v11  ;;  %v1235_v11 = vadd.f32 %v2991_v42, %v2974_v18 }
 0x199   : > { %v3056_v19 = vadd.f32 %v2062_v17, %v2974_v18 }
 0x19b   : > { %v2079_v23 = vpop.f32.mrb[32].mxu1  ;;  %v2191_v25 = vpop.f32.mrb[32].mxu0 }
 0x19c   : > { %v2080_v26 = vpop.f32.mrb[33].mxu1  ;;  %v2192_v29 = vpop.f32.mrb[33].mxu0 }
 0x19d   : > { %v2081_v33 = vadd.f32 %v2080_v26, %v2079_v23  ;;  %v2193_v34 = vadd.f32 %v2192_v29, %v2191_v25  ;;  %v2082_v36 = vpop.f32.mrb[34].mxu1  ;;  %v2194_v37 = vpop.f32.mrb[34].mxu0 }
 0x19e   : > { %v2083_v38 = vpop.f32.mrb[35].mxu1  ;;  %v2195_v43 = vpop.f32.mrb[35].mxu0 }
 0x19f   : > { %v1385_v47 = vadd.f32 %v2081_v33, %v1224_v31  ;;  %v2084_v48 = vadd.f32 %v2083_v38, %v2082_v36  ;;  %v2196_v50 = vadd.f32 %v2195_v43, %v2194_v37 }
 0x1a1   : > { %v1546_v21 = vadd.f32 %v2193_v34, %v1385_v47  ;;  %v1388_v52 = vadd.f32 %v2084_v48, %v1227_v46  ;;  %v1240_v34 = vadd.f32 %v2996_v49, %v2974_v18  ;;  %v1243_v47 = vadd.f32 %v3001_v56, %v2974_v18 }
 0x1a3   : > { %1672 = vst [vmem:[%s3065_s19] sm:$0xff] %v1546_v21  ;;  %v1549_v53 = vadd.f32 %v2196_v50, %v1388_v52  ;;  %v2085_v54 = vpop.f32.mrb[36].mxu1  ;;  %v2197_v57 = vpop.f32.mrb[36].mxu0 }
 0x1a4   : > { %v2086_v59 = vpop.f32.mrb[37].mxu1  ;;  %v2198_v62 = vpop.f32.mrb[37].mxu0 }
 0x1a5   : > { %1673 = vst [vmem:[%s3065_s19 + $0x8] sm:$0xff] %v1549_v53  ;;  %v2087_v1 = vadd.f32 %v2086_v59, %v2085_v54  ;;  %v2199_v2 = vadd.f32 %v2198_v62, %v2197_v57  ;;  %v2088_v3 = vpop.f32.mrb[38].mxu1  ;;  %v2200_v4 = vpop.f32.mrb[38].mxu0 }
 0x1a6   : > { %v2089_v9 = vpop.f32.mrb[39].mxu1  ;;  %v2201_v10 = vpop.f32.mrb[39].mxu0 }
 0x1a7   : > { %v1393_v12 = vadd.f32 %v2087_v1, %v1232_v28  ;;  %v2090_v14 = vadd.f32 %v2089_v9, %v2088_v3  ;;  %v2202_v17 = vadd.f32 %v2201_v10, %v2200_v4  ;;  %v1248_v28 = vadd.f32 %v3006_v63, %v2974_v18 }
 0x1a8   : > { %v1251_v10 = vadd.f32 %v3011_v6, %v2974_v18 }
 0x1a9   : > { %v1554_v23 = vadd.f32 %v2199_v2, %v1393_v12  ;;  %v1396_v25 = vadd.f32 %v2090_v14, %v1235_v11 }
 0x1ab   : > { %1674 = vst [vmem:[%s3065_s19 + $0x10] sm:$0xff] %v1554_v23  ;;  %v1557_v26 = vadd.f32 %v2202_v17, %v1396_v25  ;;  %v2091_v29 = vpop.f32.mrb[40].mxu1  ;;  %v2203_v35 = vpop.f32.mrb[40].mxu0 }
 0x1ac   : > { %v2092_v31 = vpop.f32.mrb[41].mxu1  ;;  %v2204_v33 = vpop.f32.mrb[41].mxu0 }
 0x1ad   : > { %1675 = vst [vmem:[%s3065_s19 + $0x18] sm:$0xff] %v1557_v26  ;;  %v2093_v36 = vadd.f32 %v2092_v31, %v2091_v29  ;;  %v2205_v37 = vadd.f32 %v2204_v33, %v2203_v35  ;;  %v2094_v38 = vpop.f32.mrb[42].mxu1  ;;  %v2206_v42 = vpop.f32.mrb[42].mxu0  ;;  %v1256_v31 = vadd.f32 %v3016_v13, %v2974_v18 }
 0x1ae   : > { %v2095_v43 = vpop.f32.mrb[43].mxu1  ;;  %v2207_v46 = vpop.f32.mrb[43].mxu0 }
 0x1af   : > { %v1401_v48 = vadd.f32 %v2093_v36, %v1240_v34  ;;  %v2096_v50 = vadd.f32 %v2095_v43, %v2094_v38  ;;  %v2208_v21 = vadd.f32 %v2207_v46, %v2206_v42  ;;  %v1259_v42 = vadd.f32 %v3021_v22, %v2974_v18 }
 0x1b1   : > { %v1562_v52 = vadd.f32 %v2205_v37, %v1401_v48  ;;  %v1404_v53 = vadd.f32 %v2096_v50, %v1243_v47 }
 0x1b3   : > { %1676 = vst [vmem:[%s3065_s19 + $0x20] sm:$0xff] %v1562_v52  ;;  %v1565_v54 = vadd.f32 %v2208_v21, %v1404_v53  ;;  %v2097_v57 = vpop.f32.mrb[44].mxu1  ;;  %v2209_v49 = vpop.f32.mrb[44].mxu0 }
 0x1b4   : > { %v2098_v59 = vpop.f32.mrb[45].mxu1  ;;  %v2210_v62 = vpop.f32.mrb[45].mxu0 }
 0x1b5   : > { %1677 = vst [vmem:[%s3065_s19 + $0x28] sm:$0xff] %v1565_v54  ;;  %v2099_v1 = vadd.f32 %v2098_v59, %v2097_v57  ;;  %v2211_v2 = vadd.f32 %v2210_v62, %v2209_v49  ;;  %v2100_v3 = vpop.f32.mrb[46].mxu1  ;;  %v2212_v56 = vpop.f32.mrb[46].mxu0  ;;  %v1264_v57 = vadd.f32 %v3026_v32, %v2974_v18 }
 0x1b6   : > { %v2101_v4 = vpop.f32.mrb[47].mxu1  ;;  %v2213_v9 = vpop.f32.mrb[47].mxu0 }
 0x1b7   : > { %v1409_v11 = vadd.f32 %v2099_v1, %v1248_v28  ;;  %v2102_v12 = vadd.f32 %v2101_v4, %v2100_v3  ;;  %v2214_v14 = vadd.f32 %v2213_v9, %v2212_v56 }
 0x1b9   : > { %v1570_v17 = vadd.f32 %v2211_v2, %v1409_v11  ;;  %v1412_v23 = vadd.f32 %v2102_v12, %v1251_v10  ;;  %v1267_v2 = vadd.f32 %v3031_v40, %v2974_v18 }
 0x1bb   : > { %1678 = vst [vmem:[%s3065_s19 + $0x30] sm:$0xff] %v1570_v17  ;;  %v1573_v25 = vadd.f32 %v2214_v14, %v1412_v23  ;;  %v2103_v26 = vpop.f32.mrb[48].mxu1  ;;  %v2215_v63 = vpop.f32.mrb[48].mxu0  ;;  %v1272_v23 = vadd.f32 %v3036_v51, %v2974_v18 }
 0x1bc   : > { %v2104_v29 = vpop.f32.mrb[49].mxu1  ;;  %v2216_v35 = vpop.f32.mrb[49].mxu0 }
 0x1bd   : > { %1679 = vst [vmem:[%s3065_s19 + $0x38] sm:$0xff] %v1573_v25  ;;  %v2105_v33 = vadd.f32 %v2104_v29, %v2103_v26  ;;  %v2217_v34 = vadd.f32 %v2216_v35, %v2215_v63  ;;  %v2106_v36 = vpop.f32.mrb[50].mxu1  ;;  %v2218_v6 = vpop.f32.mrb[50].mxu0 }
 0x1be   : > { %v2107_v37 = vpop.f32.mrb[51].mxu1  ;;  %v2219_v38 = vpop.f32.mrb[51].mxu0 }
 0x1bf   : > { %v1417_v43 = vadd.f32 %v2105_v33, %v1256_v31  ;;  %v2108_v46 = vadd.f32 %v2107_v37, %v2106_v36  ;;  %v2220_v47 = vadd.f32 %v2219_v38, %v2218_v6  ;;  %v1275_v31 = vadd.f32 %v3041_v61, %v2974_v18 }
 0x1c1   : > { %v1578_v48 = vadd.f32 %v2217_v34, %v1417_v43  ;;  %v1420_v50 = vadd.f32 %v2108_v46, %v1259_v42 }
 0x1c3   : > { %1680 = vst [vmem:[%s3065_s19 + $0x40] sm:$0xff] %v1578_v48  ;;  %v1581_v21 = vadd.f32 %v2220_v47, %v1420_v50  ;;  %v2109_v52 = vpop.f32.mrb[52].mxu1  ;;  %v2221_v13 = vpop.f32.mrb[52].mxu0  ;;  %v1280_v47 = vadd.f32 %v3048_v7, %v2974_v18 }
 0x1c4   : > { %v2110_v53 = vpop.f32.mrb[53].mxu1  ;;  %v2222_v54 = vpop.f32.mrb[53].mxu0 }
 0x1c5   : > { %1681 = vst [vmem:[%s3065_s19 + $0x48] sm:$0xff] %v1581_v21  ;;  %v2111_v49 = vadd.f32 %v2110_v53, %v2109_v52  ;;  %v2223_v59 = vadd.f32 %v2222_v54, %v2221_v13  ;;  %v2112_v62 = vpop.f32.mrb[54].mxu1  ;;  %v2224_v22 = vpop.f32.mrb[54].mxu0  ;;  %v1283_v53 = vadd.f32 %v3053_v16, %v2974_v18 }
 0x1c6   : > { %v2113_v28 = vpop.f32.mrb[55].mxu1  ;;  %v2225_v1 = vpop.f32.mrb[55].mxu0 }
 0x1c7   : > { %v1425_v3 = vadd.f32 %v2111_v49, %v1264_v57  ;;  %v2114_v56 = vadd.f32 %v2113_v28, %v2112_v62  ;;  %v2226_v4 = vadd.f32 %v2225_v1, %v2224_v22 }
 0x1c9   : > { %v1586_v9 = vadd.f32 %v2223_v59, %v1425_v3  ;;  %v1428_v10 = vadd.f32 %v2114_v56, %v1267_v2 }
 0x1cb   : > { %1682 = vst [vmem:[%s3065_s19 + $0x50] sm:$0xff] %v1586_v9  ;;  %v1589_v11 = vadd.f32 %v2226_v4, %v1428_v10  ;;  %v2115_v12 = vpop.f32.mrb[56].mxu1  ;;  %v2227_v32 = vpop.f32.mrb[56].mxu0 }
 0x1cc   : > { %v2116_v14 = vpop.f32.mrb[57].mxu1  ;;  %v2228_v17 = vpop.f32.mrb[57].mxu0 }
 0x1cd   : > { %1683 = vst [vmem:[%s3065_s19 + $0x58] sm:$0xff] %v1589_v11  ;;  %v2117_v25 = vadd.f32 %v2116_v14, %v2115_v12  ;;  %v2229_v26 = vadd.f32 %v2228_v17, %v2227_v32  ;;  %v2118_v63 = vpop.f32.mrb[58].mxu1  ;;  %v2230_v40 = vpop.f32.mrb[58].mxu0 }
 0x1ce   : > { %v2119_v29 = vpop.f32.mrb[59].mxu1  ;;  %v2231_v35 = vpop.f32.mrb[59].mxu0 }
 0x1cf   : > { %v1433_v33 = vadd.f32 %v2117_v25, %v1272_v23  ;;  %v2120_v34 = vadd.f32 %v2119_v29, %v2118_v63  ;;  %v2232_v36 = vadd.f32 %v2231_v35, %v2230_v40 }
 0x1d1   : > { %v1594_v6 = vadd.f32 %v2229_v26, %v1433_v33  ;;  %v1436_v37 = vadd.f32 %v2120_v34, %v1275_v31 }
 0x1d3   : > { %1684 = vst [vmem:[%s3065_s19 + $0x60] sm:$0xff] %v1594_v6  ;;  %v1597_v38 = vadd.f32 %v2232_v36, %v1436_v37  ;;  %v2121_v42 = vpop.f32.mrb[60].mxu1  ;;  %v2233_v51 = vpop.f32.mrb[60].mxu0 }
 0x1d4   : > { %v2122_v43 = vpop.f32.mrb[61].mxu1  ;;  %v2234_v46 = vpop.f32.mrb[61].mxu0 }
 0x1d5   : > { %1685 = vst [vmem:[%s3065_s19 + $0x68] sm:$0xff] %v1597_v38  ;;  %v2123_v48 = vadd.f32 %v2122_v43, %v2121_v42  ;;  %v2235_v50 = vadd.f32 %v2234_v46, %v2233_v51  ;;  %v2124_v21 = vpop.f32.mrb[62].mxu1  ;;  %v2236_v61 = vpop.f32.mrb[62].mxu0 }
 0x1d6   : > { %v2125_v52 = vpop.f32.mrb[63].mxu1  ;;  %v2237_v13 = vpop.f32.mrb[63].mxu0 }
 0x1d7   : > { %v1441_v54 = vadd.f32 %v2123_v48, %v1280_v47  ;;  %v2126_v57 = vadd.f32 %v2125_v52, %v2124_v21  ;;  %v2238_v49 = vadd.f32 %v2237_v13, %v2236_v61 }
 0x1d9   : > { %v1602_v59 = vadd.f32 %v2235_v50, %v1441_v54  ;;  %v1444_v62 = vadd.f32 %v2126_v57, %v1283_v53 }
 0x1db   : > { %1686 = vst [vmem:[%s3065_s19 + $0x70] sm:$0xff] %v1602_v59  ;;  %v1605_v22 = vadd.f32 %v2238_v49, %v1444_v62  ;;  %v2127_v28 = vpop.f32.mrb[64].mxu1  ;;  %v2239_v7 = vpop.f32.mrb[64].mxu0 }
 0x1dc   : > { %v2128_v1 = vpop.f32.mrb[65].mxu1  ;;  %v2240_v2 = vpop.f32.mrb[65].mxu0 }
 0x1dd   : > { %1687 = vst [vmem:[%s3065_s19 + $0x78] sm:$0xff] %v1605_v22  ;;  %v2129_v3 = vadd.f32 %v2128_v1, %v2127_v28  ;;  %v2241_v56 = vadd.f32 %v2240_v2, %v2239_v7  ;;  %v2130_v4 = vpop.f32.mrb[66].mxu1  ;;  %v2242_v9 = vpop.f32.mrb[66].mxu0 }
 0x1de   : > { %v2131_v10 = vpop.f32.mrb[67].mxu1  ;;  %v2243_v18 = vpop.f32.mrb[67].mxu0 }
 0x1df   : > { %v1449_v16 = vadd.f32 %v2129_v3, %v2979_v27  ;;  %v2132_v11 = vadd.f32 %v2131_v10, %v2130_v4  ;;  %v2244_v12 = vadd.f32 %v2243_v18, %v2242_v9 }
 0x1e1   : > { %v1610_v32 = vadd.f32 %v2241_v56, %v1449_v16  ;;  %v1452_v14 = vadd.f32 %v2132_v11, %v2984_v30 }
 0x1e3   : > { %1688 = vst [vmem:[%s3065_s19 + $0x80] sm:$0xff] %v1610_v32  ;;  %v1613_v17 = vadd.f32 %v2244_v12, %v1452_v14  ;;  %v2133_v23 = vpop.f32.mrb[68].mxu1  ;;  %v2245_v25 = vpop.f32.mrb[68].mxu0 }
 0x1e4   : > { %v2134_v26 = vpop.f32.mrb[69].mxu1  ;;  %v2246_v63 = vpop.f32.mrb[69].mxu0 }
 0x1e5   : > { %1689 = vst [vmem:[%s3065_s19 + $0x88] sm:$0xff] %v1613_v17  ;;  %v2135_v40 = vadd.f32 %v2134_v26, %v2133_v23  ;;  %v2247_v29 = vadd.f32 %v2246_v63, %v2245_v25  ;;  %v2136_v35 = vpop.f32.mrb[70].mxu1  ;;  %v2248_v31 = vpop.f32.mrb[70].mxu0 }
 0x1e6   : > { %v2137_v33 = vpop.f32.mrb[71].mxu1  ;;  %v2249_v27 = vpop.f32.mrb[71].mxu0 }
 0x1e7   : > { %v1457_v34 = vadd.f32 %v2135_v40, %v2989_v41  ;;  %v2138_v36 = vadd.f32 %v2137_v33, %v2136_v35  ;;  %v2250_v6 = vadd.f32 %v2249_v27, %v2248_v31 }
 0x1e9   : > { %v1618_v30 = vadd.f32 %v2247_v29, %v1457_v34  ;;  %v1460_v37 = vadd.f32 %v2138_v36, %v2994_v44 }
 0x1eb   : > { %1690 = vst [vmem:[%s3065_s19 + $0x90] sm:$0xff] %v1618_v30  ;;  %v1621_v38 = vadd.f32 %v2250_v6, %v1460_v37  ;;  %v2139_v42 = vpop.f32.mrb[72].mxu1  ;;  %v2251_v51 = vpop.f32.mrb[72].mxu0 }
 0x1ec   : > { %v2140_v43 = vpop.f32.mrb[73].mxu1  ;;  %v2252_v46 = vpop.f32.mrb[73].mxu0 }
 0x1ed   : > { %1691 = vst [vmem:[%s3065_s19 + $0x98] sm:$0xff] %v1621_v38  ;;  %v2141_v47 = vadd.f32 %v2140_v43, %v2139_v42  ;;  %v2253_v48 = vadd.f32 %v2252_v46, %v2251_v51  ;;  %v2142_v50 = vpop.f32.mrb[74].mxu1  ;;  %v2254_v21 = vpop.f32.mrb[74].mxu0 }
 0x1ee   : > { %v2143_v61 = vpop.f32.mrb[75].mxu1  ;;  %v2255_v41 = vpop.f32.mrb[75].mxu0 }
 0x1ef   : > { %v1465_v52 = vadd.f32 %v2141_v47, %v2999_v55  ;;  %v2144_v13 = vadd.f32 %v2143_v61, %v2142_v50  ;;  %v2256_v53 = vadd.f32 %v2255_v41, %v2254_v21 }
 0x1f1   : > { %v1626_v44 = vadd.f32 %v2253_v48, %v1465_v52  ;;  %v1468_v54 = vadd.f32 %v2144_v13, %v3004_v58 }
 0x1f3   : > { %1692 = vst [vmem:[%s3065_s19 + $0xa0] sm:$0xff] %v1626_v44  ;;  %v1629_v57 = vadd.f32 %v2256_v53, %v1468_v54  ;;  %v2145_v49 = vpop.f32.mrb[76].mxu1  ;;  %v2257_v59 = vpop.f32.mrb[76].mxu0 }
 0x1f4   : > { %v2146_v62 = vpop.f32.mrb[77].mxu1  ;;  %v2258_v22 = vpop.f32.mrb[77].mxu0 }
 0x1f5   : > { %1693 = vst [vmem:[%s3065_s19 + $0xa8] sm:$0xff] %v1629_v57  ;;  %v2147_v28 = vadd.f32 %v2146_v62, %v2145_v49  ;;  %v2259_v7 = vadd.f32 %v2258_v22, %v2257_v59  ;;  %v2148_v1 = vpop.f32.mrb[78].mxu1  ;;  %v2260_v2 = vpop.f32.mrb[78].mxu0 }
 0x1f6   : > { %v2149_v3 = vpop.f32.mrb[79].mxu1  ;;  %v2261_v55 = vpop.f32.mrb[79].mxu0 }
 0x1f7   : > { %v1473_v56 = vadd.f32 %v2147_v28, %v3009_v5  ;;  %v2150_v4 = vadd.f32 %v2149_v3, %v2148_v1  ;;  %v2262_v9 = vadd.f32 %v2261_v55, %v2260_v2 }
 0x1f9   : > { %v1634_v58 = vadd.f32 %v2259_v7, %v1473_v56  ;;  %v1476_v10 = vadd.f32 %v2150_v4, %v3014_v8 }
 0x1fb   : > { %1694 = vst [vmem:[%s3065_s19 + $0xb0] sm:$0xff] %v1634_v58  ;;  %v1637_v18 = vadd.f32 %v2262_v9, %v1476_v10  ;;  %v2151_v16 = vpop.f32.mrb[80].mxu1  ;;  %v2263_v11 = vpop.f32.mrb[80].mxu0 }
 0x1fc   : > { %v2152_v12 = vpop.f32.mrb[81].mxu1  ;;  %v2264_v32 = vpop.f32.mrb[81].mxu0 }
 0x1fd   : > { %1695 = vst [vmem:[%s3065_s19 + $0xb8] sm:$0xff] %v1637_v18  ;;  %v2153_v14 = vadd.f32 %v2152_v12, %v2151_v16  ;;  %v2265_v17 = vadd.f32 %v2264_v32, %v2263_v11  ;;  %v2154_v23 = vpop.f32.mrb[82].mxu1  ;;  %v2266_v25 = vpop.f32.mrb[82].mxu0 }
 0x1fe   : > { %v2155_v26 = vpop.f32.mrb[83].mxu1  ;;  %v2267_v5 = vpop.f32.mrb[83].mxu0 }
 0x1ff   : > { %v1481_v63 = vadd.f32 %v2153_v14, %v3019_v20  ;;  %v2156_v40 = vadd.f32 %v2155_v26, %v2154_v23  ;;  %v2268_v29 = vadd.f32 %v2267_v5, %v2266_v25 }
 0x201   : > { %v1642_v8 = vadd.f32 %v2265_v17, %v1481_v63  ;;  %v1484_v35 = vadd.f32 %v2156_v40, %v3024_v24 }
 0x203   : > { %1696 = vst [vmem:[%s3065_s19 + $0xc0] sm:$0xff] %v1642_v8  ;;  %v1645_v31 = vadd.f32 %v2268_v29, %v1484_v35  ;;  %v2157_v33 = vpop.f32.mrb[84].mxu1  ;;  %v2269_v27 = vpop.f32.mrb[84].mxu0 }
 0x204   : > { %v2158_v34 = vpop.f32.mrb[85].mxu1  ;;  %v2270_v36 = vpop.f32.mrb[85].mxu0 }
 0x205   : > { %1697 = vst [vmem:[%s3065_s19 + $0xc8] sm:$0xff] %v1645_v31  ;;  %v2159_v6 = vadd.f32 %v2158_v34, %v2157_v33  ;;  %v2271_v30 = vadd.f32 %v2270_v36, %v2269_v27  ;;  %v2160_v37 = vpop.f32.mrb[86].mxu1  ;;  %v2272_v38 = vpop.f32.mrb[86].mxu0 }
 0x206   : > { %v2161_v42 = vpop.f32.mrb[87].mxu1  ;;  %v2273_v20 = vpop.f32.mrb[87].mxu0 }
 0x207   : > { %v1489_v51 = vadd.f32 %v2159_v6, %v3029_v39  ;;  %v2162_v43 = vadd.f32 %v2161_v42, %v2160_v37  ;;  %v2274_v46 = vadd.f32 %v2273_v20, %v2272_v38 }
 0x209   : > { %v1650_v24 = vadd.f32 %v2271_v30, %v1489_v51  ;;  %v1492_v47 = vadd.f32 %v2162_v43, %v3034_v45 }
 0x20b   : > { %1698 = vst [vmem:[%s3065_s19 + $0xd0] sm:$0xff] %v1650_v24  ;;  %v1653_v48 = vadd.f32 %v2274_v46, %v1492_v47  ;;  %v2163_v50 = vpop.f32.mrb[88].mxu1  ;;  %v2275_v21 = vpop.f32.mrb[88].mxu0 }
 0x20c   : > { %v2164_v61 = vpop.f32.mrb[89].mxu1  ;;  %v2276_v41 = vpop.f32.mrb[89].mxu0 }
 0x20d   : > { %1699 = vst [vmem:[%s3065_s19 + $0xd8] sm:$0xff] %v1653_v48  ;;  %v2165_v52 = vadd.f32 %v2164_v61, %v2163_v50  ;;  %v2277_v13 = vadd.f32 %v2276_v41, %v2275_v21  ;;  %v2166_v53 = vpop.f32.mrb[90].mxu1  ;;  %v2278_v44 = vpop.f32.mrb[90].mxu0 }
 0x20e   : > { %v2167_v54 = vpop.f32.mrb[91].mxu1  ;;  %v2279_v39 = vpop.f32.mrb[91].mxu0 }
 0x20f   : > { %v1497_v57 = vadd.f32 %v2165_v52, %v3039_v60  ;;  %v2168_v49 = vadd.f32 %v2167_v54, %v2166_v53  ;;  %v2280_v59 = vadd.f32 %v2279_v39, %v2278_v44 }
 0x211   : > { %v1658_v45 = vadd.f32 %v2277_v13, %v1497_v57  ;;  %v1500_v62 = vadd.f32 %v2168_v49, %v3044_v0 }
 0x213   : > { %1700 = vst [vmem:[%s3065_s19 + $0xe0] sm:$0xff] %v1658_v45  ;;  %v1661_v22 = vadd.f32 %v2280_v59, %v1500_v62  ;;  %v2169_v28 = vpop.f32.mrb[92].mxu1  ;;  %v2281_v7 = vpop.f32.mrb[92].mxu0 }
 0x214   : > { %v2170_v1 = vpop.f32.mrb[93].mxu1  ;;  %v2282_v2 = vpop.f32.mrb[93].mxu0 }
 0x215   : > { %1701 = vst [vmem:[%s3065_s19 + $0xe8] sm:$0xff] %v1661_v22  ;;  %v2171_v3 = vadd.f32 %v2170_v1, %v2169_v28  ;;  %v2283_v55 = vadd.f32 %v2282_v2, %v2281_v7  ;;  %v2172_v56 = vpop.f32.mrb[94].mxu1  ;;  %v2284_v4 = vpop.f32.mrb[94].mxu0 }
 0x216   : > { %v2173_v9 = vpop.f32.mrb[95].mxu1  ;;  %v2285_v60 = vpop.f32.mrb[95].mxu0 }
 0x217   : > { %v1505_v58 = vadd.f32 %v2171_v3, %v3051_v15  ;;  %v2174_v10 = vadd.f32 %v2173_v9, %v2172_v56  ;;  %v2286_v18 = vadd.f32 %v2285_v60, %v2284_v4 }
 0x219   : > { %v1666_v0 = vadd.f32 %v2283_v55, %v1505_v58  ;;  %v1508_v16 = vadd.f32 %v2174_v10, %v3056_v19 }
 0x21b   : > { %1702 = vst [vmem:[%s3065_s19 + $0xf0] sm:$0xff] %v1666_v0  ;;  %v1669_v11 = vadd.f32 %v2286_v18, %v1508_v16 }
 0x21d   : > { %1703 = vst [vmem:[%s3065_s19 + $0xf8] sm:$0xff] %v1669_v11 }
 0x21e PF: > { %p14_p6 = scmp.ge.s32.totalorder %s2812_s30, 4   ;;  %s3172_s12 = smov %s2678_s13 }
 0x21f   : > { %s3173_s13 = smov %s2682_s14  ;;  %s3174_s14 = smov %s2823_s6 }
 0x220   : > { %s3175_s15 = smov %s2812_s30  ;;  %16 = sbr.rel (!%p14_p6) target bundleno = 4 (0x4), region = 80 }
 0x227   :  { %1726 = vsyncpa [#allocation3], 1 }
 0x228   :  { %1728 = vsyncpa [#allocation3 + $0x1], 1 }
 0x229   :  { %1729 = vsyncpa [#allocation5], 1 }

// kernel: tile.42
= control target key start
LH: loop header
LB: loop body
LE: loop exit
PB: predicated region body
PF: predicated region fallthrough
CT: control target
= control target key end

     0   :  { %s62_s0 = inlined_call_operand.<no memory space> [shape: f32[], index: 0, kind: input, shape index: {}]   ;;  %s63_s1 = inlined_call_operand.vmem [shape: f32[1,1024], index: 1, kind: output, shape index: {}]  }
   0x1   :  { %v2_v0 = vstv %s62_s0 }
   0x2   :  { %3 = vst [vmem:[%s63_s1] sm:$0x1] %v2_v0  ;;  %18 = vst [vmem:[%s63_s1 + $0x1] sm:$0x1] %v2_v0 }
   0x3   :  { %19 = vst [vmem:[%s63_s1 + $0x2] sm:$0x1] %v2_v0  ;;  %20 = vst [vmem:[%s63_s1 + $0x3] sm:$0x1] %v2_v0 }
   0x4   :  { %21 = vst [vmem:[%s63_s1 + $0x4] sm:$0x1] %v2_v0  ;;  %22 = vst [vmem:[%s63_s1 + $0x5] sm:$0x1] %v2_v0 }
   0x5   :  { %23 = vst [vmem:[%s63_s1 + $0x6] sm:$0x1] %v2_v0  ;;  %24 = vst [vmem:[%s63_s1 + $0x7] sm:$0x1] %v2_v0 }

// kernel: conditional_discriminator_forward.7
= control target key start
LH: loop header
LB: loop body
LE: loop exit
PB: predicated region body
PF: predicated region fallthrough
CT: control target
= control target key end

     0   :  { %s2708_s21 = smov 0   ;;  %s3483_s0 = inlined_call_operand.vmem [shape: f32[256,1024], index: 0, kind: input, shape index: {}]   ;;  %s3484_s1 = inlined_call_operand.vmem [shape: f32[1,1024], index: 1, kind: input, shape index: {}]   ;;  %s3485_s2 = inlined_call_operand.vmem [shape: f32[1,1024], index: 2, kind: input, shape index: {}]   ;;  %s3486_s3 = inlined_call_operand.vmem [shape: bf16[1024,128], index: 3, kind: input, shape index: {}]   ;;  %s3487_s4 = inlined_call_operand.vmem [shape: f32[1,128], index: 4, kind: input, shape index: {}]   ;;  %s3488_s5 = inlined_call_operand.vmem [shape: f32[256,128], index: 5, kind: output, shape index: {0}]   ;;  %s3489_s6 = inlined_call_operand.vmem [shape: f32[2,2,128], index: 6, kind: output, shape index: {1}]  }
   0x1 LB: > { %s2714_s22 = sadd.s32 4294967295, %s2671_s21   ;;  %p2260_p0 = scmp.ge.s32.totalorder %s2671_s21, 1  ;;  %s2671_s21 = sphi %s2708_s21, %s17_s21  }
   0x2   : > { %p217_p1 = scmp.lt.s32.totalorder %s2671_s21, 3 }
   0x4   : > { %p218_p2 = pnand %p2260_p0, %p217_p1 }
   0x5   : > { %v2599_v0 = vld [vmem:[%s3486_s3 + $0x40] sm:$0xff] (!%p218_p2)   ;;  %v2603_v4 = vld [vmem:[%s3486_s3 + $0x48] sm:$0xff] (!%p218_p2)   ;;  %v2607_v8 = vld [vmem:[%s3486_s3 + $0x50] sm:$0xff] (!%p218_p2)   ;;  %s2261_s9 = sshll.u32 (!%p218_p2), %s2714_s22, 4  ;;  %v400_v18 = vlaneseq (!%p218_p2)  ;;  %p265_p4 = scmp.lt.s32.totalorder (!%p218_p2), %s2714_s22, 1 }
   0x6   : > { %221 = sbr.rel (%p218_p2) target bundleno = 441 (0x1b9), region = 40  ;;  %v2600_v1 = vld [vmem:[%s3486_s3 + $0xc0] sm:$0xff] (!%p218_p2)   ;;  %2335 = vmatprep.subr.bf16.mxu0 (!%p218_p2), %v2599_v0  ;;  %v2604_v5 = vld [vmem:[%s3486_s3 + $0xc8] sm:$0xff] (!%p218_p2)   ;;  %v2608_v9 = vld [vmem:[%s3486_s3 + $0xd0] sm:$0xff] (!%p218_p2)   ;;  %p253_p3 = scmp.lt.s32.totalorder (!%p218_p2), %s2261_s9, 31 }
   0x7   : > { %v2601_v2 = vld [vmem:[%s3486_s3] sm:$0xff] (!%p218_p2)   ;;  %2399 = vmatprep.subr.bf16.mxu1 (!%p218_p2), %v2600_v1  ;;  %v2605_v6 = vld [vmem:[%s3486_s3 + $0x8] sm:$0xff] (!%p218_p2)   ;;  %v2609_v10 = vld [vmem:[%s3486_s3 + $0x10] sm:$0xff] (!%p218_p2)   ;;  %v2785_v23 = vshrl.u32 (!%p218_p2), %v400_v18, 7 }
   0x8   : > { %v2602_v3 = vld [vmem:[%s3486_s3 + $0x80] sm:$0xff] (!%p218_p2)   ;;  %2336 = vmatpush3.bf16.msra.mxu0 (!%p218_p2), %v2601_v2  ;;  %v2606_v7 = vld [vmem:[%s3486_s3 + $0x88] sm:$0xff] (!%p218_p2)   ;;  %v2610_v11 = vld [vmem:[%s3486_s3 + $0x90] sm:$0xff] (!%p218_p2)  }
   0x9   : > { %2400 = vmatpush3.bf16.msra.mxu1 (!%p218_p2), %v2602_v3  ;;  %2337 = vmatprep.subr.bf16.mxu0 (!%p218_p2), %v2603_v4  ;;  %v2611_v12 = vld [vmem:[%s3486_s3 + $0x58] sm:$0xff] (!%p218_p2)   ;;  %v2615_v16 = vld [vmem:[%s3486_s3 + $0x60] sm:$0xff] (!%p218_p2)   ;;  %v2619_v21 = vld [vmem:[%s3486_s3 + $0x68] sm:$0xff] (!%p218_p2)   ;;  %v406_v28 = vsub.s32 (!%p218_p2), 1, %v2785_v23  ;;  %v414_v31 = vsub.s32 (!%p218_p2), 3, %v2785_v23  ;;  %v402_v33 = vsub.s32 (!%p218_p2), 0, %v2785_v23 }
   0xa   : > { %2401 = vmatprep.subr.bf16.mxu1 (!%p218_p2), %v2604_v5  ;;  %v2612_v13 = vld [vmem:[%s3486_s3 + $0xd8] sm:$0xff] (!%p218_p2)   ;;  %v2616_v17 = vld [vmem:[%s3486_s3 + $0xe0] sm:$0xff] (!%p218_p2)   ;;  %v2620_v22 = vld [vmem:[%s3486_s3 + $0xe8] sm:$0xff] (!%p218_p2)   ;;  %v410_v35 = vsub.s32 (!%p218_p2), 2, %v2785_v23  ;;  %v422_v38 = vsub.s32 (!%p218_p2), 5, %v2785_v23  ;;  %v430_v42 = vsub.s32 (!%p218_p2), 7, %v2785_v23 }
   0xb   : > { %v2613_v14 = vld [vmem:[%s3486_s3 + $0x18] sm:$0xff] (!%p218_p2)   ;;  %v2617_v19 = vld [vmem:[%s3486_s3 + $0x20] sm:$0xff] (!%p218_p2)   ;;  %v2621_v24 = vld [vmem:[%s3486_s3 + $0x28] sm:$0xff] (!%p218_p2)   ;;  %v418_v43 = vsub.s32 (!%p218_p2), 4, %v2785_v23  ;;  %v426_v44 = vsub.s32 (!%p218_p2), 6, %v2785_v23 }
   0xc   : > { %2338 = vmatpush3.bf16.msra.mxu0 (!%p218_p2), %v2605_v6  ;;  %v2614_v15 = vld [vmem:[%s3486_s3 + $0x98] sm:$0xff] (!%p218_p2)   ;;  %v2618_v20 = vld [vmem:[%s3486_s3 + $0xa0] sm:$0xff] (!%p218_p2)   ;;  %v2622_v25 = vld [vmem:[%s3486_s3 + $0xa8] sm:$0xff] (!%p218_p2)  }
   0xd   : > { %2402 = vmatpush3.bf16.msra.mxu1 %v2606_v7  ;;  %2339 = vmatprep.subr.bf16.mxu0 %v2607_v8  ;;  %s3491_s9 = smov (!%p253_p3, %s2261_s9), 31  ;;  %v2623_v26 = vld [vmem:[%s3486_s3 + $0x70] sm:$0xff]   ;;  %v2627_v32 = vld [vmem:[%s3486_s3 + $0x78] sm:$0xff]   ;;  %v398_v41 = vld [vmem:[%s3484_s1] sm:$0xff]  ;;  %s3493_s22 = smov (!%p265_p4, %s2714_s22), 1 }
   0xe   : > { %2403 = vmatprep.subr.bf16.mxu1 %v2608_v9  ;;  %v2624_v27 = vld [vmem:[%s3486_s3 + $0xf0] sm:$0xff]   ;;  %s2334_s11 = sshll.u32 %s3491_s9, 6  ;;  %v2628_v34 = vld [vmem:[%s3486_s3 + $0xf8] sm:$0xff]   ;;  %v2838_v45 = vrot.slane %v398_v41, %v406_v28  ;;  %v568_v46 = vld [vmem:[%s3485_s2] sm:$0xff]  ;;  %v2845_v49 = vrot.slane %v398_v41, %v414_v31  ;;  %v2847_v50 = vrot.slane %v398_v41, %v402_v33  ;;  %v2849_v51 = vrot.slane %v398_v41, %v410_v35  ;;  %s2265_s17 = sshll.u32 %s3491_s9, 3 }
   0xf   : > { %v2625_v29 = vld [vmem:[%s3486_s3 + $0x30] sm:$0xff]   ;;  %s2820_s20 = scalar_lea.vmem %s3483_s0, %s2334_s11  ;;  %v2629_v36 = vld [vmem:[%s3486_s3 + $0x38] sm:$0xff]   ;;  %v2851_v52 = vrot.slane %v568_v46, %v406_v28  ;;  %v2853_v53 = vrot.slane %v568_v46, %v414_v31  ;;  %v2857_v56 = vrot.slane %v568_v46, %v402_v33  ;;  %v2860_v58 = vrot.slane %v568_v46, %v410_v35  ;;  %v2631_v4 = vld [vmem:[%s3486_s3 + $0x140] sm:$0xff]   ;;  %s3443_s23 = scalar_lea.vmem %s3488_s5, %s2265_s17 }
  0x10   : > { %2340 = vmatpush3.bf16.msra.mxu0 %v2609_v10  ;;  %v2626_v30 = vld [vmem:[%s3486_s3 + $0xb0] sm:$0xff]   ;;  %v2630_v37 = vld [vmem:[%s3486_s3 + $0xb8] sm:$0xff]   ;;  %v271_v39 = vld [vmem:[%s2820_s20 + $0x8] sm:$0xff]  ;;  %s2266_s9 = sshll.u32 %s3493_s22, 1 }
  0x11   : > { %2404 = vmatpush3.bf16.msra.mxu1 %v2610_v11  ;;  %2341 = vmatprep.subr.bf16.mxu0 %v2611_v12  ;;  %v279_v40 = vld [vmem:[%s2820_s20 + $0x48] sm:$0xff]  ;;  %v273_v47 = vld [vmem:[%s2820_s20 + $0x18] sm:$0xff]  ;;  %v270_v54 = vld [vmem:[%s2820_s20] sm:$0xff]  ;;  %v441_v59 = vmul.f32 %v2838_v45, %v271_v39  ;;  %s268_s26 = scalar_lea.vmem %s3489_s6, %s2266_s9 }
  0x12   : > { %2405 = vmatprep.subr.bf16.mxu1 %v2612_v13  ;;  %v281_v48 = vld [vmem:[%s2820_s20 + $0x58] sm:$0xff]  ;;  %v278_v55 = vld [vmem:[%s2820_s20 + $0x40] sm:$0xff]  ;;  %v272_v57 = vld [vmem:[%s2820_s20 + $0x10] sm:$0xff]  ;;  %v449_v60 = vmul.f32 %v2838_v45, %v279_v40  ;;  %v443_v61 = vmul.f32 %v2845_v49, %v273_v47  ;;  %v440_v0 = vmul.f32 %v2847_v50, %v270_v54 }
  0x13   : > { %v451_v62 = vmul.f32 %v2845_v49, %v281_v48  ;;  %v280_v63 = vld [vmem:[%s2820_s20 + $0x50] sm:$0xff]  ;;  %v448_v1 = vmul.f32 %v2847_v50, %v278_v55  ;;  %v442_v2 = vmul.f32 %v2849_v51, %v272_v57  ;;  %v611_v5 = vadd.f32 %v2851_v52, %v441_v59  ;;  %v2633_v13 = vld [vmem:[%s3486_s3 + $0x1c0] sm:$0xff]   ;;  %v297_v28 = vld [vmem:[%s2820_s20 + $0xd8] sm:$0xff] }
  0x14   : > { %2342 = vmatpush3.bf16.msra.mxu0 %v2613_v14  ;;  %v450_v3 = vmul.f32 %v2849_v51, %v280_v63  ;;  %v619_v6 = vadd.f32 %v2851_v52, %v449_v60  ;;  %v613_v7 = vadd.f32 %v2853_v53, %v443_v61  ;;  %v610_v9 = vadd.f32 %v2857_v56, %v440_v0  ;;  %v2632_v31 = vld [vmem:[%s3486_s3 + $0x100] sm:$0xff]   ;;  %v288_v59 = vld [vmem:[%s2820_s20 + $0x90] sm:$0xff]  ;;  %v2635_v60 = vld [vmem:[%s3486_s3 + $0x148] sm:$0xff]  }
  0x15   : > { %2406 = vmatpush3.bf16.msra.mxu1 %v2614_v15  ;;  %2343 = vmatprep.subr.bf16.mxu0 %v2615_v16  ;;  %v621_v8 = vadd.f32 %v2853_v53, %v451_v62  ;;  %v618_v10 = vadd.f32 %v2857_v56, %v448_v1  ;;  %v612_v11 = vadd.f32 %v2860_v58, %v442_v2  ;;  %vm739_vm0 = vcmp.gt.f32.partialorder %v611_v5, 0.0  ;;  %v2634_v35 = vld [vmem:[%s3486_s3 + $0x180] sm:$0xff]   ;;  %v2637_v1 = vld [vmem:[%s3486_s3 + $0x1c8] sm:$0xff]  }
  0x16   : > { %2407 = vmatprep.subr.bf16.mxu1 %v2616_v17  ;;  %v620_v12 = vadd.f32 %v2860_v58, %v450_v3  ;;  %vm747_vm1 = vcmp.gt.f32.partialorder %v619_v6, 0.0  ;;  %v867_v14 = vmul.f32 0.2, %v611_v5  ;;  %v875_v15 = vmul.f32 0.2, %v619_v6  ;;  %v294_v39 = vld [vmem:[%s2820_s20 + $0xc0] sm:$0xff] }
  0x17   : > { %vm741_vm2 = vcmp.gt.f32.partialorder %v613_v7, 0.0  ;;  %vm749_vm3 = vcmp.gt.f32.partialorder %v621_v8, 0.0  ;;  %v869_v16 = vmul.f32 0.2, %v613_v7  ;;  %v877_v17 = vmul.f32 0.2, %v621_v8 }
  0x18   : > { %2344 = vmatpush3.bf16.msra.mxu0 %v2617_v19  ;;  %v995_v18 = vsel %vm739_vm0, %v611_v5, %v867_v14  ;;  %v1003_v19 = vsel %vm747_vm1, %v619_v6, %v875_v15  ;;  %vm738_vm4 = vcmp.gt.f32.partialorder %v610_v9, 0.0  ;;  %vm746_vm5 = vcmp.gt.f32.partialorder %v618_v10, 0.0  ;;  %v296_v5 = vld [vmem:[%s2820_s20 + $0xd0] sm:$0xff] }
  0x19   : > { %2408 = vmatpush3.bf16.msra.mxu1 %v2618_v20  ;;  %2345 = vmatprep.subr.bf16.mxu0 %v2619_v21  ;;  %v287_v20 = vld [vmem:[%s2820_s20 + $0x88] sm:$0xff]  ;;  %v1123_v21 = vpack.c.bf16 %v1003_v19, %v995_v18  ;;  %vm740_vm6 = vcmp.gt.f32.partialorder %v612_v11, 0.0  ;;  %vm748_vm7 = vcmp.gt.f32.partialorder %v620_v12, 0.0  ;;  %v868_v33 = vmul.f32 0.2, %v612_v11 }
  0x1a   : > { %2409 = vmatprep.subr.bf16.mxu1 %v2620_v22  ;;  %v997_v22 = vsel %vm741_vm2, %v613_v7, %v869_v16  ;;  %v467_v47 = vmul.f32 %v2845_v49, %v297_v28  ;;  %v2636_v7 = vld [vmem:[%s3486_s3 + $0x108] sm:$0xff]   ;;  %v458_v15 = vmul.f32 %v2849_v51, %v288_v59  ;;  %v466_v16 = vmul.f32 %v2849_v51, %v296_v5  ;;  %v302_v28 = vld [vmem:[%s2820_s20 + $0x100] sm:$0xff]  ;;  %v312_v5 = vld [vmem:[%s2820_s20 + $0x150] sm:$0xff] }
  0x1b   : > { %1737 = vmatprep.mubr.bf16.mxu0 %v1123_v21  ;;  %v996_v54 = vsel %vm740_vm6, %v612_v11, %v868_v33  ;;  %v311_v18 = vld [vmem:[%s2820_s20 + $0x148] sm:$0xff] }
  0x1c   : > { %2346 = vmatpush3.bf16.msra.mxu0 %v2621_v24  ;;  %v1005_v24 = vsel %vm749_vm3, %v621_v8, %v877_v17  ;;  %v637_v0 = vadd.f32 %v2853_v53, %v467_v47  ;;  %v303_v17 = vld [vmem:[%s2820_s20 + $0x108] sm:$0xff]  ;;  %v2642_v47 = vld [vmem:[%s3486_s3 + $0x190] sm:$0xff]  }
  0x1d   : > { %2410 = vmatpush3.bf16.msra.mxu1 %v2622_v25  ;;  %2347 = vmatprep.subr.bf16.mxu0 %v2623_v26  ;;  %v866_v25 = vmul.f32 0.2, %v610_v9  ;;  %v295_v26 = vld [vmem:[%s2820_s20 + $0xc8] sm:$0xff]  ;;  %v473_v33 = vmul.f32 %v2838_v45, %v303_v17 }
  0x1e   : > { %2411 = vmatprep.subr.bf16.mxu1 %v2624_v27  ;;  %v289_v27 = vld [vmem:[%s2820_s20 + $0x98] sm:$0xff]  ;;  %v465_v41 = vmul.f32 %v2838_v45, %v295_v26  ;;  %vm765_vm11 = vcmp.gt.f32.partialorder %v637_v0, 0.0 }
  0x1f   : > { %v459_v46 = vmul.f32 %v2845_v49, %v289_v27 }
  0x20   : > { %2348 = vmatpush3.bf16.msra.mxu0 %v2625_v29  ;;  %v1125_v29 = vpack.c.bf16 %v1005_v24, %v997_v22  ;;  %v635_v62 = vadd.f32 %v2851_v52, %v465_v41  ;;  %v305_v22 = vld [vmem:[%s2820_s20 + $0x118] sm:$0xff] }
  0x21   : > { %2412 = vmatpush3.bf16.msra.mxu1 %v2626_v30  ;;  %2349 = vmatprep.subr.bf16.mxu0 %v2627_v32  ;;  %v874_v30 = vmul.f32 0.2, %v618_v10  ;;  %v994_v32 = vsel %vm738_vm4, %v610_v9, %v866_v25  ;;  %v629_v63 = vadd.f32 %v2853_v53, %v459_v46  ;;  %v313_v24 = vld [vmem:[%s2820_s20 + $0x158] sm:$0xff]  ;;  %v2641_v46 = vld [vmem:[%s3486_s3 + $0x1d0] sm:$0xff]  }
  0x22   : > { %2413 = vmatprep.subr.bf16.mxu1 %v2628_v34  ;;  %v876_v34 = vmul.f32 0.2, %v620_v12  ;;  %1834 = vmatprep.mubr.bf16.mxu1 %v1125_v29  ;;  %vm763_vm9 = vcmp.gt.f32.partialorder %v635_v62, 0.0  ;;  %v891_v6 = vmul.f32 0.2, %v635_v62  ;;  %v310_v29 = vld [vmem:[%s2820_s20 + $0x140] sm:$0xff] }
  0x23   : > { %v1002_v40 = vsel %vm746_vm5, %v618_v10, %v874_v30  ;;  %vm757_vm10 = vcmp.gt.f32.partialorder %v629_v63, 0.0  ;;  %v885_v9 = vmul.f32 0.2, %v629_v63  ;;  %v893_v10 = vmul.f32 0.2, %v637_v0  ;;  %v2639_v30 = vld [vmem:[%s3486_s3 + $0x150] sm:$0xff]  }
  0x24   : > { %2350 = vmatpush3.bf16.msra.mxu0 %v2629_v36  ;;  %v457_v36 = vmul.f32 %v2838_v45, %v287_v20  ;;  %v1122_v48 = vpack.c.bf16 %v1002_v40, %v994_v32  ;;  %v1004_v55 = vsel %vm748_vm7, %v620_v12, %v876_v34  ;;  %v2638_v12 = vld [vmem:[%s3486_s3 + $0x188] sm:$0xff]   ;;  %v636_v32 = vadd.f32 %v2860_v58, %v466_v16  ;;  %v2643_v16 = vld [vmem:[%s3486_s3 + $0x158] sm:$0xff]  }
  0x25   : > { %2414 = vmatpush3.bf16.msra.mxu1 %v2630_v37  ;;  %2463 = vmatprep.subr.bf16.mxu0 %v2631_v4  ;;  %v286_v37 = vld [vmem:[%s2820_s20 + $0x80] sm:$0xff]  ;;  %v1124_v61 = vpack.c.bf16 %v1004_v55, %v996_v54  ;;  %v464_v4 = vmul.f32 %v2847_v50, %v294_v39  ;;  %v1013_v20 = vsel %vm757_vm10, %v629_v63, %v885_v9  ;;  %v2640_v39 = vld [vmem:[%s3486_s3 + $0x110] sm:$0xff]  }
  0x26   : > { %2527 = vmatprep.subr.bf16.mxu1 %v2633_v13  ;;  %v627_v57 = vadd.f32 %v2851_v52, %v457_v36  ;;  %v456_v3 = vmul.f32 %v2847_v50, %v286_v37  ;;  %v1019_v13 = vsel %vm763_vm9, %v635_v62, %v891_v6  ;;  %v1021_v21 = vsel %vm765_vm11, %v637_v0, %v893_v10  ;;  %v319_v6 = vld [vmem:[%s2820_s20 + $0x188] sm:$0xff] }
  0x27   : > { %1738 = vmatmul.mubr.bf16.vlgmr.msra.gmra.mrb[0].mxu0 %v1122_v48  ;;  %v634_v14 = vadd.f32 %v2857_v56, %v464_v4  ;;  %v1133_v25 = vpack.c.bf16 %v1021_v21, %v1013_v20  ;;  %v481_v36 = vmul.f32 %v2838_v45, %v311_v18  ;;  %v475_v37 = vmul.f32 %v2845_v49, %v305_v22  ;;  %v2644_v20 = vld [vmem:[%s3486_s3 + $0x118] sm:$0xff]  }
  0x28   : > { %vm755_vm8 = vcmp.gt.f32.partialorder %v627_v57, 0.0  ;;  %v883_v2 = vmul.f32 0.2, %v627_v57  ;;  %1835 = vmatmul.mubr.bf16.vlgmr.msra.gmra.mrb[0].mxu1 %v1124_v61  ;;  %2464 = vmatpush3.bf16.msra.mxu0 %v2632_v31  ;;  %v626_v11 = vadd.f32 %v2857_v56, %v456_v3  ;;  %v628_v31 = vadd.f32 %v2860_v58, %v458_v15  ;;  %v2645_v21 = vld [vmem:[%s3486_s3 + $0x1d8] sm:$0xff]  }
  0x29   : > { %2528 = vmatpush3.bf16.msra.mxu1 %v2634_v35  ;;  %2465 = vmatprep.subr.bf16.mxu0 %v2635_v60  ;;  %vm762_vm13 = vcmp.gt.f32.partialorder %v634_v14, 0.0  ;;  %v890_v27 = vmul.f32 0.2, %v634_v14  ;;  %vm764_vm15 = vcmp.gt.f32.partialorder %v636_v32, 0.0  ;;  %v892_v48 = vmul.f32 0.2, %v636_v32 }
  0x2a   : > { %v1011_v8 = vsel %vm755_vm8, %v627_v57, %v883_v2  ;;  %2529 = vmatprep.subr.bf16.mxu1 %v2637_v1  ;;  %vm754_vm12 = vcmp.gt.f32.partialorder %v626_v11, 0.0  ;;  %v882_v26 = vmul.f32 0.2, %v626_v11  ;;  %1842 = vmatprep.mubr.bf16.mxu1 %v1133_v25  ;;  %vm756_vm14 = vcmp.gt.f32.partialorder %v628_v31, 0.0  ;;  %v304_v1 = vld [vmem:[%s2820_s20 + $0x110] sm:$0xff] }
  0x2b   : > { %v1131_v19 = vpack.c.bf16 %v1019_v13, %v1011_v8  ;;  %v1018_v35 = vsel %vm762_vm13, %v634_v14, %v890_v27  ;;  %v884_v41 = vmul.f32 0.2, %v628_v31  ;;  %v643_v54 = vadd.f32 %v2851_v52, %v473_v33 }
  0x2c   : > { %2466 = vmatpush3.bf16.msra.mxu0 %v2636_v7  ;;  %v1010_v34 = vsel %vm754_vm12, %v626_v11, %v882_v26  ;;  %v651_v55 = vadd.f32 %v2851_v52, %v481_v36  ;;  %v483_v57 = vmul.f32 %v2845_v49, %v313_v24  ;;  %v645_v60 = vadd.f32 %v2853_v53, %v475_v37  ;;  %v327_v7 = vld [vmem:[%s2820_s20 + $0x1c8] sm:$0xff] }
  0x2d   : > { %1745 = vmatprep.mubr.bf16.mxu0 %v1131_v19  ;;  %2530 = vmatpush3.bf16.msra.mxu1 %v2638_v12  ;;  %v1130_v40 = vpack.c.bf16 %v1018_v35, %v1010_v34  ;;  %v1012_v59 = vsel %vm756_vm14, %v628_v31, %v884_v41  ;;  %v472_v61 = vmul.f32 %v2847_v50, %v302_v28  ;;  %vm771_vm0 = vcmp.gt.f32.partialorder %v643_v54, 0.0  ;;  %v321_v12 = vld [vmem:[%s2820_s20 + $0x198] sm:$0xff] }
  0x2e   : > { %2467 = vmatprep.subr.bf16.mxu0 %v2639_v30  ;;  %v480_v62 = vmul.f32 %v2847_v50, %v310_v29  ;;  %v1020_v63 = vsel %vm764_vm15, %v636_v32, %v892_v48  ;;  %vm779_vm1 = vcmp.gt.f32.partialorder %v651_v55, 0.0  ;;  %v899_v0 = vmul.f32 0.2, %v643_v54  ;;  %2531 = vmatprep.subr.bf16.mxu1 %v2641_v46  ;;  %v329_v19 = vld [vmem:[%s2820_s20 + $0x1d8] sm:$0xff]  ;;  %v326_v48 = vld [vmem:[%s2820_s20 + $0x1c0] sm:$0xff] }
  0x2f   : > { %1746 = vmatmul.mubr.bf16.gmra.mrb[4].mxu0 %v1130_v40  ;;  %v1132_v2 = vpack.c.bf16 %v1020_v63, %v1012_v59  ;;  %v907_v3 = vmul.f32 0.2, %v651_v55  ;;  %v653_v4 = vadd.f32 %v2853_v53, %v483_v57  ;;  %vm773_vm2 = vcmp.gt.f32.partialorder %v645_v60, 0.0  ;;  %v2646_v35 = vld [vmem:[%s3486_s3 + $0x198] sm:$0xff]  }
  0x30   : > { %2468 = vmatpush3.bf16.msra.mxu0 %v2640_v39  ;;  %v1027_v8 = vsel %vm771_vm0, %v643_v54, %v899_v0  ;;  %v901_v9 = vmul.f32 0.2, %v645_v60  ;;  %v642_v10 = vadd.f32 %v2857_v56, %v472_v61  ;;  %v650_v11 = vadd.f32 %v2857_v56, %v480_v62  ;;  %v320_v54 = vld [vmem:[%s2820_s20 + $0x190] sm:$0xff]  ;;  %v335_v61 = vld [vmem:[%s2820_s20 + $0x208] sm:$0xff]  ;;  %v2647_v62 = vld [vmem:[%s3486_s3 + $0x160] sm:$0xff]  }
  0x31   : > { %2532 = vmatpush3.bf16.msra.mxu1 %v2642_v47  ;;  %v1035_v13 = vsel %vm779_vm1, %v651_v55, %v907_v3  ;;  %vm781_vm3 = vcmp.gt.f32.partialorder %v653_v4, 0.0  ;;  %v909_v14 = vmul.f32 0.2, %v653_v4  ;;  %v474_v15 = vmul.f32 %v2849_v51, %v304_v1  ;;  %2469 = vmatprep.subr.bf16.mxu0 %v2643_v16  ;;  %v318_v47 = vld [vmem:[%s2820_s20 + $0x180] sm:$0xff] }
  0x32   : > { %1843 = vmatmul.mubr.bf16.gmra.mrb[4].mxu1 %v1132_v2  ;;  %v1139_v17 = vpack.c.bf16 %v1035_v13, %v1027_v8  ;;  %v1029_v18 = vsel %vm773_vm2, %v645_v60, %v901_v9  ;;  %vm770_vm4 = vcmp.gt.f32.partialorder %v642_v10, 0.0  ;;  %vm778_vm5 = vcmp.gt.f32.partialorder %v650_v11, 0.0  ;;  %2533 = vmatprep.subr.bf16.mxu1 %v2645_v21  ;;  %v328_v60 = vld [vmem:[%s2820_s20 + $0x1d0] sm:$0xff]  ;;  %v343_v2 = vld [vmem:[%s2820_s20 + $0x248] sm:$0xff]  ;;  %v2648_v3 = vld [vmem:[%s3486_s3 + $0x120] sm:$0xff]  }
  0x33   : > { %v1037_v22 = vsel %vm781_vm3, %v653_v4, %v909_v14  ;;  %v898_v24 = vmul.f32 0.2, %v642_v10  ;;  %v906_v25 = vmul.f32 0.2, %v650_v11  ;;  %v482_v26 = vmul.f32 %v2849_v51, %v312_v5 }
  0x34   : > { %1753 = vmatprep.mubr.bf16.mxu0 %v1139_v17  ;;  %v1141_v27 = vpack.c.bf16 %v1037_v22, %v1029_v18  ;;  %v644_v28 = vadd.f32 %v2860_v58, %v474_v15  ;;  %v489_v29 = vmul.f32 %v2838_v45, %v319_v6  ;;  %v497_v30 = vmul.f32 %v2838_v45, %v327_v7  ;;  %v2649_v7 = vld [vmem:[%s3486_s3 + $0x1e0] sm:$0xff]  }
  0x35   : > { %v1026_v31 = vsel %vm770_vm4, %v642_v10, %v898_v24  ;;  %v1034_v32 = vsel %vm778_vm5, %v650_v11, %v906_v25  ;;  %v652_v33 = vadd.f32 %v2860_v58, %v482_v26  ;;  %v491_v34 = vmul.f32 %v2845_v49, %v321_v12  ;;  %2470 = vmatpush3.bf16.msra.mxu0 %v2644_v20  ;;  %v2650_v11 = vld [vmem:[%s3486_s3 + $0x1a0] sm:$0xff]  }
  0x36   : > { %1850 = vmatprep.mubr.bf16.mxu1 %v1141_v27  ;;  %v1138_v36 = vpack.c.bf16 %v1034_v32, %v1026_v31  ;;  %vm772_vm6 = vcmp.gt.f32.partialorder %v644_v28, 0.0  ;;  %v900_v37 = vmul.f32 0.2, %v644_v28  ;;  %v659_v39 = vadd.f32 %v2851_v52, %v489_v29  ;;  %2534 = vmatpush3.bf16.msra.mxu1 %v2646_v35  ;;  %v345_v29 = vld [vmem:[%s2820_s20 + $0x258] sm:$0xff]  ;;  %v334_v32 = vld [vmem:[%s2820_s20 + $0x200] sm:$0xff] }
  0x37   : > { %vm780_vm7 = vcmp.gt.f32.partialorder %v652_v33, 0.0  ;;  %v908_v40 = vmul.f32 0.2, %v652_v33  ;;  %v667_v41 = vadd.f32 %v2851_v52, %v497_v30  ;;  %v499_v46 = vmul.f32 %v2845_v49, %v329_v19  ;;  %2471 = vmatprep.subr.bf16.mxu0 %v2647_v62  ;;  %2535 = vmatprep.subr.bf16.mxu1 %v2649_v7 }
  0x38   : > { %1754 = vmatmul.mubr.bf16.gmra.mrb[8].mxu0 %v1138_v36  ;;  %v1028_v55 = vsel %vm772_vm6, %v644_v28, %v900_v37  ;;  %vm787_vm8 = vcmp.gt.f32.partialorder %v659_v39, 0.0  ;;  %v915_v57 = vmul.f32 0.2, %v659_v39  ;;  %v661_v59 = vadd.f32 %v2853_v53, %v491_v34  ;;  %v337_v28 = vld [vmem:[%s2820_s20 + $0x218] sm:$0xff]  ;;  %v336_v34 = vld [vmem:[%s2820_s20 + $0x210] sm:$0xff] }
  0x39   : > { %v1036_v63 = vsel %vm780_vm7, %v652_v33, %v908_v40  ;;  %vm795_vm9 = vcmp.gt.f32.partialorder %v667_v41, 0.0  ;;  %v923_v0 = vmul.f32 0.2, %v667_v41  ;;  %v669_v1 = vadd.f32 %v2853_v53, %v499_v46  ;;  %2472 = vmatpush3.bf16.msra.mxu0 %v2648_v3  ;;  %v342_v33 = vld [vmem:[%s2820_s20 + $0x240] sm:$0xff]  ;;  %v2651_v40 = vld [vmem:[%s3486_s3 + $0x168] sm:$0xff]  }
  0x3a   : > { %v1140_v4 = vpack.c.bf16 %v1036_v63, %v1028_v55  ;;  %v1043_v5 = vsel %vm787_vm8, %v659_v39, %v915_v57  ;;  %vm789_vm10 = vcmp.gt.f32.partialorder %v661_v59, 0.0  ;;  %v917_v6 = vmul.f32 0.2, %v661_v59  ;;  %2536 = vmatpush3.bf16.msra.mxu1 %v2650_v11  ;;  %v344_v39 = vld [vmem:[%s2820_s20 + $0x250] sm:$0xff]  ;;  %2473 = vmatprep.subr.bf16.mxu0 %v2651_v40 }
  0x3b   : > { %v1051_v8 = vsel %vm795_vm9, %v667_v41, %v923_v0  ;;  %vm797_vm11 = vcmp.gt.f32.partialorder %v669_v1, 0.0  ;;  %v925_v9 = vmul.f32 0.2, %v669_v1  ;;  %v488_v10 = vmul.f32 %v2847_v50, %v318_v47 }
  0x3c   : > { %1851 = vmatmul.mubr.bf16.gmra.mrb[8].mxu1 %v1140_v4  ;;  %v1147_v12 = vpack.c.bf16 %v1051_v8, %v1043_v5  ;;  %v1045_v13 = vsel %vm789_vm10, %v661_v59, %v917_v6  ;;  %v496_v14 = vmul.f32 %v2847_v50, %v326_v48  ;;  %v490_v15 = vmul.f32 %v2849_v51, %v320_v54  ;;  %v351_v48 = vld [vmem:[%s2820_s20 + $0x288] sm:$0xff] }
  0x3d   : > { %v1053_v16 = vsel %vm797_vm11, %v669_v1, %v925_v9  ;;  %v658_v17 = vadd.f32 %v2857_v56, %v488_v10  ;;  %v498_v18 = vmul.f32 %v2849_v51, %v328_v60  ;;  %v505_v19 = vmul.f32 %v2838_v45, %v335_v61  ;;  %v2652_v54 = vld [vmem:[%s3486_s3 + $0x128] sm:$0xff]  }
  0x3e   : > { %1761 = vmatprep.mubr.bf16.mxu0 %v1147_v12  ;;  %v1149_v20 = vpack.c.bf16 %v1053_v16, %v1045_v13  ;;  %v666_v21 = vadd.f32 %v2857_v56, %v496_v14  ;;  %v660_v22 = vadd.f32 %v2860_v58, %v490_v15  ;;  %v513_v24 = vmul.f32 %v2838_v45, %v343_v2  ;;  %v2653_v60 = vld [vmem:[%s3486_s3 + $0x1e8] sm:$0xff]  }
  0x3f   : > { %vm786_vm12 = vcmp.gt.f32.partialorder %v658_v17, 0.0  ;;  %v914_v25 = vmul.f32 0.2, %v658_v17  ;;  %v668_v26 = vadd.f32 %v2860_v58, %v498_v18  ;;  %v675_v27 = vadd.f32 %v2851_v52, %v505_v19  ;;  %2474 = vmatpush3.bf16.msra.mxu0 %v2652_v54  ;;  %v2654_v5 = vld [vmem:[%s3486_s3 + $0x1a8] sm:$0xff]   ;;  %2537 = vmatprep.subr.bf16.mxu1 %v2653_v60  ;;  %v361_v18 = vld [vmem:[%s2820_s20 + $0x2d8] sm:$0xff] }
  0x40   : > { %1858 = vmatprep.mubr.bf16.mxu1 %v1149_v20  ;;  %vm794_vm13 = vcmp.gt.f32.partialorder %v666_v21, 0.0  ;;  %v922_v30 = vmul.f32 0.2, %v666_v21  ;;  %vm788_vm14 = vcmp.gt.f32.partialorder %v660_v22, 0.0  ;;  %v916_v31 = vmul.f32 0.2, %v660_v22  ;;  %2538 = vmatpush3.bf16.msra.mxu1 %v2654_v5 }
  0x41   : > { %v1042_v35 = vsel %vm786_vm12, %v658_v17, %v914_v25  ;;  %vm796_vm15 = vcmp.gt.f32.partialorder %v668_v26, 0.0  ;;  %v924_v36 = vmul.f32 0.2, %v668_v26  ;;  %v683_v37 = vadd.f32 %v2851_v52, %v513_v24  ;;  %v359_v13 = vld [vmem:[%s2820_s20 + $0x2c8] sm:$0xff]  ;;  %v353_v17 = vld [vmem:[%s2820_s20 + $0x298] sm:$0xff]  ;;  %v350_v25 = vld [vmem:[%s2820_s20 + $0x280] sm:$0xff] }
  0x42   : > { %v1050_v41 = vsel %vm794_vm13, %v666_v21, %v922_v30  ;;  %v1044_v46 = vsel %vm788_vm14, %v660_v22, %v916_v31  ;;  %vm803_vm0 = vcmp.gt.f32.partialorder %v675_v27, 0.0  ;;  %v931_v47 = vmul.f32 0.2, %v675_v27  ;;  %v2655_v31 = vld [vmem:[%s3486_s3 + $0x170] sm:$0xff]  }
  0x43   : > { %v1146_v55 = vpack.c.bf16 %v1050_v41, %v1042_v35  ;;  %v1052_v57 = vsel %vm796_vm15, %v668_v26, %v924_v36  ;;  %vm811_vm1 = vcmp.gt.f32.partialorder %v683_v37, 0.0  ;;  %v939_v59 = vmul.f32 0.2, %v683_v37  ;;  %v358_v26 = vld [vmem:[%s2820_s20 + $0x2c0] sm:$0xff]  ;;  %v2657_v36 = vld [vmem:[%s3486_s3 + $0x1f0] sm:$0xff]   ;;  %2475 = vmatprep.subr.bf16.mxu0 %v2655_v31 }
  0x44   : > { %v1148_v61 = vpack.c.bf16 %v1052_v57, %v1044_v46  ;;  %v1059_v62 = vsel %vm803_vm0, %v675_v27, %v931_v47  ;;  %v507_v63 = vmul.f32 %v2845_v49, %v337_v28  ;;  %v515_v0 = vmul.f32 %v2845_v49, %v345_v29  ;;  %2539 = vmatprep.subr.bf16.mxu1 %v2657_v36 }
  0x45   : > { %1762 = vmatmul.mubr.bf16.gmra.mrb[12].mxu0 %v1146_v55  ;;  %v1067_v1 = vsel %vm811_vm1, %v683_v37, %v939_v59  ;;  %v504_v2 = vmul.f32 %v2847_v50, %v334_v32  ;;  %v512_v3 = vmul.f32 %v2847_v50, %v342_v33  ;;  %v506_v4 = vmul.f32 %v2849_v51, %v336_v34  ;;  %v2656_v32 = vld [vmem:[%s3486_s3 + $0x130] sm:$0xff]  }
  0x46   : > { %1859 = vmatmul.mubr.bf16.gmra.mrb[12].mxu1 %v1148_v61  ;;  %v1155_v6 = vpack.c.bf16 %v1067_v1, %v1059_v62  ;;  %v677_v7 = vadd.f32 %v2853_v53, %v507_v63  ;;  %v685_v8 = vadd.f32 %v2853_v53, %v515_v0  ;;  %v514_v9 = vmul.f32 %v2849_v51, %v344_v39  ;;  %v2658_v55 = vld [vmem:[%s3486_s3 + $0x1b0] sm:$0xff]  }
  0x47   : > { %v674_v10 = vadd.f32 %v2857_v56, %v504_v2  ;;  %v682_v11 = vadd.f32 %v2857_v56, %v512_v3  ;;  %v676_v12 = vadd.f32 %v2860_v58, %v506_v4  ;;  %v521_v14 = vmul.f32 %v2838_v45, %v351_v48  ;;  %v352_v0 = vld [vmem:[%s2820_s20 + $0x290] sm:$0xff]  ;;  %v367_v2 = vld [vmem:[%s2820_s20 + $0x308] sm:$0xff]  ;;  %2476 = vmatpush3.bf16.msra.mxu0 %v2656_v32 }
  0x48   : > { %1769 = vmatprep.mubr.bf16.mxu0 %v1155_v6  ;;  %vm805_vm2 = vcmp.gt.f32.partialorder %v677_v7, 0.0  ;;  %vm813_vm3 = vcmp.gt.f32.partialorder %v685_v8, 0.0  ;;  %v933_v15 = vmul.f32 0.2, %v677_v7  ;;  %v941_v16 = vmul.f32 0.2, %v685_v8  ;;  %2540 = vmatpush3.bf16.msra.mxu1 %v2658_v55 }
  0x49   : > { %vm802_vm4 = vcmp.gt.f32.partialorder %v674_v10, 0.0  ;;  %vm810_vm5 = vcmp.gt.f32.partialorder %v682_v11, 0.0  ;;  %v930_v19 = vmul.f32 0.2, %v674_v10  ;;  %v938_v20 = vmul.f32 0.2, %v682_v11 }
  0x4a   : > { %v1061_v21 = vsel %vm805_vm2, %v677_v7, %v933_v15  ;;  %v1069_v22 = vsel %vm813_vm3, %v685_v8, %v941_v16  ;;  %v684_v24 = vadd.f32 %v2860_v58, %v514_v9  ;;  %vm804_vm6 = vcmp.gt.f32.partialorder %v676_v12, 0.0  ;;  %v360_v1 = vld [vmem:[%s2820_s20 + $0x2d0] sm:$0xff]  ;;  %v375_v6 = vld [vmem:[%s2820_s20 + $0x348] sm:$0xff]  ;;  %v369_v7 = vld [vmem:[%s2820_s20 + $0x318] sm:$0xff] }
  0x4b   : > { %v1157_v27 = vpack.c.bf16 %v1069_v22, %v1061_v21  ;;  %v1058_v28 = vsel %vm802_vm4, %v674_v10, %v930_v19  ;;  %v1066_v29 = vsel %vm810_vm5, %v682_v11, %v938_v20  ;;  %v932_v30 = vmul.f32 0.2, %v676_v12  ;;  %v2659_v8 = vld [vmem:[%s3486_s3 + $0x178] sm:$0xff]   ;;  %v368_v55 = vld [vmem:[%s2820_s20 + $0x310] sm:$0xff] }
  0x4c   : > { %v1154_v33 = vpack.c.bf16 %v1066_v29, %v1058_v28  ;;  %vm812_vm7 = vcmp.gt.f32.partialorder %v684_v24, 0.0  ;;  %v940_v34 = vmul.f32 0.2, %v684_v24  ;;  %v529_v35 = vmul.f32 %v2838_v45, %v359_v13  ;;  %v377_v11 = vld [vmem:[%s2820_s20 + $0x358] sm:$0xff]  ;;  %2477 = vmatprep.subr.bf16.mxu0 %v2659_v8 }
  0x4d   : > { %1866 = vmatprep.mubr.bf16.mxu1 %v1157_v27  ;;  %v1060_v37 = vsel %vm804_vm6, %v676_v12, %v932_v30  ;;  %v691_v39 = vadd.f32 %v2851_v52, %v521_v14  ;;  %v523_v40 = vmul.f32 %v2845_v49, %v353_v17  ;;  %v531_v41 = vmul.f32 %v2845_v49, %v361_v18  ;;  %v2660_v15 = vld [vmem:[%s3486_s3 + $0x138] sm:$0xff]  }
  0x4e   : > { %1770 = vmatmul.mubr.bf16.gmra.mrb[16].mxu0 %v1154_v33  ;;  %v1068_v46 = vsel %vm812_vm7, %v684_v24, %v940_v34  ;;  %v699_v47 = vadd.f32 %v2851_v52, %v529_v35  ;;  %v520_v48 = vmul.f32 %v2847_v50, %v350_v25  ;;  %v528_v54 = vmul.f32 %v2847_v50, %v358_v26  ;;  %v2661_v25 = vld [vmem:[%s3486_s3 + $0x1f8] sm:$0xff]   ;;  %v366_v35 = vld [vmem:[%s2820_s20 + $0x300] sm:$0xff] }
  0x4f   : > { %v1156_v57 = vpack.c.bf16 %v1068_v46, %v1060_v37  ;;  %vm819_vm8 = vcmp.gt.f32.partialorder %v691_v39, 0.0  ;;  %v947_v59 = vmul.f32 0.2, %v691_v39  ;;  %v693_v60 = vadd.f32 %v2853_v53, %v523_v40  ;;  %2478 = vmatpush3.bf16.msra.mxu0 %v2660_v15  ;;  %v2662_v30 = vld [vmem:[%s3486_s3 + $0x1b8] sm:$0xff]   ;;  %2541 = vmatprep.subr.bf16.mxu1 %v2661_v25 }
  0x50   : > { %vm827_vm9 = vcmp.gt.f32.partialorder %v699_v47, 0.0  ;;  %v955_v61 = vmul.f32 0.2, %v699_v47  ;;  %v701_v62 = vadd.f32 %v2853_v53, %v531_v41  ;;  %v690_v63 = vadd.f32 %v2857_v56, %v520_v48  ;;  %2542 = vmatpush3.bf16.msra.mxu1 %v2662_v30 }
  0x51   : > { %1867 = vmatmul.mubr.bf16.gmra.mrb[16].mxu1 %v1156_v57  ;;  %v1075_v3 = vsel %vm819_vm8, %v691_v39, %v947_v59  ;;  %vm821_vm10 = vcmp.gt.f32.partialorder %v693_v60, 0.0  ;;  %v949_v4 = vmul.f32 0.2, %v693_v60  ;;  %v698_v5 = vadd.f32 %v2857_v56, %v528_v54  ;;  %v374_v54 = vld [vmem:[%s2820_s20 + $0x340] sm:$0xff] }
  0x52   : > { %v1083_v9 = vsel %vm827_vm9, %v699_v47, %v955_v61  ;;  %vm829_vm11 = vcmp.gt.f32.partialorder %v701_v62, 0.0  ;;  %v957_v10 = vmul.f32 0.2, %v701_v62  ;;  %vm818_vm12 = vcmp.gt.f32.partialorder %v690_v63, 0.0 }
  0x53   : > { %v1163_v12 = vpack.c.bf16 %v1083_v9, %v1075_v3  ;;  %v1077_v13 = vsel %vm821_vm10, %v693_v60, %v949_v4  ;;  %vm826_vm13 = vcmp.gt.f32.partialorder %v698_v5, 0.0  ;;  %v946_v14 = vmul.f32 0.2, %v690_v63 }
  0x54   : > { %v1085_v16 = vsel %vm829_vm11, %v701_v62, %v957_v10  ;;  %v954_v17 = vmul.f32 0.2, %v698_v5  ;;  %v522_v18 = vmul.f32 %v2849_v51, %v352_v0  ;;  %v530_v19 = vmul.f32 %v2849_v51, %v360_v1  ;;  %v376_v62 = vld [vmem:[%s2820_s20 + $0x350] sm:$0xff]  ;;  %v391_v0 = vld [vmem:[%s2820_s20 + $0x3c8] sm:$0xff] }
  0x55   : > { %1777 = vmatprep.mubr.bf16.mxu0 %v1163_v12  ;;  %v1165_v20 = vpack.c.bf16 %v1085_v16, %v1077_v13  ;;  %v1074_v21 = vsel %vm818_vm12, %v690_v63, %v946_v14  ;;  %v537_v22 = vmul.f32 %v2838_v45, %v367_v2  ;;  %v545_v24 = vmul.f32 %v2838_v45, %v375_v6  ;;  %v383_v63 = vld [vmem:[%s2820_s20 + $0x388] sm:$0xff] }
  0x56   : > { %v1082_v26 = vsel %vm826_vm13, %v698_v5, %v954_v17  ;;  %v692_v27 = vadd.f32 %v2860_v58, %v522_v18  ;;  %v700_v28 = vadd.f32 %v2860_v58, %v530_v19  ;;  %v539_v29 = vmul.f32 %v2845_v49, %v369_v7 }
  0x57   : > { %1874 = vmatprep.mubr.bf16.mxu1 %v1165_v20  ;;  %v1162_v31 = vpack.c.bf16 %v1082_v26, %v1074_v21  ;;  %v707_v32 = vadd.f32 %v2851_v52, %v537_v22  ;;  %v715_v33 = vadd.f32 %v2851_v52, %v545_v24  ;;  %v547_v34 = vmul.f32 %v2845_v49, %v377_v11  ;;  %v393_v21 = vld [vmem:[%s2820_s20 + $0x3d8] sm:$0xff]  ;;  %v382_v22 = vld [vmem:[%s2820_s20 + $0x380] sm:$0xff] }
  0x58   : > { %vm820_vm14 = vcmp.gt.f32.partialorder %v692_v27, 0.0  ;;  %vm828_vm15 = vcmp.gt.f32.partialorder %v700_v28, 0.0  ;;  %v948_v36 = vmul.f32 0.2, %v692_v27  ;;  %v956_v37 = vmul.f32 0.2, %v700_v28 }
  0x59   : > { %1778 = vmatmul.mubr.bf16.gmra.mrb[20].mxu0 %v1162_v31  ;;  %vm835_vm0 = vcmp.gt.f32.partialorder %v707_v32, 0.0  ;;  %vm843_vm1 = vcmp.gt.f32.partialorder %v715_v33, 0.0  ;;  %v963_v39 = vmul.f32 0.2, %v707_v32  ;;  %v971_v40 = vmul.f32 0.2, %v715_v33 }
  0x5a   : > { %v1076_v41 = vsel %vm820_vm14, %v692_v27, %v948_v36  ;;  %v1084_v46 = vsel %vm828_vm15, %v700_v28, %v956_v37  ;;  %v709_v47 = vadd.f32 %v2853_v53, %v539_v29  ;;  %v717_v48 = vadd.f32 %v2853_v53, %v547_v34  ;;  %v390_v28 = vld [vmem:[%s2820_s20 + $0x3c0] sm:$0xff]  ;;  %v384_v29 = vld [vmem:[%s2820_s20 + $0x390] sm:$0xff] }
  0x5b   : > { %v1164_v57 = vpack.c.bf16 %v1084_v46, %v1076_v41  ;;  %v1091_v59 = vsel %vm835_vm0, %v707_v32, %v963_v39  ;;  %v1099_v60 = vsel %vm843_vm1, %v715_v33, %v971_v40  ;;  %v536_v61 = vmul.f32 %v2847_v50, %v366_v35 }
  0x5c   : > { %v1171_v1 = vpack.c.bf16 %v1099_v60, %v1091_v59  ;;  %vm837_vm2 = vcmp.gt.f32.partialorder %v709_v47, 0.0  ;;  %vm845_vm3 = vcmp.gt.f32.partialorder %v717_v48, 0.0  ;;  %v965_v2 = vmul.f32 0.2, %v709_v47  ;;  %v275_v60 = vld [vmem:[%s2820_s20 + $0x28] sm:$0xff] }
  0x5d   : > { %1875 = vmatmul.mubr.bf16.gmra.mrb[20].mxu1 %v1164_v57  ;;  %v973_v3 = vmul.f32 0.2, %v717_v48  ;;  %v544_v4 = vmul.f32 %v2847_v50, %v374_v54  ;;  %v706_v5 = vadd.f32 %v2857_v56, %v536_v61  ;;  %v538_v6 = vmul.f32 %v2849_v51, %v368_v55 }
  0x5e   : > { %1785 = vmatprep.mubr.bf16.mxu0 %v1171_v1  ;;  %v1093_v7 = vsel %vm837_vm2, %v709_v47, %v965_v2  ;;  %v546_v8 = vmul.f32 %v2849_v51, %v376_v62  ;;  %v553_v9 = vmul.f32 %v2838_v45, %v383_v63  ;;  %v561_v10 = vmul.f32 %v2838_v45, %v391_v0  ;;  %v385_v45 = vld [vmem:[%s2820_s20 + $0x398] sm:$0xff]  ;;  %v283_v2 = vld [vmem:[%s2820_s20 + $0x68] sm:$0xff] }
  0x5f   : > { %v1101_v11 = vsel %vm845_vm3, %v717_v48, %v973_v3  ;;  %v714_v12 = vadd.f32 %v2857_v56, %v544_v4  ;;  %vm834_vm4 = vcmp.gt.f32.partialorder %v706_v5, 0.0  ;;  %v962_v13 = vmul.f32 0.2, %v706_v5 }
  0x60   : > { %v1173_v14 = vpack.c.bf16 %v1101_v11, %v1093_v7  ;;  %v708_v15 = vadd.f32 %v2860_v58, %v538_v6  ;;  %v716_v16 = vadd.f32 %v2860_v58, %v546_v8  ;;  %v723_v17 = vadd.f32 %v2851_v52, %v553_v9 }
  0x61   : > { %vm842_vm5 = vcmp.gt.f32.partialorder %v714_v12, 0.0  ;;  %v970_v18 = vmul.f32 0.2, %v714_v12  ;;  %v1090_v19 = vsel %vm834_vm4, %v706_v5, %v962_v13  ;;  %v731_v20 = vadd.f32 %v2851_v52, %v561_v10  ;;  %v392_v52 = vld [vmem:[%s2820_s20 + $0x3d0] sm:$0xff]  ;;  %v277_v10 = vld [vmem:[%s2820_s20 + $0x38] sm:$0xff] }
  0x62   : > { %1882 = vmatprep.mubr.bf16.mxu1 %v1173_v14  ;;  %vm836_vm6 = vcmp.gt.f32.partialorder %v708_v15, 0.0  ;;  %vm844_vm7 = vcmp.gt.f32.partialorder %v716_v16, 0.0  ;;  %v964_v24 = vmul.f32 0.2, %v708_v15  ;;  %v972_v25 = vmul.f32 0.2, %v716_v16 }
  0x63   : > { %v1098_v26 = vsel %vm842_vm5, %v714_v12, %v970_v18  ;;  %vm851_vm8 = vcmp.gt.f32.partialorder %v723_v17, 0.0  ;;  %vm859_vm9 = vcmp.gt.f32.partialorder %v731_v20, 0.0  ;;  %v979_v27 = vmul.f32 0.2, %v723_v17  ;;  %v285_v14 = vld [vmem:[%s2820_s20 + $0x78] sm:$0xff] }
  0x64   : > { %v1170_v30 = vpack.c.bf16 %v1098_v26, %v1090_v19  ;;  %v1092_v31 = vsel %vm836_vm6, %v708_v15, %v964_v24  ;;  %v1100_v32 = vsel %vm844_vm7, %v716_v16, %v972_v25  ;;  %v987_v33 = vmul.f32 0.2, %v731_v20  ;;  %v274_v16 = vld [vmem:[%s2820_s20 + $0x20] sm:$0xff] }
  0x65   : > { %v1172_v34 = vpack.c.bf16 %v1100_v32, %v1092_v31  ;;  %v1107_v35 = vsel %vm851_vm8, %v723_v17, %v979_v27  ;;  %v555_v36 = vmul.f32 %v2845_v49, %v385_v45  ;;  %v563_v37 = vmul.f32 %v2845_v49, %v393_v21  ;;  %v282_v17 = vld [vmem:[%s2820_s20 + $0x60] sm:$0xff]  ;;  %v276_v27 = vld [vmem:[%s2820_s20 + $0x30] sm:$0xff] }
  0x66   : > { %1786 = vmatmul.mubr.bf16.gmra.mrb[24].mxu0 %v1170_v30  ;;  %v1115_v39 = vsel %vm859_vm9, %v731_v20, %v987_v33  ;;  %v552_v40 = vmul.f32 %v2847_v50, %v382_v22  ;;  %v560_v41 = vmul.f32 %v2847_v50, %v390_v28  ;;  %v554_v46 = vmul.f32 %v2849_v51, %v384_v29  ;;  %v2663_v50 = vld [vmem:[%s3484_s1] sm:$0xff]  ;;  %v284_v28 = vld [vmem:[%s2820_s20 + $0x70] sm:$0xff] }
  0x67   : > { %1883 = vmatmul.mubr.bf16.gmra.mrb[24].mxu1 %v1172_v34  ;;  %v1179_v47 = vpack.c.bf16 %v1115_v39, %v1107_v35  ;;  %v725_v48 = vadd.f32 %v2853_v53, %v555_v36  ;;  %v733_v54 = vadd.f32 %v2853_v53, %v563_v37  ;;  %v562_v55 = vmul.f32 %v2849_v51, %v392_v52  ;;  %v291_v39 = vld [vmem:[%s2820_s20 + $0xa8] sm:$0xff] }
  0x68   : > { %v722_v57 = vadd.f32 %v2857_v56, %v552_v40  ;;  %v730_v49 = vadd.f32 %v2857_v56, %v560_v41  ;;  %v724_v59 = vadd.f32 %v2860_v58, %v554_v46  ;;  %v3159_v61 = vrot.slane %v2663_v50, %v422_v38  ;;  %v299_v46 = vld [vmem:[%s2820_s20 + $0xe8] sm:$0xff] }
  0x69   : > { %1793 = vmatprep.mubr.bf16.mxu0 %v1179_v47  ;;  %vm853_vm10 = vcmp.gt.f32.partialorder %v725_v48, 0.0  ;;  %vm861_vm11 = vcmp.gt.f32.partialorder %v733_v54, 0.0  ;;  %v981_v51 = vmul.f32 0.2, %v725_v48  ;;  %v989_v53 = vmul.f32 0.2, %v733_v54 }
  0x6a   : > { %vm850_vm12 = vcmp.gt.f32.partialorder %v722_v57, 0.0  ;;  %vm858_vm13 = vcmp.gt.f32.partialorder %v730_v49, 0.0  ;;  %v978_v56 = vmul.f32 0.2, %v722_v57  ;;  %v986_v62 = vmul.f32 0.2, %v730_v49 }
  0x6b   : > { %v1109_v63 = vsel %vm853_vm10, %v725_v48, %v981_v51  ;;  %v1117_v0 = vsel %vm861_vm11, %v733_v54, %v989_v53  ;;  %v732_v1 = vadd.f32 %v2860_v58, %v562_v55  ;;  %vm852_vm14 = vcmp.gt.f32.partialorder %v724_v59, 0.0  ;;  %v2664_v58 = vld [vmem:[%s3485_s2] sm:$0xff]  ;;  %v293_v47 = vld [vmem:[%s2820_s20 + $0xb8] sm:$0xff] }
  0x6c   : > { %v1181_v3 = vpack.c.bf16 %v1117_v0, %v1109_v63  ;;  %v1106_v4 = vsel %vm850_vm12, %v722_v57, %v978_v56  ;;  %v1114_v5 = vsel %vm858_vm13, %v730_v49, %v986_v62  ;;  %v980_v6 = vmul.f32 0.2, %v724_v59 }
  0x6d   : > { %v1178_v7 = vpack.c.bf16 %v1114_v5, %v1106_v4  ;;  %vm860_vm15 = vcmp.gt.f32.partialorder %v732_v1, 0.0  ;;  %v988_v8 = vmul.f32 0.2, %v732_v1  ;;  %v445_v9 = vmul.f32 %v3159_v61, %v275_v60  ;;  %v301_v60 = vld [vmem:[%s2820_s20 + $0xf8] sm:$0xff]  ;;  %v290_v4 = vld [vmem:[%s2820_s20 + $0xa0] sm:$0xff] }
  0x6e   : > { %1890 = vmatprep.mubr.bf16.mxu1 %v1181_v3  ;;  %v1108_v11 = vsel %vm852_vm14, %v724_v59, %v980_v6  ;;  %v453_v12 = vmul.f32 %v3159_v61, %v283_v2  ;;  %v3171_v13 = vrot.slane %v2664_v58, %v422_v38  ;;  %v3176_v15 = vrot.slane %v2663_v50, %v430_v42 }
  0x6f   : > { %1794 = vmatmul.mubr.bf16.gmra.mrb[28].mxu0 %v1178_v7  ;;  %v1116_v18 = vsel %vm860_vm15, %v732_v1, %v988_v8  ;;  %v3182_v19 = vrot.slane %v2664_v58, %v430_v42  ;;  %v3186_v20 = vrot.slane %v2663_v50, %v418_v43  ;;  %v3190_v38 = vrot.slane %v2664_v58, %v418_v43 }
  0x70   : > { %v1180_v45 = vpack.c.bf16 %v1116_v18, %v1108_v11  ;;  %v615_v21 = vadd.f32 %v3171_v13, %v445_v9  ;;  %v623_v22 = vadd.f32 %v3171_v13, %v453_v12  ;;  %v447_v24 = vmul.f32 %v3176_v15, %v277_v10 }
  0x71   : > { %v455_v25 = vmul.f32 %v3176_v15, %v285_v14  ;;  %v444_v42 = vmul.f32 %v3186_v20, %v274_v16  ;;  %v452_v26 = vmul.f32 %v3186_v20, %v282_v17  ;;  %v3202_v43 = vrot.slane %v2663_v50, %v426_v44  ;;  %v292_v14 = vld [vmem:[%s2820_s20 + $0xb0] sm:$0xff] }
  0x72   : > { %1891 = vmatmul.mubr.bf16.gmra.mrb[28].mxu1 %v1180_v45  ;;  %vm743_vm0 = vcmp.gt.f32.partialorder %v615_v21, 0.0  ;;  %vm751_vm1 = vcmp.gt.f32.partialorder %v623_v22, 0.0  ;;  %v871_v29 = vmul.f32 0.2, %v615_v21  ;;  %v879_v30 = vmul.f32 0.2, %v623_v22 }
  0x73   : > { %v617_v31 = vadd.f32 %v3182_v19, %v447_v24  ;;  %v625_v32 = vadd.f32 %v3182_v19, %v455_v25  ;;  %v614_v33 = vadd.f32 %v3190_v38, %v444_v42  ;;  %v622_v52 = vadd.f32 %v3190_v38, %v452_v26  ;;  %v315_v24 = vld [vmem:[%s2820_s20 + $0x168] sm:$0xff] }
  0x74   : > { %v999_v34 = vsel %vm743_vm0, %v615_v21, %v871_v29  ;;  %v1007_v35 = vsel %vm751_vm1, %v623_v22, %v879_v30  ;;  %v446_v36 = vmul.f32 %v3202_v43, %v276_v27  ;;  %v454_v37 = vmul.f32 %v3202_v43, %v284_v28  ;;  %v300_v21 = vld [vmem:[%s2820_s20 + $0xf0] sm:$0xff]  ;;  %v307_v22 = vld [vmem:[%s2820_s20 + $0x128] sm:$0xff] }
  0x75   : > { %v1127_v40 = vpack.c.bf16 %v1007_v35, %v999_v34  ;;  %vm745_vm2 = vcmp.gt.f32.partialorder %v617_v31, 0.0  ;;  %vm753_vm3 = vcmp.gt.f32.partialorder %v625_v32, 0.0  ;;  %v873_v41 = vmul.f32 0.2, %v617_v31 }
  0x76   : > { %v881_v48 = vmul.f32 0.2, %v625_v32  ;;  %vm742_vm4 = vcmp.gt.f32.partialorder %v614_v33, 0.0  ;;  %vm750_vm5 = vcmp.gt.f32.partialorder %v622_v52, 0.0  ;;  %v870_v54 = vmul.f32 0.2, %v614_v33 }
  0x77   : > { %1931 = vmatprep.mubr.bf16.mxu0 %v1127_v40  ;;  %v1001_v55 = vsel %vm745_vm2, %v617_v31, %v873_v41  ;;  %v878_v57 = vmul.f32 0.2, %v622_v52  ;;  %v3215_v49 = vrot.slane %v2664_v58, %v426_v44  ;;  %v461_v59 = vmul.f32 %v3159_v61, %v291_v39  ;;  %v298_v58 = vld [vmem:[%s2820_s20 + $0xe0] sm:$0xff] }
  0x78   : > { %v1009_v50 = vsel %vm753_vm3, %v625_v32, %v881_v48  ;;  %v998_v51 = vsel %vm742_vm4, %v614_v33, %v870_v54  ;;  %v469_v53 = vmul.f32 %v3159_v61, %v299_v46  ;;  %v463_v56 = vmul.f32 %v3176_v15, %v293_v47  ;;  %v309_v48 = vld [vmem:[%s2820_s20 + $0x138] sm:$0xff] }
  0x79   : > { %v1129_v62 = vpack.c.bf16 %v1009_v50, %v1001_v55  ;;  %v1006_v63 = vsel %vm750_vm5, %v622_v52, %v878_v57  ;;  %v616_v0 = vadd.f32 %v3215_v49, %v446_v36  ;;  %v624_v1 = vadd.f32 %v3215_v49, %v454_v37  ;;  %v317_v54 = vld [vmem:[%s2820_s20 + $0x178] sm:$0xff]  ;;  %v306_v55 = vld [vmem:[%s2820_s20 + $0x120] sm:$0xff] }
  0x7a   : > { %v1126_v2 = vpack.c.bf16 %v1006_v63, %v998_v51  ;;  %v631_v23 = vadd.f32 %v3171_v13, %v461_v59  ;;  %v639_v44 = vadd.f32 %v3171_v13, %v469_v53  ;;  %v471_v3 = vmul.f32 %v3176_v15, %v301_v60  ;;  %v314_v51 = vld [vmem:[%s2820_s20 + $0x160] sm:$0xff]  ;;  %v308_v53 = vld [vmem:[%s2820_s20 + $0x130] sm:$0xff] }
  0x7b   : > { %2028 = vmatprep.mubr.bf16.mxu1 %v1129_v62  ;;  %vm744_vm6 = vcmp.gt.f32.partialorder %v616_v0, 0.0  ;;  %vm752_vm7 = vcmp.gt.f32.partialorder %v624_v1, 0.0  ;;  %v872_v5 = vmul.f32 0.2, %v616_v0  ;;  %v880_v6 = vmul.f32 0.2, %v624_v1 }
  0x7c   : > { %1932 = vmatmul.mubr.bf16.vlgmr.msra.gmra.mrb[32].mxu0 %v1126_v2  ;;  %vm759_vm8 = vcmp.gt.f32.partialorder %v631_v23, 0.0  ;;  %vm767_vm9 = vcmp.gt.f32.partialorder %v639_v44, 0.0  ;;  %v887_v7 = vmul.f32 0.2, %v631_v23  ;;  %v895_v8 = vmul.f32 0.2, %v639_v44 }
  0x7d   : > { %v1000_v9 = vsel %vm744_vm6, %v616_v0, %v872_v5  ;;  %v1008_v10 = vsel %vm752_vm7, %v624_v1, %v880_v6  ;;  %v633_v11 = vadd.f32 %v3182_v19, %v463_v56  ;;  %v641_v12 = vadd.f32 %v3182_v19, %v471_v3  ;;  %v316_v1 = vld [vmem:[%s2820_s20 + $0x170] sm:$0xff] }
  0x7e   : > { %v1128_v16 = vpack.c.bf16 %v1008_v10, %v1000_v9  ;;  %v1015_v17 = vsel %vm759_vm8, %v631_v23, %v887_v7  ;;  %v1023_v18 = vsel %vm767_vm9, %v639_v44, %v895_v8  ;;  %v460_v45 = vmul.f32 %v3186_v20, %v290_v4  ;;  %v323_v4 = vld [vmem:[%s2820_s20 + $0x1a8] sm:$0xff] }
  0x7f   : > { %v1135_v25 = vpack.c.bf16 %v1023_v18, %v1015_v17  ;;  %vm761_vm10 = vcmp.gt.f32.partialorder %v633_v11, 0.0  ;;  %vm769_vm11 = vcmp.gt.f32.partialorder %v641_v12, 0.0  ;;  %v889_v42 = vmul.f32 0.2, %v633_v11  ;;  %v331_v17 = vld [vmem:[%s2820_s20 + $0x1e8] sm:$0xff] }
  0x80   : > { %2029 = vmatmul.mubr.bf16.vlgmr.msra.gmra.mrb[32].mxu1 %v1128_v16  ;;  %v897_v26 = vmul.f32 0.2, %v641_v12  ;;  %v468_v27 = vmul.f32 %v3186_v20, %v298_v58  ;;  %v630_v28 = vadd.f32 %v3190_v38, %v460_v45  ;;  %v462_v29 = vmul.f32 %v3202_v43, %v292_v14 }
  0x81   : > { %1939 = vmatprep.mubr.bf16.mxu0 %v1135_v25  ;;  %v1017_v30 = vsel %vm761_vm10, %v633_v11, %v889_v42  ;;  %v470_v31 = vmul.f32 %v3202_v43, %v300_v21  ;;  %v477_v32 = vmul.f32 %v3159_v61, %v307_v22  ;;  %v485_v33 = vmul.f32 %v3159_v61, %v315_v24 }
  0x82   : > { %v1025_v52 = vsel %vm769_vm11, %v641_v12, %v897_v26  ;;  %v638_v34 = vadd.f32 %v3190_v38, %v468_v27  ;;  %vm758_vm12 = vcmp.gt.f32.partialorder %v630_v28, 0.0  ;;  %v886_v35 = vmul.f32 0.2, %v630_v28  ;;  %v325_v27 = vld [vmem:[%s2820_s20 + $0x1b8] sm:$0xff] }
  0x83   : > { %v1137_v36 = vpack.c.bf16 %v1025_v52, %v1017_v30  ;;  %v632_v37 = vadd.f32 %v3215_v49, %v462_v29  ;;  %v640_v39 = vadd.f32 %v3215_v49, %v470_v31  ;;  %v647_v40 = vadd.f32 %v3171_v13, %v477_v32  ;;  %v330_v52 = vld [vmem:[%s2820_s20 + $0x1e0] sm:$0xff] }
  0x84   : > { %vm766_vm13 = vcmp.gt.f32.partialorder %v638_v34, 0.0  ;;  %v894_v41 = vmul.f32 0.2, %v638_v34  ;;  %v1014_v46 = vsel %vm758_vm12, %v630_v28, %v886_v35  ;;  %v655_v47 = vadd.f32 %v3171_v13, %v485_v33  ;;  %v333_v28 = vld [vmem:[%s2820_s20 + $0x1f8] sm:$0xff]  ;;  %v322_v33 = vld [vmem:[%s2820_s20 + $0x1a0] sm:$0xff] }
  0x85   : > { %2036 = vmatprep.mubr.bf16.mxu1 %v1137_v36  ;;  %vm760_vm14 = vcmp.gt.f32.partialorder %v632_v37, 0.0  ;;  %vm768_vm15 = vcmp.gt.f32.partialorder %v640_v39, 0.0  ;;  %v888_v57 = vmul.f32 0.2, %v632_v37  ;;  %v896_v59 = vmul.f32 0.2, %v640_v39 }
  0x86   : > { %v1022_v60 = vsel %vm766_vm13, %v638_v34, %v894_v41  ;;  %vm775_vm0 = vcmp.gt.f32.partialorder %v647_v40, 0.0  ;;  %vm783_vm1 = vcmp.gt.f32.partialorder %v655_v47, 0.0  ;;  %v903_v50 = vmul.f32 0.2, %v647_v40 }
  0x87   : > { %v1134_v56 = vpack.c.bf16 %v1022_v60, %v1014_v46  ;;  %v1016_v62 = vsel %vm760_vm14, %v632_v37, %v888_v57  ;;  %v1024_v63 = vsel %vm768_vm15, %v640_v39, %v896_v59  ;;  %v911_v0 = vmul.f32 0.2, %v655_v47 }
  0x88   : > { %v1136_v2 = vpack.c.bf16 %v1024_v63, %v1016_v62  ;;  %v1031_v23 = vsel %vm775_vm0, %v647_v40, %v903_v50  ;;  %v479_v44 = vmul.f32 %v3176_v15, %v309_v48  ;;  %v487_v3 = vmul.f32 %v3176_v15, %v317_v54  ;;  %v324_v63 = vld [vmem:[%s2820_s20 + $0x1b0] sm:$0xff] }
  0x89   : > { %1940 = vmatmul.mubr.bf16.gmra.mrb[36].mxu0 %v1134_v56  ;;  %v1039_v5 = vsel %vm783_vm1, %v655_v47, %v911_v0  ;;  %v476_v6 = vmul.f32 %v3186_v20, %v306_v55  ;;  %v484_v7 = vmul.f32 %v3186_v20, %v314_v51  ;;  %v478_v8 = vmul.f32 %v3202_v43, %v308_v53  ;;  %v332_v0 = vld [vmem:[%s2820_s20 + $0x1f0] sm:$0xff] }
  0x8a   : > { %2037 = vmatmul.mubr.bf16.gmra.mrb[36].mxu1 %v1136_v2  ;;  %v1143_v9 = vpack.c.bf16 %v1039_v5, %v1031_v23  ;;  %v649_v10 = vadd.f32 %v3182_v19, %v479_v44  ;;  %v657_v11 = vadd.f32 %v3182_v19, %v487_v3  ;;  %v486_v12 = vmul.f32 %v3202_v43, %v316_v1  ;;  %v339_v23 = vld [vmem:[%s2820_s20 + $0x228] sm:$0xff] }
  0x8b   : > { %v646_v58 = vadd.f32 %v3190_v38, %v476_v6  ;;  %v654_v14 = vadd.f32 %v3190_v38, %v484_v7  ;;  %v648_v16 = vadd.f32 %v3215_v49, %v478_v8  ;;  %v493_v18 = vmul.f32 %v3159_v61, %v323_v4  ;;  %v347_v44 = vld [vmem:[%s2820_s20 + $0x268] sm:$0xff]  ;;  %v341_v6 = vld [vmem:[%s2820_s20 + $0x238] sm:$0xff] }
  0x8c   : > { %1947 = vmatprep.mubr.bf16.mxu0 %v1143_v9  ;;  %vm777_vm2 = vcmp.gt.f32.partialorder %v649_v10, 0.0  ;;  %vm785_vm3 = vcmp.gt.f32.partialorder %v657_v11, 0.0  ;;  %v905_v45 = vmul.f32 0.2, %v649_v10  ;;  %v913_v21 = vmul.f32 0.2, %v657_v11 }
  0x8d   : > { %vm774_vm4 = vcmp.gt.f32.partialorder %v646_v58, 0.0  ;;  %vm782_vm5 = vcmp.gt.f32.partialorder %v654_v14, 0.0  ;;  %v902_v22 = vmul.f32 0.2, %v646_v58  ;;  %v910_v24 = vmul.f32 0.2, %v654_v14 }
  0x8e   : > { %v1033_v25 = vsel %vm777_vm2, %v649_v10, %v905_v45  ;;  %v1041_v42 = vsel %vm785_vm3, %v657_v11, %v913_v21  ;;  %v656_v26 = vadd.f32 %v3215_v49, %v486_v12  ;;  %vm776_vm6 = vcmp.gt.f32.partialorder %v648_v16, 0.0  ;;  %v349_v11 = vld [vmem:[%s2820_s20 + $0x278] sm:$0xff] }
  0x8f   : > { %v1145_v29 = vpack.c.bf16 %v1041_v42, %v1033_v25  ;;  %v1030_v30 = vsel %vm774_vm4, %v646_v58, %v902_v22  ;;  %v1038_v31 = vsel %vm782_vm5, %v654_v14, %v910_v24  ;;  %v904_v32 = vmul.f32 0.2, %v648_v16 }
  0x90   : > { %v1142_v34 = vpack.c.bf16 %v1038_v31, %v1030_v30  ;;  %vm784_vm7 = vcmp.gt.f32.partialorder %v656_v26, 0.0  ;;  %v912_v35 = vmul.f32 0.2, %v656_v26  ;;  %v501_v36 = vmul.f32 %v3159_v61, %v331_v17 }
  0x91   : > { %2044 = vmatprep.mubr.bf16.mxu1 %v1145_v29  ;;  %v1032_v37 = vsel %vm776_vm6, %v648_v16, %v904_v32  ;;  %v663_v39 = vadd.f32 %v3171_v13, %v493_v18  ;;  %v495_v40 = vmul.f32 %v3176_v15, %v325_v27  ;;  %v503_v41 = vmul.f32 %v3176_v15, %v333_v28 }
  0x92   : > { %1948 = vmatmul.mubr.bf16.gmra.mrb[40].mxu0 %v1142_v34  ;;  %v1040_v46 = vsel %vm784_vm7, %v656_v26, %v912_v35  ;;  %v671_v47 = vadd.f32 %v3171_v13, %v501_v36  ;;  %v492_v48 = vmul.f32 %v3186_v20, %v322_v33  ;;  %v500_v54 = vmul.f32 %v3186_v20, %v330_v52  ;;  %v338_v26 = vld [vmem:[%s2820_s20 + $0x220] sm:$0xff]  ;;  %v340_v35 = vld [vmem:[%s2820_s20 + $0x230] sm:$0xff] }
  0x93   : > { %v1144_v55 = vpack.c.bf16 %v1040_v46, %v1032_v37  ;;  %vm791_vm8 = vcmp.gt.f32.partialorder %v663_v39, 0.0  ;;  %v919_v57 = vmul.f32 0.2, %v663_v39  ;;  %v665_v59 = vadd.f32 %v3182_v19, %v495_v40  ;;  %v346_v34 = vld [vmem:[%s2820_s20 + $0x260] sm:$0xff]  ;;  %v355_v46 = vld [vmem:[%s2820_s20 + $0x2a8] sm:$0xff] }
  0x94   : > { %vm799_vm9 = vcmp.gt.f32.partialorder %v671_v47, 0.0  ;;  %v927_v60 = vmul.f32 0.2, %v671_v47  ;;  %v673_v50 = vadd.f32 %v3182_v19, %v503_v41  ;;  %v662_v51 = vadd.f32 %v3190_v38, %v492_v48  ;;  %v348_v41 = vld [vmem:[%s2820_s20 + $0x270] sm:$0xff] }
  0x95   : > { %2045 = vmatmul.mubr.bf16.gmra.mrb[40].mxu1 %v1144_v55  ;;  %v1047_v53 = vsel %vm791_vm8, %v663_v39, %v919_v57  ;;  %vm793_vm10 = vcmp.gt.f32.partialorder %v665_v59, 0.0  ;;  %v921_v56 = vmul.f32 0.2, %v665_v59  ;;  %v670_v62 = vadd.f32 %v3190_v38, %v500_v54 }
  0x96   : > { %v1055_v1 = vsel %vm799_vm9, %v671_v47, %v927_v60  ;;  %vm801_vm11 = vcmp.gt.f32.partialorder %v673_v50, 0.0  ;;  %v929_v2 = vmul.f32 0.2, %v673_v50  ;;  %vm790_vm12 = vcmp.gt.f32.partialorder %v662_v51, 0.0  ;;  %v363_v47 = vld [vmem:[%s2820_s20 + $0x2e8] sm:$0xff] }
  0x97   : > { %v1151_v3 = vpack.c.bf16 %v1055_v1, %v1047_v53  ;;  %v1049_v4 = vsel %vm793_vm10, %v665_v59, %v921_v56  ;;  %vm798_vm13 = vcmp.gt.f32.partialorder %v670_v62, 0.0  ;;  %v918_v5 = vmul.f32 0.2, %v662_v51 }
  0x98   : > { %v1057_v7 = vsel %vm801_vm11, %v673_v50, %v929_v2  ;;  %v926_v8 = vmul.f32 0.2, %v670_v62  ;;  %v494_v9 = vmul.f32 %v3202_v43, %v324_v63  ;;  %v502_v10 = vmul.f32 %v3202_v43, %v332_v0 }
  0x99   : > { %1955 = vmatprep.mubr.bf16.mxu0 %v1151_v3  ;;  %v1153_v12 = vpack.c.bf16 %v1057_v7, %v1049_v4  ;;  %v1046_v58 = vsel %vm790_vm12, %v662_v51, %v918_v5  ;;  %v509_v14 = vmul.f32 %v3159_v61, %v339_v23  ;;  %v517_v16 = vmul.f32 %v3159_v61, %v347_v44  ;;  %v365_v7 = vld [vmem:[%s2820_s20 + $0x2f8] sm:$0xff] }
  0x9a   : > { %v1054_v17 = vsel %vm798_vm13, %v670_v62, %v926_v8  ;;  %v664_v18 = vadd.f32 %v3215_v49, %v494_v9  ;;  %v672_v45 = vadd.f32 %v3215_v49, %v502_v10  ;;  %v511_v21 = vmul.f32 %v3176_v15, %v341_v6  ;;  %v357_v6 = vld [vmem:[%s2820_s20 + $0x2b8] sm:$0xff]  ;;  %v354_v8 = vld [vmem:[%s2820_s20 + $0x2a0] sm:$0xff] }
  0x9b   : > { %2052 = vmatprep.mubr.bf16.mxu1 %v1153_v12  ;;  %v1150_v22 = vpack.c.bf16 %v1054_v17, %v1046_v58  ;;  %v679_v24 = vadd.f32 %v3171_v13, %v509_v14  ;;  %v687_v25 = vadd.f32 %v3171_v13, %v517_v16  ;;  %v519_v42 = vmul.f32 %v3176_v15, %v349_v11  ;;  %v362_v58 = vld [vmem:[%s2820_s20 + $0x2e0] sm:$0xff]  ;;  %v356_v14 = vld [vmem:[%s2820_s20 + $0x2b0] sm:$0xff] }
  0x9c   : > { %vm792_vm14 = vcmp.gt.f32.partialorder %v664_v18, 0.0  ;;  %vm800_vm15 = vcmp.gt.f32.partialorder %v672_v45, 0.0  ;;  %v920_v27 = vmul.f32 0.2, %v664_v18  ;;  %v928_v28 = vmul.f32 0.2, %v672_v45 }
  0x9d   : > { %1956 = vmatmul.mubr.bf16.gmra.mrb[44].mxu0 %v1150_v22  ;;  %vm807_vm0 = vcmp.gt.f32.partialorder %v679_v24, 0.0  ;;  %vm815_vm1 = vcmp.gt.f32.partialorder %v687_v25, 0.0  ;;  %v935_v29 = vmul.f32 0.2, %v679_v24  ;;  %v943_v30 = vmul.f32 0.2, %v687_v25 }
  0x9e   : > { %v1048_v31 = vsel %vm792_vm14, %v664_v18, %v920_v27  ;;  %v1056_v32 = vsel %vm800_vm15, %v672_v45, %v928_v28  ;;  %v681_v33 = vadd.f32 %v3182_v19, %v511_v21  ;;  %v689_v52 = vadd.f32 %v3182_v19, %v519_v42  ;;  %v364_v21 = vld [vmem:[%s2820_s20 + $0x2f0] sm:$0xff] }
  0x9f   : > { %v1152_v36 = vpack.c.bf16 %v1056_v32, %v1048_v31  ;;  %v1063_v37 = vsel %vm807_vm0, %v679_v24, %v935_v29  ;;  %v1071_v39 = vsel %vm815_vm1, %v687_v25, %v943_v30  ;;  %v508_v40 = vmul.f32 %v3186_v20, %v338_v26  ;;  %v371_v26 = vld [vmem:[%s2820_s20 + $0x328] sm:$0xff] }
  0xa0   : > { %v1159_v48 = vpack.c.bf16 %v1071_v39, %v1063_v37  ;;  %vm809_vm2 = vcmp.gt.f32.partialorder %v681_v33, 0.0  ;;  %vm817_vm3 = vcmp.gt.f32.partialorder %v689_v52, 0.0  ;;  %v937_v54 = vmul.f32 0.2, %v681_v33  ;;  %v379_v37 = vld [vmem:[%s2820_s20 + $0x368] sm:$0xff] }
  0xa1   : > { %2053 = vmatmul.mubr.bf16.gmra.mrb[44].mxu1 %v1152_v36  ;;  %v945_v55 = vmul.f32 0.2, %v689_v52  ;;  %v516_v57 = vmul.f32 %v3186_v20, %v346_v34  ;;  %v678_v59 = vadd.f32 %v3190_v38, %v508_v40  ;;  %v510_v60 = vmul.f32 %v3202_v43, %v340_v35 }
  0xa2   : > { %1963 = vmatprep.mubr.bf16.mxu0 %v1159_v48  ;;  %v1065_v50 = vsel %vm809_vm2, %v681_v33, %v937_v54  ;;  %v518_v51 = vmul.f32 %v3202_v43, %v348_v41  ;;  %v525_v53 = vmul.f32 %v3159_v61, %v355_v46  ;;  %v533_v56 = vmul.f32 %v3159_v61, %v363_v47 }
  0xa3   : > { %v1073_v62 = vsel %vm817_vm3, %v689_v52, %v945_v55  ;;  %v686_v63 = vadd.f32 %v3190_v38, %v516_v57  ;;  %vm806_vm4 = vcmp.gt.f32.partialorder %v678_v59, 0.0  ;;  %v934_v0 = vmul.f32 0.2, %v678_v59  ;;  %v373_v57 = vld [vmem:[%s2820_s20 + $0x338] sm:$0xff] }
  0xa4   : > { %v1161_v1 = vpack.c.bf16 %v1073_v62, %v1065_v50  ;;  %v680_v2 = vadd.f32 %v3215_v49, %v510_v60  ;;  %v688_v23 = vadd.f32 %v3215_v49, %v518_v51  ;;  %v695_v44 = vadd.f32 %v3171_v13, %v525_v53  ;;  %v378_v62 = vld [vmem:[%s2820_s20 + $0x360] sm:$0xff] }
  0xa5   : > { %vm814_vm5 = vcmp.gt.f32.partialorder %v686_v63, 0.0  ;;  %v942_v3 = vmul.f32 0.2, %v686_v63  ;;  %v1062_v4 = vsel %vm806_vm4, %v678_v59, %v934_v0  ;;  %v703_v5 = vadd.f32 %v3171_v13, %v533_v56  ;;  %v381_v59 = vld [vmem:[%s2820_s20 + $0x378] sm:$0xff]  ;;  %v370_v56 = vld [vmem:[%s2820_s20 + $0x320] sm:$0xff] }
  0xa6   : > { %2060 = vmatprep.mubr.bf16.mxu1 %v1161_v1  ;;  %vm808_vm6 = vcmp.gt.f32.partialorder %v680_v2, 0.0  ;;  %vm816_vm7 = vcmp.gt.f32.partialorder %v688_v23, 0.0  ;;  %v936_v9 = vmul.f32 0.2, %v680_v2  ;;  %v944_v10 = vmul.f32 0.2, %v688_v23 }
  0xa7   : > { %v1070_v11 = vsel %vm814_vm5, %v686_v63, %v942_v3  ;;  %vm823_vm8 = vcmp.gt.f32.partialorder %v695_v44, 0.0  ;;  %vm831_vm9 = vcmp.gt.f32.partialorder %v703_v5, 0.0  ;;  %v951_v12 = vmul.f32 0.2, %v695_v44 }
  0xa8   : > { %v1158_v16 = vpack.c.bf16 %v1070_v11, %v1062_v4  ;;  %v1064_v17 = vsel %vm808_vm6, %v680_v2, %v936_v9  ;;  %v1072_v18 = vsel %vm816_vm7, %v688_v23, %v944_v10  ;;  %v959_v45 = vmul.f32 0.2, %v703_v5 }
  0xa9   : > { %v1160_v22 = vpack.c.bf16 %v1072_v18, %v1064_v17  ;;  %v1079_v24 = vsel %vm823_vm8, %v695_v44, %v951_v12  ;;  %v527_v25 = vmul.f32 %v3176_v15, %v357_v6  ;;  %v535_v42 = vmul.f32 %v3176_v15, %v365_v7  ;;  %v372_v18 = vld [vmem:[%s2820_s20 + $0x330] sm:$0xff] }
  0xaa   : > { %1964 = vmatmul.mubr.bf16.gmra.mrb[48].mxu0 %v1158_v16  ;;  %v1087_v27 = vsel %vm831_vm9, %v703_v5, %v959_v45  ;;  %v524_v28 = vmul.f32 %v3186_v20, %v354_v8  ;;  %v532_v29 = vmul.f32 %v3186_v20, %v362_v58  ;;  %v526_v30 = vmul.f32 %v3202_v43, %v356_v14  ;;  %v380_v45 = vld [vmem:[%s2820_s20 + $0x370] sm:$0xff] }
  0xab   : > { %2061 = vmatmul.mubr.bf16.gmra.mrb[48].mxu1 %v1160_v22  ;;  %v1167_v31 = vpack.c.bf16 %v1087_v27, %v1079_v24  ;;  %v697_v32 = vadd.f32 %v3182_v19, %v527_v25  ;;  %v705_v33 = vadd.f32 %v3182_v19, %v535_v42  ;;  %v534_v52 = vmul.f32 %v3202_v43, %v364_v21  ;;  %v387_v24 = vld [vmem:[%s2820_s20 + $0x3a8] sm:$0xff] }
  0xac   : > { %v694_v34 = vadd.f32 %v3190_v38, %v524_v28  ;;  %v702_v35 = vadd.f32 %v3190_v38, %v532_v29  ;;  %v696_v36 = vadd.f32 %v3215_v49, %v526_v30  ;;  %v541_v39 = vmul.f32 %v3159_v61, %v371_v26  ;;  %v395_v25 = vld [vmem:[%s2820_s20 + $0x3e8] sm:$0xff]  ;;  %v389_v28 = vld [vmem:[%s2820_s20 + $0x3b8] sm:$0xff] }
  0xad   : > { %1971 = vmatprep.mubr.bf16.mxu0 %v1167_v31  ;;  %vm825_vm10 = vcmp.gt.f32.partialorder %v697_v32, 0.0  ;;  %vm833_vm11 = vcmp.gt.f32.partialorder %v705_v33, 0.0  ;;  %v953_v40 = vmul.f32 0.2, %v697_v32  ;;  %v961_v41 = vmul.f32 0.2, %v705_v33 }
  0xae   : > { %vm822_vm12 = vcmp.gt.f32.partialorder %v694_v34, 0.0  ;;  %vm830_vm13 = vcmp.gt.f32.partialorder %v702_v35, 0.0  ;;  %v950_v46 = vmul.f32 0.2, %v694_v34  ;;  %v958_v47 = vmul.f32 0.2, %v702_v35 }
  0xaf   : > { %v1081_v48 = vsel %vm825_vm10, %v697_v32, %v953_v40  ;;  %v1089_v54 = vsel %vm833_vm11, %v705_v33, %v961_v41  ;;  %v704_v55 = vadd.f32 %v3215_v49, %v534_v52  ;;  %vm824_vm14 = vcmp.gt.f32.partialorder %v696_v36, 0.0  ;;  %v397_v33 = vld [vmem:[%s2820_s20 + $0x3f8] sm:$0xff] }
  0xb0   : > { %v1169_v60 = vpack.c.bf16 %v1089_v54, %v1081_v48  ;;  %v1078_v50 = vsel %vm822_vm12, %v694_v34, %v950_v46  ;;  %v1086_v51 = vsel %vm830_vm13, %v702_v35, %v958_v47  ;;  %v952_v53 = vmul.f32 0.2, %v696_v36 }
  0xb1   : > { %v1166_v63 = vpack.c.bf16 %v1086_v51, %v1078_v50  ;;  %vm832_vm15 = vcmp.gt.f32.partialorder %v704_v55, 0.0  ;;  %v960_v0 = vmul.f32 0.2, %v704_v55  ;;  %v549_v1 = vmul.f32 %v3159_v61, %v379_v37 }
  0xb2   : > { %2068 = vmatprep.mubr.bf16.mxu1 %v1169_v60  ;;  %v1080_v2 = vsel %vm824_vm14, %v696_v36, %v952_v53  ;;  %v711_v23 = vadd.f32 %v3171_v13, %v541_v39  ;;  %v543_v44 = vmul.f32 %v3176_v15, %v373_v57  ;;  %v551_v3 = vmul.f32 %v3176_v15, %v381_v59 }
  0xb3   : > { %1972 = vmatmul.mubr.bf16.gmra.mrb[52].mxu0 %v1166_v63  ;;  %v1088_v4 = vsel %vm832_vm15, %v704_v55, %v960_v0  ;;  %v719_v5 = vadd.f32 %v3171_v13, %v549_v1  ;;  %v540_v6 = vmul.f32 %v3186_v20, %v370_v56  ;;  %v548_v7 = vmul.f32 %v3186_v20, %v378_v62  ;;  %v386_v55 = vld [vmem:[%s2820_s20 + $0x3a0] sm:$0xff] }
  0xb4   : > { %v1168_v8 = vpack.c.bf16 %v1088_v4, %v1080_v2  ;;  %vm839_vm0 = vcmp.gt.f32.partialorder %v711_v23, 0.0  ;;  %v967_v9 = vmul.f32 0.2, %v711_v23  ;;  %v713_v10 = vadd.f32 %v3182_v19, %v543_v44  ;;  %v394_v56 = vld [vmem:[%s2820_s20 + $0x3e0] sm:$0xff]  ;;  %v396_v2 = vld [vmem:[%s2820_s20 + $0x3f0] sm:$0xff] }
  0xb5   : > { %vm847_vm1 = vcmp.gt.f32.partialorder %v719_v5, 0.0  ;;  %v975_v11 = vmul.f32 0.2, %v719_v5  ;;  %v721_v12 = vadd.f32 %v3182_v19, %v551_v3  ;;  %v710_v58 = vadd.f32 %v3190_v38, %v540_v6 }
  0xb6   : > { %2069 = vmatmul.mubr.bf16.gmra.mrb[52].mxu1 %v1168_v8  ;;  %v1095_v14 = vsel %vm839_vm0, %v711_v23, %v967_v9  ;;  %vm841_vm2 = vcmp.gt.f32.partialorder %v713_v10, 0.0  ;;  %v969_v16 = vmul.f32 0.2, %v713_v10  ;;  %v718_v17 = vadd.f32 %v3190_v38, %v548_v7 }
  0xb7   : > { %v1103_v21 = vsel %vm847_vm1, %v719_v5, %v975_v11  ;;  %vm849_vm3 = vcmp.gt.f32.partialorder %v721_v12, 0.0  ;;  %v977_v22 = vmul.f32 0.2, %v721_v12  ;;  %vm838_vm4 = vcmp.gt.f32.partialorder %v710_v58, 0.0 }
  0xb8   : > { %v1175_v42 = vpack.c.bf16 %v1103_v21, %v1095_v14  ;;  %v1097_v26 = vsel %vm841_vm2, %v713_v10, %v969_v16  ;;  %vm846_vm5 = vcmp.gt.f32.partialorder %v718_v17, 0.0  ;;  %v966_v27 = vmul.f32 0.2, %v710_v58 }
  0xb9   : > { %v1105_v29 = vsel %vm849_vm3, %v721_v12, %v977_v22  ;;  %v974_v30 = vmul.f32 0.2, %v718_v17  ;;  %v542_v31 = vmul.f32 %v3202_v43, %v372_v18  ;;  %v550_v32 = vmul.f32 %v3202_v43, %v380_v45 }
  0xba   : > { %1979 = vmatprep.mubr.bf16.mxu0 %v1175_v42  ;;  %v1177_v52 = vpack.c.bf16 %v1105_v29, %v1097_v26  ;;  %v1094_v34 = vsel %vm838_vm4, %v710_v58, %v966_v27  ;;  %v557_v35 = vmul.f32 %v3159_v61, %v387_v24  ;;  %v565_v36 = vmul.f32 %v3159_v61, %v395_v25 }
  0xbb   : > { %v1102_v37 = vsel %vm846_vm5, %v718_v17, %v974_v30  ;;  %v712_v39 = vadd.f32 %v3215_v49, %v542_v31  ;;  %v720_v40 = vadd.f32 %v3215_v49, %v550_v32  ;;  %v559_v41 = vmul.f32 %v3176_v15, %v389_v28 }
  0xbc   : > { %2076 = vmatprep.mubr.bf16.mxu1 %v1177_v52  ;;  %v1174_v46 = vpack.c.bf16 %v1102_v37, %v1094_v34  ;;  %v727_v47 = vadd.f32 %v3171_v13, %v557_v35  ;;  %v735_v48 = vadd.f32 %v3171_v13, %v565_v36  ;;  %v567_v54 = vmul.f32 %v3176_v15, %v397_v33  ;;  %v388_v15 = vld [vmem:[%s2820_s20 + $0x3b0] sm:$0xff] }
  0xbd   : > { %vm840_vm6 = vcmp.gt.f32.partialorder %v712_v39, 0.0  ;;  %vm848_vm7 = vcmp.gt.f32.partialorder %v720_v40, 0.0  ;;  %v968_v61 = vmul.f32 0.2, %v712_v39  ;;  %v976_v57 = vmul.f32 0.2, %v720_v40 }
  0xbe   : > { %1980 = vmatmul.mubr.bf16.gmra.mrb[56].mxu0 %v1174_v46  ;;  %vm855_vm8 = vcmp.gt.f32.partialorder %v727_v47, 0.0  ;;  %vm863_vm9 = vcmp.gt.f32.partialorder %v735_v48, 0.0  ;;  %v983_v59 = vmul.f32 0.2, %v727_v47  ;;  %v991_v60 = vmul.f32 0.2, %v735_v48 }
  0xbf   : > { %v1096_v50 = vsel %vm840_vm6, %v712_v39, %v968_v61  ;;  %v1104_v51 = vsel %vm848_vm7, %v720_v40, %v976_v57  ;;  %v729_v53 = vadd.f32 %v3182_v19, %v559_v41  ;;  %v737_v13 = vadd.f32 %v3182_v19, %v567_v54 }
  0xc0   : > { %v1176_v62 = vpack.c.bf16 %v1104_v51, %v1096_v50  ;;  %v1111_v63 = vsel %vm855_vm8, %v727_v47, %v983_v59  ;;  %v1119_v0 = vsel %vm863_vm9, %v735_v48, %v991_v60  ;;  %v556_v1 = vmul.f32 %v3186_v20, %v386_v55 }
  0xc1   : > { %v1183_v23 = vpack.c.bf16 %v1119_v0, %v1111_v63  ;;  %vm857_vm10 = vcmp.gt.f32.partialorder %v729_v53, 0.0  ;;  %vm865_vm11 = vcmp.gt.f32.partialorder %v737_v13, 0.0  ;;  %v985_v44 = vmul.f32 0.2, %v729_v53 }
  0xc2   : > { %2077 = vmatmul.mubr.bf16.gmra.mrb[56].mxu1 %v1176_v62  ;;  %v993_v3 = vmul.f32 0.2, %v737_v13  ;;  %v564_v4 = vmul.f32 %v3186_v20, %v394_v56  ;;  %v726_v5 = vadd.f32 %v3190_v38, %v556_v1  ;;  %v558_v19 = vmul.f32 %v3202_v43, %v388_v15 }
  0xc3   : > { %1987 = vmatprep.mubr.bf16.mxu0 %v1183_v23  ;;  %v1113_v6 = vsel %vm857_vm10, %v729_v53, %v985_v44  ;;  %v566_v7 = vmul.f32 %v3202_v43, %v396_v2 }
  0xc4   : > { %v1121_v8 = vsel %vm865_vm11, %v737_v13, %v993_v3  ;;  %v734_v9 = vadd.f32 %v3190_v38, %v564_v4  ;;  %vm854_vm12 = vcmp.gt.f32.partialorder %v726_v5, 0.0  ;;  %v982_v10 = vmul.f32 0.2, %v726_v5 }
  0xc5   : > { %v1185_v11 = vpack.c.bf16 %v1121_v8, %v1113_v6  ;;  %v728_v12 = vadd.f32 %v3215_v49, %v558_v19  ;;  %v736_v58 = vadd.f32 %v3215_v49, %v566_v7  ;;  %v3387_v49 = vld [vmem:[%s3487_s4] ss:$0 sm:$0xff] }
  0xc6   : > { %vm862_vm13 = vcmp.gt.f32.partialorder %v734_v9, 0.0  ;;  %v990_v20 = vmul.f32 0.2, %v734_v9  ;;  %v1110_v14 = vsel %vm854_vm12, %v726_v5, %v982_v10 }
  0xc7   : > { %2084 = vmatprep.mubr.bf16.mxu1 %v1185_v11  ;;  %vm856_vm14 = vcmp.gt.f32.partialorder %v728_v12, 0.0  ;;  %vm864_vm15 = vcmp.gt.f32.partialorder %v736_v58, 0.0  ;;  %v984_v16 = vmul.f32 0.2, %v728_v12  ;;  %v992_v17 = vmul.f32 0.2, %v736_v58 }
  0xc8   : > { %v1118_v18 = vsel %vm862_vm13, %v734_v9, %v990_v20 }
  0xc9   : > { %v1182_v43 = vpack.c.bf16 %v1118_v18, %v1110_v14  ;;  %v1112_v45 = vsel %vm856_vm14, %v728_v12, %v984_v16  ;;  %v1120_v21 = vsel %vm864_vm15, %v736_v58, %v992_v17 }
  0xca   : > { %v1184_v38 = vpack.c.bf16 %v1120_v21, %v1112_v45 }
  0xcb   : > { %1988 = vmatmul.mubr.bf16.gmra.mrb[60].mxu0 %v1182_v43 }
  0xcc   : > { %2085 = vmatmul.mubr.bf16.gmra.mrb[60].mxu1 %v1184_v38 }
  0xfa   : > { %v2351_v22 = vpop.f32.mrb[0].mxu0 }
  0xfb   : > { %v2415_v24 = vpop.f32.mrb[0].mxu1  ;;  %v2352_v25 = vpop.f32.mrb[1].mxu0 }
  0xfc   : > { %v2353_v42 = vadd.f32 %v2352_v25, %v2351_v22  ;;  %v2416_v26 = vpop.f32.mrb[1].mxu1  ;;  %v2354_v27 = vpop.f32.mrb[2].mxu0 }
  0xfd   : > { %v2417_v28 = vadd.f32 %v2416_v26, %v2415_v24  ;;  %v2418_v29 = vpop.f32.mrb[2].mxu1  ;;  %v2355_v30 = vpop.f32.mrb[3].mxu0 }
  0xfe   : > { %v1740_v31 = vadd.f32 %v2353_v42, %v3387_v49  ;;  %v2356_v32 = vadd.f32 %v2355_v30, %v2354_v27  ;;  %v2419_v33 = vpop.f32.mrb[3].mxu1 }
  0xff   : > { %v2420_v52 = vadd.f32 %v2419_v33, %v2418_v29 }
 0x100   : > { %v3390_v34 = vadd.f32 %v2417_v28, %v1740_v31  ;;  %v1743_v35 = vadd.f32 %v2356_v32, %v3387_v49 }
 0x102   : > { %v3393_v36 = vadd.f32 %v2420_v52, %v1743_v35  ;;  %v2357_v37 = vpop.f32.mrb[4].mxu0 }
 0x103   : > { %v2358_v39 = vpop.f32.mrb[5].mxu0 }
 0x104   : > { %v2359_v40 = vadd.f32 %v2358_v39, %v2357_v37  ;;  %v2360_v41 = vpop.f32.mrb[6].mxu0 }
 0x105   : > { %v2361_v46 = vpop.f32.mrb[7].mxu0  ;;  %v2421_v47 = vpop.f32.mrb[4].mxu1 }
 0x106   : > { %v1748_v48 = vadd.f32 %v2359_v40, %v3387_v49  ;;  %v2362_v54 = vadd.f32 %v2361_v46, %v2360_v41  ;;  %v2422_v55 = vpop.f32.mrb[5].mxu1 }
 0x107   : > { %v2423_v61 = vadd.f32 %v2422_v55, %v2421_v47  ;;  %v2424_v57 = vpop.f32.mrb[6].mxu1 }
 0x108   : > { %v1751_v59 = vadd.f32 %v2362_v54, %v3387_v49  ;;  %v2425_v60 = vpop.f32.mrb[7].mxu1 }
 0x109   : > { %v3397_v50 = vadd.f32 %v2423_v61, %v1748_v48  ;;  %v2426_v51 = vadd.f32 %v2425_v60, %v2424_v57 }
 0x10b   : > { %v3399_v53 = vadd.f32 %v2426_v51, %v1751_v59  ;;  %v2363_v13 = vpop.f32.mrb[8].mxu0 }
 0x10c   : > { %v2364_v56 = vpop.f32.mrb[9].mxu0 }
 0x10d   : > { %v2365_v15 = vadd.f32 %v2364_v56, %v2363_v13  ;;  %v2366_v62 = vpop.f32.mrb[10].mxu0 }
 0x10e   : > { %v2367_v63 = vpop.f32.mrb[11].mxu0 }
 0x10f   : > { %v2427_v0 = vpop.f32.mrb[8].mxu1  ;;  %v1756_v1 = vadd.f32 %v2365_v15, %v3387_v49  ;;  %v2368_v2 = vadd.f32 %v2367_v63, %v2366_v62 }
 0x110   : > { %v2428_v23 = vpop.f32.mrb[9].mxu1 }
 0x111   : > { %v2429_v44 = vadd.f32 %v2428_v23, %v2427_v0  ;;  %v2430_v3 = vpop.f32.mrb[10].mxu1  ;;  %v1759_v4 = vadd.f32 %v2368_v2, %v3387_v49 }
 0x112   : > { %v2431_v5 = vpop.f32.mrb[11].mxu1 }
 0x113   : > { %v3403_v19 = vadd.f32 %v2429_v44, %v1756_v1  ;;  %v2432_v6 = vadd.f32 %v2431_v5, %v2430_v3 }
 0x115   : > { %v3405_v7 = vadd.f32 %v2432_v6, %v1759_v4 }
 0x118   : > { %v2369_v8 = vpop.f32.mrb[12].mxu0 }
 0x119   : > { %v2433_v9 = vpop.f32.mrb[12].mxu1  ;;  %v2370_v10 = vpop.f32.mrb[13].mxu0 }
 0x11a   : > { %v2371_v11 = vadd.f32 %v2370_v10, %v2369_v8  ;;  %v2434_v12 = vpop.f32.mrb[13].mxu1  ;;  %v2372_v58 = vpop.f32.mrb[14].mxu0 }
 0x11b   : > { %v2435_v20 = vadd.f32 %v2434_v12, %v2433_v9  ;;  %v2436_v14 = vpop.f32.mrb[14].mxu1  ;;  %v2373_v16 = vpop.f32.mrb[15].mxu0 }
 0x11c   : > { %v1764_v17 = vadd.f32 %v2371_v11, %v3387_v49  ;;  %v2374_v18 = vadd.f32 %v2373_v16, %v2372_v58  ;;  %v2437_v43 = vpop.f32.mrb[15].mxu1 }
 0x11d   : > { %v2438_v45 = vadd.f32 %v2437_v43, %v2436_v14 }
 0x11e   : > { %v3408_v21 = vadd.f32 %v2435_v20, %v1764_v17  ;;  %v1767_v38 = vadd.f32 %v2374_v18, %v3387_v49 }
 0x120   : > { %v3411_v22 = vadd.f32 %v2438_v45, %v1767_v38 }
 0x121   : > { %v2375_v24 = vpop.f32.mrb[16].mxu0 }
 0x122   : > { %v2376_v25 = vpop.f32.mrb[17].mxu0 }
 0x123   : > { %v2377_v42 = vadd.f32 %v2376_v25, %v2375_v24  ;;  %v2378_v26 = vpop.f32.mrb[18].mxu0 }
 0x124   : > { %v2439_v27 = vpop.f32.mrb[16].mxu1  ;;  %v2379_v28 = vpop.f32.mrb[19].mxu0 }
 0x125   : > { %v1772_v29 = vadd.f32 %v2377_v42, %v3387_v49  ;;  %v2440_v30 = vpop.f32.mrb[17].mxu1  ;;  %v2380_v31 = vadd.f32 %v2379_v28, %v2378_v26 }
 0x126   : > { %v2441_v32 = vadd.f32 %v2440_v30, %v2439_v27  ;;  %v2442_v33 = vpop.f32.mrb[18].mxu1 }
 0x127   : > { %v1775_v52 = vadd.f32 %v2380_v31, %v3387_v49  ;;  %v2443_v35 = vpop.f32.mrb[19].mxu1 }
 0x128   : > { %v3415_v37 = vadd.f32 %v2441_v32, %v1772_v29  ;;  %v2444_v39 = vadd.f32 %v2443_v35, %v2442_v33 }
 0x12a   : > { %v3417_v40 = vadd.f32 %v2444_v39, %v1775_v52 }
 0x12c   : > { %v2381_v41 = vpop.f32.mrb[20].mxu0 }
 0x12d   : > { %v2382_v46 = vpop.f32.mrb[21].mxu0 }
 0x12e   : > { %v2383_v47 = vadd.f32 %v2382_v46, %v2381_v41  ;;  %v2384_v48 = vpop.f32.mrb[22].mxu0 }
 0x12f   : > { %v2385_v54 = vpop.f32.mrb[23].mxu0 }
 0x130   : > { %v2445_v55 = vpop.f32.mrb[20].mxu1  ;;  %v1780_v61 = vadd.f32 %v2383_v47, %v3387_v49  ;;  %v2386_v57 = vadd.f32 %v2385_v54, %v2384_v48 }
 0x131   : > { %v2446_v59 = vpop.f32.mrb[21].mxu1 }
 0x132   : > { %v2447_v60 = vadd.f32 %v2446_v59, %v2445_v55  ;;  %v2448_v51 = vpop.f32.mrb[22].mxu1  ;;  %v1783_v13 = vadd.f32 %v2386_v57, %v3387_v49 }
 0x133   : > { %v2449_v56 = vpop.f32.mrb[23].mxu1 }
 0x134   : > { %v3421_v15 = vadd.f32 %v2447_v60, %v1780_v61  ;;  %v2450_v62 = vadd.f32 %v2449_v56, %v2448_v51 }
 0x136   : > { %v3423_v63 = vadd.f32 %v2450_v62, %v1783_v13 }
 0x139   : > { %v2387_v0 = vpop.f32.mrb[24].mxu0 }
 0x13a   : > { %v2451_v1 = vpop.f32.mrb[24].mxu1  ;;  %v2388_v2 = vpop.f32.mrb[25].mxu0 }
 0x13b   : > { %v2389_v23 = vadd.f32 %v2388_v2, %v2387_v0  ;;  %v2452_v44 = vpop.f32.mrb[25].mxu1  ;;  %v2390_v3 = vpop.f32.mrb[26].mxu0 }
 0x13c   : > { %v2453_v4 = vadd.f32 %v2452_v44, %v2451_v1  ;;  %v2454_v5 = vpop.f32.mrb[26].mxu1  ;;  %v2391_v6 = vpop.f32.mrb[27].mxu0 }
 0x13d   : > { %v1788_v8 = vadd.f32 %v2389_v23, %v3387_v49  ;;  %v2392_v9 = vadd.f32 %v2391_v6, %v2390_v3  ;;  %v2455_v10 = vpop.f32.mrb[27].mxu1 }
 0x13e   : > { %v2456_v11 = vadd.f32 %v2455_v10, %v2454_v5 }
 0x13f   : > { %v3426_v12 = vadd.f32 %v2453_v4, %v1788_v8  ;;  %v1791_v58 = vadd.f32 %v2392_v9, %v3387_v49 }
 0x141   : > { %v3429_v20 = vadd.f32 %v2456_v11, %v1791_v58 }
 0x142   : > { %v2393_v14 = vpop.f32.mrb[28].mxu0 }
 0x143   : > { %v2394_v16 = vpop.f32.mrb[29].mxu0 }
 0x144   : > { %v2395_v17 = vadd.f32 %v2394_v16, %v2393_v14  ;;  %v2396_v18 = vpop.f32.mrb[30].mxu0 }
 0x145   : > { %v2457_v43 = vpop.f32.mrb[28].mxu1  ;;  %v2397_v45 = vpop.f32.mrb[31].mxu0 }
 0x146   : > { %v1796_v38 = vadd.f32 %v2395_v17, %v3387_v49  ;;  %v2458_v24 = vpop.f32.mrb[29].mxu1  ;;  %v2398_v25 = vadd.f32 %v2397_v45, %v2396_v18 }
 0x147   : > { %v2459_v42 = vadd.f32 %v2458_v24, %v2457_v43  ;;  %v2460_v26 = vpop.f32.mrb[30].mxu1 }
 0x148   : > { %v1799_v27 = vadd.f32 %v2398_v25, %v3387_v49  ;;  %v2461_v28 = vpop.f32.mrb[31].mxu1 }
 0x149   : > { %v3433_v29 = vadd.f32 %v2459_v42, %v1796_v38  ;;  %v2462_v30 = vadd.f32 %v2461_v28, %v2460_v26 }
 0x14b   : > { %v3435_v31 = vadd.f32 %v2462_v30, %v1799_v27 }
 0x14f   : > { %v2479_v32 = vpop.f32.mrb[32].mxu0 }
 0x150   : > { %v2480_v33 = vpop.f32.mrb[33].mxu0 }
 0x151   : > { %v2481_v52 = vadd.f32 %v2480_v33, %v2479_v32  ;;  %v2482_v35 = vpop.f32.mrb[34].mxu0 }
 0x152   : > { %v2483_v39 = vpop.f32.mrb[35].mxu0 }
 0x153   : > { %v2543_v41 = vpop.f32.mrb[32].mxu1  ;;  %v1934_v46 = vadd.f32 %v2481_v52, %v3390_v34  ;;  %v2484_v47 = vadd.f32 %v2483_v39, %v2482_v35 }
 0x154   : > { %v2544_v48 = vpop.f32.mrb[33].mxu1 }
 0x155   : > { %v2545_v54 = vadd.f32 %v2544_v48, %v2543_v41  ;;  %v2546_v55 = vpop.f32.mrb[34].mxu1  ;;  %v1937_v49 = vadd.f32 %v2484_v47, %v3393_v36 }
 0x156   : > { %v2547_v61 = vpop.f32.mrb[35].mxu1 }
 0x157   : > { %v2031_v57 = vadd.f32 %v2545_v54, %v1934_v46  ;;  %v2548_v59 = vadd.f32 %v2547_v61, %v2546_v55 }
 0x159   : > { %2093 = vst [vmem:[%s3443_s23] sm:$0xff] %v2031_v57  ;;  %v2034_v60 = vadd.f32 %v2548_v59, %v1937_v49  ;;  %v2131_v34 = vmul.f32 %v2031_v57, %v2031_v57 }
 0x15b   : > { %2094 = vst [vmem:[%s3443_s23 + $0x8] sm:$0xff] %v2034_v60  ;;  %v2109_v51 = vadd.f32 %v2034_v60, %v2031_v57  ;;  %v2132_v13 = vmul.f32 %v2034_v60, %v2034_v60 }
 0x15c   : > { %v2485_v56 = vpop.f32.mrb[36].mxu0 }
 0x15d   : > { %v2147_v62 = vadd.f32 %v2132_v13, %v2131_v34  ;;  %v2549_v36 = vpop.f32.mrb[36].mxu1  ;;  %v2486_v0 = vpop.f32.mrb[37].mxu0 }
 0x15e   : > { %v2487_v1 = vadd.f32 %v2486_v0, %v2485_v56  ;;  %v2550_v2 = vpop.f32.mrb[37].mxu1  ;;  %v2488_v23 = vpop.f32.mrb[38].mxu0 }
 0x15f   : > { %v2551_v44 = vadd.f32 %v2550_v2, %v2549_v36  ;;  %v2552_v3 = vpop.f32.mrb[38].mxu1  ;;  %v2489_v4 = vpop.f32.mrb[39].mxu0 }
 0x160   : > { %v1942_v5 = vadd.f32 %v2487_v1, %v3397_v50  ;;  %v2490_v6 = vadd.f32 %v2489_v4, %v2488_v23  ;;  %v2553_v8 = vpop.f32.mrb[39].mxu1 }
 0x161   : > { %v2554_v9 = vadd.f32 %v2553_v8, %v2552_v3 }
 0x162   : > { %v2039_v10 = vadd.f32 %v2551_v44, %v1942_v5  ;;  %v1945_v11 = vadd.f32 %v2490_v6, %v3399_v53 }
 0x164   : > { %2095 = vst [vmem:[%s3443_s23 + $0x10] sm:$0xff] %v2039_v10  ;;  %v2110_v58 = vadd.f32 %v2109_v51, %v2039_v10  ;;  %v2133_v14 = vmul.f32 %v2039_v10, %v2039_v10  ;;  %v2042_v16 = vadd.f32 %v2554_v9, %v1945_v11 }
 0x165   : > { %v2491_v17 = vpop.f32.mrb[40].mxu0 }
 0x166   : > { %v2148_v18 = vadd.f32 %v2147_v62, %v2133_v14  ;;  %2096 = vst [vmem:[%s3443_s23 + $0x18] sm:$0xff] %v2042_v16  ;;  %v2111_v43 = vadd.f32 %v2110_v58, %v2042_v16  ;;  %v2134_v45 = vmul.f32 %v2042_v16, %v2042_v16  ;;  %v2492_v38 = vpop.f32.mrb[41].mxu0 }
 0x167   : > { %v2493_v24 = vadd.f32 %v2492_v38, %v2491_v17  ;;  %v2494_v25 = vpop.f32.mrb[42].mxu0 }
 0x168   : > { %v2149_v50 = vadd.f32 %v2148_v18, %v2134_v45  ;;  %v2555_v42 = vpop.f32.mrb[40].mxu1  ;;  %v2495_v26 = vpop.f32.mrb[43].mxu0 }
 0x169   : > { %v1950_v27 = vadd.f32 %v2493_v24, %v3403_v19  ;;  %v2556_v53 = vpop.f32.mrb[41].mxu1  ;;  %v2496_v28 = vadd.f32 %v2495_v26, %v2494_v25 }
 0x16a   : > { %v2557_v30 = vadd.f32 %v2556_v53, %v2555_v42  ;;  %v2558_v32 = vpop.f32.mrb[42].mxu1 }
 0x16b   : > { %v1953_v33 = vadd.f32 %v2496_v28, %v3405_v7  ;;  %v2559_v52 = vpop.f32.mrb[43].mxu1 }
 0x16c   : > { %v2047_v35 = vadd.f32 %v2557_v30, %v1950_v27  ;;  %v2560_v39 = vadd.f32 %v2559_v52, %v2558_v32 }
 0x16e   : > { %2097 = vst [vmem:[%s3443_s23 + $0x20] sm:$0xff] %v2047_v35  ;;  %v2112_v41 = vadd.f32 %v2111_v43, %v2047_v35  ;;  %v2135_v46 = vmul.f32 %v2047_v35, %v2047_v35  ;;  %v2050_v47 = vadd.f32 %v2560_v39, %v1953_v33 }
 0x170   : > { %v2150_v48 = vadd.f32 %v2149_v50, %v2135_v46  ;;  %2098 = vst [vmem:[%s3443_s23 + $0x28] sm:$0xff] %v2050_v47  ;;  %v2113_v54 = vadd.f32 %v2112_v41, %v2050_v47  ;;  %v2136_v55 = vmul.f32 %v2050_v47, %v2050_v47  ;;  %v2497_v49 = vpop.f32.mrb[44].mxu0 }
 0x171   : > { %v2498_v19 = vpop.f32.mrb[45].mxu0 }
 0x172   : > { %v2151_v61 = vadd.f32 %v2150_v48, %v2136_v55  ;;  %v2499_v57 = vadd.f32 %v2498_v19, %v2497_v49  ;;  %v2500_v59 = vpop.f32.mrb[46].mxu0 }
 0x173   : > { %v2501_v60 = vpop.f32.mrb[47].mxu0 }
 0x174   : > { %v2561_v7 = vpop.f32.mrb[44].mxu1  ;;  %v1958_v34 = vadd.f32 %v2499_v57, %v3408_v21  ;;  %v2502_v51 = vadd.f32 %v2501_v60, %v2500_v59 }
 0x175   : > { %v2562_v13 = vpop.f32.mrb[45].mxu1 }
 0x176   : > { %v2563_v56 = vadd.f32 %v2562_v13, %v2561_v7  ;;  %v2564_v62 = vpop.f32.mrb[46].mxu1  ;;  %v1961_v36 = vadd.f32 %v2502_v51, %v3411_v22 }
 0x177   : > { %v2565_v0 = vpop.f32.mrb[47].mxu1 }
 0x178   : > { %v2055_v1 = vadd.f32 %v2563_v56, %v1958_v34  ;;  %v2566_v2 = vadd.f32 %v2565_v0, %v2564_v62 }
 0x17a   : > { %2099 = vst [vmem:[%s3443_s23 + $0x30] sm:$0xff] %v2055_v1  ;;  %v2114_v23 = vadd.f32 %v2113_v54, %v2055_v1  ;;  %v2137_v44 = vmul.f32 %v2055_v1, %v2055_v1  ;;  %v2058_v3 = vadd.f32 %v2566_v2, %v1961_v36 }
 0x17c   : > { %v2152_v4 = vadd.f32 %v2151_v61, %v2137_v44  ;;  %2100 = vst [vmem:[%s3443_s23 + $0x38] sm:$0xff] %v2058_v3  ;;  %v2115_v5 = vadd.f32 %v2114_v23, %v2058_v3  ;;  %v2138_v6 = vmul.f32 %v2058_v3, %v2058_v3 }
 0x17d   : > { %v2503_v8 = vpop.f32.mrb[48].mxu0 }
 0x17e   : > { %v2153_v21 = vadd.f32 %v2152_v4, %v2138_v6  ;;  %v2567_v9 = vpop.f32.mrb[48].mxu1  ;;  %v2504_v10 = vpop.f32.mrb[49].mxu0 }
 0x17f   : > { %v2505_v11 = vadd.f32 %v2504_v10, %v2503_v8  ;;  %v2568_v58 = vpop.f32.mrb[49].mxu1  ;;  %v2506_v14 = vpop.f32.mrb[50].mxu0 }
 0x180   : > { %v2569_v22 = vadd.f32 %v2568_v58, %v2567_v9  ;;  %v2570_v16 = vpop.f32.mrb[50].mxu1  ;;  %v2507_v17 = vpop.f32.mrb[51].mxu0 }
 0x181   : > { %v1966_v18 = vadd.f32 %v2505_v11, %v3415_v37  ;;  %v2508_v43 = vadd.f32 %v2507_v17, %v2506_v14  ;;  %v2571_v45 = vpop.f32.mrb[51].mxu1 }
 0x182   : > { %v2572_v38 = vadd.f32 %v2571_v45, %v2570_v16 }
 0x183   : > { %v2063_v24 = vadd.f32 %v2569_v22, %v1966_v18  ;;  %v1969_v25 = vadd.f32 %v2508_v43, %v3417_v40 }
 0x185   : > { %2101 = vst [vmem:[%s3443_s23 + $0x40] sm:$0xff] %v2063_v24  ;;  %v2116_v50 = vadd.f32 %v2115_v5, %v2063_v24  ;;  %v2139_v42 = vmul.f32 %v2063_v24, %v2063_v24  ;;  %v2066_v26 = vadd.f32 %v2572_v38, %v1969_v25 }
 0x186   : > { %v2509_v27 = vpop.f32.mrb[52].mxu0 }
 0x187   : > { %v2154_v53 = vadd.f32 %v2153_v21, %v2139_v42  ;;  %2102 = vst [vmem:[%s3443_s23 + $0x48] sm:$0xff] %v2066_v26  ;;  %v2117_v28 = vadd.f32 %v2116_v50, %v2066_v26  ;;  %v2140_v30 = vmul.f32 %v2066_v26, %v2066_v26  ;;  %v2510_v32 = vpop.f32.mrb[53].mxu0 }
 0x188   : > { %v2511_v33 = vadd.f32 %v2510_v32, %v2509_v27  ;;  %v2512_v52 = vpop.f32.mrb[54].mxu0 }
 0x189   : > { %v2155_v37 = vadd.f32 %v2154_v53, %v2140_v30  ;;  %v2573_v35 = vpop.f32.mrb[52].mxu1  ;;  %v2513_v39 = vpop.f32.mrb[55].mxu0 }
 0x18a   : > { %v1974_v41 = vadd.f32 %v2511_v33, %v3421_v15  ;;  %v2574_v40 = vpop.f32.mrb[53].mxu1  ;;  %v2514_v46 = vadd.f32 %v2513_v39, %v2512_v52 }
 0x18b   : > { %v2575_v47 = vadd.f32 %v2574_v40, %v2573_v35  ;;  %v2576_v48 = vpop.f32.mrb[54].mxu1 }
 0x18c   : > { %v1977_v54 = vadd.f32 %v2514_v46, %v3423_v63  ;;  %v2577_v55 = vpop.f32.mrb[55].mxu1 }
 0x18d   : > { %v2071_v49 = vadd.f32 %v2575_v47, %v1974_v41  ;;  %v2578_v19 = vadd.f32 %v2577_v55, %v2576_v48 }
 0x18f   : > { %2103 = vst [vmem:[%s3443_s23 + $0x50] sm:$0xff] %v2071_v49  ;;  %v2118_v61 = vadd.f32 %v2117_v28, %v2071_v49  ;;  %v2141_v57 = vmul.f32 %v2071_v49, %v2071_v49  ;;  %v2074_v59 = vadd.f32 %v2578_v19, %v1977_v54 }
 0x191   : > { %v2156_v60 = vadd.f32 %v2155_v37, %v2141_v57  ;;  %2104 = vst [vmem:[%s3443_s23 + $0x58] sm:$0xff] %v2074_v59  ;;  %v2119_v7 = vadd.f32 %v2118_v61, %v2074_v59  ;;  %v2142_v34 = vmul.f32 %v2074_v59, %v2074_v59  ;;  %v2515_v51 = vpop.f32.mrb[56].mxu0 }
 0x192   : > { %v2516_v15 = vpop.f32.mrb[57].mxu0 }
 0x193   : > { %v2157_v13 = vadd.f32 %v2156_v60, %v2142_v34  ;;  %v2517_v56 = vadd.f32 %v2516_v15, %v2515_v51  ;;  %v2518_v62 = vpop.f32.mrb[58].mxu0 }
 0x194   : > { %v2519_v36 = vpop.f32.mrb[59].mxu0 }
 0x195   : > { %v2579_v63 = vpop.f32.mrb[56].mxu1  ;;  %v1982_v0 = vadd.f32 %v2517_v56, %v3426_v12  ;;  %v2520_v1 = vadd.f32 %v2519_v36, %v2518_v62 }
 0x196   : > { %v2580_v2 = vpop.f32.mrb[57].mxu1 }
 0x197   : > { %v2581_v23 = vadd.f32 %v2580_v2, %v2579_v63  ;;  %v2582_v44 = vpop.f32.mrb[58].mxu1  ;;  %v1985_v3 = vadd.f32 %v2520_v1, %v3429_v20 }
 0x198   : > { %v2583_v4 = vpop.f32.mrb[59].mxu1 }
 0x199   : > { %v2079_v5 = vadd.f32 %v2581_v23, %v1982_v0  ;;  %v2584_v6 = vadd.f32 %v2583_v4, %v2582_v44 }
 0x19b   : > { %2105 = vst [vmem:[%s3443_s23 + $0x60] sm:$0xff] %v2079_v5  ;;  %v2120_v8 = vadd.f32 %v2119_v7, %v2079_v5  ;;  %v2143_v21 = vmul.f32 %v2079_v5, %v2079_v5  ;;  %v2082_v9 = vadd.f32 %v2584_v6, %v1985_v3 }
 0x19d   : > { %v2158_v10 = vadd.f32 %v2157_v13, %v2143_v21  ;;  %2106 = vst [vmem:[%s3443_s23 + $0x68] sm:$0xff] %v2082_v9  ;;  %v2121_v11 = vadd.f32 %v2120_v8, %v2082_v9  ;;  %v2144_v58 = vmul.f32 %v2082_v9, %v2082_v9 }
 0x19e   : > { %v2521_v14 = vpop.f32.mrb[60].mxu0 }
 0x19f   : > { %v2159_v12 = vadd.f32 %v2158_v10, %v2144_v58  ;;  %v2585_v22 = vpop.f32.mrb[60].mxu1  ;;  %v2522_v16 = vpop.f32.mrb[61].mxu0 }
 0x1a0   : > { %v2523_v17 = vadd.f32 %v2522_v16, %v2521_v14  ;;  %v2586_v18 = vpop.f32.mrb[61].mxu1  ;;  %v2524_v20 = vpop.f32.mrb[62].mxu0 }
 0x1a1   : > { %v2587_v43 = vadd.f32 %v2586_v18, %v2585_v22  ;;  %v2588_v45 = vpop.f32.mrb[62].mxu1  ;;  %v2525_v38 = vpop.f32.mrb[63].mxu0 }
 0x1a2   : > { %v1990_v24 = vadd.f32 %v2523_v17, %v3433_v29  ;;  %v2526_v25 = vadd.f32 %v2525_v38, %v2524_v20  ;;  %v2589_v50 = vpop.f32.mrb[63].mxu1 }
 0x1a3   : > { %v2590_v42 = vadd.f32 %v2589_v50, %v2588_v45 }
 0x1a4   : > { %v2087_v26 = vadd.f32 %v2587_v43, %v1990_v24  ;;  %v1993_v27 = vadd.f32 %v2526_v25, %v3435_v31 }
 0x1a6   : > { %2107 = vst [vmem:[%s3443_s23 + $0x70] sm:$0xff] %v2087_v26  ;;  %v2122_v53 = vadd.f32 %v2121_v11, %v2087_v26  ;;  %v2145_v28 = vmul.f32 %v2087_v26, %v2087_v26  ;;  %v2090_v30 = vadd.f32 %v2590_v42, %v1993_v27 }
 0x1a8   : > { %v2160_v32 = vadd.f32 %v2159_v12, %v2145_v28  ;;  %2108 = vst [vmem:[%s3443_s23 + $0x78] sm:$0xff] %v2090_v30  ;;  %v2123_v33 = vadd.f32 %v2122_v53, %v2090_v30  ;;  %v2146_v52 = vmul.f32 %v2090_v30, %v2090_v30 }
 0x1aa   : > { %v2124_v37 = vrot.slane %v2123_v33, 4  ;;  %v2161_v35 = vadd.f32 %v2160_v32, %v2146_v52 }
 0x1ac   : > { %v2125_v29 = vadd.f32 %v2124_v37, %v2123_v33  ;;  %v2162_v39 = vrot.slane %v2161_v35, 4 }
 0x1ae   : > { %v2126_v41 = vrot.slane %v2125_v29, 2  ;;  %v2163_v40 = vadd.f32 %v2162_v39, %v2161_v35 }
 0x1b0   : > { %v2127_v46 = vadd.f32 %v2126_v41, %v2125_v29  ;;  %v2164_v47 = vrot.slane %v2163_v40, 2 }
 0x1b2   : > { %v2128_v31 = vrot.slane %v2127_v46, 1  ;;  %v2165_v48 = vadd.f32 %v2164_v47, %v2163_v40 }
 0x1b4   : > { %v2129_v54 = vadd.f32 %v2128_v31, %v2127_v46  ;;  %v2166_v55 = vrot.slane %v2165_v48, 1 }
 0x1b6   : > { %2130 = vst [vmem:[%s268_s26] sm:$0x1] %v2129_v54  ;;  %v2167_v49 = vadd.f32 %v2166_v55, %v2165_v48 }
 0x1b8   : > { %2168 = vst [vmem:[%s268_s26 + $0x1] sm:$0x1] %v2167_v49 }
 0x1b9 PF: > { %s17_s21 = sadd.s32 1, %s2671_s21  }
 0x1ba   : > { %p14_p5 = scmp.ge.s32.totalorder %s17_s21, 4  }
 0x1bc   :  { %16 = sbr.rel (!%p14_p5) target bundleno = 1 (0x1), region = 82 }

// kernel: tile.47
= control target key start
LH: loop header
LB: loop body
LE: loop exit
PB: predicated region body
PF: predicated region fallthrough
CT: control target
= control target key end

     0   :  { %s64_s0 = inlined_call_operand.vmem [shape: f32[16], index: 0, kind: input, shape index: {}]   ;;  %s65_s1 = inlined_call_operand.vmem [shape: f32[64,16], index: 1, kind: output, shape index: {}]  }
   0x1   :  { %v4_v0 = vld [vmem:[%s64_s0] ss:$0 sm:$0xff] }
   0x2   :  { %5 = vst [vmem:[%s65_s1] sm:$0xff] %v4_v0  ;;  %20 = vst [vmem:[%s65_s1 + $0x8] sm:$0xff] %v4_v0 }
   0x3   :  { %21 = vst [vmem:[%s65_s1 + $0x10] sm:$0xff] %v4_v0  ;;  %22 = vst [vmem:[%s65_s1 + $0x18] sm:$0xff] %v4_v0 }
   0x4   :  { %23 = vst [vmem:[%s65_s1 + $0x20] sm:$0xff] %v4_v0  ;;  %24 = vst [vmem:[%s65_s1 + $0x28] sm:$0xff] %v4_v0 }
   0x5   :  { %25 = vst [vmem:[%s65_s1 + $0x30] sm:$0xff] %v4_v0  ;;  %26 = vst [vmem:[%s65_s1 + $0x38] sm:$0xff] %v4_v0 }

// kernel: tile.48
= control target key start
LH: loop header
LB: loop body
LE: loop exit
PB: predicated region body
PF: predicated region fallthrough
CT: control target
= control target key end

     0   :  { %vm4_vm0 = vcmask 1047556   ;;  %s167_s16 = smov 112   ;;  %s168_s19 = smov 80   ;;  %vm6_vm1 = vcmask 130048   ;;  %vm17_vm2 = vcmask 1048448   ;;  %vm28_vm3 = vcmask 917248   ;;  %s264_s0 = inlined_call_operand.vmem [shape: f32[64,16], index: 0, kind: input, shape index: {}]   ;;  %s265_s1 = inlined_call_operand.vmem [shape: f32[1,1024], index: 1, kind: output, shape index: {}]  }
   0x1   :  { %v139_v0 = vld [vmem:[%s264_s0 + $0x7] ss:$8 sm:$0xf]   ;;  %v143_v2 = vld [vmem:[%s264_s0 + $0x5] ss:$8 sm:$0xf]  }
   0x2   :  { %v140_v1 = vld [vmem:[%s264_s0 + $0x7] ss:$8 sm:$0xf0]   ;;  %v144_v4 = vld [vmem:[%s264_s0 + $0x5] ss:$8 sm:$0xf0]  }
   0x3   :  { %v14_v3 = vsel %vm4_vm0, %v140_v1, %v139_v0  ;;  %v141_v5 = vld [vmem:[%s264_s0 + $0x6] ss:$8 sm:$0xf]   ;;  %v36_v6 = vsel %vm4_vm0, %v144_v4, %v143_v2  ;;  %v145_v9 = vld [vmem:[%s264_s0 + $0x4] ss:$8 sm:$0xf]  }
   0x4   :  { %15 = vrot.lane.b32.xlu0 %v14_v3, %s167_s16  ;;  %v142_v7 = vld [vmem:[%s264_s0 + $0x6] ss:$8 sm:$0xf0]   ;;  %37 = vrot.lane.b32.xlu1 %v36_v6, %s168_s19  ;;  %v146_v10 = vld [vmem:[%s264_s0 + $0x4] ss:$8 sm:$0xf0]  }
   0x5   :  { %v25_v8 = vsel %vm4_vm0, %v142_v7, %v141_v5  ;;  %v47_v11 = vsel %vm4_vm0, %v146_v10, %v145_v9  ;;  %v147_v12 = vld [vmem:[%s264_s0 + $0x3] ss:$8 sm:$0xf]   ;;  %v149_v14 = vld [vmem:[%s264_s0 + $0x2] ss:$8 sm:$0xf]  }
   0x6   :  { %v148_v13 = vld [vmem:[%s264_s0 + $0x3] ss:$8 sm:$0xf0]   ;;  %s169_s30 = smov 96   ;;  %s170_s4 = smov 64   ;;  %vm39_vm4 = vcmask 786048  }
   0x7   :  { %v150_v15 = vld [vmem:[%s264_s0 + $0x2] ss:$8 sm:$0xf0]   ;;  %v58_v16 = vsel %vm4_vm0, %v148_v13, %v147_v12  ;;  %v151_v17 = vld [vmem:[%s264_s0 + $0x1] ss:$8 sm:$0xf]  }
   0x8   :  { %26 = vrot.lane.b32.xlu0 %v25_v8, %s169_s30  ;;  %48 = vrot.lane.b32.xlu1 %v47_v11, %s170_s4  ;;  %v152_v18 = vld [vmem:[%s264_s0 + $0x1] ss:$8 sm:$0xf0]   ;;  %v69_v19 = vsel %vm4_vm0, %v150_v15, %v149_v14  ;;  %v2_v20 = vld [vmem:[%s264_s0] ss:$8 sm:$0xf]  }
   0x9   :  { %v3_v21 = vld [vmem:[%s264_s0] ss:$8 sm:$0xf0]   ;;  %s171_s0 = smov 48   ;;  %s172_s13 = smov 32   ;;  %v80_v23 = vsel %vm4_vm0, %v152_v18, %v151_v17  ;;  %vm50_vm5 = vcmask 654848  }
   0xa   :  { %v5_v22 = vsel %vm4_vm0, %v3_v21, %v2_v20  ;;  %s173_s14 = smov 16   ;;  %vm61_vm6 = vcmask 523648   ;;  %vm72_vm7 = vcmask 392448   ;;  %vm83_vm8 = vcmask 261248  }
   0xb   :  { %7 = vst.msk [vmem:[#allocation0] ss:$8 sm:$0xf] %vm6_vm1, %v5_v22   ;;  %8 = vst.msk [vmem:[#allocation0] ss:$8 sm:$0xf0] %vm6_vm1, %v5_v22  }
   0xc   :  { %59 = vrot.lane.b32.xlu0 %v58_v16, %s171_s0  ;;  %70 = vrot.lane.b32.xlu1 %v69_v19, %s172_s13 }
  0x10   :  { %81 = vrot.lane.b32.xlu0 %v80_v23, %s173_s14 }
  0x76   :  { %v16_v24 = vpop.permute.xlu0 %15   ;;  %v38_v25 = vpop.permute.xlu1 %37  }
  0x77   :  { %18 = vst.msk [vmem:[#allocation0] ss:$8 sm:$0xf] %vm17_vm2, %v16_v24   ;;  %19 = vst.msk [vmem:[#allocation0] ss:$8 sm:$0xf0] %vm17_vm2, %v16_v24  }
  0x7a   :  { %v27_v26 = vpop.permute.xlu0 %26   ;;  %v49_v27 = vpop.permute.xlu1 %48  }
  0x7b   :  { %29 = vst.msk [vmem:[#allocation0] ss:$8 sm:$0xf] %vm28_vm3, %v27_v26   ;;  %30 = vst.msk [vmem:[#allocation0] ss:$8 sm:$0xf0] %vm28_vm3, %v27_v26  }
  0x7c   :  { %40 = vst.msk [vmem:[#allocation0] ss:$8 sm:$0xf] %vm39_vm4, %v38_v25   ;;  %41 = vst.msk [vmem:[#allocation0] ss:$8 sm:$0xf0] %vm39_vm4, %v38_v25  }
  0x7d   :  { %51 = vst.msk [vmem:[#allocation0] ss:$8 sm:$0xf] %vm50_vm5, %v49_v27   ;;  %52 = vst.msk [vmem:[#allocation0] ss:$8 sm:$0xf0] %vm50_vm5, %v49_v27  }
  0x7e   :  { %v60_v28 = vpop.permute.xlu0 %59   ;;  %v71_v29 = vpop.permute.xlu1 %70  }
  0x7f   :  { %62 = vst.msk [vmem:[#allocation0] ss:$8 sm:$0xf] %vm61_vm6, %v60_v28   ;;  %63 = vst.msk [vmem:[#allocation0] ss:$8 sm:$0xf0] %vm61_vm6, %v60_v28  }
  0x80   :  { %73 = vst.msk [vmem:[#allocation0] ss:$8 sm:$0xf] %vm72_vm7, %v71_v29   ;;  %74 = vst.msk [vmem:[#allocation0] ss:$8 sm:$0xf0] %vm72_vm7, %v71_v29  }
  0x82   :  { %v82_v30 = vpop.permute.xlu0 %81  }
  0x83   :  { %84 = vst.msk [vmem:[#allocation0] ss:$8 sm:$0xf] %vm83_vm8, %v82_v30   ;;  %85 = vst.msk [vmem:[#allocation0] ss:$8 sm:$0xf0] %vm83_vm8, %v82_v30  }
  0x8a   :  { %v89_v31 = vld [vmem:[#allocation0] sm:$0x1]  ;;  %v93_v32 = vld [vmem:[#allocation0 + $0x8] sm:$0x1]  ;;  %v98_v33 = vld [vmem:[#allocation0 + $0x10] sm:$0x1] }
  0x8b   :  { %91 = vst [vmem:[%s265_s1] sm:$0x1] %v89_v31  ;;  %153 = vst [vmem:[%s265_s1 + $0x1] sm:$0x1] %v93_v32  ;;  %v104_v34 = vld [vmem:[#allocation0 + $0x18] sm:$0x1] }
  0x8c   :  { %154 = vst [vmem:[%s265_s1 + $0x2] sm:$0x1] %v98_v33  ;;  %v110_v35 = vld [vmem:[#allocation0 + $0x20] sm:$0x1]  ;;  %v116_v36 = vld [vmem:[#allocation0 + $0x28] sm:$0x1] }
  0x8d   :  { %155 = vst [vmem:[%s265_s1 + $0x3] sm:$0x1] %v104_v34  ;;  %156 = vst [vmem:[%s265_s1 + $0x4] sm:$0x1] %v110_v35  ;;  %v122_v37 = vld [vmem:[#allocation0 + $0x30] sm:$0x1] }
  0x8e   :  { %157 = vst [vmem:[%s265_s1 + $0x5] sm:$0x1] %v116_v36  ;;  %v128_v38 = vld [vmem:[#allocation0 + $0x38] sm:$0x1]  ;;  %158 = vst [vmem:[%s265_s1 + $0x6] sm:$0x1] %v122_v37 }
  0x8f   :  { %159 = vst [vmem:[%s265_s1 + $0x7] sm:$0x1] %v128_v38 }

// kernel: conditional_discriminator_forward.8
= control target key start
LH: loop header
LB: loop body
LE: loop exit
PB: predicated region body
PF: predicated region fallthrough
CT: control target
= control target key end

     0   :  { %s2034_s21 = smov 0   ;;  %s2564_s0 = inlined_call_operand.vmem [shape: f32[128,1024], index: 0, kind: input, shape index: {}]   ;;  %s2565_s1 = inlined_call_operand.vmem [shape: f32[1,1024], index: 1, kind: input, shape index: {}]   ;;  %s2566_s2 = inlined_call_operand.vmem [shape: f32[1,1024], index: 2, kind: input, shape index: {}]   ;;  %s2567_s3 = inlined_call_operand.vmem [shape: bf16[1024,128], index: 3, kind: input, shape index: {}]   ;;  %s2568_s4 = inlined_call_operand.vmem [shape: f32[1,128], index: 4, kind: input, shape index: {}]   ;;  %s2569_s5 = inlined_call_operand.vmem [shape: f32[128,128], index: 5, kind: output, shape index: {0}]   ;;  %s2570_s6 = inlined_call_operand.vmem [shape: f32[2,2,128], index: 6, kind: output, shape index: {1}]  }
   0x1 LB: > { %s2040_s22 = sadd.s32 4294967295, %s1997_s21   ;;  %p1684_p0 = scmp.ge.s32.totalorder %s1997_s21, 1  ;;  %s1997_s21 = sphi %s2034_s21, %s17_s21  }
   0x2   : > { %p217_p1 = scmp.lt.s32.totalorder %s1997_s21, 3 }
   0x4   : > { %p218_p2 = pnand %p1684_p0, %p217_p1 }
   0x5   : > { %v1927_v0 = vld [vmem:[%s2567_s3 + $0x40] sm:$0xff] (!%p218_p2)   ;;  %v1931_v4 = vld [vmem:[%s2567_s3 + $0x48] sm:$0xff] (!%p218_p2)   ;;  %v1935_v8 = vld [vmem:[%s2567_s3 + $0x50] sm:$0xff] (!%p218_p2)   ;;  %s1685_s9 = sshll.u32 (!%p218_p2), %s2040_s22, 3  ;;  %v336_v18 = vlaneseq (!%p218_p2)  ;;  %p265_p4 = scmp.lt.s32.totalorder (!%p218_p2), %s2040_s22, 1 }
   0x6   : > { %221 = sbr.rel (%p218_p2) target bundleno = 352 (0x160), region = 40  ;;  %v1928_v1 = vld [vmem:[%s2567_s3 + $0xc0] sm:$0xff] (!%p218_p2)   ;;  %1759 = vmatprep.subr.bf16.mxu0 (!%p218_p2), %v1927_v0  ;;  %v1932_v5 = vld [vmem:[%s2567_s3 + $0xc8] sm:$0xff] (!%p218_p2)   ;;  %v1936_v9 = vld [vmem:[%s2567_s3 + $0xd0] sm:$0xff] (!%p218_p2)   ;;  %p253_p3 = scmp.lt.s32.totalorder (!%p218_p2), %s1685_s9, 15 }
   0x7   : > { %v1929_v2 = vld [vmem:[%s2567_s3] sm:$0xff] (!%p218_p2)   ;;  %1799 = vmatprep.subr.bf16.mxu1 (!%p218_p2), %v1928_v1  ;;  %v1933_v6 = vld [vmem:[%s2567_s3 + $0x8] sm:$0xff] (!%p218_p2)   ;;  %v1937_v10 = vld [vmem:[%s2567_s3 + $0x10] sm:$0xff] (!%p218_p2)   ;;  %v2111_v23 = vshrl.u32 (!%p218_p2), %v336_v18, 7 }
   0x8   : > { %v1930_v3 = vld [vmem:[%s2567_s3 + $0x80] sm:$0xff] (!%p218_p2)   ;;  %1760 = vmatpush3.bf16.msra.mxu0 (!%p218_p2), %v1929_v2  ;;  %v1934_v7 = vld [vmem:[%s2567_s3 + $0x88] sm:$0xff] (!%p218_p2)   ;;  %v1938_v11 = vld [vmem:[%s2567_s3 + $0x90] sm:$0xff] (!%p218_p2)  }
   0x9   : > { %1800 = vmatpush3.bf16.msra.mxu1 (!%p218_p2), %v1930_v3  ;;  %1761 = vmatprep.subr.bf16.mxu0 (!%p218_p2), %v1931_v4  ;;  %v1939_v12 = vld [vmem:[%s2567_s3 + $0x58] sm:$0xff] (!%p218_p2)   ;;  %v1943_v16 = vld [vmem:[%s2567_s3 + $0x60] sm:$0xff] (!%p218_p2)   ;;  %v1947_v21 = vld [vmem:[%s2567_s3 + $0x68] sm:$0xff] (!%p218_p2)   ;;  %v342_v28 = vsub.s32 (!%p218_p2), 1, %v2111_v23  ;;  %v350_v31 = vsub.s32 (!%p218_p2), 3, %v2111_v23  ;;  %v338_v33 = vsub.s32 (!%p218_p2), 0, %v2111_v23 }
   0xa   : > { %1801 = vmatprep.subr.bf16.mxu1 (!%p218_p2), %v1932_v5  ;;  %v1940_v13 = vld [vmem:[%s2567_s3 + $0xd8] sm:$0xff] (!%p218_p2)   ;;  %v1944_v17 = vld [vmem:[%s2567_s3 + $0xe0] sm:$0xff] (!%p218_p2)   ;;  %v1948_v22 = vld [vmem:[%s2567_s3 + $0xe8] sm:$0xff] (!%p218_p2)   ;;  %v346_v35 = vsub.s32 (!%p218_p2), 2, %v2111_v23 }
   0xb   : > { %v1941_v14 = vld [vmem:[%s2567_s3 + $0x18] sm:$0xff] (!%p218_p2)   ;;  %v1945_v19 = vld [vmem:[%s2567_s3 + $0x20] sm:$0xff] (!%p218_p2)   ;;  %v1949_v24 = vld [vmem:[%s2567_s3 + $0x28] sm:$0xff] (!%p218_p2)  }
   0xc   : > { %1762 = vmatpush3.bf16.msra.mxu0 (!%p218_p2), %v1933_v6  ;;  %v1942_v15 = vld [vmem:[%s2567_s3 + $0x98] sm:$0xff] (!%p218_p2)   ;;  %v1946_v20 = vld [vmem:[%s2567_s3 + $0xa0] sm:$0xff] (!%p218_p2)   ;;  %v1950_v25 = vld [vmem:[%s2567_s3 + $0xa8] sm:$0xff] (!%p218_p2)  }
   0xd   : > { %1802 = vmatpush3.bf16.msra.mxu1 %v1934_v7  ;;  %1763 = vmatprep.subr.bf16.mxu0 %v1935_v8  ;;  %s2572_s9 = smov (!%p253_p3, %s1685_s9), 15  ;;  %v1951_v26 = vld [vmem:[%s2567_s3 + $0x70] sm:$0xff]   ;;  %v1955_v32 = vld [vmem:[%s2567_s3 + $0x78] sm:$0xff]   ;;  %v2160_v40 = vld [vmem:[%s2565_s1] sm:$0xff]  ;;  %s2574_s22 = smov (!%p265_p4, %s2040_s22), 1 }
   0xe   : > { %1803 = vmatprep.subr.bf16.mxu1 %v1936_v9  ;;  %v1952_v27 = vld [vmem:[%s2567_s3 + $0xf0] sm:$0xff]   ;;  %s1758_s11 = sshll.u32 %s2572_s9, 6  ;;  %v1956_v34 = vld [vmem:[%s2567_s3 + $0xf8] sm:$0xff]   ;;  %v2163_v41 = vrot.slane %v2160_v40, %v342_v28  ;;  %v2168_v42 = vld [vmem:[%s2566_s2] sm:$0xff]  ;;  %v2173_v45 = vrot.slane %v2160_v40, %v350_v31  ;;  %v2176_v46 = vrot.slane %v2160_v40, %v338_v33  ;;  %v2179_v47 = vrot.slane %v2160_v40, %v346_v35  ;;  %s1689_s13 = sshll.u32 %s2572_s9, 3 }
   0xf   : > { %v1953_v29 = vld [vmem:[%s2567_s3 + $0x30] sm:$0xff]   ;;  %s2146_s20 = scalar_lea.vmem %s2564_s0, %s1758_s11  ;;  %v1957_v36 = vld [vmem:[%s2567_s3 + $0x38] sm:$0xff]   ;;  %v2182_v48 = vrot.slane %v2168_v42, %v342_v28  ;;  %v2185_v49 = vrot.slane %v2168_v42, %v350_v31  ;;  %v2190_v52 = vrot.slane %v2168_v42, %v338_v33  ;;  %v2194_v54 = vrot.slane %v2168_v42, %v346_v35  ;;  %v1959_v0 = vld [vmem:[%s2567_s3 + $0x140] sm:$0xff]   ;;  %s2540_s16 = scalar_lea.vmem %s2569_s5, %s1689_s13 }
  0x10   : > { %1764 = vmatpush3.bf16.msra.mxu0 %v1937_v10  ;;  %v1954_v30 = vld [vmem:[%s2567_s3 + $0xb0] sm:$0xff]   ;;  %v1958_v37 = vld [vmem:[%s2567_s3 + $0xb8] sm:$0xff]   ;;  %v271_v38 = vld [vmem:[%s2146_s20 + $0x8] sm:$0xff]  ;;  %s1690_s9 = sshll.u32 %s2574_s22, 1 }
  0x11   : > { %1804 = vmatpush3.bf16.msra.mxu1 %v1938_v11  ;;  %1765 = vmatprep.subr.bf16.mxu0 %v1939_v12  ;;  %v279_v39 = vld [vmem:[%s2146_s20 + $0x48] sm:$0xff]  ;;  %v273_v43 = vld [vmem:[%s2146_s20 + $0x18] sm:$0xff]  ;;  %v270_v50 = vld [vmem:[%s2146_s20] sm:$0xff]  ;;  %v377_v55 = vmul.f32 %v2163_v41, %v271_v38  ;;  %s268_s19 = scalar_lea.vmem %s2570_s6, %s1690_s9 }
  0x12   : > { %1805 = vmatprep.subr.bf16.mxu1 %v1940_v13  ;;  %v281_v44 = vld [vmem:[%s2146_s20 + $0x58] sm:$0xff]  ;;  %v278_v51 = vld [vmem:[%s2146_s20 + $0x40] sm:$0xff]  ;;  %v272_v53 = vld [vmem:[%s2146_s20 + $0x10] sm:$0xff]  ;;  %v385_v56 = vmul.f32 %v2163_v41, %v279_v39  ;;  %v379_v57 = vmul.f32 %v2173_v45, %v273_v43  ;;  %v376_v60 = vmul.f32 %v2176_v46, %v270_v50 }
  0x13   : > { %v387_v58 = vmul.f32 %v2173_v45, %v281_v44  ;;  %v280_v59 = vld [vmem:[%s2146_s20 + $0x50] sm:$0xff]  ;;  %v384_v61 = vmul.f32 %v2176_v46, %v278_v51  ;;  %v378_v62 = vmul.f32 %v2179_v47, %v272_v53  ;;  %v483_v1 = vadd.f32 %v2182_v48, %v377_v55  ;;  %v1960_v5 = vld [vmem:[%s2567_s3 + $0x1c0] sm:$0xff]   ;;  %v1963_v28 = vld [vmem:[%s2567_s3 + $0x148] sm:$0xff]  }
  0x14   : > { %1766 = vmatpush3.bf16.msra.mxu0 %v1941_v14  ;;  %v386_v63 = vmul.f32 %v2179_v47, %v280_v59  ;;  %v491_v2 = vadd.f32 %v2182_v48, %v385_v56  ;;  %v485_v3 = vadd.f32 %v2185_v49, %v379_v57  ;;  %v482_v6 = vadd.f32 %v2190_v52, %v376_v60  ;;  %v1964_v33 = vld [vmem:[%s2567_s3 + $0x1c8] sm:$0xff]   ;;  %v289_v38 = vld [vmem:[%s2146_s20 + $0x98] sm:$0xff]  ;;  %v286_v53 = vld [vmem:[%s2146_s20 + $0x80] sm:$0xff] }
  0x15   : > { %1806 = vmatpush3.bf16.msra.mxu1 %v1942_v15  ;;  %1767 = vmatprep.subr.bf16.mxu0 %v1943_v16  ;;  %v493_v4 = vadd.f32 %v2185_v49, %v387_v58  ;;  %v490_v7 = vadd.f32 %v2190_v52, %v384_v61  ;;  %v484_v8 = vadd.f32 %v2194_v54, %v378_v62  ;;  %vm547_vm0 = vcmp.gt.f32.partialorder %v483_v1, 0.0  ;;  %v297_v39 = vld [vmem:[%s2146_s20 + $0xd8] sm:$0xff]  ;;  %v1965_v43 = vld [vmem:[%s2567_s3 + $0x108] sm:$0xff]   ;;  %v294_v55 = vld [vmem:[%s2146_s20 + $0xc0] sm:$0xff] }
  0x16   : > { %1807 = vmatprep.subr.bf16.mxu1 %v1944_v17  ;;  %v492_v9 = vadd.f32 %v2194_v54, %v386_v63  ;;  %vm555_vm1 = vcmp.gt.f32.partialorder %v491_v2, 0.0  ;;  %v611_v10 = vmul.f32 0.2, %v483_v1  ;;  %v619_v11 = vmul.f32 0.2, %v491_v2  ;;  %v1966_v56 = vld [vmem:[%s2567_s3 + $0x188] sm:$0xff]  }
  0x17   : > { %vm549_vm2 = vcmp.gt.f32.partialorder %v485_v3, 0.0  ;;  %vm557_vm3 = vcmp.gt.f32.partialorder %v493_v4, 0.0  ;;  %v613_v12 = vmul.f32 0.2, %v485_v3  ;;  %v621_v13 = vmul.f32 0.2, %v493_v4 }
  0x18   : > { %1768 = vmatpush3.bf16.msra.mxu0 %v1945_v19  ;;  %v675_v14 = vsel %vm547_vm0, %v483_v1, %v611_v10  ;;  %v683_v15 = vsel %vm555_vm1, %v491_v2, %v619_v11  ;;  %vm546_vm4 = vcmp.gt.f32.partialorder %v482_v6, 0.0  ;;  %vm554_vm5 = vcmp.gt.f32.partialorder %v490_v7, 0.0  ;;  %v288_v63 = vld [vmem:[%s2146_s20 + $0x90] sm:$0xff] }
  0x19   : > { %1808 = vmatpush3.bf16.msra.mxu1 %v1946_v20  ;;  %1769 = vmatprep.subr.bf16.mxu0 %v1947_v21  ;;  %v739_v16 = vpack.c.bf16 %v683_v15, %v675_v14  ;;  %v677_v17 = vsel %vm549_vm2, %v485_v3, %v613_v12  ;;  %v685_v18 = vsel %vm557_vm3, %v493_v4, %v621_v13  ;;  %v610_v19 = vmul.f32 0.2, %v482_v6  ;;  %v296_v4 = vld [vmem:[%s2146_s20 + $0xd0] sm:$0xff]  ;;  %v1971_v15 = vld [vmem:[%s2567_s3 + $0x158] sm:$0xff]  }
  0x1a   : > { %1809 = vmatprep.subr.bf16.mxu1 %v1948_v22  ;;  %v741_v20 = vpack.c.bf16 %v685_v18, %v677_v17  ;;  %v618_v21 = vmul.f32 0.2, %v490_v7  ;;  %vm548_vm6 = vcmp.gt.f32.partialorder %v484_v8, 0.0  ;;  %vm556_vm7 = vcmp.gt.f32.partialorder %v492_v9, 0.0  ;;  %v1961_v22 = vld [vmem:[%s2567_s3 + $0x100] sm:$0xff]   ;;  %v1970_v11 = vld [vmem:[%s2567_s3 + $0x190] sm:$0xff]  }
  0x1b   : > { %1321 = vmatprep.mubr.bf16.mxu0 %v739_v16  ;;  %v395_v50 = vmul.f32 %v2173_v45, %v289_v38  ;;  %v403_v51 = vmul.f32 %v2173_v45, %v297_v39  ;;  %v392_v58 = vmul.f32 %v2176_v46, %v286_v53  ;;  %v400_v59 = vmul.f32 %v2176_v46, %v294_v55  ;;  %v313_v39 = vld [vmem:[%s2146_s20 + $0x158] sm:$0xff] }
  0x1c   : > { %1770 = vmatpush3.bf16.msra.mxu0 %v1949_v24  ;;  %v674_v24 = vsel %vm546_vm4, %v482_v6, %v610_v19  ;;  %1386 = vmatprep.mubr.bf16.mxu1 %v741_v20  ;;  %v394_v19 = vmul.f32 %v2179_v47, %v288_v63  ;;  %v419_v53 = vmul.f32 %v2173_v45, %v313_v39  ;;  %v366_v39 = vsub.s32 7, %v2111_v23 }
  0x1d   : > { %1810 = vmatpush3.bf16.msra.mxu1 %v1950_v25  ;;  %1771 = vmatprep.subr.bf16.mxu0 %v1951_v26  ;;  %v612_v25 = vmul.f32 0.2, %v484_v8  ;;  %v620_v26 = vmul.f32 0.2, %v492_v9  ;;  %v501_v61 = vadd.f32 %v2185_v49, %v395_v50  ;;  %v509_v62 = vadd.f32 %v2185_v49, %v403_v51  ;;  %v310_v50 = vld [vmem:[%s2146_s20 + $0x140] sm:$0xff] }
  0x1e   : > { %1811 = vmatprep.subr.bf16.mxu1 %v1952_v27  ;;  %v1962_v27 = vld [vmem:[%s2567_s3 + $0x180] sm:$0xff]   ;;  %v498_v2 = vadd.f32 %v2190_v52, %v392_v58  ;;  %v506_v3 = vadd.f32 %v2190_v52, %v400_v59  ;;  %v525_v63 = vadd.f32 %v2185_v49, %v419_v53  ;;  %v329_v53 = vld [vmem:[%s2146_s20 + $0x1d8] sm:$0xff] }
  0x1f   : > { %v676_v31 = vsel %vm548_vm6, %v484_v8, %v612_v25  ;;  %vm565_vm10 = vcmp.gt.f32.partialorder %v501_v61, 0.0  ;;  %vm573_vm11 = vcmp.gt.f32.partialorder %v509_v62, 0.0  ;;  %v637_v10 = vmul.f32 0.2, %v509_v62 }
  0x20   : > { %1772 = vmatpush3.bf16.msra.mxu0 %v1953_v29  ;;  %v682_v29 = vsel %vm554_vm5, %v490_v7, %v618_v21  ;;  %v1969_v7 = vld [vmem:[%s2567_s3 + $0x110] sm:$0xff]   ;;  %vm562_vm12 = vcmp.gt.f32.partialorder %v498_v2, 0.0  ;;  %vm570_vm13 = vcmp.gt.f32.partialorder %v506_v3, 0.0  ;;  %v626_v13 = vmul.f32 0.2, %v498_v2 }
  0x21   : > { %1812 = vmatpush3.bf16.msra.mxu1 %v1954_v30  ;;  %1773 = vmatprep.subr.bf16.mxu0 %v1955_v32  ;;  %v738_v30 = vpack.c.bf16 %v682_v29, %v674_v24  ;;  %v684_v32 = vsel %vm556_vm7, %v492_v9, %v620_v26  ;;  %v629_v9 = vmul.f32 0.2, %v501_v61  ;;  %v634_v14 = vmul.f32 0.2, %v506_v3  ;;  %v1973_v29 = vld [vmem:[%s2567_s3 + $0x118] sm:$0xff]  }
  0x22   : > { %1813 = vmatprep.subr.bf16.mxu1 %v1956_v34  ;;  %v287_v34 = vld [vmem:[%s2146_s20 + $0x88] sm:$0xff]  ;;  %v740_v35 = vpack.c.bf16 %v684_v32, %v676_v31  ;;  %v701_v18 = vsel %vm573_vm11, %v509_v62, %v637_v10  ;;  %v690_v21 = vsel %vm562_vm12, %v498_v2, %v626_v13  ;;  %v402_v24 = vmul.f32 %v2179_v47, %v296_v4  ;;  %v1974_v31 = vld [vmem:[%s2567_s3 + $0x198] sm:$0xff]   ;;  %v1975_v62 = vld [vmem:[%s2567_s3 + $0x160] sm:$0xff]  }
  0x23   : > { %v693_v17 = vsel %vm565_vm10, %v501_v61, %v629_v9  ;;  %v500_v26 = vadd.f32 %v2194_v54, %v394_v19  ;;  %v312_v2 = vld [vmem:[%s2146_s20 + $0x150] sm:$0xff]  ;;  %v1976_v4 = vld [vmem:[%s2567_s3 + $0x1e0] sm:$0xff]   ;;  %vm589_vm3 = vcmp.gt.f32.partialorder %v525_v63, 0.0 }
  0x24   : > { %1774 = vmatpush3.bf16.msra.mxu0 %v1957_v36  ;;  %v295_v36 = vld [vmem:[%s2146_s20 + $0xc8] sm:$0xff]  ;;  %v749_v20 = vpack.c.bf16 %v701_v18, %v693_v17  ;;  %v418_v19 = vmul.f32 %v2179_v47, %v312_v2 }
  0x25   : > { %1814 = vmatpush3.bf16.msra.mxu1 %v1958_v37  ;;  %1839 = vmatprep.subr.bf16.mxu0 %v1959_v0  ;;  %v393_v37 = vmul.f32 %v2163_v41, %v287_v34  ;;  %v401_v44 = vmul.f32 %v2163_v41, %v295_v36  ;;  %v1967_v0 = vld [vmem:[%s2567_s3 + $0x150] sm:$0xff]   ;;  %vm564_vm14 = vcmp.gt.f32.partialorder %v500_v26, 0.0  ;;  %v311_v34 = vld [vmem:[%s2146_s20 + $0x148] sm:$0xff] }
  0x26   : > { %1879 = vmatprep.subr.bf16.mxu1 %v1960_v5  ;;  %v1968_v5 = vld [vmem:[%s2567_s3 + $0x1d0] sm:$0xff]   ;;  %v417_v38 = vmul.f32 %v2163_v41, %v311_v34  ;;  %v319_v34 = vld [vmem:[%s2146_s20 + $0x188] sm:$0xff] }
  0x27   : > { %1322 = vmatmul.mubr.bf16.vlgmr.msra.gmra.mrb[0].mxu0 %v738_v30  ;;  %v499_v57 = vadd.f32 %v2182_v48, %v393_v37  ;;  %v507_v60 = vadd.f32 %v2182_v48, %v401_v44  ;;  %v628_v30 = vmul.f32 0.2, %v500_v26  ;;  %v302_v44 = vld [vmem:[%s2146_s20 + $0x100] sm:$0xff] }
  0x28   : > { %1387 = vmatmul.mubr.bf16.vlgmr.msra.gmra.mrb[0].mxu1 %v740_v35  ;;  %1840 = vmatpush3.bf16.msra.mxu0 %v1961_v22  ;;  %v698_v22 = vsel %vm570_vm13, %v506_v3, %v634_v14  ;;  %v305_v35 = vld [vmem:[%s2146_s20 + $0x118] sm:$0xff]  ;;  %v408_v55 = vmul.f32 %v2176_v46, %v302_v44 }
  0x29   : > { %1880 = vmatpush3.bf16.msra.mxu1 %v1962_v27  ;;  %1841 = vmatprep.subr.bf16.mxu0 %v1963_v28  ;;  %vm563_vm8 = vcmp.gt.f32.partialorder %v499_v57, 0.0  ;;  %v627_v1 = vmul.f32 0.2, %v499_v57  ;;  %vm571_vm9 = vcmp.gt.f32.partialorder %v507_v60, 0.0  ;;  %v635_v6 = vmul.f32 0.2, %v507_v60 }
  0x2a   : > { %1881 = vmatprep.subr.bf16.mxu1 %v1964_v33  ;;  %v746_v25 = vpack.c.bf16 %v698_v22, %v690_v21  ;;  %v1972_v27 = vld [vmem:[%s2567_s3 + $0x1d8] sm:$0xff]   ;;  %1394 = vmatprep.mubr.bf16.mxu1 %v749_v20  ;;  %v508_v28 = vadd.f32 %v2194_v54, %v402_v24  ;;  %v303_v33 = vld [vmem:[%s2146_s20 + $0x108] sm:$0xff]  ;;  %v692_v36 = vsel %vm564_vm14, %v500_v26, %v628_v30  ;;  %v358_v24 = vsub.s32 5, %v2111_v23 }
  0x2b   : > { %v691_v8 = vsel %vm563_vm8, %v499_v57, %v627_v1  ;;  %v699_v12 = vsel %vm571_vm9, %v507_v60, %v635_v6  ;;  %v409_v37 = vmul.f32 %v2163_v41, %v303_v33  ;;  %v304_v57 = vld [vmem:[%s2146_s20 + $0x110] sm:$0xff]  ;;  %v523_v60 = vadd.f32 %v2182_v48, %v417_v38  ;;  %v1979_v22 = vld [vmem:[%s2567_s3 + $0x168] sm:$0xff]  }
  0x2c   : > { %1842 = vmatpush3.bf16.msra.mxu0 %v1965_v43  ;;  %v747_v16 = vpack.c.bf16 %v699_v12, %v691_v8  ;;  %vm572_vm15 = vcmp.gt.f32.partialorder %v508_v28, 0.0  ;;  %v636_v32 = vmul.f32 0.2, %v508_v28  ;;  %v411_v43 = vmul.f32 %v2173_v45, %v305_v35  ;;  %v1978_v12 = vld [vmem:[%s2567_s3 + $0x1a0] sm:$0xff]   ;;  %v1981_v30 = vld [vmem:[%s2567_s3 + $0x128] sm:$0xff]  }
  0x2d   : > { %1882 = vmatpush3.bf16.msra.mxu1 %v1966_v56  ;;  %1843 = vmatprep.subr.bf16.mxu0 %v1967_v0  ;;  %v416_v56 = vmul.f32 %v2176_v46, %v310_v50  ;;  %v515_v59 = vadd.f32 %v2182_v48, %v409_v37  ;;  %v514_v0 = vadd.f32 %v2190_v52, %v408_v55  ;;  %vm587_vm1 = vcmp.gt.f32.partialorder %v523_v60, 0.0  ;;  %v1982_v33 = vld [vmem:[%s2567_s3 + $0x1a8] sm:$0xff]   ;;  %v318_v55 = vld [vmem:[%s2146_s20 + $0x180] sm:$0xff] }
  0x2e   : > { %1883 = vmatprep.subr.bf16.mxu1 %v1968_v5  ;;  %1329 = vmatprep.mubr.bf16.mxu0 %v747_v16  ;;  %v700_v51 = vsel %vm572_vm15, %v508_v28, %v636_v32  ;;  %v517_v61 = vadd.f32 %v2185_v49, %v411_v43  ;;  %v410_v3 = vmul.f32 %v2179_v47, %v304_v57  ;;  %v651_v6 = vmul.f32 0.2, %v523_v60  ;;  %v1980_v28 = vld [vmem:[%s2567_s3 + $0x1e8] sm:$0xff]  }
  0x2f   : > { %1330 = vmatmul.mubr.bf16.gmra.mrb[4].mxu0 %v746_v25  ;;  %v748_v58 = vpack.c.bf16 %v700_v51, %v692_v36  ;;  %v522_v1 = vadd.f32 %v2190_v52, %v416_v56  ;;  %vm579_vm0 = vcmp.gt.f32.partialorder %v515_v59, 0.0  ;;  %v643_v5 = vmul.f32 0.2, %v515_v59  ;;  %v327_v35 = vld [vmem:[%s2146_s20 + $0x1c8] sm:$0xff]  ;;  %v321_v36 = vld [vmem:[%s2146_s20 + $0x198] sm:$0xff]  ;;  %v326_v56 = vld [vmem:[%s2146_s20 + $0x1c0] sm:$0xff] }
  0x30   : > { %1844 = vmatpush3.bf16.msra.mxu0 %v1969_v7  ;;  %vm581_vm2 = vcmp.gt.f32.partialorder %v517_v61, 0.0  ;;  %v645_v7 = vmul.f32 0.2, %v517_v61  ;;  %v653_v8 = vmul.f32 0.2, %v525_v63  ;;  %v715_v10 = vsel %vm587_vm1, %v523_v60, %v651_v6 }
  0x31   : > { %1884 = vmatpush3.bf16.msra.mxu1 %v1970_v11  ;;  %1845 = vmatprep.subr.bf16.mxu0 %v1971_v15  ;;  %v707_v9 = vsel %vm579_vm0, %v515_v59, %v643_v5  ;;  %vm578_vm4 = vcmp.gt.f32.partialorder %v514_v0, 0.0  ;;  %vm586_vm5 = vcmp.gt.f32.partialorder %v522_v1, 0.0  ;;  %v1977_v11 = vld [vmem:[%s2567_s3 + $0x120] sm:$0xff]   ;;  %v642_v16 = vmul.f32 0.2, %v514_v0 }
  0x32   : > { %1885 = vmatprep.subr.bf16.mxu1 %v1972_v27  ;;  %1395 = vmatmul.mubr.bf16.gmra.mrb[4].mxu1 %v748_v58  ;;  %v755_v13 = vpack.c.bf16 %v715_v10, %v707_v9  ;;  %v709_v14 = vsel %vm581_vm2, %v517_v61, %v645_v7  ;;  %v717_v15 = vsel %vm589_vm3, %v525_v63, %v653_v8  ;;  %v650_v18 = vmul.f32 0.2, %v522_v1  ;;  %v328_v63 = vld [vmem:[%s2146_s20 + $0x1d0] sm:$0xff] }
  0x33   : > { %v757_v17 = vpack.c.bf16 %v717_v15, %v709_v14  ;;  %v516_v20 = vadd.f32 %v2194_v54, %v410_v3  ;;  %v706_v21 = vsel %vm578_vm4, %v514_v0, %v642_v16  ;;  %v524_v26 = vadd.f32 %v2194_v54, %v418_v19  ;;  %v1983_v3 = vld [vmem:[%s2567_s3 + $0x170] sm:$0xff]  }
  0x34   : > { %1846 = vmatpush3.bf16.msra.mxu0 %v1973_v29  ;;  %1337 = vmatprep.mubr.bf16.mxu0 %v755_v13  ;;  %v714_v25 = vsel %vm586_vm5, %v522_v1, %v650_v18  ;;  %v2342_v37 = vrot.slane %v2160_v40, %v358_v24  ;;  %v2345_v38 = vrot.slane %v2168_v42, %v358_v24  ;;  %v354_v43 = vsub.s32 4, %v2111_v23  ;;  %v1986_v16 = vld [vmem:[%s2567_s3 + $0x1b0] sm:$0xff]  }
  0x35   : > { %1886 = vmatpush3.bf16.msra.mxu1 %v1974_v31  ;;  %1847 = vmatprep.subr.bf16.mxu0 %v1975_v62  ;;  %vm580_vm6 = vcmp.gt.f32.partialorder %v516_v20, 0.0  ;;  %v644_v27 = vmul.f32 0.2, %v516_v20  ;;  %v754_v29 = vpack.c.bf16 %v714_v25, %v706_v21  ;;  %vm588_vm7 = vcmp.gt.f32.partialorder %v524_v26, 0.0  ;;  %v320_v62 = vld [vmem:[%s2146_s20 + $0x190] sm:$0xff] }
  0x36   : > { %1887 = vmatprep.subr.bf16.mxu1 %v1976_v4  ;;  %1402 = vmatprep.mubr.bf16.mxu1 %v757_v17  ;;  %v652_v31 = vmul.f32 0.2, %v524_v26  ;;  %v425_v50 = vmul.f32 %v2163_v41, %v319_v34  ;;  %v433_v51 = vmul.f32 %v2163_v41, %v327_v35  ;;  %v362_v57 = vsub.s32 6, %v2111_v23  ;;  %v1987_v17 = vld [vmem:[%s2567_s3 + $0x178] sm:$0xff]   ;;  %v284_v23 = vld [vmem:[%s2146_s20 + $0x70] sm:$0xff] }
  0x37   : > { %v708_v32 = vsel %vm580_vm6, %v516_v20, %v644_v27  ;;  %1338 = vmatmul.mubr.bf16.gmra.mrb[8].mxu0 %v754_v29  ;;  %v427_v59 = vmul.f32 %v2173_v45, %v321_v36  ;;  %v435_v60 = vmul.f32 %v2173_v45, %v329_v53  ;;  %v424_v61 = vmul.f32 %v2176_v46, %v318_v55  ;;  %v1988_v20 = vld [vmem:[%s2567_s3 + $0x1f8] sm:$0xff]  }
  0x38   : > { %1848 = vmatpush3.bf16.msra.mxu0 %v1977_v11  ;;  %v716_v44 = vsel %vm588_vm7, %v524_v26, %v652_v31  ;;  %v531_v0 = vadd.f32 %v2182_v48, %v425_v50  ;;  %v539_v1 = vadd.f32 %v2182_v48, %v433_v51  ;;  %v432_v41 = vmul.f32 %v2176_v46, %v326_v56  ;;  %v1984_v48 = vld [vmem:[%s2567_s3 + $0x1f0] sm:$0xff]   ;;  %v1989_v27 = vld [vmem:[%s2567_s3 + $0x138] sm:$0xff]  }
  0x39   : > { %1888 = vmatpush3.bf16.msra.mxu1 %v1978_v12  ;;  %1849 = vmatprep.subr.bf16.mxu0 %v1979_v22  ;;  %v756_v58 = vpack.c.bf16 %v716_v44, %v708_v32  ;;  %v426_v2 = vmul.f32 %v2179_v47, %v320_v62  ;;  %v533_v4 = vadd.f32 %v2185_v49, %v427_v59  ;;  %v277_v50 = vld [vmem:[%s2146_s20 + $0x38] sm:$0xff]  ;;  %v282_v59 = vld [vmem:[%s2146_s20 + $0x60] sm:$0xff] }
  0x3a   : > { %1889 = vmatprep.subr.bf16.mxu1 %v1980_v28  ;;  %v541_v45 = vadd.f32 %v2185_v49, %v435_v60  ;;  %v530_v5 = vadd.f32 %v2190_v52, %v424_v61  ;;  %v434_v6 = vmul.f32 %v2179_v47, %v328_v63  ;;  %vm595_vm8 = vcmp.gt.f32.partialorder %v531_v0, 0.0  ;;  %v1985_v47 = vld [vmem:[%s2567_s3 + $0x130] sm:$0xff]   ;;  %v285_v51 = vld [vmem:[%s2146_s20 + $0x78] sm:$0xff] }
  0x3b   : > { %1403 = vmatmul.mubr.bf16.gmra.mrb[8].mxu1 %v756_v58  ;;  %vm603_vm9 = vcmp.gt.f32.partialorder %v539_v1, 0.0  ;;  %v659_v46 = vmul.f32 0.2, %v531_v0  ;;  %v667_v7 = vmul.f32 0.2, %v539_v1  ;;  %vm597_vm10 = vcmp.gt.f32.partialorder %v533_v4, 0.0 }
  0x3c   : > { %1850 = vmatpush3.bf16.msra.mxu0 %v1981_v30  ;;  %vm605_vm11 = vcmp.gt.f32.partialorder %v541_v45, 0.0  ;;  %v661_v8 = vmul.f32 0.2, %v533_v4  ;;  %v669_v9 = vmul.f32 0.2, %v541_v45  ;;  %v538_v11 = vadd.f32 %v2190_v52, %v432_v41  ;;  %v1990_v30 = vld [vmem:[%s2567_s3 + $0x1b8] sm:$0xff]  }
  0x3d   : > { %1890 = vmatpush3.bf16.msra.mxu1 %v1982_v33  ;;  %1851 = vmatprep.subr.bf16.mxu0 %v1983_v3  ;;  %v723_v10 = vsel %vm595_vm8, %v531_v0, %v659_v46  ;;  %v731_v49 = vsel %vm603_vm9, %v539_v1, %v667_v7  ;;  %vm594_vm12 = vcmp.gt.f32.partialorder %v530_v5, 0.0  ;;  %v658_v15 = vmul.f32 0.2, %v530_v5  ;;  %v275_v33 = vld [vmem:[%s2146_s20 + $0x28] sm:$0xff]  ;;  %v274_v58 = vld [vmem:[%s2146_s20 + $0x20] sm:$0xff]  ;;  %v276_v60 = vld [vmem:[%s2146_s20 + $0x30] sm:$0xff] }
  0x3e   : > { %1891 = vmatprep.subr.bf16.mxu1 %v1984_v48  ;;  %v763_v12 = vpack.c.bf16 %v731_v49, %v723_v10  ;;  %v725_v13 = vsel %vm597_vm10, %v533_v4, %v661_v8  ;;  %v733_v14 = vsel %vm605_vm11, %v541_v45, %v669_v9  ;;  %vm602_vm13 = vcmp.gt.f32.partialorder %v538_v11, 0.0  ;;  %v291_v9 = vld [vmem:[%s2146_s20 + $0xa8] sm:$0xff] }
  0x3f   : > { %v765_v18 = vpack.c.bf16 %v733_v14, %v725_v13  ;;  %v666_v52 = vmul.f32 0.2, %v538_v11  ;;  %v532_v19 = vadd.f32 %v2194_v54, %v426_v2  ;;  %v722_v21 = vsel %vm594_vm12, %v530_v5, %v658_v15  ;;  %v293_v13 = vld [vmem:[%s2146_s20 + $0xb8] sm:$0xff] }
  0x40   : > { %1852 = vmatpush3.bf16.msra.mxu0 %v1985_v47  ;;  %1345 = vmatprep.mubr.bf16.mxu0 %v763_v12  ;;  %v540_v22 = vadd.f32 %v2194_v54, %v434_v6  ;;  %v2392_v24 = vrot.slane %v2160_v40, %v366_v39  ;;  %v2400_v54 = vrot.slane %v2160_v40, %v354_v43  ;;  %v299_v12 = vld [vmem:[%s2146_s20 + $0xe8] sm:$0xff] }
  0x41   : > { %1892 = vmatpush3.bf16.msra.mxu1 %v1986_v16  ;;  %1410 = vmatprep.mubr.bf16.mxu1 %v765_v18  ;;  %v730_v25 = vsel %vm602_vm13, %v538_v11, %v666_v52  ;;  %vm596_vm14 = vcmp.gt.f32.partialorder %v532_v19, 0.0  ;;  %v660_v26 = vmul.f32 0.2, %v532_v19  ;;  %v2408_v31 = vrot.slane %v2160_v40, %v362_v57  ;;  %v283_v40 = vld [vmem:[%s2146_s20 + $0x68] sm:$0xff]  ;;  %v301_v18 = vld [vmem:[%s2146_s20 + $0xf8] sm:$0xff]  ;;  %v290_v52 = vld [vmem:[%s2146_s20 + $0xa0] sm:$0xff] }
  0x42   : > { %1853 = vmatprep.subr.bf16.mxu0 %v1987_v17  ;;  %v762_v28 = vpack.c.bf16 %v730_v25, %v722_v21  ;;  %vm604_vm15 = vcmp.gt.f32.partialorder %v540_v22, 0.0  ;;  %v668_v29 = vmul.f32 0.2, %v540_v22  ;;  %1893 = vmatprep.subr.bf16.mxu1 %v1988_v20  ;;  %v2414_v34 = vrot.slane %v2168_v42, %v366_v39 }
  0x43   : > { %v724_v32 = vsel %vm596_vm14, %v532_v19, %v660_v26  ;;  %v2419_v35 = vrot.slane %v2168_v42, %v354_v43  ;;  %v381_v44 = vmul.f32 %v2342_v37, %v275_v33  ;;  %v2428_v39 = vrot.slane %v2168_v42, %v362_v57 }
  0x44   : > { %1854 = vmatpush3.bf16.msra.mxu0 %v1989_v27  ;;  %v732_v36 = vsel %vm604_vm15, %v540_v22, %v668_v29  ;;  %v389_v55 = vmul.f32 %v2342_v37, %v283_v40  ;;  %v383_v43 = vmul.f32 %v2392_v24, %v277_v50  ;;  %v391_v56 = vmul.f32 %v2392_v24, %v285_v51  ;;  %v298_v22 = vld [vmem:[%s2146_s20 + $0xe0] sm:$0xff] }
  0x45   : > { %1346 = vmatmul.mubr.bf16.gmra.mrb[12].mxu0 %v762_v28  ;;  %1894 = vmatpush3.bf16.msra.mxu1 %v1990_v30  ;;  %v764_v53 = vpack.c.bf16 %v732_v36, %v724_v32  ;;  %v487_v61 = vadd.f32 %v2345_v38, %v381_v44  ;;  %v380_v62 = vmul.f32 %v2400_v54, %v274_v58 }
  0x46   : > { %v388_v63 = vmul.f32 %v2400_v54, %v282_v59  ;;  %v382_v42 = vmul.f32 %v2408_v31, %v276_v60  ;;  %v495_v57 = vadd.f32 %v2345_v38, %v389_v55  ;;  %v489_v0 = vadd.f32 %v2414_v34, %v383_v43  ;;  %v292_v55 = vld [vmem:[%s2146_s20 + $0xb0] sm:$0xff] }
  0x47   : > { %1411 = vmatmul.mubr.bf16.gmra.mrb[12].mxu1 %v764_v53  ;;  %v497_v1 = vadd.f32 %v2414_v34, %v391_v56  ;;  %v390_v41 = vmul.f32 %v2408_v31, %v284_v23  ;;  %vm551_vm0 = vcmp.gt.f32.partialorder %v487_v61, 0.0  ;;  %v615_v2 = vmul.f32 0.2, %v487_v61 }
  0x48   : > { %v486_v3 = vadd.f32 %v2419_v35, %v380_v62  ;;  %v494_v4 = vadd.f32 %v2419_v35, %v388_v63  ;;  %vm559_vm1 = vcmp.gt.f32.partialorder %v495_v57, 0.0  ;;  %v623_v45 = vmul.f32 0.2, %v495_v57 }
  0x49   : > { %vm553_vm2 = vcmp.gt.f32.partialorder %v489_v0, 0.0  ;;  %vm561_vm3 = vcmp.gt.f32.partialorder %v497_v1, 0.0  ;;  %v679_v5 = vsel %vm551_vm0, %v487_v61, %v615_v2  ;;  %v617_v6 = vmul.f32 0.2, %v489_v0  ;;  %v300_v61 = vld [vmem:[%s2146_s20 + $0xf0] sm:$0xff] }
  0x4a   : > { %v625_v48 = vmul.f32 0.2, %v497_v1  ;;  %vm550_vm4 = vcmp.gt.f32.partialorder %v486_v3, 0.0  ;;  %v687_v46 = vsel %vm559_vm1, %v495_v57, %v623_v45  ;;  %vm558_vm5 = vcmp.gt.f32.partialorder %v494_v4, 0.0  ;;  %v307_v57 = vld [vmem:[%s2146_s20 + $0x128] sm:$0xff] }
  0x4b   : > { %v614_v7 = vmul.f32 0.2, %v486_v3  ;;  %v622_v8 = vmul.f32 0.2, %v494_v4  ;;  %v743_v10 = vpack.c.bf16 %v687_v46, %v679_v5  ;;  %v681_v49 = vsel %vm553_vm2, %v489_v0, %v617_v6  ;;  %v315_v0 = vld [vmem:[%s2146_s20 + $0x168] sm:$0xff] }
  0x4c   : > { %v689_v11 = vsel %vm561_vm3, %v497_v1, %v625_v48  ;;  %v488_v47 = vadd.f32 %v2428_v39, %v382_v42  ;;  %v496_v17 = vadd.f32 %v2428_v39, %v390_v41  ;;  %v397_v21 = vmul.f32 %v2342_v37, %v291_v9 }
  0x4d   : > { %v745_v14 = vpack.c.bf16 %v689_v11, %v681_v49  ;;  %v678_v15 = vsel %vm550_vm4, %v486_v3, %v614_v7  ;;  %v686_v16 = vsel %vm558_vm5, %v494_v4, %v622_v8  ;;  %1451 = vmatprep.mubr.bf16.mxu0 %v743_v10  ;;  %v405_v26 = vmul.f32 %v2342_v37, %v299_v12  ;;  %v309_v3 = vld [vmem:[%s2146_s20 + $0x138] sm:$0xff] }
  0x4e   : > { %v742_v19 = vpack.c.bf16 %v686_v16, %v678_v15  ;;  %vm552_vm6 = vcmp.gt.f32.partialorder %v488_v47, 0.0  ;;  %v616_v20 = vmul.f32 0.2, %v488_v47  ;;  %vm560_vm7 = vcmp.gt.f32.partialorder %v496_v17, 0.0  ;;  %v317_v4 = vld [vmem:[%s2146_s20 + $0x178] sm:$0xff] }
  0x4f   : > { %1516 = vmatprep.mubr.bf16.mxu1 %v745_v14  ;;  %v624_v25 = vmul.f32 0.2, %v496_v17  ;;  %v399_v27 = vmul.f32 %v2392_v24, %v293_v13  ;;  %v503_v29 = vadd.f32 %v2345_v38, %v397_v21  ;;  %v407_v30 = vmul.f32 %v2392_v24, %v301_v18 }
  0x50   : > { %1452 = vmatmul.mubr.bf16.vlgmr.msra.gmra.mrb[16].mxu0 %v742_v19  ;;  %v680_v28 = vsel %vm552_vm6, %v488_v47, %v616_v20  ;;  %v396_v32 = vmul.f32 %v2400_v54, %v290_v52  ;;  %v511_v36 = vadd.f32 %v2345_v38, %v405_v26  ;;  %v404_v44 = vmul.f32 %v2400_v54, %v298_v22  ;;  %v306_v19 = vld [vmem:[%s2146_s20 + $0x120] sm:$0xff]  ;;  %v316_v26 = vld [vmem:[%s2146_s20 + $0x170] sm:$0xff] }
  0x51   : > { %v688_v33 = vsel %vm560_vm7, %v496_v17, %v624_v25  ;;  %v505_v40 = vadd.f32 %v2414_v34, %v399_v27  ;;  %vm567_vm8 = vcmp.gt.f32.partialorder %v503_v29, 0.0  ;;  %v631_v51 = vmul.f32 0.2, %v503_v29  ;;  %v314_v20 = vld [vmem:[%s2146_s20 + $0x160] sm:$0xff]  ;;  %v308_v25 = vld [vmem:[%s2146_s20 + $0x130] sm:$0xff] }
  0x52   : > { %v744_v50 = vpack.c.bf16 %v688_v33, %v680_v28  ;;  %v513_v53 = vadd.f32 %v2414_v34, %v407_v30  ;;  %vm575_vm9 = vcmp.gt.f32.partialorder %v511_v36, 0.0  ;;  %v639_v43 = vmul.f32 0.2, %v511_v36  ;;  %v323_v30 = vld [vmem:[%s2146_s20 + $0x1a8] sm:$0xff] }
  0x53   : > { %vm569_vm10 = vcmp.gt.f32.partialorder %v505_v40, 0.0  ;;  %v633_v56 = vmul.f32 0.2, %v505_v40  ;;  %v695_v58 = vsel %vm567_vm8, %v503_v29, %v631_v51  ;;  %v502_v60 = vadd.f32 %v2419_v35, %v396_v32 }
  0x54   : > { %1517 = vmatmul.mubr.bf16.vlgmr.msra.gmra.mrb[16].mxu1 %v744_v50  ;;  %vm577_vm11 = vcmp.gt.f32.partialorder %v513_v53, 0.0  ;;  %v641_v59 = vmul.f32 0.2, %v513_v53  ;;  %v703_v62 = vsel %vm575_vm9, %v511_v36, %v639_v43  ;;  %v510_v23 = vadd.f32 %v2419_v35, %v404_v44  ;;  %v331_v44 = vld [vmem:[%s2146_s20 + $0x1e8] sm:$0xff] }
  0x55   : > { %v697_v63 = vsel %vm569_vm10, %v505_v40, %v633_v56  ;;  %v398_v42 = vmul.f32 %v2408_v31, %v292_v55  ;;  %v751_v1 = vpack.c.bf16 %v703_v62, %v695_v58  ;;  %vm566_vm12 = vcmp.gt.f32.partialorder %v502_v60, 0.0 }
  0x56   : > { %v705_v41 = vsel %vm577_vm11, %v513_v53, %v641_v59  ;;  %v630_v2 = vmul.f32 0.2, %v502_v60  ;;  %vm574_vm13 = vcmp.gt.f32.partialorder %v510_v23, 0.0  ;;  %v638_v5 = vmul.f32 0.2, %v510_v23 }
  0x57   : > { %v753_v45 = vpack.c.bf16 %v705_v41, %v697_v63  ;;  %v406_v6 = vmul.f32 %v2408_v31, %v300_v61  ;;  %1459 = vmatprep.mubr.bf16.mxu0 %v751_v1  ;;  %v504_v46 = vadd.f32 %v2428_v39, %v398_v42  ;;  %v413_v7 = vmul.f32 %v2342_v37, %v307_v57 }
  0x58   : > { %v694_v48 = vsel %vm566_vm12, %v502_v60, %v630_v2  ;;  %v421_v8 = vmul.f32 %v2342_v37, %v315_v0  ;;  %v702_v9 = vsel %vm574_vm13, %v510_v23, %v638_v5  ;;  %v415_v49 = vmul.f32 %v2392_v24, %v309_v3  ;;  %v325_v23 = vld [vmem:[%s2146_s20 + $0x1b8] sm:$0xff] }
  0x59   : > { %1524 = vmatprep.mubr.bf16.mxu1 %v753_v45  ;;  %v512_v10 = vadd.f32 %v2428_v39, %v406_v6  ;;  %v423_v11 = vmul.f32 %v2392_v24, %v317_v4  ;;  %v750_v47 = vpack.c.bf16 %v702_v9, %v694_v48  ;;  %vm568_vm14 = vcmp.gt.f32.partialorder %v504_v46, 0.0  ;;  %v333_v4 = vld [vmem:[%s2146_s20 + $0x1f8] sm:$0xff]  ;;  %v322_v45 = vld [vmem:[%s2146_s20 + $0x1a0] sm:$0xff]  ;;  %v332_v9 = vld [vmem:[%s2146_s20 + $0x1f0] sm:$0xff] }
  0x5a   : > { %v632_v12 = vmul.f32 0.2, %v504_v46  ;;  %v519_v13 = vadd.f32 %v2345_v38, %v413_v7  ;;  %v527_v15 = vadd.f32 %v2345_v38, %v421_v8  ;;  %v521_v16 = vadd.f32 %v2414_v34, %v415_v49  ;;  %v330_v7 = vld [vmem:[%s2146_s20 + $0x1e0] sm:$0xff]  ;;  %v324_v8 = vld [vmem:[%s2146_s20 + $0x1b0] sm:$0xff] }
  0x5b   : > { %vm576_vm15 = vcmp.gt.f32.partialorder %v512_v10, 0.0  ;;  %v640_v14 = vmul.f32 0.2, %v512_v10  ;;  %1460 = vmatmul.mubr.bf16.gmra.mrb[20].mxu0 %v750_v47  ;;  %v529_v52 = vadd.f32 %v2414_v34, %v423_v11  ;;  %v412_v36 = vmul.f32 %v2400_v54, %v306_v19 }
  0x5c   : > { %v696_v17 = vsel %vm568_vm14, %v504_v46, %v632_v12  ;;  %vm583_vm0 = vcmp.gt.f32.partialorder %v519_v13, 0.0  ;;  %v647_v18 = vmul.f32 0.2, %v519_v13  ;;  %vm591_vm1 = vcmp.gt.f32.partialorder %v527_v15, 0.0 }
  0x5d   : > { %v704_v21 = vsel %vm576_vm15, %v512_v10, %v640_v14  ;;  %v655_v22 = vmul.f32 0.2, %v527_v15  ;;  %vm585_vm2 = vcmp.gt.f32.partialorder %v521_v16, 0.0  ;;  %vm593_vm3 = vcmp.gt.f32.partialorder %v529_v52, 0.0 }
  0x5e   : > { %v752_v27 = vpack.c.bf16 %v704_v21, %v696_v17  ;;  %v711_v28 = vsel %vm583_vm0, %v519_v13, %v647_v18  ;;  %v649_v29 = vmul.f32 0.2, %v521_v16  ;;  %v657_v33 = vmul.f32 0.2, %v529_v52 }
  0x5f   : > { %v719_v32 = vsel %vm591_vm1, %v527_v15, %v655_v22  ;;  %v420_v40 = vmul.f32 %v2400_v54, %v314_v20  ;;  %v414_v53 = vmul.f32 %v2408_v31, %v308_v25  ;;  %v422_v55 = vmul.f32 %v2408_v31, %v316_v26 }
  0x60   : > { %1525 = vmatmul.mubr.bf16.gmra.mrb[20].mxu1 %v752_v27  ;;  %v759_v50 = vpack.c.bf16 %v719_v32, %v711_v28  ;;  %v713_v51 = vsel %vm585_vm2, %v521_v16, %v649_v29  ;;  %v721_v43 = vsel %vm593_vm3, %v529_v52, %v657_v33  ;;  %v518_v56 = vadd.f32 %v2419_v35, %v412_v36 }
  0x61   : > { %v526_v58 = vadd.f32 %v2419_v35, %v420_v40  ;;  %v429_v59 = vmul.f32 %v2342_v37, %v323_v30  ;;  %v761_v60 = vpack.c.bf16 %v721_v43, %v713_v51  ;;  %v520_v61 = vadd.f32 %v2428_v39, %v414_v53 }
  0x62   : > { %1467 = vmatprep.mubr.bf16.mxu0 %v759_v50  ;;  %v528_v62 = vadd.f32 %v2428_v39, %v422_v55  ;;  %v437_v63 = vmul.f32 %v2342_v37, %v331_v44  ;;  %vm582_vm4 = vcmp.gt.f32.partialorder %v518_v56, 0.0  ;;  %v646_v42 = vmul.f32 0.2, %v518_v56  ;;  %v1691_v50 = vld [vmem:[%s2568_s4] ss:$0 sm:$0xff] }
  0x63   : > { %vm590_vm5 = vcmp.gt.f32.partialorder %v526_v58, 0.0  ;;  %v654_v57 = vmul.f32 0.2, %v526_v58  ;;  %1532 = vmatprep.mubr.bf16.mxu1 %v761_v60  ;;  %vm584_vm6 = vcmp.gt.f32.partialorder %v520_v61, 0.0  ;;  %v648_v0 = vmul.f32 0.2, %v520_v61 }
  0x64   : > { %vm592_vm7 = vcmp.gt.f32.partialorder %v528_v62, 0.0  ;;  %v656_v1 = vmul.f32 0.2, %v528_v62  ;;  %v710_v41 = vsel %vm582_vm4, %v518_v56, %v646_v42  ;;  %v535_v3 = vadd.f32 %v2345_v38, %v429_v59 }
  0x65   : > { %v718_v2 = vsel %vm590_vm5, %v526_v58, %v654_v57  ;;  %v543_v37 = vadd.f32 %v2345_v38, %v437_v63  ;;  %v712_v6 = vsel %vm584_vm6, %v520_v61, %v648_v0  ;;  %v431_v46 = vmul.f32 %v2392_v24, %v325_v23 }
  0x66   : > { %v758_v5 = vpack.c.bf16 %v718_v2, %v710_v41  ;;  %v720_v48 = vsel %vm592_vm7, %v528_v62, %v656_v1  ;;  %vm599_vm8 = vcmp.gt.f32.partialorder %v535_v3, 0.0  ;;  %v663_v49 = vmul.f32 0.2, %v535_v3 }
  0x67   : > { %v760_v10 = vpack.c.bf16 %v720_v48, %v712_v6  ;;  %vm607_vm9 = vcmp.gt.f32.partialorder %v543_v37, 0.0  ;;  %v671_v11 = vmul.f32 0.2, %v543_v37  ;;  %v439_v47 = vmul.f32 %v2392_v24, %v333_v4 }
  0x68   : > { %1468 = vmatmul.mubr.bf16.gmra.mrb[24].mxu0 %v758_v5  ;;  %v537_v38 = vadd.f32 %v2414_v34, %v431_v46  ;;  %v428_v12 = vmul.f32 %v2400_v54, %v322_v45  ;;  %v727_v13 = vsel %vm599_vm8, %v535_v3, %v663_v49  ;;  %v436_v14 = vmul.f32 %v2400_v54, %v330_v7 }
  0x69   : > { %1533 = vmatmul.mubr.bf16.gmra.mrb[24].mxu1 %v760_v10  ;;  %v430_v15 = vmul.f32 %v2408_v31, %v324_v8  ;;  %v438_v16 = vmul.f32 %v2408_v31, %v332_v9  ;;  %v735_v17 = vsel %vm607_vm9, %v543_v37, %v671_v11  ;;  %v545_v18 = vadd.f32 %v2414_v34, %v439_v47 }
  0x6a   : > { %vm601_vm10 = vcmp.gt.f32.partialorder %v537_v38, 0.0  ;;  %v665_v52 = vmul.f32 0.2, %v537_v38  ;;  %v767_v19 = vpack.c.bf16 %v735_v17, %v727_v13  ;;  %v534_v24 = vadd.f32 %v2419_v35, %v428_v12 }
  0x6b   : > { %v542_v20 = vadd.f32 %v2419_v35, %v436_v14  ;;  %v536_v21 = vadd.f32 %v2428_v39, %v430_v15  ;;  %vm609_vm11 = vcmp.gt.f32.partialorder %v545_v18, 0.0  ;;  %v673_v22 = vmul.f32 0.2, %v545_v18 }
  0x6c   : > { %v729_v25 = vsel %vm601_vm10, %v537_v38, %v665_v52  ;;  %v544_v54 = vadd.f32 %v2428_v39, %v438_v16  ;;  %1475 = vmatprep.mubr.bf16.mxu0 %v767_v19  ;;  %vm598_vm12 = vcmp.gt.f32.partialorder %v534_v24, 0.0  ;;  %v662_v31 = vmul.f32 0.2, %v534_v24 }
  0x6d   : > { %vm606_vm13 = vcmp.gt.f32.partialorder %v542_v20, 0.0  ;;  %v670_v26 = vmul.f32 0.2, %v542_v20  ;;  %v737_v34 = vsel %vm609_vm11, %v545_v18, %v673_v22  ;;  %vm600_vm14 = vcmp.gt.f32.partialorder %v536_v21, 0.0 }
  0x6e   : > { %vm608_vm15 = vcmp.gt.f32.partialorder %v544_v54, 0.0  ;;  %v664_v27 = vmul.f32 0.2, %v536_v21  ;;  %v769_v28 = vpack.c.bf16 %v737_v34, %v729_v25  ;;  %v726_v29 = vsel %vm598_vm12, %v534_v24, %v662_v31 }
  0x6f   : > { %v734_v30 = vsel %vm606_vm13, %v542_v20, %v670_v26  ;;  %v672_v35 = vmul.f32 0.2, %v544_v54 }
  0x70   : > { %v766_v32 = vpack.c.bf16 %v734_v30, %v726_v29  ;;  %v728_v33 = vsel %vm600_vm14, %v536_v21, %v664_v27  ;;  %1540 = vmatprep.mubr.bf16.mxu1 %v769_v28 }
  0x71   : > { %v736_v36 = vsel %vm608_vm15, %v544_v54, %v672_v35 }
  0x72   : > { %1476 = vmatmul.mubr.bf16.gmra.mrb[28].mxu0 %v766_v32  ;;  %v768_v40 = vpack.c.bf16 %v736_v36, %v728_v33 }
  0x74   : > { %1541 = vmatmul.mubr.bf16.gmra.mrb[28].mxu1 %v768_v40 }
  0xfa   : > { %v1775_v39 = vpop.f32.mrb[0].mxu0 }
  0xfb   : > { %v1815_v44 = vpop.f32.mrb[0].mxu1  ;;  %v1776_v51 = vpop.f32.mrb[1].mxu0 }
  0xfc   : > { %v1777_v53 = vadd.f32 %v1776_v51, %v1775_v39  ;;  %v1816_v55 = vpop.f32.mrb[1].mxu1  ;;  %v1778_v43 = vpop.f32.mrb[2].mxu0 }
  0xfd   : > { %v1817_v56 = vadd.f32 %v1816_v55, %v1815_v44  ;;  %v1818_v58 = vpop.f32.mrb[2].mxu1  ;;  %v1779_v59 = vpop.f32.mrb[3].mxu0 }
  0xfe   : > { %v1324_v60 = vadd.f32 %v1777_v53, %v1691_v50  ;;  %v1780_v61 = vadd.f32 %v1779_v59, %v1778_v43  ;;  %v1819_v62 = vpop.f32.mrb[3].mxu1 }
  0xff   : > { %v1820_v63 = vadd.f32 %v1819_v62, %v1818_v58 }
 0x100   : > { %v1389_v23 = vadd.f32 %v1817_v56, %v1324_v60  ;;  %v1327_v42 = vadd.f32 %v1780_v61, %v1691_v50 }
 0x102   : > { %v1392_v57 = vadd.f32 %v1820_v63, %v1327_v42  ;;  %v1781_v0 = vpop.f32.mrb[4].mxu0 }
 0x103   : > { %v1782_v1 = vpop.f32.mrb[5].mxu0 }
 0x104   : > { %v1783_v41 = vadd.f32 %v1782_v1, %v1781_v0  ;;  %v1784_v2 = vpop.f32.mrb[6].mxu0 }
 0x105   : > { %v1785_v3 = vpop.f32.mrb[7].mxu0  ;;  %v1821_v4 = vpop.f32.mrb[4].mxu1 }
 0x106   : > { %v1786_v37 = vadd.f32 %v1785_v3, %v1784_v2  ;;  %v1332_v45 = vadd.f32 %v1783_v41, %v1691_v50  ;;  %v1822_v5 = vpop.f32.mrb[5].mxu1 }
 0x107   : > { %v1823_v6 = vadd.f32 %v1822_v5, %v1821_v4  ;;  %v1824_v48 = vpop.f32.mrb[6].mxu1 }
 0x108   : > { %v1335_v46 = vadd.f32 %v1786_v37, %v1691_v50  ;;  %v1825_v7 = vpop.f32.mrb[7].mxu1 }
 0x109   : > { %v2524_v8 = vadd.f32 %v1823_v6, %v1332_v45  ;;  %v1826_v9 = vadd.f32 %v1825_v7, %v1824_v48 }
 0x10a   : > { %v1787_v49 = vpop.f32.mrb[8].mxu0 }
 0x10b   : > { %v2526_v10 = vadd.f32 %v1826_v9, %v1335_v46  ;;  %v1788_v11 = vpop.f32.mrb[9].mxu0 }
 0x10c   : > { %v1789_v47 = vadd.f32 %v1788_v11, %v1787_v49  ;;  %v1790_v38 = vpop.f32.mrb[10].mxu0 }
 0x10d   : > { %v1791_v12 = vpop.f32.mrb[11].mxu0 }
 0x10e   : > { %v1827_v13 = vpop.f32.mrb[8].mxu1  ;;  %v1340_v14 = vadd.f32 %v1789_v47, %v1691_v50  ;;  %v1792_v15 = vadd.f32 %v1791_v12, %v1790_v38 }
 0x10f   : > { %v1828_v16 = vpop.f32.mrb[9].mxu1 }
 0x110   : > { %v1829_v17 = vadd.f32 %v1828_v16, %v1827_v13  ;;  %v1830_v18 = vpop.f32.mrb[10].mxu1  ;;  %v1343_v52 = vadd.f32 %v1792_v15, %v1691_v50 }
 0x111   : > { %v1831_v19 = vpop.f32.mrb[11].mxu1 }
 0x112   : > { %v2528_v24 = vadd.f32 %v1829_v17, %v1340_v14  ;;  %v1832_v20 = vadd.f32 %v1831_v19, %v1830_v18 }
 0x114   : > { %v2530_v21 = vadd.f32 %v1832_v20, %v1343_v52 }
 0x118   : > { %v1793_v22 = vpop.f32.mrb[12].mxu0 }
 0x119   : > { %v1794_v25 = vpop.f32.mrb[13].mxu0 }
 0x11a   : > { %v1795_v54 = vadd.f32 %v1794_v25, %v1793_v22  ;;  %v1796_v31 = vpop.f32.mrb[14].mxu0  ;;  %v1833_v26 = vpop.f32.mrb[12].mxu1 }
 0x11b   : > { %v1797_v34 = vpop.f32.mrb[15].mxu0  ;;  %v1834_v28 = vpop.f32.mrb[13].mxu1 }
 0x11c   : > { %v1348_v27 = vadd.f32 %v1795_v54, %v1691_v50  ;;  %v1798_v29 = vadd.f32 %v1797_v34, %v1796_v31  ;;  %v1835_v30 = vadd.f32 %v1834_v28, %v1833_v26  ;;  %v1836_v35 = vpop.f32.mrb[14].mxu1 }
 0x11d   : > { %v1837_v33 = vpop.f32.mrb[15].mxu1 }
 0x11e   : > { %v1351_v32 = vadd.f32 %v1798_v29, %v1691_v50  ;;  %v2532_v36 = vadd.f32 %v1835_v30, %v1348_v27  ;;  %v1838_v40 = vadd.f32 %v1837_v33, %v1836_v35 }
 0x120   : > { %v2534_v39 = vadd.f32 %v1838_v40, %v1351_v32 }
 0x123   : > { %v1855_v44 = vpop.f32.mrb[16].mxu0 }
 0x124   : > { %v1856_v51 = vpop.f32.mrb[17].mxu0 }
 0x125   : > { %v1857_v53 = vadd.f32 %v1856_v51, %v1855_v44  ;;  %v1858_v55 = vpop.f32.mrb[18].mxu0 }
 0x126   : > { %v1859_v43 = vpop.f32.mrb[19].mxu0 }
 0x127   : > { %v1895_v56 = vpop.f32.mrb[16].mxu1  ;;  %v1454_v58 = vadd.f32 %v1857_v53, %v1389_v23  ;;  %v1860_v59 = vadd.f32 %v1859_v43, %v1858_v55 }
 0x128   : > { %v1896_v60 = vpop.f32.mrb[17].mxu1 }
 0x129   : > { %v1897_v61 = vadd.f32 %v1896_v60, %v1895_v56  ;;  %v1898_v62 = vpop.f32.mrb[18].mxu1  ;;  %v1457_v63 = vadd.f32 %v1860_v59, %v1392_v57 }
 0x12a   : > { %v1899_v50 = vpop.f32.mrb[19].mxu1 }
 0x12b   : > { %v1519_v42 = vadd.f32 %v1897_v61, %v1454_v58  ;;  %v1900_v0 = vadd.f32 %v1899_v50, %v1898_v62 }
 0x12d   : > { %1549 = vst [vmem:[%s2540_s16] sm:$0xff] %v1519_v42  ;;  %v1522_v1 = vadd.f32 %v1900_v0, %v1457_v63  ;;  %v1571_v41 = vmul.f32 %v1519_v42, %v1519_v42 }
 0x12e   : > { %v1861_v3 = vpop.f32.mrb[20].mxu0 }
 0x12f   : > { %1550 = vst [vmem:[%s2540_s16 + $0x8] sm:$0xff] %v1522_v1  ;;  %v1557_v23 = vadd.f32 %v1522_v1, %v1519_v42  ;;  %v1572_v2 = vmul.f32 %v1522_v1, %v1522_v1  ;;  %v1862_v37 = vpop.f32.mrb[21].mxu0 }
 0x130   : > { %v1863_v4 = vadd.f32 %v1862_v37, %v1861_v3  ;;  %v1864_v45 = vpop.f32.mrb[22].mxu0 }
 0x131   : > { %v1579_v57 = vadd.f32 %v1572_v2, %v1571_v41  ;;  %v1865_v5 = vpop.f32.mrb[23].mxu0 }
 0x132   : > { %v1462_v48 = vadd.f32 %v1863_v4, %v2524_v8  ;;  %v1866_v46 = vadd.f32 %v1865_v5, %v1864_v45 }
 0x133   : > { %v1901_v6 = vpop.f32.mrb[20].mxu1 }
 0x134   : > { %v1902_v7 = vpop.f32.mrb[21].mxu1  ;;  %v1465_v11 = vadd.f32 %v1866_v46, %v2526_v10 }
 0x135   : > { %v1903_v9 = vadd.f32 %v1902_v7, %v1901_v6  ;;  %v1904_v49 = vpop.f32.mrb[22].mxu1 }
 0x136   : > { %v1905_v47 = vpop.f32.mrb[23].mxu1 }
 0x137   : > { %v1527_v38 = vadd.f32 %v1903_v9, %v1462_v48  ;;  %v1906_v12 = vadd.f32 %v1905_v47, %v1904_v49 }
 0x139   : > { %1551 = vst [vmem:[%s2540_s16 + $0x10] sm:$0xff] %v1527_v38  ;;  %v1558_v13 = vadd.f32 %v1557_v23, %v1527_v38  ;;  %v1573_v14 = vmul.f32 %v1527_v38, %v1527_v38  ;;  %v1530_v15 = vadd.f32 %v1906_v12, %v1465_v11 }
 0x13b   : > { %v1580_v16 = vadd.f32 %v1579_v57, %v1573_v14  ;;  %1552 = vst [vmem:[%s2540_s16 + $0x18] sm:$0xff] %v1530_v15  ;;  %v1559_v17 = vadd.f32 %v1558_v13, %v1530_v15  ;;  %v1574_v18 = vmul.f32 %v1530_v15, %v1530_v15  ;;  %v1867_v52 = vpop.f32.mrb[24].mxu0 }
 0x13c   : > { %v1907_v8 = vpop.f32.mrb[24].mxu1  ;;  %v1868_v19 = vpop.f32.mrb[25].mxu0 }
 0x13d   : > { %v1581_v20 = vadd.f32 %v1580_v16, %v1574_v18  ;;  %v1869_v22 = vadd.f32 %v1868_v19, %v1867_v52  ;;  %v1908_v25 = vpop.f32.mrb[25].mxu1  ;;  %v1870_v10 = vpop.f32.mrb[26].mxu0 }
 0x13e   : > { %v1909_v54 = vadd.f32 %v1908_v25, %v1907_v8  ;;  %v1910_v31 = vpop.f32.mrb[26].mxu1  ;;  %v1871_v26 = vpop.f32.mrb[27].mxu0 }
 0x13f   : > { %v1470_v34 = vadd.f32 %v1869_v22, %v2528_v24  ;;  %v1872_v27 = vadd.f32 %v1871_v26, %v1870_v10  ;;  %v1911_v28 = vpop.f32.mrb[27].mxu1 }
 0x140   : > { %v1912_v29 = vadd.f32 %v1911_v28, %v1910_v31 }
 0x141   : > { %v1535_v30 = vadd.f32 %v1909_v54, %v1470_v34  ;;  %v1473_v35 = vadd.f32 %v1872_v27, %v2530_v21 }
 0x143   : > { %1553 = vst [vmem:[%s2540_s16 + $0x20] sm:$0xff] %v1535_v30  ;;  %v1560_v32 = vadd.f32 %v1559_v17, %v1535_v30  ;;  %v1575_v33 = vmul.f32 %v1535_v30, %v1535_v30  ;;  %v1538_v40 = vadd.f32 %v1912_v29, %v1473_v35 }
 0x145   : > { %v1582_v44 = vadd.f32 %v1581_v20, %v1575_v33  ;;  %1554 = vst [vmem:[%s2540_s16 + $0x28] sm:$0xff] %v1538_v40  ;;  %v1561_v51 = vadd.f32 %v1560_v32, %v1538_v40  ;;  %v1576_v53 = vmul.f32 %v1538_v40, %v1538_v40  ;;  %v1873_v55 = vpop.f32.mrb[28].mxu0 }
 0x146   : > { %v1874_v43 = vpop.f32.mrb[29].mxu0 }
 0x147   : > { %v1583_v56 = vadd.f32 %v1582_v44, %v1576_v53  ;;  %v1913_v58 = vpop.f32.mrb[28].mxu1  ;;  %v1875_v24 = vadd.f32 %v1874_v43, %v1873_v55  ;;  %v1876_v59 = vpop.f32.mrb[30].mxu0 }
 0x148   : > { %v1914_v60 = vpop.f32.mrb[29].mxu1  ;;  %v1877_v61 = vpop.f32.mrb[31].mxu0 }
 0x149   : > { %v1478_v21 = vadd.f32 %v1875_v24, %v2532_v36  ;;  %v1915_v62 = vadd.f32 %v1914_v60, %v1913_v58  ;;  %v1916_v63 = vpop.f32.mrb[30].mxu1  ;;  %v1878_v50 = vadd.f32 %v1877_v61, %v1876_v59 }
 0x14a   : > { %v1917_v42 = vpop.f32.mrb[31].mxu1 }
 0x14b   : > { %v1543_v0 = vadd.f32 %v1915_v62, %v1478_v21  ;;  %v1481_v1 = vadd.f32 %v1878_v50, %v2534_v39  ;;  %v1918_v41 = vadd.f32 %v1917_v42, %v1916_v63 }
 0x14d   : > { %1555 = vst [vmem:[%s2540_s16 + $0x30] sm:$0xff] %v1543_v0  ;;  %v1562_v23 = vadd.f32 %v1561_v51, %v1543_v0  ;;  %v1577_v2 = vmul.f32 %v1543_v0, %v1543_v0  ;;  %v1546_v3 = vadd.f32 %v1918_v41, %v1481_v1 }
 0x14f   : > { %v1584_v37 = vadd.f32 %v1583_v56, %v1577_v2  ;;  %1556 = vst [vmem:[%s2540_s16 + $0x38] sm:$0xff] %v1546_v3  ;;  %v1563_v57 = vadd.f32 %v1562_v23, %v1546_v3  ;;  %v1578_v4 = vmul.f32 %v1546_v3, %v1546_v3 }
 0x151   : > { %v1564_v45 = vrot.slane %v1563_v57, 4  ;;  %v1585_v36 = vadd.f32 %v1584_v37, %v1578_v4 }
 0x153   : > { %v1565_v5 = vadd.f32 %v1564_v45, %v1563_v57  ;;  %v1586_v6 = vrot.slane %v1585_v36, 4 }
 0x155   : > { %v1566_v48 = vrot.slane %v1565_v5, 2  ;;  %v1587_v46 = vadd.f32 %v1586_v6, %v1585_v36 }
 0x157   : > { %v1567_v7 = vadd.f32 %v1566_v48, %v1565_v5  ;;  %v1588_v39 = vrot.slane %v1587_v46, 2 }
 0x159   : > { %v1568_v9 = vrot.slane %v1567_v7, 1  ;;  %v1589_v49 = vadd.f32 %v1588_v39, %v1587_v46 }
 0x15b   : > { %v1569_v11 = vadd.f32 %v1568_v9, %v1567_v7  ;;  %v1590_v47 = vrot.slane %v1589_v49, 1 }
 0x15d   : > { %1570 = vst [vmem:[%s268_s19] sm:$0x1] %v1569_v11  ;;  %v1591_v38 = vadd.f32 %v1590_v47, %v1589_v49 }
 0x15f   : > { %1592 = vst [vmem:[%s268_s19 + $0x1] sm:$0x1] %v1591_v38 }
 0x160 PF: > { %s17_s21 = sadd.s32 1, %s1997_s21  }
 0x161   : > { %p14_p5 = scmp.ge.s32.totalorder %s17_s21, 4  }
 0x163   :  { %16 = sbr.rel (!%p14_p5) target bundleno = 1 (0x1), region = 82 }

// kernel: tile.57
= control target key start
LH: loop header
LB: loop body
LE: loop exit
PB: predicated region body
PF: predicated region fallthrough
CT: control target
= control target key end

     0   :  { %s40_s0 = inlined_call_operand.vmem [shape: f32[32], index: 0, kind: input, shape index: {}]   ;;  %s41_s1 = inlined_call_operand.vmem [shape: f32[32,32], index: 1, kind: output, shape index: {}]  }
   0x1   :  { %v4_v0 = vld [vmem:[%s40_s0] ss:$0 sm:$0xff] }
   0x2   :  { %5 = vst [vmem:[%s41_s1] sm:$0xff] %v4_v0  ;;  %12 = vst [vmem:[%s41_s1 + $0x8] sm:$0xff] %v4_v0 }
   0x3   :  { %13 = vst [vmem:[%s41_s1 + $0x10] sm:$0xff] %v4_v0  ;;  %14 = vst [vmem:[%s41_s1 + $0x18] sm:$0xff] %v4_v0 }

// kernel: tile.58
= control target key start
LH: loop header
LB: loop body
LE: loop exit
PB: predicated region body
PF: predicated region fallthrough
CT: control target
= control target key end

     0   :  { %s93_s8 = smov 96   ;;  %vm3_vm0 = vcmask 261120   ;;  %s95_s15 = smov 64   ;;  %vm10_vm1 = vcmask 1048320   ;;  %vm17_vm2 = vcmask 785920   ;;  %vm24_vm3 = vcmask 523520   ;;  %s142_s0 = inlined_call_operand.vmem [shape: f32[32,32], index: 0, kind: input, shape index: {}]   ;;  %s143_s1 = inlined_call_operand.vmem [shape: f32[1,1024], index: 1, kind: output, shape index: {}]  }
   0x1   :  { %v80_v0 = vld [vmem:[%s142_s0 + $0x3] ss:$4 sm:$0xff]   ;;  %v82_v1 = vld [vmem:[%s142_s0 + $0x1] ss:$4 sm:$0xff]   ;;  %v2_v2 = vld [vmem:[%s142_s0] ss:$4 sm:$0xff]  }
   0x2   :  { %8 = vrot.lane.b32.xlu0 %v80_v0, %s93_s8  ;;  %v81_v3 = vld [vmem:[%s142_s0 + $0x2] ss:$4 sm:$0xff]   ;;  %s94_s0 = smov 32   ;;  %4 = vst.msk [vmem:[#allocation0] ss:$8 sm:$0xf] %vm3_vm0, %v2_v2  }
   0x3   :  { %22 = vrot.lane.b32.xlu1 %v82_v1, %s94_s0  ;;  %5 = vst.msk [vmem:[#allocation0] ss:$8 sm:$0xf0] %vm3_vm0, %v2_v2  }
   0x6   :  { %15 = vrot.lane.b32.xlu0 %v81_v3, %s95_s15 }
  0x74   :  { %v9_v4 = vpop.permute.xlu0 %8  }
  0x75   :  { %11 = vst.msk [vmem:[#allocation0] ss:$8 sm:$0xf] %vm10_vm1, %v9_v4   ;;  %12 = vst.msk [vmem:[#allocation0] ss:$8 sm:$0xf0] %vm10_vm1, %v9_v4   ;;  %v23_v5 = vpop.permute.xlu1 %22  }
  0x78   :  { %v16_v6 = vpop.permute.xlu0 %15  }
  0x79   :  { %18 = vst.msk [vmem:[#allocation0] ss:$8 sm:$0xf] %vm17_vm2, %v16_v6   ;;  %19 = vst.msk [vmem:[#allocation0] ss:$8 sm:$0xf0] %vm17_vm2, %v16_v6  }
  0x7a   :  { %25 = vst.msk [vmem:[#allocation0] ss:$8 sm:$0xf] %vm24_vm3, %v23_v5   ;;  %26 = vst.msk [vmem:[#allocation0] ss:$8 sm:$0xf0] %vm24_vm3, %v23_v5  }
  0x81   :  { %v30_v7 = vld [vmem:[#allocation0] sm:$0x1]  ;;  %v34_v8 = vld [vmem:[#allocation0 + $0x8] sm:$0x1]  ;;  %v39_v9 = vld [vmem:[#allocation0 + $0x10] sm:$0x1] }
  0x82   :  { %32 = vst [vmem:[%s143_s1] sm:$0x1] %v30_v7  ;;  %83 = vst [vmem:[%s143_s1 + $0x1] sm:$0x1] %v34_v8  ;;  %v45_v10 = vld [vmem:[#allocation0 + $0x18] sm:$0x1] }
  0x83   :  { %84 = vst [vmem:[%s143_s1 + $0x2] sm:$0x1] %v39_v9  ;;  %v51_v11 = vld [vmem:[#allocation0 + $0x20] sm:$0x1]  ;;  %v57_v12 = vld [vmem:[#allocation0 + $0x28] sm:$0x1] }
  0x84   :  { %85 = vst [vmem:[%s143_s1 + $0x3] sm:$0x1] %v45_v10  ;;  %86 = vst [vmem:[%s143_s1 + $0x4] sm:$0x1] %v51_v11  ;;  %v63_v13 = vld [vmem:[#allocation0 + $0x30] sm:$0x1] }
  0x85   :  { %87 = vst [vmem:[%s143_s1 + $0x5] sm:$0x1] %v57_v12  ;;  %v69_v14 = vld [vmem:[#allocation0 + $0x38] sm:$0x1]  ;;  %88 = vst [vmem:[%s143_s1 + $0x6] sm:$0x1] %v63_v13 }
  0x86   :  { %89 = vst [vmem:[%s143_s1 + $0x7] sm:$0x1] %v69_v14 }

// kernel: conditional_discriminator_forward.9
= control target key start
LH: loop header
LB: loop body
LE: loop exit
PB: predicated region body
PF: predicated region fallthrough
CT: control target
= control target key end

     0   :  { %s1698_s21 = smov 0   ;;  %s2099_s0 = inlined_call_operand.vmem [shape: f32[64,1024], index: 0, kind: input, shape index: {}]   ;;  %s2100_s1 = inlined_call_operand.vmem [shape: f32[1,1024], index: 1, kind: input, shape index: {}]   ;;  %s2101_s2 = inlined_call_operand.vmem [shape: f32[1,1024], index: 2, kind: input, shape index: {}]   ;;  %s2102_s3 = inlined_call_operand.vmem [shape: bf16[1024,128], index: 3, kind: input, shape index: {}]   ;;  %s2103_s4 = inlined_call_operand.vmem [shape: f32[1,128], index: 4, kind: input, shape index: {}]   ;;  %s2104_s5 = inlined_call_operand.vmem [shape: f32[64,128], index: 5, kind: output, shape index: {0}]   ;;  %s2105_s6 = inlined_call_operand.vmem [shape: f32[2,2,128], index: 6, kind: output, shape index: {1}]  }
   0x1 LB: > { %s1704_s22 = sadd.s32 4294967295, %s1661_s21   ;;  %p1396_p0 = scmp.ge.s32.totalorder %s1661_s21, 1  ;;  %s1661_s21 = sphi %s1698_s21, %s17_s21  }
   0x2   : > { %p217_p1 = scmp.lt.s32.totalorder %s1661_s21, 3 }
   0x4   : > { %p218_p2 = pnand %p1396_p0, %p217_p1 }
   0x5   : > { %v1591_v0 = vld [vmem:[%s2102_s3 + $0x40] sm:$0xff] (!%p218_p2)   ;;  %v1595_v4 = vld [vmem:[%s2102_s3 + $0x48] sm:$0xff] (!%p218_p2)   ;;  %v1599_v8 = vld [vmem:[%s2102_s3 + $0x50] sm:$0xff] (!%p218_p2)   ;;  %s1397_s9 = sshll.u32 (!%p218_p2), %s1704_s22, 2  ;;  %v304_v18 = vlaneseq (!%p218_p2)  ;;  %p265_p4 = scmp.lt.s32.totalorder (!%p218_p2), %s1704_s22, 1 }
   0x6   : > { %221 = sbr.rel (%p218_p2) target bundleno = 318 (0x13e), region = 40  ;;  %v1592_v1 = vld [vmem:[%s2102_s3 + $0xc0] sm:$0xff] (!%p218_p2)   ;;  %1471 = vmatprep.subr.bf16.mxu0 (!%p218_p2), %v1591_v0  ;;  %v1596_v5 = vld [vmem:[%s2102_s3 + $0xc8] sm:$0xff] (!%p218_p2)   ;;  %v1600_v9 = vld [vmem:[%s2102_s3 + $0xd0] sm:$0xff] (!%p218_p2)   ;;  %p253_p3 = scmp.lt.s32.totalorder (!%p218_p2), %s1397_s9, 7 }
   0x7   : > { %v1593_v2 = vld [vmem:[%s2102_s3] sm:$0xff] (!%p218_p2)   ;;  %1499 = vmatprep.subr.bf16.mxu1 (!%p218_p2), %v1592_v1  ;;  %v1597_v6 = vld [vmem:[%s2102_s3 + $0x8] sm:$0xff] (!%p218_p2)   ;;  %v1601_v10 = vld [vmem:[%s2102_s3 + $0x10] sm:$0xff] (!%p218_p2)   ;;  %v1775_v23 = vshrl.u32 (!%p218_p2), %v304_v18, 7 }
   0x8   : > { %v1594_v3 = vld [vmem:[%s2102_s3 + $0x80] sm:$0xff] (!%p218_p2)   ;;  %1472 = vmatpush3.bf16.msra.mxu0 (!%p218_p2), %v1593_v2  ;;  %v1598_v7 = vld [vmem:[%s2102_s3 + $0x88] sm:$0xff] (!%p218_p2)   ;;  %v1602_v11 = vld [vmem:[%s2102_s3 + $0x90] sm:$0xff] (!%p218_p2)  }
   0x9   : > { %1500 = vmatpush3.bf16.msra.mxu1 (!%p218_p2), %v1594_v3  ;;  %1473 = vmatprep.subr.bf16.mxu0 (!%p218_p2), %v1595_v4  ;;  %v1603_v12 = vld [vmem:[%s2102_s3 + $0x58] sm:$0xff] (!%p218_p2)   ;;  %v1607_v16 = vld [vmem:[%s2102_s3 + $0x60] sm:$0xff] (!%p218_p2)   ;;  %v1611_v21 = vld [vmem:[%s2102_s3 + $0x68] sm:$0xff] (!%p218_p2)   ;;  %v310_v28 = vsub.s32 (!%p218_p2), 1, %v1775_v23  ;;  %v318_v31 = vsub.s32 (!%p218_p2), 3, %v1775_v23  ;;  %v306_v33 = vsub.s32 (!%p218_p2), 0, %v1775_v23 }
   0xa   : > { %1501 = vmatprep.subr.bf16.mxu1 (!%p218_p2), %v1596_v5  ;;  %v1604_v13 = vld [vmem:[%s2102_s3 + $0xd8] sm:$0xff] (!%p218_p2)   ;;  %v1608_v17 = vld [vmem:[%s2102_s3 + $0xe0] sm:$0xff] (!%p218_p2)   ;;  %v1612_v22 = vld [vmem:[%s2102_s3 + $0xe8] sm:$0xff] (!%p218_p2)   ;;  %v314_v35 = vsub.s32 (!%p218_p2), 2, %v1775_v23 }
   0xb   : > { %v1605_v14 = vld [vmem:[%s2102_s3 + $0x18] sm:$0xff] (!%p218_p2)   ;;  %v1609_v19 = vld [vmem:[%s2102_s3 + $0x20] sm:$0xff] (!%p218_p2)   ;;  %v1613_v24 = vld [vmem:[%s2102_s3 + $0x28] sm:$0xff] (!%p218_p2)  }
   0xc   : > { %1474 = vmatpush3.bf16.msra.mxu0 (!%p218_p2), %v1597_v6  ;;  %v1606_v15 = vld [vmem:[%s2102_s3 + $0x98] sm:$0xff] (!%p218_p2)   ;;  %v1610_v20 = vld [vmem:[%s2102_s3 + $0xa0] sm:$0xff] (!%p218_p2)   ;;  %v1614_v25 = vld [vmem:[%s2102_s3 + $0xa8] sm:$0xff] (!%p218_p2)  }
   0xd   : > { %1502 = vmatpush3.bf16.msra.mxu1 %v1598_v7  ;;  %1475 = vmatprep.subr.bf16.mxu0 %v1599_v8  ;;  %s2107_s9 = smov (!%p253_p3, %s1397_s9), 7  ;;  %v1615_v26 = vld [vmem:[%s2102_s3 + $0x70] sm:$0xff]   ;;  %v1619_v32 = vld [vmem:[%s2102_s3 + $0x78] sm:$0xff]   ;;  %v1824_v40 = vld [vmem:[%s2100_s1] sm:$0xff]  ;;  %s2109_s22 = smov (!%p265_p4, %s1704_s22), 1 }
   0xe   : > { %1503 = vmatprep.subr.bf16.mxu1 %v1600_v9  ;;  %v1616_v27 = vld [vmem:[%s2102_s3 + $0xf0] sm:$0xff]   ;;  %s1470_s11 = sshll.u32 %s2107_s9, 6  ;;  %v1620_v34 = vld [vmem:[%s2102_s3 + $0xf8] sm:$0xff]   ;;  %v1827_v41 = vrot.slane %v1824_v40, %v310_v28  ;;  %v1832_v42 = vld [vmem:[%s2101_s2] sm:$0xff]  ;;  %v1837_v45 = vrot.slane %v1824_v40, %v318_v31  ;;  %v1840_v46 = vrot.slane %v1824_v40, %v306_v33  ;;  %v1843_v47 = vrot.slane %v1824_v40, %v314_v35  ;;  %s1401_s13 = sshll.u32 %s2107_s9, 3 }
   0xf   : > { %v1617_v29 = vld [vmem:[%s2102_s3 + $0x30] sm:$0xff]   ;;  %s1810_s20 = scalar_lea.vmem %s2099_s0, %s1470_s11  ;;  %v1621_v36 = vld [vmem:[%s2102_s3 + $0x38] sm:$0xff]   ;;  %v1846_v48 = vrot.slane %v1832_v42, %v310_v28  ;;  %v1849_v49 = vrot.slane %v1832_v42, %v318_v31  ;;  %v1854_v52 = vrot.slane %v1832_v42, %v306_v33  ;;  %v1858_v54 = vrot.slane %v1832_v42, %v314_v35  ;;  %v1623_v0 = vld [vmem:[%s2102_s3 + $0x140] sm:$0xff]   ;;  %s2085_s16 = scalar_lea.vmem %s2104_s5, %s1401_s13 }
  0x10   : > { %1476 = vmatpush3.bf16.msra.mxu0 %v1601_v10  ;;  %v1618_v30 = vld [vmem:[%s2102_s3 + $0xb0] sm:$0xff]   ;;  %v1622_v37 = vld [vmem:[%s2102_s3 + $0xb8] sm:$0xff]   ;;  %v271_v38 = vld [vmem:[%s1810_s20 + $0x8] sm:$0xff]  ;;  %s1402_s9 = sshll.u32 %s2109_s22, 1 }
  0x11   : > { %1504 = vmatpush3.bf16.msra.mxu1 %v1602_v11  ;;  %1477 = vmatprep.subr.bf16.mxu0 %v1603_v12  ;;  %v279_v39 = vld [vmem:[%s1810_s20 + $0x48] sm:$0xff]  ;;  %v273_v43 = vld [vmem:[%s1810_s20 + $0x18] sm:$0xff]  ;;  %v270_v50 = vld [vmem:[%s1810_s20] sm:$0xff]  ;;  %v345_v55 = vmul.f32 %v1827_v41, %v271_v38  ;;  %s268_s19 = scalar_lea.vmem %s2105_s6, %s1402_s9 }
  0x12   : > { %1505 = vmatprep.subr.bf16.mxu1 %v1604_v13  ;;  %v281_v44 = vld [vmem:[%s1810_s20 + $0x58] sm:$0xff]  ;;  %v278_v51 = vld [vmem:[%s1810_s20 + $0x40] sm:$0xff]  ;;  %v272_v53 = vld [vmem:[%s1810_s20 + $0x10] sm:$0xff]  ;;  %v353_v56 = vmul.f32 %v1827_v41, %v279_v39  ;;  %v347_v57 = vmul.f32 %v1837_v45, %v273_v43  ;;  %v344_v60 = vmul.f32 %v1840_v46, %v270_v50 }
  0x13   : > { %v355_v58 = vmul.f32 %v1837_v45, %v281_v44  ;;  %v280_v59 = vld [vmem:[%s1810_s20 + $0x50] sm:$0xff]  ;;  %v352_v61 = vmul.f32 %v1840_v46, %v278_v51  ;;  %v346_v62 = vmul.f32 %v1843_v47, %v272_v53  ;;  %v419_v1 = vadd.f32 %v1846_v48, %v345_v55  ;;  %v1624_v5 = vld [vmem:[%s2102_s3 + $0x1c0] sm:$0xff]   ;;  %v1627_v28 = vld [vmem:[%s2102_s3 + $0x148] sm:$0xff]  }
  0x14   : > { %1478 = vmatpush3.bf16.msra.mxu0 %v1605_v14  ;;  %v354_v63 = vmul.f32 %v1843_v47, %v280_v59  ;;  %v427_v2 = vadd.f32 %v1846_v48, %v353_v56  ;;  %v421_v3 = vadd.f32 %v1849_v49, %v347_v57  ;;  %v418_v6 = vadd.f32 %v1854_v52, %v344_v60  ;;  %v1628_v33 = vld [vmem:[%s2102_s3 + $0x1c8] sm:$0xff]   ;;  %v1632_v38 = vld [vmem:[%s2102_s3 + $0x1d0] sm:$0xff]   ;;  %v1635_v44 = vld [vmem:[%s2102_s3 + $0x158] sm:$0xff]  }
  0x15   : > { %1506 = vmatpush3.bf16.msra.mxu1 %v1606_v15  ;;  %1479 = vmatprep.subr.bf16.mxu0 %v1607_v16  ;;  %v429_v4 = vadd.f32 %v1849_v49, %v355_v58  ;;  %v426_v7 = vadd.f32 %v1854_v52, %v352_v61  ;;  %v420_v8 = vadd.f32 %v1858_v54, %v346_v62  ;;  %vm451_vm0 = vcmp.gt.f32.partialorder %v419_v1, 0.0  ;;  %v1629_v35 = vld [vmem:[%s2102_s3 + $0x108] sm:$0xff]   ;;  %v1633_v39 = vld [vmem:[%s2102_s3 + $0x110] sm:$0xff]   ;;  %v1636_v50 = vld [vmem:[%s2102_s3 + $0x1d8] sm:$0xff]  }
  0x16   : > { %1507 = vmatprep.subr.bf16.mxu1 %v1608_v17  ;;  %v428_v9 = vadd.f32 %v1858_v54, %v354_v63  ;;  %vm459_vm1 = vcmp.gt.f32.partialorder %v427_v2, 0.0  ;;  %v483_v10 = vmul.f32 0.2, %v419_v1  ;;  %v491_v11 = vmul.f32 0.2, %v427_v2  ;;  %v1634_v43 = vld [vmem:[%s2102_s3 + $0x190] sm:$0xff]  }
  0x17   : > { %vm453_vm2 = vcmp.gt.f32.partialorder %v421_v3, 0.0  ;;  %vm461_vm3 = vcmp.gt.f32.partialorder %v429_v4, 0.0  ;;  %v485_v12 = vmul.f32 0.2, %v421_v3  ;;  %v493_v13 = vmul.f32 0.2, %v429_v4 }
  0x18   : > { %1480 = vmatpush3.bf16.msra.mxu0 %v1609_v19  ;;  %v515_v14 = vsel %vm451_vm0, %v419_v1, %v483_v10  ;;  %v523_v15 = vsel %vm459_vm1, %v427_v2, %v491_v11  ;;  %vm450_vm4 = vcmp.gt.f32.partialorder %v418_v6, 0.0  ;;  %vm458_vm5 = vcmp.gt.f32.partialorder %v426_v7, 0.0  ;;  %v1637_v51 = vld [vmem:[%s2102_s3 + $0x118] sm:$0xff]   ;;  %v1639_v55 = vld [vmem:[%s2102_s3 + $0x160] sm:$0xff]   ;;  %v287_v57 = vld [vmem:[%s1810_s20 + $0x88] sm:$0xff] }
  0x19   : > { %1508 = vmatpush3.bf16.msra.mxu1 %v1610_v20  ;;  %1481 = vmatprep.subr.bf16.mxu0 %v1611_v21  ;;  %v547_v16 = vpack.c.bf16 %v523_v15, %v515_v14  ;;  %v517_v17 = vsel %vm453_vm2, %v421_v3, %v485_v12  ;;  %v525_v18 = vsel %vm461_vm3, %v429_v4, %v493_v13  ;;  %v482_v19 = vmul.f32 0.2, %v418_v6  ;;  %v1638_v53 = vld [vmem:[%s2102_s3 + $0x198] sm:$0xff]   ;;  %v1640_v56 = vld [vmem:[%s2102_s3 + $0x1e0] sm:$0xff]   ;;  %v295_v59 = vld [vmem:[%s1810_s20 + $0xc8] sm:$0xff] }
  0x1a   : > { %1509 = vmatprep.subr.bf16.mxu1 %v1612_v22  ;;  %v549_v20 = vpack.c.bf16 %v525_v18, %v517_v17  ;;  %v490_v21 = vmul.f32 0.2, %v426_v7  ;;  %vm452_vm6 = vcmp.gt.f32.partialorder %v420_v8, 0.0  ;;  %vm460_vm7 = vcmp.gt.f32.partialorder %v428_v9, 0.0  ;;  %v1625_v22 = vld [vmem:[%s2102_s3 + $0x100] sm:$0xff]   ;;  %v1644_v4 = vld [vmem:[%s2102_s3 + $0x1e8] sm:$0xff]  }
  0x1b   : > { %1113 = vmatprep.mubr.bf16.mxu0 %v547_v16  ;;  %v1641_v58 = vld [vmem:[%s2102_s3 + $0x120] sm:$0xff]   ;;  %v361_v60 = vmul.f32 %v1827_v41, %v287_v57  ;;  %v369_v62 = vmul.f32 %v1827_v41, %v295_v59  ;;  %v289_v11 = vld [vmem:[%s1810_s20 + $0x98] sm:$0xff]  ;;  %v288_v15 = vld [vmem:[%s1810_s20 + $0x90] sm:$0xff]  ;;  %v334_v17 = vsub.s32 7, %v1775_v23  ;;  %v322_v18 = vsub.s32 4, %v1775_v23 }
  0x1c   : > { %1482 = vmatpush3.bf16.msra.mxu0 %v1613_v24  ;;  %v514_v24 = vsel %vm450_vm4, %v418_v6, %v482_v19  ;;  %1162 = vmatprep.mubr.bf16.mxu1 %v549_v20  ;;  %v1642_v61 = vld [vmem:[%s2102_s3 + $0x1a0] sm:$0xff]   ;;  %v326_v6 = vsub.s32 5, %v1775_v23  ;;  %v297_v13 = vld [vmem:[%s1810_s20 + $0xd8] sm:$0xff]  ;;  %v363_v14 = vmul.f32 %v1837_v45, %v289_v11  ;;  %v296_v16 = vld [vmem:[%s1810_s20 + $0xd0] sm:$0xff] }
  0x1d   : > { %1510 = vmatpush3.bf16.msra.mxu1 %v1614_v25  ;;  %1483 = vmatprep.subr.bf16.mxu0 %v1615_v26  ;;  %v484_v25 = vmul.f32 0.2, %v420_v8  ;;  %v492_v26 = vmul.f32 0.2, %v428_v9  ;;  %v435_v63 = vadd.f32 %v1846_v48, %v361_v60  ;;  %v286_v1 = vld [vmem:[%s1810_s20 + $0x80] sm:$0xff]  ;;  %v443_v3 = vadd.f32 %v1846_v48, %v369_v62  ;;  %v1645_v48 = vld [vmem:[%s2102_s3 + $0x128] sm:$0xff]  }
  0x1e   : > { %1511 = vmatprep.subr.bf16.mxu1 %v1616_v27  ;;  %v1626_v27 = vld [vmem:[%s2102_s3 + $0x180] sm:$0xff]   ;;  %v360_v41 = vmul.f32 %v1840_v46, %v286_v1  ;;  %v1652_v57 = vld [vmem:[%s2102_s3 + $0x1f8] sm:$0xff]   ;;  %v2013_v60 = vrot.slane %v1832_v42, %v326_v6  ;;  %v2027_v1 = vrot.slane %v1832_v42, %v322_v18 }
  0x1f   : > { %v516_v31 = vsel %vm452_vm6, %v420_v8, %v484_v25  ;;  %v294_v2 = vld [vmem:[%s1810_s20 + $0xc0] sm:$0xff]  ;;  %vm467_vm8 = vcmp.gt.f32.partialorder %v435_v63, 0.0  ;;  %vm475_vm9 = vcmp.gt.f32.partialorder %v443_v3, 0.0  ;;  %v507_v8 = vmul.f32 0.2, %v443_v3  ;;  %v1647_v25 = vld [vmem:[%s2102_s3 + $0x170] sm:$0xff]  }
  0x20   : > { %1484 = vmatpush3.bf16.msra.mxu0 %v1617_v29  ;;  %v522_v29 = vsel %vm458_vm5, %v426_v7, %v490_v21  ;;  %v499_v7 = vmul.f32 0.2, %v435_v63  ;;  %v1653_v59 = vld [vmem:[%s2102_s3 + $0x138] sm:$0xff]  }
  0x21   : > { %1512 = vmatpush3.bf16.msra.mxu1 %v1618_v30  ;;  %1485 = vmatprep.subr.bf16.mxu0 %v1619_v32  ;;  %v546_v30 = vpack.c.bf16 %v522_v29, %v514_v24  ;;  %v524_v32 = vsel %vm460_vm7, %v428_v9, %v492_v26  ;;  %v434_v9 = vadd.f32 %v1854_v52, %v360_v41  ;;  %v1648_v26 = vld [vmem:[%s2102_s3 + $0x1f0] sm:$0xff]   ;;  %v1654_v62 = vld [vmem:[%s2102_s3 + $0x1b8] sm:$0xff]   ;;  %v274_v41 = vld [vmem:[%s1810_s20 + $0x20] sm:$0xff] }
  0x22   : > { %1513 = vmatprep.subr.bf16.mxu1 %v1620_v34  ;;  %v548_v34 = vpack.c.bf16 %v524_v32, %v516_v31  ;;  %v531_v12 = vsel %vm467_vm8, %v435_v63, %v499_v7  ;;  %v539_v19 = vsel %vm475_vm9, %v443_v3, %v507_v8  ;;  %v437_v24 = vadd.f32 %v1849_v49, %v363_v14  ;;  %v1649_v32 = vld [vmem:[%s2102_s3 + $0x130] sm:$0xff]   ;;  %v275_v63 = vld [vmem:[%s1810_s20 + $0x28] sm:$0xff]  ;;  %v277_v3 = vld [vmem:[%s1810_s20 + $0x38] sm:$0xff] }
  0x23   : > { %vm466_vm10 = vcmp.gt.f32.partialorder %v434_v9, 0.0  ;;  %v555_v20 = vpack.c.bf16 %v539_v19, %v531_v12  ;;  %v370_v29 = vmul.f32 %v1843_v47, %v296_v16  ;;  %v282_v7 = vld [vmem:[%s1810_s20 + $0x60] sm:$0xff]  ;;  %v276_v8 = vld [vmem:[%s1810_s20 + $0x30] sm:$0xff] }
  0x24   : > { %1486 = vmatpush3.bf16.msra.mxu0 %v1621_v36  ;;  %v1630_v36 = vld [vmem:[%s2102_s3 + $0x188] sm:$0xff]   ;;  %vm469_vm12 = vcmp.gt.f32.partialorder %v437_v24, 0.0  ;;  %v501_v31 = vmul.f32 0.2, %v437_v24 }
  0x25   : > { %1514 = vmatpush3.bf16.msra.mxu1 %v1622_v37  ;;  %1527 = vmatprep.subr.bf16.mxu0 %v1623_v0  ;;  %v1631_v37 = vld [vmem:[%s2102_s3 + $0x150] sm:$0xff]   ;;  %v1643_v0 = vld [vmem:[%s2102_s3 + $0x168] sm:$0xff]  }
  0x26   : > { %1555 = vmatprep.subr.bf16.mxu1 %v1624_v5  ;;  %v368_v5 = vmul.f32 %v1840_v46, %v294_v2  ;;  %v1646_v46 = vld [vmem:[%s2102_s3 + $0x1a8] sm:$0xff]  }
  0x27   : > { %1114 = vmatmul.mubr.bf16.vlgmr.msra.gmra.mrb[0].mxu0 %v546_v30 }
  0x28   : > { %1163 = vmatmul.mubr.bf16.vlgmr.msra.gmra.mrb[0].mxu1 %v548_v34  ;;  %1528 = vmatpush3.bf16.msra.mxu0 %v1625_v22  ;;  %v442_v10 = vadd.f32 %v1854_v52, %v368_v5  ;;  %v498_v52 = vmul.f32 0.2, %v434_v9  ;;  %v371_v22 = vmul.f32 %v1837_v45, %v297_v13 }
  0x29   : > { %1556 = vmatpush3.bf16.msra.mxu1 %v1626_v27  ;;  %1529 = vmatprep.subr.bf16.mxu0 %v1627_v28  ;;  %v362_v28 = vmul.f32 %v1843_v47, %v288_v15  ;;  %v1650_v47 = vld [vmem:[%s2102_s3 + $0x1b0] sm:$0xff]  }
  0x2a   : > { %1557 = vmatprep.subr.bf16.mxu1 %v1628_v33  ;;  %vm474_vm11 = vcmp.gt.f32.partialorder %v442_v10, 0.0  ;;  %v506_v21 = vmul.f32 0.2, %v442_v10  ;;  %v530_v27 = vsel %vm466_vm10, %v434_v9, %v498_v52  ;;  %1121 = vmatprep.mubr.bf16.mxu0 %v555_v20  ;;  %v445_v45 = vadd.f32 %v1849_v49, %v371_v22  ;;  %v284_v9 = vld [vmem:[%s1810_s20 + $0x70] sm:$0xff] }
  0x2b   : > { %v436_v34 = vadd.f32 %v1858_v54, %v362_v28 }
  0x2c   : > { %1530 = vmatpush3.bf16.msra.mxu0 %v1629_v35  ;;  %v538_v30 = vsel %vm474_vm11, %v442_v10, %v506_v21  ;;  %v444_v35 = vadd.f32 %v1858_v54, %v370_v29  ;;  %vm477_vm13 = vcmp.gt.f32.partialorder %v445_v45, 0.0  ;;  %v509_v49 = vmul.f32 0.2, %v445_v45 }
  0x2d   : > { %1558 = vmatpush3.bf16.msra.mxu1 %v1630_v36  ;;  %1531 = vmatprep.subr.bf16.mxu0 %v1631_v37  ;;  %v554_v33 = vpack.c.bf16 %v538_v30, %v530_v27  ;;  %v330_v36 = vsub.s32 6, %v1775_v23  ;;  %v533_v37 = vsel %vm469_vm12, %v437_v24, %v501_v31  ;;  %vm468_vm14 = vcmp.gt.f32.partialorder %v436_v34, 0.0  ;;  %v291_v24 = vld [vmem:[%s1810_s20 + $0xa8] sm:$0xff]  ;;  %v293_v30 = vld [vmem:[%s1810_s20 + $0xb8] sm:$0xff] }
  0x2e   : > { %1559 = vmatprep.subr.bf16.mxu1 %v1632_v38  ;;  %v1651_v38 = vld [vmem:[%s2102_s3 + $0x178] sm:$0xff]   ;;  %vm476_vm15 = vcmp.gt.f32.partialorder %v444_v35, 0.0  ;;  %v508_v54 = vmul.f32 0.2, %v444_v35  ;;  %v2024_v23 = vrot.slane %v1832_v42, %v334_v17 }
  0x2f   : > { %1122 = vmatmul.mubr.bf16.gmra.mrb[4].mxu0 %v554_v33  ;;  %v2041_v10 = vrot.slane %v1832_v42, %v330_v36 }
  0x30   : > { %1532 = vmatpush3.bf16.msra.mxu0 %v1633_v39  ;;  %v500_v39 = vmul.f32 0.2, %v436_v34 }
  0x31   : > { %1560 = vmatpush3.bf16.msra.mxu1 %v1634_v43  ;;  %1533 = vmatprep.subr.bf16.mxu0 %v1635_v44  ;;  %v541_v43 = vsel %vm477_vm13, %v445_v45, %v509_v49  ;;  %v1996_v44 = vrot.slane %v1824_v40, %v326_v6 }
  0x32   : > { %1561 = vmatprep.subr.bf16.mxu1 %v1636_v50  ;;  %v1999_v50 = vrot.slane %v1824_v40, %v334_v17 }
  0x34   : > { %1534 = vmatpush3.bf16.msra.mxu0 %v1637_v51  ;;  %v2002_v51 = vrot.slane %v1824_v40, %v322_v18  ;;  %v351_v5 = vmul.f32 %v1999_v50, %v277_v3  ;;  %v292_v3 = vld [vmem:[%s1810_s20 + $0xb0] sm:$0xff] }
  0x35   : > { %1562 = vmatpush3.bf16.msra.mxu1 %v1638_v53  ;;  %1535 = vmatprep.subr.bf16.mxu0 %v1639_v55  ;;  %v557_v53 = vpack.c.bf16 %v541_v43, %v533_v37  ;;  %v532_v55 = vsel %vm468_vm14, %v436_v34, %v500_v39  ;;  %v290_v39 = vld [vmem:[%s1810_s20 + $0xa0] sm:$0xff] }
  0x36   : > { %1563 = vmatprep.subr.bf16.mxu1 %v1640_v56  ;;  %v540_v56 = vsel %vm476_vm15, %v444_v35, %v508_v54  ;;  %v356_v12 = vmul.f32 %v2002_v51, %v282_v7  ;;  %v425_v14 = vadd.f32 %v2024_v23, %v351_v5  ;;  %v365_v35 = vmul.f32 %v1996_v44, %v291_v24 }
  0x37   : > { %1170 = vmatprep.mubr.bf16.mxu1 %v557_v53 }
  0x38   : > { %1536 = vmatpush3.bf16.msra.mxu0 %v1641_v58  ;;  %v556_v58 = vpack.c.bf16 %v540_v56, %v532_v55  ;;  %vm457_vm2 = vcmp.gt.f32.partialorder %v425_v14, 0.0  ;;  %v489_v19 = vmul.f32 0.2, %v425_v14  ;;  %v430_v22 = vadd.f32 %v2027_v1, %v356_v12 }
  0x39   : > { %1564 = vmatpush3.bf16.msra.mxu1 %v1642_v61  ;;  %1537 = vmatprep.subr.bf16.mxu0 %v1643_v0  ;;  %v2016_v61 = vrot.slane %v1824_v40, %v330_v36  ;;  %v283_v0 = vld [vmem:[%s1810_s20 + $0x68] sm:$0xff]  ;;  %v349_v40 = vmul.f32 %v1996_v44, %v275_v63  ;;  %v301_v36 = vld [vmem:[%s1810_s20 + $0xf8] sm:$0xff]  ;;  %v439_v53 = vadd.f32 %v2013_v60, %v365_v35 }
  0x3a   : > { %1565 = vmatprep.subr.bf16.mxu1 %v1644_v4  ;;  %1171 = vmatmul.mubr.bf16.gmra.mrb[4].mxu1 %v556_v58  ;;  %v357_v2 = vmul.f32 %v1996_v44, %v283_v0  ;;  %v285_v4 = vld [vmem:[%s1810_s20 + $0x78] sm:$0xff]  ;;  %v521_v27 = vsel %vm457_vm2, %v425_v14, %v489_v19  ;;  %vm462_vm5 = vcmp.gt.f32.partialorder %v430_v22, 0.0  ;;  %v494_v31 = vmul.f32 0.2, %v430_v22  ;;  %v298_v58 = vld [vmem:[%s1810_s20 + $0xe0] sm:$0xff] }
  0x3b   : > { %v359_v6 = vmul.f32 %v1999_v50, %v285_v4  ;;  %v350_v13 = vmul.f32 %v2016_v61, %v276_v8  ;;  %v358_v17 = vmul.f32 %v2016_v61, %v284_v9  ;;  %vm471_vm8 = vcmp.gt.f32.partialorder %v439_v53, 0.0 }
  0x3c   : > { %1538 = vmatpush3.bf16.msra.mxu0 %v1645_v48  ;;  %v348_v48 = vmul.f32 %v2002_v51, %v274_v41  ;;  %v431_v11 = vadd.f32 %v2013_v60, %v357_v2  ;;  %v526_v49 = vsel %vm462_vm5, %v430_v22, %v494_v31  ;;  %v364_v63 = vmul.f32 %v2002_v51, %v290_v39  ;;  %v300_v41 = vld [vmem:[%s1810_s20 + $0xf0] sm:$0xff]  ;;  %v1403_v22 = vld [vmem:[%s2103_s4] ss:$0 sm:$0xff] }
  0x3d   : > { %1566 = vmatpush3.bf16.msra.mxu1 %v1646_v46  ;;  %1539 = vmatprep.subr.bf16.mxu0 %v1647_v25  ;;  %v423_v46 = vadd.f32 %v2013_v60, %v349_v40  ;;  %v433_v15 = vadd.f32 %v2024_v23, %v359_v6  ;;  %v299_v25 = vld [vmem:[%s1810_s20 + $0xe8] sm:$0xff]  ;;  %v432_v34 = vadd.f32 %v2041_v10, %v358_v17 }
  0x3e   : > { %1567 = vmatprep.subr.bf16.mxu1 %v1648_v26  ;;  %v422_v16 = vadd.f32 %v2027_v1, %v348_v48  ;;  %vm463_vm1 = vcmp.gt.f32.partialorder %v431_v11, 0.0  ;;  %v495_v18 = vmul.f32 0.2, %v431_v11  ;;  %v438_v7 = vadd.f32 %v2027_v1, %v364_v63 }
  0x3f   : > { %vm455_vm0 = vcmp.gt.f32.partialorder %v423_v46, 0.0  ;;  %v487_v42 = vmul.f32 0.2, %v423_v46  ;;  %vm465_vm3 = vcmp.gt.f32.partialorder %v433_v15, 0.0  ;;  %v497_v52 = vmul.f32 0.2, %v433_v15 }
  0x40   : > { %1540 = vmatpush3.bf16.msra.mxu0 %v1649_v32  ;;  %v527_v21 = vsel %vm463_vm1, %v431_v11, %v495_v18  ;;  %vm454_vm4 = vcmp.gt.f32.partialorder %v422_v16, 0.0  ;;  %v486_v29 = vmul.f32 0.2, %v422_v16  ;;  %v424_v32 = vadd.f32 %v2041_v10, %v350_v13 }
  0x41   : > { %1568 = vmatpush3.bf16.msra.mxu1 %v1650_v47  ;;  %1541 = vmatprep.subr.bf16.mxu0 %v1651_v38  ;;  %v519_v20 = vsel %vm455_vm0, %v423_v46, %v487_v42  ;;  %v529_v28 = vsel %vm465_vm3, %v433_v15, %v497_v52  ;;  %v373_v47 = vmul.f32 %v1996_v44, %v299_v25  ;;  %vm464_vm7 = vcmp.gt.f32.partialorder %v432_v34, 0.0 }
  0x42   : > { %1569 = vmatprep.subr.bf16.mxu1 %v1652_v57  ;;  %v551_v26 = vpack.c.bf16 %v527_v21, %v519_v20  ;;  %v553_v45 = vpack.c.bf16 %v529_v28, %v521_v27  ;;  %v518_v33 = vsel %vm454_vm4, %v422_v16, %v486_v29  ;;  %vm456_vm6 = vcmp.gt.f32.partialorder %v424_v32, 0.0 }
  0x43   : > { %v488_v37 = vmul.f32 0.2, %v424_v32  ;;  %v367_v38 = vmul.f32 %v1999_v50, %v293_v30  ;;  %v550_v54 = vpack.c.bf16 %v526_v49, %v518_v33  ;;  %v496_v43 = vmul.f32 0.2, %v432_v34 }
  0x44   : > { %1542 = vmatpush3.bf16.msra.mxu0 %v1653_v59  ;;  %1211 = vmatprep.mubr.bf16.mxu0 %v551_v26  ;;  %v447_v56 = vadd.f32 %v2013_v60, %v373_v47  ;;  %v375_v44 = vmul.f32 %v1999_v50, %v301_v36  ;;  %v372_v50 = vmul.f32 %v2002_v51, %v298_v58  ;;  %vm470_vm12 = vcmp.gt.f32.partialorder %v438_v7, 0.0 }
  0x45   : > { %1570 = vmatpush3.bf16.msra.mxu1 %v1654_v62  ;;  %1260 = vmatprep.mubr.bf16.mxu1 %v553_v45  ;;  %v520_v55 = vsel %vm456_vm6, %v424_v32, %v488_v37  ;;  %v441_v57 = vadd.f32 %v2024_v23, %v367_v38  ;;  %v528_v59 = vsel %vm464_vm7, %v432_v34, %v496_v43  ;;  %v503_v62 = vmul.f32 0.2, %v439_v53 }
  0x46   : > { %v552_v0 = vpack.c.bf16 %v528_v59, %v520_v55  ;;  %vm479_vm9 = vcmp.gt.f32.partialorder %v447_v56, 0.0  ;;  %v511_v40 = vmul.f32 0.2, %v447_v56  ;;  %v449_v2 = vadd.f32 %v2024_v23, %v375_v44 }
  0x47   : > { %1212 = vmatmul.mubr.bf16.vlgmr.msra.gmra.mrb[8].mxu0 %v550_v54  ;;  %v535_v4 = vsel %vm471_vm8, %v439_v53, %v503_v62  ;;  %vm473_vm10 = vcmp.gt.f32.partialorder %v441_v57, 0.0  ;;  %v505_v60 = vmul.f32 0.2, %v441_v57  ;;  %v446_v9 = vadd.f32 %v2027_v1, %v372_v50 }
  0x48   : > { %1261 = vmatmul.mubr.bf16.vlgmr.msra.gmra.mrb[8].mxu1 %v552_v0  ;;  %v543_v5 = vsel %vm479_vm9, %v447_v56, %v511_v40  ;;  %vm481_vm11 = vcmp.gt.f32.partialorder %v449_v2, 0.0  ;;  %v513_v6 = vmul.f32 0.2, %v449_v2  ;;  %v366_v46 = vmul.f32 %v2016_v61, %v292_v3 }
  0x49   : > { %v559_v48 = vpack.c.bf16 %v543_v5, %v535_v4  ;;  %v537_v8 = vsel %vm473_vm10, %v441_v57, %v505_v60  ;;  %v502_v11 = vmul.f32 0.2, %v438_v7  ;;  %v374_v12 = vmul.f32 %v2016_v61, %v300_v41 }
  0x4a   : > { %v545_v23 = vsel %vm481_vm11, %v449_v2, %v513_v6  ;;  %vm478_vm13 = vcmp.gt.f32.partialorder %v446_v9, 0.0  ;;  %v510_v13 = vmul.f32 0.2, %v446_v9  ;;  %v440_v14 = vadd.f32 %v2041_v10, %v366_v46 }
  0x4b   : > { %1219 = vmatprep.mubr.bf16.mxu0 %v559_v48  ;;  %v561_v51 = vpack.c.bf16 %v545_v23, %v537_v8  ;;  %v534_v15 = vsel %vm470_vm12, %v438_v7, %v502_v11  ;;  %v448_v16 = vadd.f32 %v2041_v10, %v374_v12 }
  0x4c   : > { %v542_v17 = vsel %vm478_vm13, %v446_v9, %v510_v13  ;;  %vm472_vm14 = vcmp.gt.f32.partialorder %v440_v14, 0.0  ;;  %v504_v1 = vmul.f32 0.2, %v440_v14 }
  0x4d   : > { %1268 = vmatprep.mubr.bf16.mxu1 %v561_v51  ;;  %v558_v42 = vpack.c.bf16 %v542_v17, %v534_v15  ;;  %vm480_vm15 = vcmp.gt.f32.partialorder %v448_v16, 0.0  ;;  %v512_v18 = vmul.f32 0.2, %v448_v16 }
  0x4e   : > { %v536_v19 = vsel %vm472_vm14, %v440_v14, %v504_v1 }
  0x4f   : > { %1220 = vmatmul.mubr.bf16.gmra.mrb[12].mxu0 %v558_v42  ;;  %v544_v52 = vsel %vm480_vm15, %v448_v16, %v512_v18 }
  0x50   : > { %v560_v61 = vpack.c.bf16 %v544_v52, %v536_v19 }
  0x52   : > { %1269 = vmatmul.mubr.bf16.gmra.mrb[12].mxu1 %v560_v61 }
  0xfa   : > { %v1487_v20 = vpop.f32.mrb[0].mxu0 }
  0xfb   : > { %v1515_v21 = vpop.f32.mrb[0].mxu1  ;;  %v1488_v24 = vpop.f32.mrb[1].mxu0 }
  0xfc   : > { %v1489_v10 = vadd.f32 %v1488_v24, %v1487_v20  ;;  %v1516_v25 = vpop.f32.mrb[1].mxu1  ;;  %v1490_v26 = vpop.f32.mrb[2].mxu0 }
  0xfd   : > { %v1517_v27 = vadd.f32 %v1516_v25, %v1515_v21  ;;  %v1518_v28 = vpop.f32.mrb[2].mxu1  ;;  %v1491_v29 = vpop.f32.mrb[3].mxu0 }
  0xfe   : > { %v1116_v30 = vadd.f32 %v1489_v10, %v1403_v22  ;;  %v1492_v45 = vadd.f32 %v1491_v29, %v1490_v26  ;;  %v1519_v31 = vpop.f32.mrb[3].mxu1 }
  0xff   : > { %v1520_v32 = vadd.f32 %v1519_v31, %v1518_v28 }
 0x100   : > { %v1165_v33 = vadd.f32 %v1517_v27, %v1116_v30  ;;  %v1119_v34 = vadd.f32 %v1492_v45, %v1403_v22 }
 0x102   : > { %v1168_v35 = vadd.f32 %v1520_v32, %v1119_v34  ;;  %v1493_v47 = vpop.f32.mrb[4].mxu0 }
 0x103   : > { %v1494_v36 = vpop.f32.mrb[5].mxu0 }
 0x104   : > { %v1495_v49 = vadd.f32 %v1494_v36, %v1493_v47  ;;  %v1496_v37 = vpop.f32.mrb[6].mxu0 }
 0x105   : > { %v1497_v38 = vpop.f32.mrb[7].mxu0 }
 0x106   : > { %v1498_v39 = vadd.f32 %v1497_v38, %v1496_v37  ;;  %v1124_v54 = vadd.f32 %v1495_v49, %v1403_v22 }
 0x108   : > { %v1127_v55 = vadd.f32 %v1498_v39, %v1403_v22 }
 0x10d   : > { %v1521_v43 = vpop.f32.mrb[4].mxu1 }
 0x10e   : > { %v1522_v53 = vpop.f32.mrb[5].mxu1 }
 0x10f   : > { %v1523_v56 = vadd.f32 %v1522_v53, %v1521_v43  ;;  %v1524_v44 = vpop.f32.mrb[6].mxu1 }
 0x110   : > { %v1525_v57 = vpop.f32.mrb[7].mxu1 }
 0x111   : > { %v1173_v58 = vadd.f32 %v1523_v56, %v1124_v54  ;;  %v1526_v59 = vadd.f32 %v1525_v57, %v1524_v44 }
 0x113   : > { %v1176_v62 = vadd.f32 %v1526_v59, %v1127_v55 }
 0x11a   : > { %v1543_v63 = vpop.f32.mrb[8].mxu0 }
 0x11b   : > { %v1544_v0 = vpop.f32.mrb[9].mxu0  ;;  %v1571_v3 = vpop.f32.mrb[8].mxu1 }
 0x11c   : > { %v1545_v40 = vadd.f32 %v1544_v0, %v1543_v63  ;;  %v1546_v2 = vpop.f32.mrb[10].mxu0  ;;  %v1572_v50 = vpop.f32.mrb[9].mxu1 }
 0x11d   : > { %v1547_v4 = vpop.f32.mrb[11].mxu0  ;;  %v1573_v5 = vadd.f32 %v1572_v50, %v1571_v3  ;;  %v1574_v6 = vpop.f32.mrb[10].mxu1 }
 0x11e   : > { %v1214_v60 = vadd.f32 %v1545_v40, %v1165_v33  ;;  %v1548_v41 = vadd.f32 %v1547_v4, %v1546_v2  ;;  %v1575_v48 = vpop.f32.mrb[11].mxu1 }
 0x11f   : > { %v1576_v9 = vadd.f32 %v1575_v48, %v1574_v6 }
 0x120   : > { %v1217_v7 = vadd.f32 %v1548_v41, %v1168_v35  ;;  %v1263_v8 = vadd.f32 %v1573_v5, %v1214_v60 }
 0x122   : > { %1277 = vst [vmem:[%s2085_s16] sm:$0xff] %v1263_v8  ;;  %v1266_v46 = vadd.f32 %v1576_v9, %v1217_v7  ;;  %v1291_v23 = vmul.f32 %v1263_v8, %v1263_v8  ;;  %v1549_v51 = vpop.f32.mrb[12].mxu0 }
 0x123   : > { %v1550_v13 = vpop.f32.mrb[13].mxu0 }
 0x124   : > { %1278 = vst [vmem:[%s2085_s16 + $0x8] sm:$0xff] %v1266_v46  ;;  %v1281_v11 = vadd.f32 %v1266_v46, %v1263_v8  ;;  %v1292_v12 = vmul.f32 %v1266_v46, %v1266_v46  ;;  %v1551_v15 = vadd.f32 %v1550_v13, %v1549_v51  ;;  %v1552_v16 = vpop.f32.mrb[14].mxu0 }
 0x125   : > { %v1577_v17 = vpop.f32.mrb[12].mxu1  ;;  %v1553_v1 = vpop.f32.mrb[15].mxu0 }
 0x126   : > { %v1295_v14 = vadd.f32 %v1292_v12, %v1291_v23  ;;  %v1222_v42 = vadd.f32 %v1551_v15, %v1173_v58  ;;  %v1578_v18 = vpop.f32.mrb[13].mxu1  ;;  %v1554_v19 = vadd.f32 %v1553_v1, %v1552_v16 }
 0x127   : > { %v1579_v52 = vadd.f32 %v1578_v18, %v1577_v17  ;;  %v1580_v61 = vpop.f32.mrb[14].mxu1 }
 0x128   : > { %v1225_v20 = vadd.f32 %v1554_v19, %v1176_v62  ;;  %v1581_v21 = vpop.f32.mrb[15].mxu1 }
 0x129   : > { %v1271_v22 = vadd.f32 %v1579_v52, %v1222_v42  ;;  %v1582_v24 = vadd.f32 %v1581_v21, %v1580_v61 }
 0x12b   : > { %1279 = vst [vmem:[%s2085_s16 + $0x10] sm:$0xff] %v1271_v22  ;;  %v1282_v10 = vadd.f32 %v1281_v11, %v1271_v22  ;;  %v1293_v25 = vmul.f32 %v1271_v22, %v1271_v22  ;;  %v1274_v26 = vadd.f32 %v1582_v24, %v1225_v20 }
 0x12d   : > { %v1296_v27 = vadd.f32 %v1295_v14, %v1293_v25  ;;  %1280 = vst [vmem:[%s2085_s16 + $0x18] sm:$0xff] %v1274_v26  ;;  %v1283_v28 = vadd.f32 %v1282_v10, %v1274_v26  ;;  %v1294_v29 = vmul.f32 %v1274_v26, %v1274_v26 }
 0x12f   : > { %v1284_v30 = vrot.slane %v1283_v28, 4  ;;  %v1297_v45 = vadd.f32 %v1296_v27, %v1294_v29 }
 0x131   : > { %v1285_v31 = vadd.f32 %v1284_v30, %v1283_v28  ;;  %v1298_v32 = vrot.slane %v1297_v45, 4 }
 0x133   : > { %v1286_v33 = vrot.slane %v1285_v31, 2  ;;  %v1299_v34 = vadd.f32 %v1298_v32, %v1297_v45 }
 0x135   : > { %v1287_v35 = vadd.f32 %v1286_v33, %v1285_v31  ;;  %v1300_v47 = vrot.slane %v1299_v34, 2 }
 0x137   : > { %v1288_v36 = vrot.slane %v1287_v35, 1  ;;  %v1301_v49 = vadd.f32 %v1300_v47, %v1299_v34 }
 0x139   : > { %v1289_v37 = vadd.f32 %v1288_v36, %v1287_v35  ;;  %v1302_v38 = vrot.slane %v1301_v49, 1 }
 0x13b   : > { %1290 = vst [vmem:[%s268_s19] sm:$0x1] %v1289_v37  ;;  %v1303_v39 = vadd.f32 %v1302_v38, %v1301_v49 }
 0x13d   : > { %1304 = vst [vmem:[%s268_s19 + $0x1] sm:$0x1] %v1303_v39 }
 0x13e PF: > { %s17_s21 = sadd.s32 1, %s1661_s21  }
 0x13f   : > { %p14_p5 = scmp.ge.s32.totalorder %s17_s21, 4  }
 0x141   :  { %16 = sbr.rel (!%p14_p5) target bundleno = 1 (0x1), region = 82 }

// kernel: tile.67
= control target key start
LH: loop header
LB: loop body
LE: loop exit
PB: predicated region body
PF: predicated region fallthrough
CT: control target
= control target key end

     0   :  { %s28_s0 = inlined_call_operand.vmem [shape: f32[64], index: 0, kind: input, shape index: {}]   ;;  %s29_s1 = inlined_call_operand.vmem [shape: f32[16,64], index: 1, kind: output, shape index: {}]  }
   0x1   :  { %v4_v0 = vld [vmem:[%s28_s0] ss:$0 sm:$0xff] }
   0x2   :  { %5 = vst [vmem:[%s29_s1] sm:$0xff] %v4_v0  ;;  %8 = vst [vmem:[%s29_s1 + $0x8] sm:$0xff] %v4_v0 }

// kernel: tile.68
= control target key start
LH: loop header
LB: loop body
LE: loop exit
PB: predicated region body
PF: predicated region fallthrough
CT: control target
= control target key end

     0   :  { %vm3_vm0 = vcmask 523264   ;;  %vm10_vm1 = vcmask 1048064   ;;  %s116_s0 = inlined_call_operand.vmem [shape: f32[16,64], index: 0, kind: input, shape index: {}]   ;;  %s117_s1 = inlined_call_operand.vmem [shape: f32[1,1024], index: 1, kind: output, shape index: {}]  }
   0x1   :  { %v66_v0 = vld [vmem:[%s116_s0 + $0x1] ss:$2 sm:$0xff]   ;;  %v2_v1 = vld [vmem:[%s116_s0] ss:$2 sm:$0xff]   ;;  %s75_s0 = smov 64  }
   0x2   :  { %8 = vrot.lane.b32.xlu0 %v66_v0, %s75_s0  ;;  %4 = vst.msk [vmem:[#allocation0] ss:$8 sm:$0xf] %vm3_vm0, %v2_v1   ;;  %5 = vst.msk [vmem:[#allocation0] ss:$8 sm:$0xf0] %vm3_vm0, %v2_v1  }
  0x74   :  { %v9_v2 = vpop.permute.xlu0 %8  }
  0x75   :  { %11 = vst.msk [vmem:[#allocation0] ss:$8 sm:$0xf] %vm10_vm1, %v9_v2   ;;  %12 = vst.msk [vmem:[#allocation0] ss:$8 sm:$0xf0] %vm10_vm1, %v9_v2  }
  0x7c   :  { %v16_v3 = vld [vmem:[#allocation0] sm:$0x1]  ;;  %v20_v4 = vld [vmem:[#allocation0 + $0x8] sm:$0x1]  ;;  %v25_v5 = vld [vmem:[#allocation0 + $0x10] sm:$0x1] }
  0x7d   :  { %18 = vst [vmem:[%s117_s1] sm:$0x1] %v16_v3  ;;  %67 = vst [vmem:[%s117_s1 + $0x1] sm:$0x1] %v20_v4  ;;  %v31_v6 = vld [vmem:[#allocation0 + $0x18] sm:$0x1] }
  0x7e   :  { %68 = vst [vmem:[%s117_s1 + $0x2] sm:$0x1] %v25_v5  ;;  %v37_v7 = vld [vmem:[#allocation0 + $0x20] sm:$0x1]  ;;  %v43_v8 = vld [vmem:[#allocation0 + $0x28] sm:$0x1] }
  0x7f   :  { %69 = vst [vmem:[%s117_s1 + $0x3] sm:$0x1] %v31_v6  ;;  %70 = vst [vmem:[%s117_s1 + $0x4] sm:$0x1] %v37_v7  ;;  %v49_v9 = vld [vmem:[#allocation0 + $0x30] sm:$0x1] }
  0x80   :  { %71 = vst [vmem:[%s117_s1 + $0x5] sm:$0x1] %v43_v8  ;;  %v55_v10 = vld [vmem:[#allocation0 + $0x38] sm:$0x1]  ;;  %72 = vst [vmem:[%s117_s1 + $0x6] sm:$0x1] %v49_v9 }
  0x81   :  { %73 = vst [vmem:[%s117_s1 + $0x7] sm:$0x1] %v55_v10 }

// kernel: tile.77
= control target key start
LH: loop header
LB: loop body
LE: loop exit
PB: predicated region body
PF: predicated region fallthrough
CT: control target
= control target key end

     0   :  { %s28_s0 = inlined_call_operand.vmem [shape: f32[128], index: 0, kind: input, shape index: {}]   ;;  %s29_s1 = inlined_call_operand.vmem [shape: f32[16,128], index: 1, kind: output, shape index: {}]  }
   0x1   :  { %v4_v0 = vld [vmem:[%s28_s0] ss:$0 sm:$0xff] }
   0x2   :  { %5 = vst [vmem:[%s29_s1] sm:$0xff] %v4_v0  ;;  %8 = vst [vmem:[%s29_s1 + $0x8] sm:$0xff] %v4_v0 }

// kernel: conditional_discriminator_forward.10
= control target key start
LH: loop header
LB: loop body
LE: loop exit
PB: predicated region body
PF: predicated region fallthrough
CT: control target
= control target key end

     0   :  { %s1530_s21 = smov 0   ;;  %s1809_s0 = inlined_call_operand.vmem [shape: f32[32,1024], index: 0, kind: input, shape index: {}]   ;;  %s1810_s1 = inlined_call_operand.vmem [shape: f32[1,1024], index: 1, kind: input, shape index: {}]   ;;  %s1811_s2 = inlined_call_operand.vmem [shape: f32[1,1024], index: 2, kind: input, shape index: {}]   ;;  %s1812_s3 = inlined_call_operand.vmem [shape: bf16[1024,128], index: 3, kind: input, shape index: {}]   ;;  %s1813_s4 = inlined_call_operand.vmem [shape: f32[1,128], index: 4, kind: input, shape index: {}]   ;;  %s1814_s5 = inlined_call_operand.vmem [shape: f32[32,128], index: 5, kind: output, shape index: {0}]   ;;  %s1815_s6 = inlined_call_operand.vmem [shape: f32[2,2,128], index: 6, kind: output, shape index: {1}]  }
   0x1 LB: > { %s1536_s22 = sadd.s32 4294967295, %s1493_s21   ;;  %p1252_p0 = scmp.ge.s32.totalorder %s1493_s21, 1  ;;  %s1493_s21 = sphi %s1530_s21, %s17_s21  }
   0x2   : > { %p217_p1 = scmp.lt.s32.totalorder %s1493_s21, 3 }
   0x4   : > { %p218_p2 = pnand %p1252_p0, %p217_p1 }
   0x5   : > { %v1423_v0 = vld [vmem:[%s1812_s3 + $0x40] sm:$0xff] (!%p218_p2)   ;;  %v1427_v4 = vld [vmem:[%s1812_s3 + $0x48] sm:$0xff] (!%p218_p2)   ;;  %v1431_v8 = vld [vmem:[%s1812_s3 + $0x50] sm:$0xff] (!%p218_p2)   ;;  %s1253_s9 = sshll.u32 (!%p218_p2), %s1536_s22, 1  ;;  %v288_v18 = vlaneseq (!%p218_p2)  ;;  %p265_p4 = scmp.lt.s32.totalorder (!%p218_p2), %s1536_s22, 1 }
   0x6   : > { %221 = sbr.rel (%p218_p2) target bundleno = 309 (0x135), region = 40  ;;  %v1424_v1 = vld [vmem:[%s1812_s3 + $0xc0] sm:$0xff] (!%p218_p2)   ;;  %1327 = vmatprep.subr.bf16.mxu0 (!%p218_p2), %v1423_v0  ;;  %v1428_v5 = vld [vmem:[%s1812_s3 + $0xc8] sm:$0xff] (!%p218_p2)   ;;  %v1432_v9 = vld [vmem:[%s1812_s3 + $0xd0] sm:$0xff] (!%p218_p2)   ;;  %p253_p3 = scmp.lt.s32.totalorder (!%p218_p2), %s1253_s9, 3 }
   0x7   : > { %v1425_v2 = vld [vmem:[%s1812_s3] sm:$0xff] (!%p218_p2)   ;;  %1349 = vmatprep.subr.bf16.mxu1 (!%p218_p2), %v1424_v1  ;;  %v1429_v6 = vld [vmem:[%s1812_s3 + $0x8] sm:$0xff] (!%p218_p2)   ;;  %v1433_v10 = vld [vmem:[%s1812_s3 + $0x10] sm:$0xff] (!%p218_p2)   ;;  %v1607_v23 = vshrl.u32 (!%p218_p2), %v288_v18, 7 }
   0x8   : > { %v1426_v3 = vld [vmem:[%s1812_s3 + $0x80] sm:$0xff] (!%p218_p2)   ;;  %1328 = vmatpush3.bf16.msra.mxu0 (!%p218_p2), %v1425_v2  ;;  %v1430_v7 = vld [vmem:[%s1812_s3 + $0x88] sm:$0xff] (!%p218_p2)   ;;  %v1434_v11 = vld [vmem:[%s1812_s3 + $0x90] sm:$0xff] (!%p218_p2)  }
   0x9   : > { %1350 = vmatpush3.bf16.msra.mxu1 (!%p218_p2), %v1426_v3  ;;  %1329 = vmatprep.subr.bf16.mxu0 (!%p218_p2), %v1427_v4  ;;  %v1435_v12 = vld [vmem:[%s1812_s3 + $0x58] sm:$0xff] (!%p218_p2)   ;;  %v1439_v16 = vld [vmem:[%s1812_s3 + $0x60] sm:$0xff] (!%p218_p2)   ;;  %v1443_v21 = vld [vmem:[%s1812_s3 + $0x68] sm:$0xff] (!%p218_p2)   ;;  %v294_v28 = vsub.s32 (!%p218_p2), 1, %v1607_v23  ;;  %v302_v31 = vsub.s32 (!%p218_p2), 3, %v1607_v23  ;;  %v290_v33 = vsub.s32 (!%p218_p2), 0, %v1607_v23 }
   0xa   : > { %1351 = vmatprep.subr.bf16.mxu1 (!%p218_p2), %v1428_v5  ;;  %v1436_v13 = vld [vmem:[%s1812_s3 + $0xd8] sm:$0xff] (!%p218_p2)   ;;  %v1440_v17 = vld [vmem:[%s1812_s3 + $0xe0] sm:$0xff] (!%p218_p2)   ;;  %v1444_v22 = vld [vmem:[%s1812_s3 + $0xe8] sm:$0xff] (!%p218_p2)   ;;  %v298_v35 = vsub.s32 (!%p218_p2), 2, %v1607_v23 }
   0xb   : > { %v1437_v14 = vld [vmem:[%s1812_s3 + $0x18] sm:$0xff] (!%p218_p2)   ;;  %v1441_v19 = vld [vmem:[%s1812_s3 + $0x20] sm:$0xff] (!%p218_p2)   ;;  %v1445_v24 = vld [vmem:[%s1812_s3 + $0x28] sm:$0xff] (!%p218_p2)  }
   0xc   : > { %1330 = vmatpush3.bf16.msra.mxu0 (!%p218_p2), %v1429_v6  ;;  %v1438_v15 = vld [vmem:[%s1812_s3 + $0x98] sm:$0xff] (!%p218_p2)   ;;  %v1442_v20 = vld [vmem:[%s1812_s3 + $0xa0] sm:$0xff] (!%p218_p2)   ;;  %v1446_v25 = vld [vmem:[%s1812_s3 + $0xa8] sm:$0xff] (!%p218_p2)  }
   0xd   : > { %1352 = vmatpush3.bf16.msra.mxu1 %v1430_v7  ;;  %1331 = vmatprep.subr.bf16.mxu0 %v1431_v8  ;;  %s1817_s9 = smov (!%p253_p3, %s1253_s9), 3  ;;  %v1447_v26 = vld [vmem:[%s1812_s3 + $0x70] sm:$0xff]   ;;  %v1451_v32 = vld [vmem:[%s1812_s3 + $0x78] sm:$0xff]   ;;  %v1656_v40 = vld [vmem:[%s1810_s1] sm:$0xff]  ;;  %s1819_s22 = smov (!%p265_p4, %s1536_s22), 1 }
   0xe   : > { %1353 = vmatprep.subr.bf16.mxu1 %v1432_v9  ;;  %v1448_v27 = vld [vmem:[%s1812_s3 + $0xf0] sm:$0xff]   ;;  %s1326_s11 = sshll.u32 %s1817_s9, 6  ;;  %v1452_v34 = vld [vmem:[%s1812_s3 + $0xf8] sm:$0xff]   ;;  %v295_v41 = vrot.slane %v1656_v40, %v294_v28  ;;  %v1662_v42 = vld [vmem:[%s1811_s2] sm:$0xff]  ;;  %v303_v45 = vrot.slane %v1656_v40, %v302_v31  ;;  %v291_v46 = vrot.slane %v1656_v40, %v290_v33  ;;  %v299_v47 = vrot.slane %v1656_v40, %v298_v35  ;;  %s1257_s13 = sshll.u32 %s1817_s9, 3 }
   0xf   : > { %v1449_v29 = vld [vmem:[%s1812_s3 + $0x30] sm:$0xff]   ;;  %s1642_s20 = scalar_lea.vmem %s1809_s0, %s1326_s11  ;;  %v1453_v36 = vld [vmem:[%s1812_s3 + $0x38] sm:$0xff]   ;;  %v353_v48 = vrot.slane %v1662_v42, %v294_v28  ;;  %v361_v49 = vrot.slane %v1662_v42, %v302_v31  ;;  %v349_v52 = vrot.slane %v1662_v42, %v290_v33  ;;  %v357_v54 = vrot.slane %v1662_v42, %v298_v35  ;;  %v1455_v0 = vld [vmem:[%s1812_s3 + $0x140] sm:$0xff]   ;;  %s263_s16 = scalar_lea.vmem %s1814_s5, %s1257_s13 }
  0x10   : > { %1332 = vmatpush3.bf16.msra.mxu0 %v1433_v10  ;;  %v1450_v30 = vld [vmem:[%s1812_s3 + $0xb0] sm:$0xff]   ;;  %v1454_v37 = vld [vmem:[%s1812_s3 + $0xb8] sm:$0xff]   ;;  %v271_v38 = vld [vmem:[%s1642_s20 + $0x8] sm:$0xff]  ;;  %s1258_s9 = sshll.u32 %s1819_s22, 1 }
  0x11   : > { %1354 = vmatpush3.bf16.msra.mxu1 %v1434_v11  ;;  %1333 = vmatprep.subr.bf16.mxu0 %v1435_v12  ;;  %v279_v39 = vld [vmem:[%s1642_s20 + $0x48] sm:$0xff]  ;;  %v273_v43 = vld [vmem:[%s1642_s20 + $0x18] sm:$0xff]  ;;  %v270_v50 = vld [vmem:[%s1642_s20] sm:$0xff]  ;;  %v329_v55 = vmul.f32 %v295_v41, %v271_v38  ;;  %s268_s19 = scalar_lea.vmem %s1815_s6, %s1258_s9 }
  0x12   : > { %1355 = vmatprep.subr.bf16.mxu1 %v1436_v13  ;;  %v281_v44 = vld [vmem:[%s1642_s20 + $0x58] sm:$0xff]  ;;  %v278_v51 = vld [vmem:[%s1642_s20 + $0x40] sm:$0xff]  ;;  %v272_v53 = vld [vmem:[%s1642_s20 + $0x10] sm:$0xff]  ;;  %v337_v56 = vmul.f32 %v295_v41, %v279_v39  ;;  %v331_v57 = vmul.f32 %v303_v45, %v273_v43  ;;  %v328_v60 = vmul.f32 %v291_v46, %v270_v50 }
  0x13   : > { %v339_v58 = vmul.f32 %v303_v45, %v281_v44  ;;  %v280_v59 = vld [vmem:[%s1642_s20 + $0x50] sm:$0xff]  ;;  %v336_v61 = vmul.f32 %v291_v46, %v278_v51  ;;  %v330_v62 = vmul.f32 %v299_v47, %v272_v53  ;;  %v387_v1 = vadd.f32 %v353_v48, %v329_v55  ;;  %v1456_v5 = vld [vmem:[%s1812_s3 + $0x1c0] sm:$0xff]   ;;  %v1459_v28 = vld [vmem:[%s1812_s3 + $0x148] sm:$0xff]  }
  0x14   : > { %1334 = vmatpush3.bf16.msra.mxu0 %v1437_v14  ;;  %v338_v63 = vmul.f32 %v299_v47, %v280_v59  ;;  %v395_v2 = vadd.f32 %v353_v48, %v337_v56  ;;  %v389_v3 = vadd.f32 %v361_v49, %v331_v57  ;;  %v386_v6 = vadd.f32 %v349_v52, %v328_v60  ;;  %v1460_v33 = vld [vmem:[%s1812_s3 + $0x1c8] sm:$0xff]   ;;  %v1464_v38 = vld [vmem:[%s1812_s3 + $0x1d0] sm:$0xff]   ;;  %v1467_v43 = vld [vmem:[%s1812_s3 + $0x158] sm:$0xff]  }
  0x15   : > { %1356 = vmatpush3.bf16.msra.mxu1 %v1438_v15  ;;  %1335 = vmatprep.subr.bf16.mxu0 %v1439_v16  ;;  %v397_v4 = vadd.f32 %v361_v49, %v339_v58  ;;  %v394_v7 = vadd.f32 %v349_v52, %v336_v61  ;;  %v388_v8 = vadd.f32 %v357_v54, %v330_v62  ;;  %vm403_vm0 = vcmp.gt.f32.partialorder %v387_v1, 0.0  ;;  %v1461_v35 = vld [vmem:[%s1812_s3 + $0x108] sm:$0xff]   ;;  %v1465_v39 = vld [vmem:[%s1812_s3 + $0x110] sm:$0xff]   ;;  %v1468_v44 = vld [vmem:[%s1812_s3 + $0x1d8] sm:$0xff]  }
  0x16   : > { %1357 = vmatprep.subr.bf16.mxu1 %v1440_v17  ;;  %v396_v9 = vadd.f32 %v357_v54, %v338_v63  ;;  %vm411_vm1 = vcmp.gt.f32.partialorder %v395_v2, 0.0  ;;  %v419_v10 = vmul.f32 0.2, %v387_v1  ;;  %v427_v11 = vmul.f32 0.2, %v395_v2  ;;  %v1466_v41 = vld [vmem:[%s1812_s3 + $0x190] sm:$0xff]  }
  0x17   : > { %vm405_vm2 = vcmp.gt.f32.partialorder %v389_v3, 0.0  ;;  %vm413_vm3 = vcmp.gt.f32.partialorder %v397_v4, 0.0  ;;  %v421_v12 = vmul.f32 0.2, %v389_v3  ;;  %v429_v13 = vmul.f32 0.2, %v397_v4 }
  0x18   : > { %1336 = vmatpush3.bf16.msra.mxu0 %v1441_v19  ;;  %v435_v14 = vsel %vm403_vm0, %v387_v1, %v419_v10  ;;  %v443_v15 = vsel %vm411_vm1, %v395_v2, %v427_v11  ;;  %vm402_vm4 = vcmp.gt.f32.partialorder %v386_v6, 0.0  ;;  %vm410_vm5 = vcmp.gt.f32.partialorder %v394_v7, 0.0  ;;  %v1469_v45 = vld [vmem:[%s1812_s3 + $0x118] sm:$0xff]   ;;  %v1471_v47 = vld [vmem:[%s1812_s3 + $0x160] sm:$0xff]   ;;  %v1475_v51 = vld [vmem:[%s1812_s3 + $0x168] sm:$0xff]  }
  0x19   : > { %1358 = vmatpush3.bf16.msra.mxu1 %v1442_v20  ;;  %1337 = vmatprep.subr.bf16.mxu0 %v1443_v21  ;;  %v451_v16 = vpack.c.bf16 %v443_v15, %v435_v14  ;;  %v437_v17 = vsel %vm405_vm2, %v389_v3, %v421_v12  ;;  %v445_v18 = vsel %vm413_vm3, %v397_v4, %v429_v13  ;;  %v418_v19 = vmul.f32 0.2, %v386_v6  ;;  %v1470_v46 = vld [vmem:[%s1812_s3 + $0x198] sm:$0xff]   ;;  %v1472_v48 = vld [vmem:[%s1812_s3 + $0x1e0] sm:$0xff]   ;;  %v1476_v52 = vld [vmem:[%s1812_s3 + $0x1e8] sm:$0xff]  }
  0x1a   : > { %1359 = vmatprep.subr.bf16.mxu1 %v1444_v22  ;;  %v453_v20 = vpack.c.bf16 %v445_v18, %v437_v17  ;;  %v426_v21 = vmul.f32 0.2, %v394_v7  ;;  %vm404_vm6 = vcmp.gt.f32.partialorder %v388_v8, 0.0  ;;  %vm412_vm7 = vcmp.gt.f32.partialorder %v396_v9, 0.0  ;;  %v1457_v22 = vld [vmem:[%s1812_s3 + $0x100] sm:$0xff]   ;;  %v1477_v54 = vld [vmem:[%s1812_s3 + $0x128] sm:$0xff]  }
  0x1b   : > { %1009 = vmatprep.mubr.bf16.mxu0 %v451_v16  ;;  %v1473_v49 = vld [vmem:[%s1812_s3 + $0x120] sm:$0xff]   ;;  %v310_v53 = vsub.s32 5, %v1607_v23  ;;  %v318_v55 = vsub.s32 7, %v1607_v23  ;;  %v1478_v56 = vld [vmem:[%s1812_s3 + $0x1a8] sm:$0xff]   ;;  %v306_v57 = vsub.s32 4, %v1607_v23  ;;  %v1479_v58 = vld [vmem:[%s1812_s3 + $0x170] sm:$0xff]  }
  0x1c   : > { %1338 = vmatpush3.bf16.msra.mxu0 %v1445_v24  ;;  %v434_v24 = vsel %vm402_vm4, %v386_v6, %v418_v19  ;;  %1050 = vmatprep.mubr.bf16.mxu1 %v453_v20  ;;  %v1474_v50 = vld [vmem:[%s1812_s3 + $0x1a0] sm:$0xff]   ;;  %v314_v59 = vsub.s32 6, %v1607_v23  ;;  %v1480_v60 = vld [vmem:[%s1812_s3 + $0x1f0] sm:$0xff]   ;;  %v1484_v4 = vld [vmem:[%s1812_s3 + $0x1f8] sm:$0xff]  }
  0x1d   : > { %1360 = vmatpush3.bf16.msra.mxu1 %v1446_v25  ;;  %1339 = vmatprep.subr.bf16.mxu0 %v1447_v26  ;;  %v420_v25 = vmul.f32 0.2, %v388_v8  ;;  %v428_v26 = vmul.f32 0.2, %v396_v9  ;;  %v1481_v61 = vld [vmem:[%s1812_s3 + $0x130] sm:$0xff]   ;;  %v311_v62 = vrot.slane %v1656_v40, %v310_v53  ;;  %v319_v63 = vrot.slane %v1656_v40, %v318_v55  ;;  %v285_v10 = vld [vmem:[%s1642_s20 + $0x78] sm:$0xff] }
  0x1e   : > { %1361 = vmatprep.subr.bf16.mxu1 %v1448_v27  ;;  %v1458_v27 = vld [vmem:[%s1812_s3 + $0x180] sm:$0xff]   ;;  %v1482_v23 = vld [vmem:[%s1812_s3 + $0x1b0] sm:$0xff]   ;;  %v369_v1 = vrot.slane %v1662_v42, %v310_v53  ;;  %v307_v2 = vrot.slane %v1656_v40, %v306_v57  ;;  %v315_v3 = vrot.slane %v1656_v40, %v314_v59  ;;  %v377_v6 = vrot.slane %v1662_v42, %v318_v55  ;;  %v1485_v18 = vld [vmem:[%s1812_s3 + $0x138] sm:$0xff]  }
  0x1f   : > { %v436_v31 = vsel %vm404_vm6, %v388_v8, %v420_v25  ;;  %v365_v11 = vrot.slane %v1662_v42, %v306_v57  ;;  %v343_v13 = vmul.f32 %v319_v63, %v285_v10  ;;  %v274_v14 = vld [vmem:[%s1642_s20 + $0x20] sm:$0xff]  ;;  %v276_v16 = vld [vmem:[%s1642_s20 + $0x30] sm:$0xff]  ;;  %v373_v17 = vrot.slane %v1662_v42, %v314_v59 }
  0x20   : > { %1340 = vmatpush3.bf16.msra.mxu0 %v1449_v29  ;;  %v442_v29 = vsel %vm410_vm5, %v394_v7, %v426_v21  ;;  %v283_v7 = vld [vmem:[%s1642_s20 + $0x68] sm:$0xff]  ;;  %v282_v15 = vld [vmem:[%s1642_s20 + $0x60] sm:$0xff]  ;;  %v332_v20 = vmul.f32 %v307_v2, %v274_v14 }
  0x21   : > { %1362 = vmatpush3.bf16.msra.mxu1 %v1450_v30  ;;  %1341 = vmatprep.subr.bf16.mxu0 %v1451_v32  ;;  %v450_v30 = vpack.c.bf16 %v442_v29, %v434_v24  ;;  %v444_v32 = vsel %vm412_vm7, %v396_v9, %v428_v26  ;;  %v277_v9 = vld [vmem:[%s1642_s20 + $0x38] sm:$0xff]  ;;  %v341_v12 = vmul.f32 %v311_v62, %v283_v7  ;;  %v1259_v57 = vld [vmem:[%s1813_s4] ss:$0 sm:$0xff] }
  0x22   : > { %1363 = vmatprep.subr.bf16.mxu1 %v1452_v34  ;;  %v452_v34 = vpack.c.bf16 %v444_v32, %v436_v31  ;;  %v335_v40 = vmul.f32 %v319_v63, %v277_v9  ;;  %v340_v21 = vmul.f32 %v307_v2, %v282_v15  ;;  %v1486_v24 = vld [vmem:[%s1812_s3 + $0x1b8] sm:$0xff]   ;;  %v284_v31 = vld [vmem:[%s1642_s20 + $0x70] sm:$0xff] }
  0x23   : > { %v399_v25 = vadd.f32 %v369_v1, %v341_v12 }
  0x24   : > { %1342 = vmatpush3.bf16.msra.mxu0 %v1453_v36  ;;  %v1462_v36 = vld [vmem:[%s1812_s3 + $0x188] sm:$0xff]   ;;  %v393_v26 = vadd.f32 %v377_v6, %v335_v40  ;;  %v398_v29 = vadd.f32 %v365_v11, %v340_v21 }
  0x25   : > { %1364 = vmatpush3.bf16.msra.mxu1 %v1454_v37  ;;  %1371 = vmatprep.subr.bf16.mxu0 %v1455_v0  ;;  %v1463_v37 = vld [vmem:[%s1812_s3 + $0x150] sm:$0xff]   ;;  %v1483_v0 = vld [vmem:[%s1812_s3 + $0x178] sm:$0xff]   ;;  %vm415_vm9 = vcmp.gt.f32.partialorder %v399_v25, 0.0 }
  0x26   : > { %1393 = vmatprep.subr.bf16.mxu1 %v1456_v5  ;;  %v275_v5 = vld [vmem:[%s1642_s20 + $0x28] sm:$0xff]  ;;  %vm409_vm10 = vcmp.gt.f32.partialorder %v393_v26, 0.0  ;;  %vm414_vm13 = vcmp.gt.f32.partialorder %v398_v29, 0.0 }
  0x27   : > { %1010 = vmatmul.mubr.bf16.vlgmr.msra.gmra.mrb[0].mxu0 %v450_v30  ;;  %v333_v8 = vmul.f32 %v311_v62, %v275_v5  ;;  %v431_v30 = vmul.f32 0.2, %v399_v25 }
  0x28   : > { %1051 = vmatmul.mubr.bf16.vlgmr.msra.gmra.mrb[0].mxu1 %v452_v34  ;;  %1372 = vmatpush3.bf16.msra.mxu0 %v1457_v22  ;;  %v334_v22 = vmul.f32 %v315_v3, %v276_v16 }
  0x29   : > { %1394 = vmatpush3.bf16.msra.mxu1 %v1458_v27  ;;  %1373 = vmatprep.subr.bf16.mxu0 %v1459_v28  ;;  %v391_v19 = vadd.f32 %v369_v1, %v333_v8  ;;  %v401_v27 = vadd.f32 %v377_v6, %v343_v13  ;;  %v390_v28 = vadd.f32 %v365_v11, %v332_v20 }
  0x2a   : > { %1395 = vmatprep.subr.bf16.mxu1 %v1460_v33  ;;  %v425_v33 = vmul.f32 0.2, %v393_v26 }
  0x2b   : > { %vm407_vm8 = vcmp.gt.f32.partialorder %v391_v19, 0.0  ;;  %v423_v42 = vmul.f32 0.2, %v391_v19  ;;  %vm417_vm11 = vcmp.gt.f32.partialorder %v401_v27, 0.0  ;;  %v433_v34 = vmul.f32 0.2, %v401_v27 }
  0x2c   : > { %1374 = vmatpush3.bf16.msra.mxu0 %v1461_v35  ;;  %vm406_vm12 = vcmp.gt.f32.partialorder %v390_v28, 0.0  ;;  %v447_v35 = vsel %vm415_vm9, %v399_v25, %v431_v30 }
  0x2d   : > { %1396 = vmatpush3.bf16.msra.mxu1 %v1462_v36  ;;  %1375 = vmatprep.subr.bf16.mxu0 %v1463_v37  ;;  %v439_v32 = vsel %vm407_vm8, %v391_v19, %v423_v42  ;;  %v422_v36 = vmul.f32 0.2, %v390_v28  ;;  %v430_v37 = vmul.f32 0.2, %v398_v29 }
  0x2e   : > { %1397 = vmatprep.subr.bf16.mxu1 %v1464_v38  ;;  %v455_v38 = vpack.c.bf16 %v447_v35, %v439_v32 }
  0x30   : > { %1376 = vmatpush3.bf16.msra.mxu0 %v1465_v39  ;;  %v441_v39 = vsel %vm409_vm10, %v393_v26, %v425_v33  ;;  %1091 = vmatprep.mubr.bf16.mxu0 %v455_v38 }
  0x31   : > { %1398 = vmatpush3.bf16.msra.mxu1 %v1466_v41  ;;  %1377 = vmatprep.subr.bf16.mxu0 %v1467_v43  ;;  %v449_v41 = vsel %vm417_vm11, %v401_v27, %v433_v34  ;;  %v342_v43 = vmul.f32 %v315_v3, %v284_v31 }
  0x32   : > { %1399 = vmatprep.subr.bf16.mxu1 %v1468_v44  ;;  %v457_v44 = vpack.c.bf16 %v449_v41, %v441_v39 }
  0x34   : > { %1378 = vmatpush3.bf16.msra.mxu0 %v1469_v45  ;;  %v438_v45 = vsel %vm406_vm12, %v390_v28, %v422_v36  ;;  %1132 = vmatprep.mubr.bf16.mxu1 %v457_v44 }
  0x35   : > { %1400 = vmatpush3.bf16.msra.mxu1 %v1470_v46  ;;  %1379 = vmatprep.subr.bf16.mxu0 %v1471_v47  ;;  %v446_v46 = vsel %vm414_vm13, %v398_v29, %v430_v37  ;;  %v392_v47 = vadd.f32 %v373_v17, %v334_v22 }
  0x36   : > { %1401 = vmatprep.subr.bf16.mxu1 %v1472_v48  ;;  %v454_v48 = vpack.c.bf16 %v446_v46, %v438_v45 }
  0x37   : > { %vm408_vm14 = vcmp.gt.f32.partialorder %v392_v47, 0.0 }
  0x38   : > { %1380 = vmatpush3.bf16.msra.mxu0 %v1473_v49  ;;  %v400_v49 = vadd.f32 %v373_v17, %v342_v43 }
  0x39   : > { %1402 = vmatpush3.bf16.msra.mxu1 %v1474_v50  ;;  %1381 = vmatprep.subr.bf16.mxu0 %v1475_v51  ;;  %v424_v50 = vmul.f32 0.2, %v392_v47 }
  0x3a   : > { %1403 = vmatprep.subr.bf16.mxu1 %v1476_v52  ;;  %vm416_vm15 = vcmp.gt.f32.partialorder %v400_v49, 0.0  ;;  %v432_v51 = vmul.f32 0.2, %v400_v49 }
  0x3b   : > { %v440_v52 = vsel %vm408_vm14, %v392_v47, %v424_v50 }
  0x3c   : > { %1382 = vmatpush3.bf16.msra.mxu0 %v1477_v54  ;;  %v448_v53 = vsel %vm416_vm15, %v400_v49, %v432_v51 }
  0x3d   : > { %1404 = vmatpush3.bf16.msra.mxu1 %v1478_v56  ;;  %1383 = vmatprep.subr.bf16.mxu0 %v1479_v58  ;;  %v456_v54 = vpack.c.bf16 %v448_v53, %v440_v52 }
  0x3e   : > { %1405 = vmatprep.subr.bf16.mxu1 %v1480_v60 }
  0x40   : > { %1384 = vmatpush3.bf16.msra.mxu0 %v1481_v61 }
  0x41   : > { %1406 = vmatpush3.bf16.msra.mxu1 %v1482_v23  ;;  %1385 = vmatprep.subr.bf16.mxu0 %v1483_v0 }
  0x42   : > { %1407 = vmatprep.subr.bf16.mxu1 %v1484_v4 }
  0x44   : > { %1386 = vmatpush3.bf16.msra.mxu0 %v1485_v18 }
  0x45   : > { %1408 = vmatpush3.bf16.msra.mxu1 %v1486_v24 }
  0x47   : > { %1092 = vmatmul.mubr.bf16.vlgmr.msra.gmra.mrb[4].mxu0 %v454_v48 }
  0x48   : > { %1133 = vmatmul.mubr.bf16.vlgmr.msra.gmra.mrb[4].mxu1 %v456_v54 }
  0xfa   : > { %v1343_v55 = vpop.f32.mrb[0].mxu0 }
  0xfb   : > { %v1365_v56 = vpop.f32.mrb[0].mxu1  ;;  %v1344_v58 = vpop.f32.mrb[1].mxu0 }
  0xfc   : > { %v1345_v59 = vadd.f32 %v1344_v58, %v1343_v55  ;;  %v1366_v60 = vpop.f32.mrb[1].mxu1  ;;  %v1346_v61 = vpop.f32.mrb[2].mxu0 }
  0xfd   : > { %v1367_v62 = vadd.f32 %v1366_v60, %v1365_v56  ;;  %v1368_v23 = vpop.f32.mrb[2].mxu1  ;;  %v1347_v63 = vpop.f32.mrb[3].mxu0 }
  0xfe   : > { %v1012_v0 = vadd.f32 %v1345_v59, %v1259_v57  ;;  %v1348_v1 = vadd.f32 %v1347_v63, %v1346_v61  ;;  %v1369_v2 = vpop.f32.mrb[3].mxu1 }
  0xff   : > { %v1370_v3 = vadd.f32 %v1369_v2, %v1368_v23 }
 0x100   : > { %v1053_v4 = vadd.f32 %v1367_v62, %v1012_v0  ;;  %v1015_v5 = vadd.f32 %v1348_v1, %v1259_v57 }
 0x102   : > { %v1056_v6 = vadd.f32 %v1370_v3, %v1015_v5 }
 0x11a   : > { %v1387_v7 = vpop.f32.mrb[4].mxu0 }
 0x11b   : > { %v1388_v8 = vpop.f32.mrb[5].mxu0  ;;  %v1409_v13 = vpop.f32.mrb[4].mxu1 }
 0x11c   : > { %v1389_v9 = vadd.f32 %v1388_v8, %v1387_v7  ;;  %v1390_v10 = vpop.f32.mrb[6].mxu0  ;;  %v1410_v14 = vpop.f32.mrb[5].mxu1 }
 0x11d   : > { %v1391_v11 = vpop.f32.mrb[7].mxu0  ;;  %v1411_v16 = vadd.f32 %v1410_v14, %v1409_v13  ;;  %v1412_v17 = vpop.f32.mrb[6].mxu1 }
 0x11e   : > { %v1094_v12 = vadd.f32 %v1389_v9, %v1053_v4  ;;  %v1392_v40 = vadd.f32 %v1391_v11, %v1390_v10  ;;  %v1413_v18 = vpop.f32.mrb[7].mxu1 }
 0x11f   : > { %v1414_v20 = vadd.f32 %v1413_v18, %v1412_v17 }
 0x120   : > { %v1097_v15 = vadd.f32 %v1392_v40, %v1056_v6  ;;  %v1135_v19 = vadd.f32 %v1411_v16, %v1094_v12 }
 0x122   : > { %1141 = vst [vmem:[%s263_s16] sm:$0xff] %v1135_v19  ;;  %v1138_v21 = vadd.f32 %v1414_v20, %v1097_v15  ;;  %v1151_v22 = vmul.f32 %v1135_v19, %v1135_v19 }
 0x124   : > { %1142 = vst [vmem:[%s263_s16 + $0x8] sm:$0xff] %v1138_v21  ;;  %v1143_v24 = vadd.f32 %v1138_v21, %v1135_v19  ;;  %v1152_v25 = vmul.f32 %v1138_v21, %v1138_v21 }
 0x126   : > { %v1144_v26 = vrot.slane %v1143_v24, 4  ;;  %v1153_v27 = vadd.f32 %v1152_v25, %v1151_v22 }
 0x128   : > { %v1145_v42 = vadd.f32 %v1144_v26, %v1143_v24  ;;  %v1154_v28 = vrot.slane %v1153_v27, 4 }
 0x12a   : > { %v1146_v29 = vrot.slane %v1145_v42, 2  ;;  %v1155_v30 = vadd.f32 %v1154_v28, %v1153_v27 }
 0x12c   : > { %v1147_v31 = vadd.f32 %v1146_v29, %v1145_v42  ;;  %v1156_v32 = vrot.slane %v1155_v30, 2 }
 0x12e   : > { %v1148_v33 = vrot.slane %v1147_v31, 1  ;;  %v1157_v34 = vadd.f32 %v1156_v32, %v1155_v30 }
 0x130   : > { %v1149_v35 = vadd.f32 %v1148_v33, %v1147_v31  ;;  %v1158_v36 = vrot.slane %v1157_v34, 1 }
 0x132   : > { %1150 = vst [vmem:[%s268_s19] sm:$0x1] %v1149_v35  ;;  %v1159_v37 = vadd.f32 %v1158_v36, %v1157_v34 }
 0x134   : > { %1160 = vst [vmem:[%s268_s19 + $0x1] sm:$0x1] %v1159_v37 }
 0x135 PF: > { %s17_s21 = sadd.s32 1, %s1493_s21  }
 0x136   : > { %p14_p5 = scmp.ge.s32.totalorder %s17_s21, 4  }
 0x138   :  { %16 = sbr.rel (!%p14_p5) target bundleno = 1 (0x1), region = 82 }

// kernel: conditional_discriminator_forward.11
= control target key start
LH: loop header
LB: loop body
LE: loop exit
PB: predicated region body
PF: predicated region fallthrough
CT: control target
= control target key end

     0   :  { %v1395_v3 = vmov 0.0   ;;  %vm452_vm0 = vcmask 130048   ;;  %v39_v51 = vlaneseq  ;;  %v1396_v53 = vmov 1983009808   ;;  %s1887_s4 = inlined_call_operand.vmem [shape: f32[16,2048], index: 4, kind: input, shape index: {}]   ;;  %s1888_s3 = inlined_call_operand.vmem [shape: f32[2,16], index: 3, kind: input, shape index: {}]   ;;  %s1889_s7 = inlined_call_operand.<no memory space> [shape: f32[1,1], index: 7, kind: input, shape index: {}]   ;;  %s1890_s1 = inlined_call_operand.vmem [shape: f32[1,2048], index: 1, kind: input, shape index: {}]   ;;  %s1891_s2 = inlined_call_operand.vmem [shape: f32[1,2048], index: 2, kind: input, shape index: {}]   ;;  %s1892_s0 = inlined_call_operand.vmem [shape: f32[2,2048], index: 0, kind: input, shape index: {}]   ;;  %s1893_s5 = inlined_call_operand.vmem [shape: f32[1,2048], index: 5, kind: input, shape index: {}]   ;;  %s1894_s6 = inlined_call_operand.vmem [shape: f32[1,2048], index: 6, kind: input, shape index: {}]   ;;  %s1895_s8 = inlined_call_operand.vmem [shape: f32[2,1], index: 8, kind: output, shape index: {}]  }
   0x1   :  { %v337_v0 = vld [vmem:[%s1887_s4 + $0x8] sm:$0xff]  ;;  %v339_v2 = vld [vmem:[%s1887_s4 + $0x18] sm:$0xff]  ;;  %520 = vmatprep.mubr.f32.mxu0 %v1395_v3  ;;  %591 = vmatprep.mubr.f32.mxu1 %v1395_v3  ;;  %v336_v6 = vld [vmem:[%s1887_s4] sm:$0xff]  ;;  %v13_v50 = vstv %s1889_s7  ;;  %v106_v54 = vunpack.c.l.s4 %v1396_v53  ;;  %vm1304_vm4 = vcmask 1041408   ;;  %vm1346_vm6 = vcmask 1024  }
   0x2   :  { %v353_v1 = vld [vmem:[%s1887_s4 + $0x88] sm:$0xff]  ;;  %v355_v5 = vld [vmem:[%s1887_s4 + $0x98] sm:$0xff]  ;;  %v352_v7 = vld [vmem:[%s1887_s4 + $0x80] sm:$0xff]  ;;  %14 = vst [vmem:[#allocation2] sm:$0x1] %v13_v50  ;;  %v40_v52 = vshrl.u32 %v39_v51, 7 }
   0x3   :  { %v1361_v4 = vpack.c.bf16 %v353_v1, %v337_v0  ;;  %v1365_v8 = vpack.c.bf16 %v355_v5, %v339_v2  ;;  %v1363_v9 = vpack.c.bf16 %v352_v7, %v336_v6  ;;  %v338_v10 = vld [vmem:[%s1887_s4 + $0x10] sm:$0xff]  ;;  %v1471_v12 = vld [vmem:[%s1888_s3] sm:$0x3]  ;;  %v341_v14 = vld [vmem:[%s1887_s4 + $0x28] sm:$0xff]  ;;  %v107_v60 = vunpack.c.0.s8 %v106_v54 }
   0x4   :  { %v354_v11 = vld [vmem:[%s1887_s4 + $0x90] sm:$0xff]  ;;  %v357_v15 = vld [vmem:[%s1887_s4 + $0xa8] sm:$0xff]  ;;  %v343_v16 = vld [vmem:[%s1887_s4 + $0x38] sm:$0xff]  ;;  %v1570_v55 = vsub.s32 0, %v40_v52  ;;  %v1572_v56 = vsub.s32 2, %v40_v52  ;;  %v1574_v57 = vsub.s32 1, %v40_v52 }
   0x5   :  { %1362 = vmatprep.subr.bf16.mxu0 %v1361_v4  ;;  %v1367_v13 = vpack.c.bf16 %v354_v11, %v338_v10  ;;  %1366 = vmatprep.subr.bf16.mxu1 %v1365_v8  ;;  %v1369_v17 = vpack.c.bf16 %v357_v15, %v341_v14  ;;  %v359_v18 = vld [vmem:[%s1887_s4 + $0xb8] sm:$0xff]  ;;  %v340_v19 = vld [vmem:[%s1887_s4 + $0x20] sm:$0xff]  ;;  %v342_v23 = vld [vmem:[%s1887_s4 + $0x30] sm:$0xff]  ;;  %v1576_v58 = vsub.s32 3, %v40_v52  ;;  %v1588_v2 = vsub.s32 4, %v40_v52 }
   0x6   :  { %1364 = vmatpush1.bf16.msra.mxu0 %v1363_v9  ;;  %v356_v20 = vld [vmem:[%s1887_s4 + $0xa0] sm:$0xff]  ;;  %v1373_v21 = vpack.c.bf16 %v359_v18, %v343_v16  ;;  %v358_v24 = vld [vmem:[%s1887_s4 + $0xb0] sm:$0xff]  ;;  %v345_v25 = vld [vmem:[%s1887_s4 + $0x48] sm:$0xff]  ;;  %v1592_v4 = vsub.s32 5, %v40_v52  ;;  %v1594_v5 = vsub.s32 7, %v40_v52  ;;  %v1596_v6 = vsub.s32 %v107_v60, %v40_v52 }
   0x7   :  { %1368 = vmatpush1.bf16.msra.mxu1 %v1367_v13  ;;  %v1371_v22 = vpack.c.bf16 %v356_v20, %v340_v19  ;;  %1370 = vmatprep.subr.bf16.mxu0 %v1369_v17  ;;  %v1375_v26 = vpack.c.bf16 %v358_v24, %v342_v23  ;;  %v361_v27 = vld [vmem:[%s1887_s4 + $0xc8] sm:$0xff]  ;;  %v347_v28 = vld [vmem:[%s1887_s4 + $0x58] sm:$0xff]  ;;  %v344_v32 = vld [vmem:[%s1887_s4 + $0x40] sm:$0xff] }
   0x8   :  { %v363_v29 = vld [vmem:[%s1887_s4 + $0xd8] sm:$0xff]  ;;  %1374 = vmatprep.subr.bf16.mxu1 %v1373_v21  ;;  %v1377_v30 = vpack.c.bf16 %v361_v27, %v345_v25  ;;  %v360_v33 = vld [vmem:[%s1887_s4 + $0xc0] sm:$0xff]  ;;  %v346_v34 = vld [vmem:[%s1887_s4 + $0x50] sm:$0xff] }
   0x9   :  { %1352 = vmatmul.mubr.msk.f32.vlgmr.msra.gmra.mrb[0].mxu0 %vm452_vm0, %v1471_v12  ;;  %v1381_v31 = vpack.c.bf16 %v363_v29, %v347_v28  ;;  %v1379_v35 = vpack.c.bf16 %v360_v33, %v344_v32  ;;  %v362_v36 = vld [vmem:[%s1887_s4 + $0xd0] sm:$0xff]  ;;  %v349_v37 = vld [vmem:[%s1887_s4 + $0x68] sm:$0xff]  ;;  %v351_v40 = vld [vmem:[%s1887_s4 + $0x78] sm:$0xff] }
   0xa   :  { %1353 = vmatmul.mubr.msk.f32.vlgmr.msra.gmra.mrb[0].mxu1 %vm452_vm0, %v1471_v12  ;;  %1372 = vmatpush1.bf16.msra.mxu0 %v1371_v22  ;;  %v365_v38 = vld [vmem:[%s1887_s4 + $0xe8] sm:$0xff]  ;;  %v1383_v39 = vpack.c.bf16 %v362_v36, %v346_v34  ;;  %v367_v41 = vld [vmem:[%s1887_s4 + $0xf8] sm:$0xff]  ;;  %v348_v42 = vld [vmem:[%s1887_s4 + $0x60] sm:$0xff] }
   0xb   :  { %1376 = vmatpush1.bf16.msra.mxu1 %v1375_v26  ;;  %662 = vmatprep.mubr.f32.mxu0 %v1395_v3  ;;  %v1385_v43 = vpack.c.bf16 %v365_v38, %v349_v37  ;;  %v364_v44 = vld [vmem:[%s1887_s4 + $0xe0] sm:$0xff]  ;;  %v350_v45 = vld [vmem:[%s1887_s4 + $0x70] sm:$0xff]  ;;  %v1389_v47 = vpack.c.bf16 %v367_v41, %v351_v40  ;;  %v1615_v27 = vld [vmem:[%s1890_s1 + $0x8] sm:$0xff] }
   0xc   :  { %733 = vmatprep.mubr.f32.mxu1 %v1395_v3  ;;  %1378 = vmatprep.subr.bf16.mxu0 %v1377_v30  ;;  %v366_v46 = vld [vmem:[%s1887_s4 + $0xf0] sm:$0xff]  ;;  %v1387_v48 = vpack.c.bf16 %v364_v44, %v348_v42  ;;  %v35_v59 = vld [vmem:[%s1890_s1] sm:$0xff]  ;;  %v74_v36 = vrot.slane %v1615_v27, %v1570_v55  ;;  %v78_v37 = vrot.slane %v1615_v27, %v1574_v57  ;;  %v1635_v40 = vld [vmem:[%s1891_s2 + $0x8] sm:$0xff] }
   0xd   :  { %1354 = vmatmul.mubr.msk.f32.vlgmr.msra.gmra.mrb[2].mxu0 %vm452_vm0, %v1471_v12  ;;  %1382 = vmatprep.subr.bf16.mxu1 %v1381_v31  ;;  %v1391_v49 = vpack.c.bf16 %v366_v46, %v350_v45  ;;  %v42_v61 = vrot.slane %v35_v59, %v1570_v55  ;;  %v46_v62 = vrot.slane %v35_v59, %v1574_v57  ;;  %v179_v1 = vld [vmem:[%s1891_s2] sm:$0xff]  ;;  %v32_v46 = vld [vmem:[%s1892_s0 + $0x8] sm:$0xff] }
   0xe   :  { %1355 = vmatmul.mubr.msk.f32.vlgmr.msra.gmra.mrb[2].mxu1 %vm452_vm0, %v1471_v12  ;;  %1380 = vmatpush1.bf16.msra.mxu0 %v1379_v35  ;;  %v50_v63 = vrot.slane %v35_v59, %v1572_v56  ;;  %v54_v0 = vrot.slane %v35_v59, %v1576_v58  ;;  %v186_v9 = vrot.slane %v179_v1, %v1570_v55  ;;  %v31_v31 = vld [vmem:[%s1892_s0] sm:$0xff] }
   0xf   :  { %1384 = vmatpush1.bf16.msra.mxu1 %v1383_v39  ;;  %804 = vmatprep.mubr.f32.mxu0 %v1395_v3  ;;  %v103_v7 = vcombine.low %v42_v61, %v46_v62  ;;  %v190_v10 = vrot.slane %v179_v1, %v1574_v57  ;;  %v194_v11 = vrot.slane %v179_v1, %v1572_v56  ;;  %v1652_v50 = vld [vmem:[%s1894_s6] sm:$0xff] }
  0x10   :  { %875 = vmatprep.mubr.f32.mxu1 %v1395_v3  ;;  %1386 = vmatprep.subr.bf16.mxu0 %v1385_v43  ;;  %v104_v8 = vcombine.low %v50_v63, %v54_v0  ;;  %v58_v13 = vrot.slane %v35_v59, %v1588_v2  ;;  %v62_v14 = vrot.slane %v35_v59, %v1592_v4 }
  0x11   :  { %1356 = vmatmul.mubr.msk.f32.vlgmr.msra.gmra.mrb[4].mxu0 %vm452_vm0, %v1471_v12  ;;  %1390 = vmatprep.subr.bf16.mxu1 %v1389_v47  ;;  %v70_v16 = vrot.slane %v35_v59, %v1594_v5  ;;  %v111_v17 = vrot.slane %v103_v7, %v1596_v6  ;;  %v247_v19 = vcombine.low %v186_v9, %v190_v10 }
  0x12   :  { %1357 = vmatmul.mubr.msk.f32.vlgmr.msra.gmra.mrb[4].mxu1 %vm452_vm0, %v1471_v12  ;;  %1388 = vmatpush1.bf16.msra.mxu0 %v1387_v48  ;;  %v118_v18 = vrot.slane %v104_v8, %v1596_v6  ;;  %v202_v21 = vrot.slane %v179_v1, %v1588_v2  ;;  %v206_v22 = vrot.slane %v179_v1, %v1592_v4 }
  0x13   :  { %1392 = vmatpush1.bf16.msra.mxu1 %v1391_v49  ;;  %946 = vmatprep.mubr.f32.mxu0 %v1395_v3  ;;  %v120_v23 = vcombine.low %v58_v13, %v62_v14  ;;  %v214_v26 = vrot.slane %v179_v1, %v1594_v5  ;;  %v255_v29 = vrot.slane %v247_v19, %v1596_v6  ;;  %v1647_v49 = vld [vmem:[%s1893_s5] sm:$0xff] }
  0x14   :  { %1017 = vmatprep.mubr.f32.mxu1 %v1395_v3  ;;  %v1590_v3 = vsub.s32 6, %v40_v52  ;;  %v119_v28 = vcombine.low %v111_v17, %v118_v18  ;;  %v264_v34 = vcombine.low %v202_v21, %v206_v22  ;;  %v82_v38 = vrot.slane %v1615_v27, %v1572_v56 }
  0x15   :  { %1358 = vmatmul.mubr.msk.f32.vlgmr.msra.gmra.mrb[6].mxu0 %vm452_vm0, %v1471_v12  ;;  %v128_v32 = vrot.slane %v120_v23, %v1596_v6  ;;  %v86_v39 = vrot.slane %v1615_v27, %v1576_v58  ;;  %v137_v47 = vcombine.low %v74_v36, %v78_v37  ;;  %v218_v48 = vrot.slane %v1635_v40, %v1570_v55  ;;  %v1693_v23 = vld [vmem:[%s1893_s5 + $0x8] sm:$0xff] }
  0x16   :  { %1359 = vmatmul.mubr.msk.f32.vlgmr.msra.gmra.mrb[6].mxu1 %vm452_vm0, %v1471_v12  ;;  %v198_v12 = vrot.slane %v179_v1, %v1576_v58  ;;  %v66_v15 = vrot.slane %v35_v59, %v1590_v3  ;;  %v210_v25 = vrot.slane %v179_v1, %v1590_v3  ;;  %v175_v41 = vmul.f32 %v119_v28, %v31_v31  ;;  %v1700_v28 = vld [vmem:[%s1894_s6 + $0x8] sm:$0xff] }
  0x17   :  { %v272_v44 = vrot.slane %v264_v34, %v1596_v6  ;;  %v138_v51 = vcombine.low %v82_v38, %v86_v39  ;;  %v222_v52 = vrot.slane %v1635_v40, %v1574_v57  ;;  %v226_v53 = vrot.slane %v1635_v40, %v1572_v56 }
  0x18   :  { %v248_v20 = vcombine.low %v194_v11, %v198_v12  ;;  %v121_v24 = vcombine.low %v66_v15, %v70_v16  ;;  %v265_v35 = vcombine.low %v210_v25, %v214_v26  ;;  %v230_v54 = vrot.slane %v1635_v40, %v1576_v58 }
  0x19   :  { %v375_v62 = vrot.slane %v1647_v49, %v1570_v55  ;;  %v1031_v63 = vrot.slane %v1652_v50, %v1570_v55  ;;  %v383_v0 = vrot.slane %v1647_v49, %v1572_v56  ;;  %v379_v1 = vrot.slane %v1647_v49, %v1574_v57 }
  0x1a   :  { %v262_v30 = vrot.slane %v248_v20, %v1596_v6  ;;  %v135_v33 = vrot.slane %v121_v24, %v1596_v6  ;;  %v279_v45 = vrot.slane %v265_v35, %v1596_v6  ;;  %v145_v7 = vrot.slane %v137_v47, %v1596_v6 }
  0x1b   :  { %v152_v8 = vrot.slane %v138_v51, %v1596_v6  ;;  %v281_v9 = vcombine.low %v218_v48, %v222_v52  ;;  %v282_v10 = vcombine.low %v226_v53, %v230_v54  ;;  %v1039_v11 = vrot.slane %v1652_v50, %v1572_v56 }
  0x1c   :  { %v263_v42 = vcombine.low %v255_v29, %v262_v30  ;;  %v136_v43 = vcombine.low %v128_v32, %v135_v33  ;;  %v280_v61 = vcombine.low %v272_v44, %v279_v45  ;;  %v1035_v12 = vrot.slane %v1652_v50, %v1574_v57  ;;  %v33_v29 = vld [vmem:[%s1892_s0 + $0x10] sm:$0xff] }
  0x1d   :  { %v387_v13 = vrot.slane %v1647_v49, %v1576_v58  ;;  %v1043_v14 = vrot.slane %v1652_v50, %v1576_v58  ;;  %v391_v16 = vrot.slane %v1647_v49, %v1588_v2  ;;  %v399_v17 = vrot.slane %v1647_v49, %v1590_v3 }
  0x1e   :  { %v319_v59 = vadd.f32 %v263_v42, %v175_v41  ;;  %v176_v60 = vmul.f32 %v136_v43, %v32_v46  ;;  %v1047_v19 = vrot.slane %v1652_v50, %v1588_v2  ;;  %v1055_v20 = vrot.slane %v1652_v50, %v1590_v3 }
  0x1f   :  { %v395_v21 = vrot.slane %v1647_v49, %v1592_v4  ;;  %v1051_v22 = vrot.slane %v1652_v50, %v1592_v4  ;;  %v153_v24 = vcombine.low %v145_v7, %v152_v8  ;;  %v289_v25 = vrot.slane %v281_v9, %v1596_v6 }
  0x20   :  { %v327_v15 = vmul.f32 0.2, %v319_v59  ;;  %v320_v18 = vadd.f32 %v280_v61, %v176_v60  ;;  %vm323_vm1 = vcmp.gt.f32.partialorder %v319_v59, 0.0  ;;  %v296_v26 = vrot.slane %v282_v10, %v1596_v6 }
  0x21   :  { %v90_v30 = vrot.slane %v1615_v27, %v1588_v2  ;;  %v94_v31 = vrot.slane %v1615_v27, %v1592_v4  ;;  %v98_v32 = vrot.slane %v1615_v27, %v1590_v3  ;;  %v102_v33 = vrot.slane %v1615_v27, %v1594_v5 }
  0x22   :  { %v1713_v34 = vsel %vm323_vm1, %v319_v59, %v327_v15  ;;  %v328_v35 = vmul.f32 0.2, %v320_v18  ;;  %v403_v36 = vrot.slane %v1647_v49, %v1594_v5  ;;  %v1059_v37 = vrot.slane %v1652_v50, %v1594_v5 }
  0x23   :  { %vm324_vm2 = vcmp.gt.f32.partialorder %v320_v18, 0.0  ;;  %v407_v38 = vrot.slane %v1693_v23, %v1570_v55  ;;  %v415_v39 = vrot.slane %v1693_v23, %v1572_v56  ;;  %v411_v41 = vrot.slane %v1693_v23, %v1574_v57 }
  0x24   :  { %v1063_v27 = vrot.slane %v1700_v28, %v1570_v55  ;;  %v1071_v42 = vrot.slane %v1700_v28, %v1572_v56  ;;  %v177_v43 = vmul.f32 %v153_v24, %v33_v29  ;;  %v297_v44 = vcombine.low %v289_v25, %v296_v26 }
  0x25   :  { %v1067_v45 = vrot.slane %v1700_v28, %v1574_v57  ;;  %v419_v46 = vrot.slane %v1693_v23, %v1576_v58  ;;  %v154_v47 = vcombine.low %v90_v30, %v94_v31  ;;  %v155_v48 = vcombine.low %v98_v32, %v102_v33 }
  0x26   :  { %v1733_v51 = vsel %vm324_vm2, %v320_v18, %v328_v35  ;;  %v1075_v52 = vrot.slane %v1700_v28, %v1576_v58  ;;  %v234_v53 = vrot.slane %v1635_v40, %v1588_v2  ;;  %v238_v54 = vrot.slane %v1635_v40, %v1592_v4 }
  0x27   :  { %v423_v60 = vrot.slane %v1693_v23, %v1588_v2  ;;  %v431_v61 = vrot.slane %v1693_v23, %v1590_v3  ;;  %v242_v7 = vrot.slane %v1635_v40, %v1590_v3  ;;  %v246_v8 = vrot.slane %v1635_v40, %v1594_v5 }
  0x28   :  { %v1749_v18 = vadd.f32 %v297_v44, %v177_v43  ;;  %v427_v24 = vrot.slane %v1693_v23, %v1592_v4  ;;  %v435_v25 = vrot.slane %v1693_v23, %v1594_v5  ;;  %v162_v31 = vrot.slane %v154_v47, %v1596_v6 }
  0x29   :  { %v169_v32 = vrot.slane %v155_v48, %v1596_v6  ;;  %v1079_v33 = vrot.slane %v1700_v28, %v1588_v2  ;;  %v298_v35 = vcombine.low %v234_v53, %v238_v54  ;;  %v1087_v44 = vrot.slane %v1700_v28, %v1590_v3 }
  0x2a   :  { %v299_v47 = vcombine.low %v242_v7, %v246_v8  ;;  %vm325_vm3 = vcmp.gt.f32.partialorder %v1749_v18, 0.0  ;;  %v1091_v58 = vrot.slane %v1700_v28, %v1594_v5 }
  0x2b   :  { %v170_v7 = vcombine.low %v162_v31, %v169_v32 }
  0xdc   :  { %v522_v59 = vpop.f32.mrb[0].mxu0 }
  0xdd   :  { %v523_v9 = vadd.f32 %v522_v59, %v375_v62  ;;  %v593_v10 = vpop.f32.mrb[0].mxu1  ;;  %v524_v15 = vpop.f32.mrb[1].mxu0 }
  0xde   :  { %v594_v26 = vadd.f32 %v593_v10, %v383_v0  ;;  %v525_v29 = vadd.f32 %v524_v15, %v379_v1  ;;  %v595_v30 = vpop.f32.mrb[1].mxu1  ;;  %v34_v10 = vld [vmem:[%s1892_s0 + $0x18] sm:$0xff]  ;;  %v306_v15 = vrot.slane %v298_v35, %v1596_v6 }
  0xdf   :  { %v1108_v40 = vadd.f32 %v1031_v63, %v523_v9  ;;  %v596_v62 = vadd.f32 %v595_v30, %v387_v13  ;;  %v178_v50 = vmul.f32 %v170_v7, %v34_v10 }
  0xe0   :  { %v1110_v43 = vadd.f32 %v1039_v11, %v594_v26  ;;  %v1109_v0 = vadd.f32 %v1035_v12, %v525_v29  ;;  %v664_v1 = vpop.f32.mrb[2].mxu0  ;;  %v1083_v11 = vrot.slane %v1700_v28, %v1592_v4 }
  0xe1   :  { %v1111_v63 = vadd.f32 %v1043_v14, %v596_v62  ;;  %v665_v13 = vadd.f32 %v664_v1, %v391_v16  ;;  %v735_v48 = vpop.f32.mrb[2].mxu1  ;;  %v666_v53 = vpop.f32.mrb[3].mxu0 }
  0xe2   :  { %v1140_v12 = vcombine.low %v1108_v40, %v1109_v0  ;;  %v736_v54 = vadd.f32 %v735_v48, %v399_v17  ;;  %v667_v14 = vadd.f32 %v666_v53, %v395_v21  ;;  %v737_v59 = vpop.f32.mrb[3].mxu1 }
  0xe3   :  { %v1141_v8 = vcombine.low %v1110_v43, %v1111_v63  ;;  %v1112_v16 = vadd.f32 %v1047_v19, %v665_v13  ;;  %v738_v9 = vadd.f32 %v737_v59, %v403_v36  ;;  %v313_v19 = vrot.slane %v299_v47, %v1596_v6 }
  0xe4   :  { %v1148_v17 = vrot.slane %v1140_v12, %v1596_v6  ;;  %v1114_v49 = vadd.f32 %v1055_v20, %v736_v54  ;;  %v1113_v21 = vadd.f32 %v1051_v22, %v667_v14  ;;  %v806_v26 = vpop.f32.mrb[4].mxu0  ;;  %v329_v20 = vmul.f32 0.2, %v1749_v18 }
  0xe5   :  { %v1155_v36 = vrot.slane %v1141_v8, %v1596_v6  ;;  %v1115_v29 = vadd.f32 %v1059_v37, %v738_v9  ;;  %v807_v30 = vadd.f32 %v806_v26, %v407_v38  ;;  %v877_v31 = vpop.f32.mrb[4].mxu1  ;;  %v808_v32 = vpop.f32.mrb[5].mxu0  ;;  %v314_v63 = vcombine.low %v306_v15, %v313_v19 }
  0xe6   :  { %v1157_v40 = vcombine.low %v1112_v16, %v1113_v21  ;;  %v878_v22 = vadd.f32 %v877_v31, %v415_v39  ;;  %v809_v62 = vadd.f32 %v808_v32, %v411_v41  ;;  %v879_v35 = vpop.f32.mrb[5].mxu1  ;;  %v333_v14 = vsel %vm325_vm3, %v1749_v18, %v329_v20 }
  0xe7   :  { %v1156_v37 = vcombine.low %v1148_v17, %v1155_v36  ;;  %v1158_v43 = vcombine.low %v1114_v49, %v1115_v29  ;;  %v1116_v38 = vadd.f32 %v1063_v27, %v807_v30  ;;  %v880_v0 = vadd.f32 %v879_v35, %v419_v46 }
  0xe8   :  { %v1165_v1 = vrot.slane %v1157_v40, %v1596_v6  ;;  %v1118_v39 = vadd.f32 %v1071_v42, %v878_v22  ;;  %v1117_v41 = vadd.f32 %v1067_v45, %v809_v62  ;;  %v948_v47 = vpop.f32.mrb[6].mxu0  ;;  %v322_v8 = vadd.f32 %v314_v63, %v178_v50 }
  0xe9   :  { %v1212_v13 = vmul.f32 %v1156_v37, %v1713_v34  ;;  %v1172_v55 = vrot.slane %v1158_v43, %v1596_v6  ;;  %v1119_v27 = vadd.f32 %v1075_v52, %v880_v0  ;;  %v949_v46 = vadd.f32 %v948_v47, %v423_v60  ;;  %v1019_v56 = vpop.f32.mrb[6].mxu1  ;;  %v950_v42 = vpop.f32.mrb[7].mxu0 }
  0xea   :  { %v1174_v48 = vcombine.low %v1116_v38, %v1117_v41  ;;  %v1020_v57 = vadd.f32 %v1019_v56, %v431_v61  ;;  %v951_v34 = vadd.f32 %v950_v42, %v427_v24  ;;  %v1021_v45 = vpop.f32.mrb[7].mxu1  ;;  %vm326_vm5 = vcmp.gt.f32.partialorder %v322_v8, 0.0 }
  0xeb   :  { %v1220_v52 = vcombine.high %v1212_v13, %v1212_v13  ;;  %v1227_v53 = vrot.slane %v1212_v13, %v1596_v6  ;;  %v1173_v12 = vcombine.low %v1165_v1, %v1172_v55  ;;  %v1175_v60 = vcombine.low %v1118_v39, %v1119_v27 }
  0xec   :  { %v1182_v54 = vrot.slane %v1174_v48, %v1596_v6  ;;  %v1120_v4 = vadd.f32 %v1079_v33, %v949_v46  ;;  %v1121_v61 = vadd.f32 %v1083_v11, %v951_v34  ;;  %v1122_v9 = vadd.f32 %v1087_v44, %v1020_v57 }
  0xed   :  { %v1234_v24 = vrot.slane %v1220_v52, %v1596_v6  ;;  %v1235_v59 = vcombine.high %v1227_v53, %v1227_v53  ;;  %v1213_v7 = vmul.f32 %v1173_v12, %v1733_v51  ;;  %v1189_v16 = vrot.slane %v1175_v60, %v1596_v6 }
  0xee   :  { %v1191_v10 = vcombine.low %v1120_v4, %v1121_v61  ;;  %v1022_v18 = vadd.f32 %v1021_v45, %v435_v25  ;;  %v1305_v33 = vsel %vm1304_vm4, %v1227_v53, 0.0  ;;  %v330_v3 = vmul.f32 0.2, %v322_v8 }
  0xef   :  { %v1236_v2 = vcombine.high %v1234_v24, %v1234_v24  ;;  %v1306_v11 = vsel %vm1304_vm4, %v1235_v59, 0.0  ;;  %v1237_v15 = vcombine.high %v1213_v7, %v1213_v7  ;;  %v1244_v51 = vrot.slane %v1213_v7, %v1596_v6  ;;  %v1360_v7 = vld [vmem:[#allocation2] ss:$0 sm:$0xff] }
  0xf0   :  { %v1307_v17 = vadd.f32 %v1306_v11, %v1305_v33  ;;  %v1190_v49 = vcombine.low %v1182_v54, %v1189_v16  ;;  %v1308_v21 = vsel %vm1304_vm4, %v1234_v24, 0.0  ;;  %v1123_v26 = vadd.f32 %v1091_v58, %v1022_v18 }
  0xf1   :  { %v1252_v44 = vcombine.high %v1244_v51, %v1244_v51  ;;  %v1199_v5 = vrot.slane %v1191_v10, %v1596_v6  ;;  %v1251_v23 = vrot.slane %v1237_v15, %v1596_v6  ;;  %v1310_v25 = vsel %vm1304_vm4, %v1236_v2, 0.0 }
  0xf2   :  { %v1309_v28 = vadd.f32 %v1308_v21, %v1307_v17  ;;  %v1214_v19 = vmul.f32 %v1190_v49, %v333_v14  ;;  %v1312_v36 = vsel %vm1304_vm4, %v1244_v51, 0.0  ;;  %v1192_v29 = vcombine.low %v1122_v9, %v1123_v26 }
  0xf3   :  { %v1314_v31 = vsel %vm1304_vm4, %v1252_v44, 0.0  ;;  %v334_v22 = vsel %vm326_vm5, %v322_v8, %v330_v3  ;;  %v1253_v62 = vcombine.high %v1251_v23, %v1251_v23  ;;  %v1316_v43 = vsel %vm1304_vm4, %v1251_v23, 0.0 }
  0xf4   :  { %v1311_v30 = vadd.f32 %v1310_v25, %v1309_v28  ;;  %v1261_v32 = vrot.slane %v1214_v19, %v1596_v6  ;;  %v1206_v20 = vrot.slane %v1192_v29, %v1596_v6  ;;  %v1254_v35 = vcombine.high %v1214_v19, %v1214_v19 }
  0xf5   :  { %v1318_v47 = vsel %vm1304_vm4, %v1253_v62, 0.0 }
  0xf6   :  { %v1313_v40 = vadd.f32 %v1312_v36, %v1311_v30  ;;  %v1207_v50 = vcombine.low %v1199_v5, %v1206_v20  ;;  %v1269_v38 = vcombine.high %v1261_v32, %v1261_v32  ;;  %v1320_v39 = vsel %vm1304_vm4, %v1261_v32, 0.0 }
  0xf7   :  { %v1268_v41 = vrot.slane %v1254_v35, %v1596_v6 }
  0xf8   :  { %v1315_v37 = vadd.f32 %v1314_v31, %v1313_v40  ;;  %v1215_v0 = vmul.f32 %v1207_v50, %v334_v22  ;;  %v1322_v55 = vsel %vm1304_vm4, %v1269_v38, 0.0 }
  0xf9   :  { %v1270_v46 = vcombine.high %v1268_v41, %v1268_v41  ;;  %v1324_v57 = vsel %vm1304_vm4, %v1268_v41, 0.0 }
  0xfa   :  { %v1317_v1 = vadd.f32 %v1316_v43, %v1315_v37  ;;  %v1278_v13 = vrot.slane %v1215_v0, %v1596_v6  ;;  %v1271_v56 = vcombine.high %v1215_v0, %v1215_v0 }
  0xfb   :  { %v1326_v58 = vsel %vm1304_vm4, %v1270_v46, 0.0 }
  0xfc   :  { %v1319_v63 = vadd.f32 %v1318_v47, %v1317_v1  ;;  %v1286_v48 = vcombine.high %v1278_v13, %v1278_v13  ;;  %v1285_v45 = vrot.slane %v1271_v56, %v1596_v6  ;;  %v1328_v52 = vsel %vm1304_vm4, %v1278_v13, 0.0 }
  0xfe   :  { %v1321_v27 = vadd.f32 %v1320_v39, %v1319_v63  ;;  %v1330_v12 = vsel %vm1304_vm4, %v1286_v48, 0.0  ;;  %v1287_v54 = vcombine.high %v1285_v45, %v1285_v45  ;;  %v1332_v4 = vsel %vm1304_vm4, %v1285_v45, 0.0 }
 0x100   :  { %v1323_v42 = vadd.f32 %v1322_v55, %v1321_v27  ;;  %v1334_v24 = vsel %vm1304_vm4, %v1287_v54, 0.0 }
 0x102   :  { %v1325_v34 = vadd.f32 %v1324_v57, %v1323_v42 }
 0x104   :  { %v1327_v53 = vadd.f32 %v1326_v58, %v1325_v34 }
 0x106   :  { %v1329_v60 = vadd.f32 %v1328_v52, %v1327_v53 }
 0x108   :  { %v1331_v14 = vadd.f32 %v1330_v12, %v1329_v60 }
 0x10a   :  { %v1333_v61 = vadd.f32 %v1332_v4, %v1331_v14 }
 0x10c   :  { %v1335_v59 = vadd.f32 %v1334_v24, %v1333_v61 }
 0x10e   :  { %1336 = vadd.xlane.f32.xlu0 %v1335_v59 }
 0x19b   :  { %v1337_v8 = vpop.xlane.xlu0 %1336 }
 0x19c   :  { %v1345_v6 = vadd.f32 %v1360_v7, %v1337_v8 }
 0x19e   :  { %1347 = vst.msk [vmem:[%s1895_s8] sm:$0x3] %vm1346_vm6, %v1345_v6 }

</bundles_post_ra>
